<compile_context>
chip_gen: v5e
topology: v5e:2x2
jax: 0.10.0
libtpu: 0.0.40
codegen_flags: <defaults>
</compile_context>

<pallas_src>
import math
from functools import partial

import jax
import jax.numpy as jnp
from jax import lax
from jax.experimental import pallas as pl
from jax.experimental.pallas import tpu as pltpu

_EPS = 1e-5
_NEG_INF = -1e30                      # finite "minus infinity" (avoids exp(nan))
_VMEM_LIMIT = 48 * 1024 * 1024        # fits comfortably on v5e/v6e/v7x
_DEFAULT_TI = 512


def _pick_tile(n, target, *, lane=False):
    """Largest divisor of n <= target, preferring multiples of 128.

    lane=True  -> the tile ends up on a lane (last) dim: multiple of 128 or n.
    lane=False -> sublane dim: multiple of 128, else multiple of 8, else n.
    """
    target = max(1, min(target, n))
    mult8 = None
    for c in range(target, 0, -1):
        if n % c:
            continue
        if c % 128 == 0:
            return c
        if mult8 is None and c % 8 == 0:
            mult8 = c
    if lane:
        return n
    return mult8 if mult8 is not None else n


# --------------------------------------------------------------------------
# Kernel 1: RMSNorm -> fused QKV projection -> rotary embedding (+ q scaling)
# --------------------------------------------------------------------------
def _qkv_rope_kernel(x_ref, nw_ref, wqkv_ref, bqkv_ref, cos_ref, sin_ref,
                     q_ref, k_ref, v_ref, *, eps, num_heads, head_dim, q_scale):
    x = x_ref[...].astype(jnp.float32)                       # (ts, H)
    H = x.shape[-1]

    # attention_norm: RMSNorm(eps=1e-5), f32 math
    var = jnp.mean(x * x, axis=-1, keepdims=True)
    xn = (x * lax.rsqrt(var + eps) * nw_ref[...].astype(jnp.float32))
    xn = xn.astype(wqkv_ref.dtype)

    # fused QKV projection (bf16 x bf16 -> f32 accumulation on the MXU)
    qkv = jnp.dot(xn, wqkv_ref[...], preferred_element_type=jnp.float32)
    qkv = qkv + bqkv_ref[...].astype(jnp.float32)            # (ts, 3H)
    q, k, v = qkv[:, :H], qkv[:, H:2 * H], qkv[:, 2 * H:]

    # rotary embedding, standard head-major layout.
    # cos_ref/sin_ref are compact (ts, head_dim) f32; the rotate_half sign is
    # already folded into sin_ref ([-sin_half | +sin_half]).
    half = head_dim // 2
    cos_f = jnp.concatenate([cos_ref[...]] * num_heads, axis=-1)   # (ts, H)
    sin_f = jnp.concatenate([sin_ref[...]] * num_heads, axis=-1)
    lane = lax.broadcasted_iota(jnp.int32, (1, H), 1)
    first_half = (lane % head_dim) < half

    def rope(t):
        # per-head rotate_half via two whole-row rolls + one select
        rolled = jnp.where(first_half,
                           pltpu.roll(t, H - half, 1),   # t[(l+half) mod H]
                           pltpu.roll(t, half, 1))       # t[l-half]
        return t * cos_f + rolled * sin_f

    q_ref[...] = (rope(q) * q_scale).astype(q_ref.dtype)    # scale folded into q
    k_ref[...] = rope(k).astype(k_ref.dtype)
    v_ref[...] = v.astype(v_ref.dtype)


def _qkv_rope_call(x2d, nw, wqkv, bqkv, cos_c, sin_c, *,
                   seq_len, num_heads, head_dim, ts):
    T, H = x2d.shape
    s_blocks = seq_len // ts
    out_sd = jax.ShapeDtypeStruct((T, H), x2d.dtype)
    tok_spec = pl.BlockSpec((ts, H), lambda i: (i, 0))
    return pl.pallas_call(
        partial(_qkv_rope_kernel, eps=_EPS, num_heads=num_heads,
                head_dim=head_dim, q_scale=1.0 / math.sqrt(head_dim)),
        out_shape=(out_sd, out_sd, out_sd),
        grid=(T // ts,),
        in_specs=[
            tok_spec,                                            # x (flat tokens)
            pl.BlockSpec((1, H), lambda i: (0, 0)),              # attn_norm weight
            pl.BlockSpec((H, 3 * H), lambda i: (0, 0)),          # wqkv (resident)
            pl.BlockSpec((1, 3 * H), lambda i: (0, 0)),          # bqkv
            pl.BlockSpec((ts, head_dim), lambda i: (i % s_blocks, 0)),  # cos
            pl.BlockSpec((ts, head_dim), lambda i: (i % s_blocks, 0)),  # sin (signed)
        ],
        out_specs=(tok_spec, tok_spec, tok_spec),
        compiler_params=pltpu.CompilerParams(
            dimension_semantics=("parallel",),
            vmem_limit_bytes=_VMEM_LIMIT),
    )(x2d, nw, wqkv, bqkv, cos_c, sin_c)


# --------------------------------------------------------------------------
# Kernel 2: flash attention, all heads per grid step, KV streamed
# --------------------------------------------------------------------------
def _flash_attn_kernel(*refs, num_heads, head_dim, mode):
    if mode == "seg":
        work_ref, q_ref, k_ref, v_ref, sq_ref, sk_ref = refs[:6]
        o_ref, m_s, l_s, acc_s = refs[6:]
    elif mode == "dense":
        q_ref, k_ref, v_ref, mask_ref = refs[:4]
        o_ref, m_s, l_s, acc_s = refs[4:]
    else:
        q_ref, k_ref, v_ref = refs[:3]
        o_ref, m_s, l_s, acc_s = refs[3:]

    b = pl.program_id(0)
    qi = pl.program_id(1)
    ki = pl.program_id(2)
    hd = head_dim

    @pl.when(ki == 0)
    def _():
        m_s[...] = jnp.full(m_s.shape, _NEG_INF, m_s.dtype)
        l_s[...] = jnp.zeros(l_s.shape, l_s.dtype)
        acc_s[...] = jnp.zeros(acc_s.shape, acc_s.dtype)

    def compute():
        q = q_ref[0]                                          # (tq, H), pre-scaled
        k = k_ref[0]                                          # (tkv, H)
        v = v_ref[0]                                          # (tkv, H)
        if mode == "seg":
            bias = jnp.where(sq_ref[0] == sk_ref[0],
                             jnp.float32(0.0), jnp.float32(_NEG_INF))  # (tq, tkv)
        elif mode == "dense":
            bias = mask_ref[0].astype(jnp.float32)
        else:
            bias = None
        for h in range(num_heads):
            sl = slice(h * hd, (h + 1) * hd)
            s = lax.dot_general(q[:, sl], k[:, sl], (((1,), (1,)), ((), ())),
                                preferred_element_type=jnp.float32)    # (tq, tkv)
            if bias is not None:
                s = s + bias
            m_prev = m_s[:, h:h + 1]
            m_new = jnp.maximum(m_prev, jnp.max(s, axis=-1, keepdims=True))
            alpha = jnp.exp(m_prev - m_new)
            p = jnp.exp(s - m_new)
            l_s[:, h:h + 1] = alpha * l_s[:, h:h + 1] + jnp.sum(p, axis=-1,
                                                                keepdims=True)
            acc_s[:, sl] = alpha * acc_s[:, sl] + jnp.dot(
                p.astype(v.dtype), v[:, sl], preferred_element_type=jnp.float32)
            m_s[:, h:h + 1] = m_new

    if mode == "seg":
        flat = (b * pl.num_programs(1) + qi) * pl.num_programs(2) + ki

        @pl.when(work_ref[flat] != 0)      # skip fully-masked KV tiles
        def _():
            compute()
    else:
        compute()

    @pl.when(ki == pl.num_programs(2) - 1)
    def _():
        outs = []
        for h in range(num_heads):
            inv = pl.reciprocal(jnp.maximum(l_s[:, h:h + 1], 1e-30), approx=True)
            outs.append(acc_s[:, h * hd:(h + 1) * hd] * inv)
        o_ref[0] = jnp.concatenate(outs, axis=-1).astype(o_ref.dtype)  # lane-dense


def _flash_attn_call(q, k, v, *, num_heads, head_dim, tq, tkv,
                     seg=None, dense_mask=None, work=None):
    B, S, H = q.shape
    nQ, nK = S // tq, S // tkv
    mode = "seg" if seg is not None else ("dense" if dense_mask is not None
                                          else "none")
    if mode == "seg":
        assert work is not None

        def im(f):
            return lambda b, qi, ki, work_ref: f(b, qi, ki)
    else:
        def im(f):
            return lambda b, qi, ki: f(b, qi, ki)

    in_specs = [
        pl.BlockSpec((1, tq, H), im(lambda b, qi, ki: (b, qi, 0))),
        pl.BlockSpec((1, tkv, H), im(lambda b, qi, ki: (b, ki, 0))),
        pl.BlockSpec((1, tkv, H), im(lambda b, qi, ki: (b, ki, 0))),
    ]
    operands = [q, k, v]
    prefetch = ()
    num_prefetch = 0
    if mode == "seg":
        sq = seg[:, :, None].astype(jnp.int32)           # (B, S, 1)
        sk = seg[:, None, :].astype(jnp.int32)           # (B, 1, S)
        in_specs += [
            pl.BlockSpec((1, tq, 1), im(lambda b, qi, ki: (b, qi, 0))),
            pl.BlockSpec((1, 1, tkv), im(lambda b, qi, ki: (b, 0, ki))),
        ]
        operands += [sq, sk]
        prefetch = (work,)
        num_prefetch = 1
    elif mode == "dense":
        bm = dense_mask.shape[0]
        mask_map = (lambda b, qi, ki: (0, qi, ki)) if bm == 1 else \
                   (lambda b, qi, ki: (b, qi, ki))
        in_specs.append(pl.BlockSpec((1, tq, tkv), im(mask_map)))
        operands.append(dense_mask)

    grid_spec = pltpu.PrefetchScalarGridSpec(
        num_scalar_prefetch=num_prefetch,
        grid=(B, nQ, nK),
        in_specs=in_specs,
        out_specs=pl.BlockSpec((1, tq, H), im(lambda b, qi, ki: (b, qi, 0))),
        scratch_shapes=[
            pltpu.VMEM((tq, num_heads), jnp.float32),    # running max per head
            pltpu.VMEM((tq, num_heads), jnp.float32),    # running denom per head
            pltpu.VMEM((tq, H), jnp.float32),            # output accumulator
        ])
    return pl.pallas_call(
        partial(_flash_attn_kernel, num_heads=num_heads, head_dim=head_dim,
                mode=mode),
        out_shape=jax.ShapeDtypeStruct((B, S, H), q.dtype),
        grid_spec=grid_spec,
        compiler_params=pltpu.CompilerParams(
            dimension_semantics=("parallel", "parallel", "arbitrary"),
            vmem_limit_bytes=_VMEM_LIMIT),
    )(*prefetch, *operands)


# --------------------------------------------------------------------------
# Kernel 3: out-proj + residual + RMSNorm + fused SiLU-gated MLP (K-tiled)
# --------------------------------------------------------------------------
def _mlp_block_kernel(x_ref, attn_ref, wo_ref, bo_ref, nw_ref, wgu_ref, wd_ref,
                      o_ref, h1_s, hn_s, acc_s, *, eps, ti):
    kt = pl.program_id(1)

    @pl.when(kt == 0)
    def _():
        attn = jnp.dot(attn_ref[...], wo_ref[...],
                       preferred_element_type=jnp.float32)
        h1 = x_ref[...].astype(jnp.float32) + attn + bo_ref[...].astype(jnp.float32)
        h1_s[...] = h1
        var = jnp.mean(h1 * h1, axis=-1, keepdims=True)
        hn = h1 * lax.rsqrt(var + eps) * nw_ref[...].astype(jnp.float32)
        hn_s[...] = hn.astype(hn_s.dtype)
        acc_s[...] = jnp.zeros(acc_s.shape, acc_s.dtype)

    # gated MLP: intermediate dim streamed in ti-sized tiles; gate/up fused in
    # one (H, 2*ti) weight tile (pre-interleaved at load time).
    hn = hn_s[...]
    gu = jnp.dot(hn, wgu_ref[...], preferred_element_type=jnp.float32)  # (ts, 2ti)
    g = gu[:, :ti]
    u = gu[:, ti:]
    act = (g * jax.nn.sigmoid(g) * u).astype(wd_ref.dtype)              # SiluAndMul
    acc_s[...] += jnp.dot(act, wd_ref[...], preferred_element_type=jnp.float32)

    @pl.when(kt == pl.num_programs(1) - 1)
    def _():
        o_ref[...] = (h1_s[...] + acc_s[...]).astype(o_ref.dtype)


def _mlp_call(x2d, attn2d, wo, bo, nw, wgu, wd, *, ts, ti):
    T, H = x2d.shape
    inter = wd.shape[0]
    tok_spec = pl.BlockSpec((ts, H), lambda i, k: (i, 0))
    return pl.pallas_call(
        partial(_mlp_block_kernel, eps=_EPS, ti=ti),
        out_shape=jax.ShapeDtypeStruct((T, H), x2d.dtype),
        grid=(T // ts, inter // ti),
        in_specs=[
            tok_spec,                                            # residual in
            tok_spec,                                            # attention out
            pl.BlockSpec((H, H), lambda i, k: (0, 0)),           # wo (resident)
            pl.BlockSpec((1, H), lambda i, k: (0, 0)),           # bo
            pl.BlockSpec((1, H), lambda i, k: (0, 0)),           # ffn_norm weight
            pl.BlockSpec((H, 2 * ti), lambda i, k: (0, k)),      # [gate_k | up_k]
            pl.BlockSpec((ti, H), lambda i, k: (k, 0)),          # w_down tile
        ],
        out_specs=tok_spec,
        scratch_shapes=[
            pltpu.VMEM((ts, H), jnp.float32),    # h1 (residual stream, f32)
            pltpu.VMEM((ts, H), x2d.dtype),      # normalized hidden, model dtype
            pltpu.VMEM((ts, H), jnp.float32),    # down-proj accumulator
        ],
        compiler_params=pltpu.CompilerParams(
            dimension_semantics=("parallel", "arbitrary"),
            vmem_limit_bytes=_VMEM_LIMIT),
    )(x2d, attn2d, wo, bo, nw, wgu, wd)


# --------------------------------------------------------------------------
# Weight-load-time preparation (hoisted out of the forward pass)
# --------------------------------------------------------------------------
def prepare_params(params, *, ti_target=_DEFAULT_TI):
    """Interleave gate/up per ti-tile and reshape small vectors.  Call once at
    weight-load time.  `ti_target` must match the value later passed to
    pixtral_transformer_forward."""
    out = []
    for p in params:
        H = p["wqkv"].shape[0]
        inter = p["w_down"].shape[0]
        ti = _pick_tile(inter, ti_target, lane=True)
        nt = inter // ti
        g = p["w_gate_up"][:, :inter].reshape(H, nt, ti)
        u = p["w_gate_up"][:, inter:].reshape(H, nt, ti)
        wgu = jnp.stack([g, u], axis=2).reshape(H, 2 * inter)
        out.append(dict(
            attn_norm_w=jnp.asarray(p["attn_norm_w"])[None, :],
            wqkv=p["wqkv"],
            bqkv=jnp.asarray(p["bqkv"])[None, :],
            wo=p["wo"],
            bo=jnp.asarray(p["bo"])[None, :],
            ffn_norm_w=jnp.asarray(p["ffn_norm_w"])[None, :],
            wgu=wgu,
            wd=p["w_down"],
        ))
    return out


# --------------------------------------------------------------------------
# Python wrapper: PixtralHFTransformer.forward
# --------------------------------------------------------------------------
def pixtral_transformer_forward(x, attention_mask, position_embeddings,
                                prepared_params, *, num_heads, head_dim,
                                return_all_hidden_states=False,
                                ts_qkv=256, tq=256, tkv=256,
                                ts_mlp=512, ti_target=_DEFAULT_TI):
    """Equivalent of PixtralHFTransformer.forward.

    attention_mask may be:
      * None
      * per-token segment ids, int (B, S) or (S,)  -> fast path (mask built
        in-kernel, fully-masked KV tiles skipped)
      * a dense additive mask (B,S,S)/(1,S,S)/(B,1,S,S) -> fallback path
    """
    B, S, H = x.shape
    assert H == num_heads * head_dim and head_dim % 2 == 0
    T = B * S
    half = head_dim // 2

    cos, sin = position_embeddings
    # Compact rope tables (S, head_dim) f32; rotate_half sign folded into sin.
    cos_c = cos[:, :head_dim].astype(jnp.float32)
    sin_c = jnp.concatenate([-sin[:, :half], sin[:, half:head_dim]],
                            axis=-1).astype(jnp.float32)

    seg = dense = work = None
    if attention_mask is not None:
        m = attention_mask
        if m.ndim <= 2 and jnp.issubdtype(m.dtype, jnp.integer):
            seg = jnp.broadcast_to(
                (m if m.ndim == 2 else m[None, :]).astype(jnp.int32), (B, S))
        else:
            if m.ndim == 4:
                m = m[:, 0]
            if m.ndim == 2:
                m = m[None]
            dense = m.astype(jnp.bfloat16)

    # TODO(synk): pad S to a multiple of 128 (with a dedicated padding segment
    # id) instead of falling back to larger / full-dimension tiles here.
    ts_qkv = _pick_tile(S, ts_qkv)
    tq = _pick_tile(S, tq)
    tkv = _pick_tile(S, tkv, lane=True)
    ts_mlp = _pick_tile(T, ts_mlp)

    if seg is not None:
        nQ, nK = S // tq, S // tkv
        qt = seg.reshape(B, nQ, tq)
        kt = seg.reshape(B, nK, tkv)
        qmin, qmax = qt.min(axis=-1), qt.max(axis=-1)
        kmin, kmax = kt.min(axis=-1), kt.max(axis=-1)
        # conservative per-tile "has any unmasked pair" flag (range overlap)
        work = ((qmax[:, :, None] >= kmin[:, None, :]) &
                (qmin[:, :, None] <= kmax[:, None, :])).astype(jnp.int32).reshape(-1)

    hs2d = x.reshape(T, H)
    all_hs = [x]
    for p in prepared_params:
        inter = p["wd"].shape[0]
        ti = _pick_tile(inter, ti_target, lane=True)

        # 1) RMSNorm + QKV + rotary (+ q scaling), flat-token grid
        q2d, k2d, v2d = _qkv_rope_call(
            hs2d, p["attn_norm_w"], p["wqkv"], p["bqkv"], cos_c, sin_c,
            seq_len=S, num_heads=num_heads, head_dim=head_dim, ts=ts_qkv)

        # 2) flash attention straight on (B, S, H) (no head transposes)
        attn = _flash_attn_call(
            q2d.reshape(B, S, H), k2d.reshape(B, S, H), v2d.reshape(B, S, H),
            num_heads=num_heads, head_dim=head_dim, tq=tq, tkv=tkv,
            seg=seg, dense_mask=dense, work=work)

        # 3) out-proj + residual + ffn_norm + fused gated MLP + residual
        hs2d = _mlp_call(hs2d, attn.reshape(T, H), p["wo"], p["bo"],
                         p["ffn_norm_w"], p["wgu"], p["wd"], ts=ts_mlp, ti=ti)
        if return_all_hidden_states:
            all_hs.append(hs2d.reshape(B, S, H))

    return all_hs if return_all_hidden_states else hs2d.reshape(B, S, H)


# --------------------------------------------------------------------------
# Synthetic weights / rotary tables / pure-JAX reference
# --------------------------------------------------------------------------
def init_params(key, num_layers, hidden, intermediate, dtype=jnp.bfloat16):
    params = []
    s = 0.05
    for _ in range(num_layers):
        key, k0, k1, k2, k3, k4, k5 = jax.random.split(key, 7)
        params.append(dict(
            attn_norm_w=jnp.ones((hidden,), dtype),
            wqkv=(jax.random.normal(k0, (hidden, 3 * hidden)) * s).astype(dtype),
            bqkv=(jax.random.normal(k1, (3 * hidden,)) * s).astype(dtype),
            wo=(jax.random.normal(k2, (hidden, hidden)) * s).astype(dtype),
            bo=(jax.random.normal(k3, (hidden,)) * s).astype(dtype),
            ffn_norm_w=jnp.ones((hidden,), dtype),
            w_gate_up=(jax.random.normal(k4, (hidden, 2 * intermediate)) * s).astype(dtype),
            w_down=(jax.random.normal(k5, (intermediate, hidden)) * s).astype(dtype),
        ))
    return params


def make_rotary(seq_len, head_dim, theta=10000.0):
    inv_freq = 1.0 / (theta ** (jnp.arange(0, head_dim, 2, dtype=jnp.float32) / head_dim))
    pos = jnp.arange(seq_len, dtype=jnp.float32)
    freqs = jnp.outer(pos, inv_freq)
    emb = jnp.concatenate([freqs, freqs], axis=-1)
    return jnp.cos(emb), jnp.sin(emb)


def _reference_forward(x, mask, cos, sin, params, *, num_heads, head_dim, eps=_EPS):
    """Plain-JAX reference with HF/sglang semantics (additive mask or None)."""
    dt = x.dtype
    cosf, sinf = cos.astype(jnp.float32), sin.astype(jnp.float32)

    def rms(h, w):
        hf = h.astype(jnp.float32)
        v = jnp.mean(hf * hf, axis=-1, keepdims=True)
        return (hf * lax.rsqrt(v + eps) * w.astype(jnp.float32)).astype(dt)

    def rope(t):
        rh = jnp.concatenate([-t[..., head_dim // 2:], t[..., :head_dim // 2]], -1)
        return t * cosf + rh * sinf

    hs = x
    for p in params:
        B, S, H = hs.shape
        xn = rms(hs, p["attn_norm_w"])
        qkv = jnp.dot(xn, p["wqkv"], preferred_element_type=jnp.float32) \
            + p["bqkv"].astype(jnp.float32)
        q, k, v = qkv[..., :H], qkv[..., H:2 * H], qkv[..., 2 * H:]

        def heads(t):
            return t.reshape(B, S, num_heads, head_dim).transpose(0, 2, 1, 3)

        qh, kh = rope(heads(q)).astype(dt), rope(heads(k)).astype(dt)
        vh = heads(v).astype(dt)
        s = jnp.einsum("bhqd,bhkd->bhqk", qh, kh,
                       preferred_element_type=jnp.float32) / math.sqrt(head_dim)
        if mask is not None:
            m = mask[:, 0] if mask.ndim == 4 else mask
            s = s + m[:, None].astype(jnp.float32)
        pattn = jax.nn.softmax(s, axis=-1).astype(dt)
        o = jnp.einsum("bhqk,bhkd->bhqd", pattn, vh,
                       preferred_element_type=jnp.float32)
        o = o.transpose(0, 2, 1, 3).reshape(B, S, H).astype(dt)
        attn = jnp.dot(o, p["wo"], preferred_element_type=jnp.float32) \
            + p["bo"].astype(jnp.float32)
        h1 = hs.astype(jnp.float32) + attn
        hn = rms(h1.astype(dt), p["ffn_norm_w"])
        inter = p["w_down"].shape[0]
        gu = jnp.dot(hn, p["w_gate_up"], preferred_element_type=jnp.float32)
        g, u = gu[..., :inter], gu[..., inter:]
        act = (g * jax.nn.sigmoid(g) * u).astype(dt)
        ffn = jnp.dot(act, p["w_down"], preferred_element_type=jnp.float32)
        hs = (h1 + ffn).astype(dt)
    return hs


if __name__ == "__main__":
    # Small config: hidden=128, heads=2 (head_dim=64), intermediate=256,
    # 2 layers, batch=2, seq=256.  Tiles of 128 are passed explicitly so the
    # demo exercises token/KV/intermediate streaming and tile skipping.
    B, S, H = 2, 256, 128
    num_heads, head_dim = 2, 64
    intermediate = 256
    num_layers = 2

    key = jax.random.PRNGKey(0)
    kx, kp = jax.random.split(key)
    x = jax.random.normal(kx, (B, S, H), jnp.float32).astype(jnp.bfloat16)
    cos, sin = make_rotary(S, head_dim)
    raw_params = init_params(kp, num_layers, H, intermediate, dtype=jnp.bfloat16)
    prepared = prepare_params(raw_params, ti_target=128)

    fwd = jax.jit(partial(pixtral_transformer_forward,
                          num_heads=num_heads, head_dim=head_dim,
                          ts_qkv=128, tq=128, tkv=128, ts_mlp=128, ti_target=128))

    def max_err(a, b):
        return float(jnp.max(jnp.abs(a.astype(jnp.float32) - b.astype(jnp.float32))))

    # --- run 1: attention_mask=None (no mask is ever built or DMA'd) ---------
    out = jax.block_until_ready(fwd(x, None, (cos, sin), prepared))
    assert out.shape == (B, S, H) and out.dtype == x.dtype
    ref = _reference_forward(x, None, cos, sin, raw_params,
                             num_heads=num_heads, head_dim=head_dim)
    e = max_err(out, ref)
    assert e < 0.15, f"mismatch vs reference (mask=None): {e}"

    # --- run 2: per-token segment ids (block-diagonal Pixtral-style mask); one
    #     boundary is NOT tile-aligned, exercising in-tile masking + skipping --
    seg = jnp.stack([
        jnp.where(jnp.arange(S) < 128, 0, 1),
        jnp.where(jnp.arange(S) < 80, 0, 1),
    ]).astype(jnp.int32)
    out_s = jax.block_until_ready(fwd(x, seg, (cos, sin), prepared))
    add_mask = jnp.where(seg[:, :, None] == seg[:, None, :], 0.0, -1e9).astype(jnp.float32)
    ref_s = _reference_forward(x, add_mask, cos, sin, raw_params,
                               num_heads=num_heads, head_dim=head_dim)
    e = max_err(out_s, ref_s)
    assert e < 0.15, f"mismatch vs reference (segment ids): {e}"

    # --- run 3: dense additive mask shared across the batch (fallback path) ---
    blk = (jnp.arange(S) < 128)
    m1 = jnp.where(blk[:, None] == blk[None, :], 0.0, -1e9).astype(jnp.float32)[None]
    out_d = jax.block_until_ready(fwd(x, m1, (cos, sin), prepared))
    ref_d = _reference_forward(x, m1, cos, sin, raw_params,
                               num_heads=num_heads, head_dim=head_dim)
    e = max_err(out_d, ref_d)
    assert e < 0.15, f"mismatch vs reference (dense mask): {e}"

    print("KERNEL_OK")
</pallas_src>

<mosaic_0001>
module attributes {stable_mosaic.version = 11 : i64} {
  func.func @_mlp_block_kernel(%arg0: i32, %arg1: i32, %arg2: memref<128x128xbf16, #tpu.memory_space<vmem>>, %arg3: memref<128x128xbf16, #tpu.memory_space<vmem>>, %arg4: memref<128x128xbf16, #tpu.memory_space<vmem>>, %arg5: memref<1x128xbf16, #tpu.memory_space<vmem>>, %arg6: memref<1x128xbf16, #tpu.memory_space<vmem>>, %arg7: memref<128x256xbf16, #tpu.memory_space<vmem>>, %arg8: memref<128x128xbf16, #tpu.memory_space<vmem>>, %arg9: memref<128x128xbf16, #tpu.memory_space<vmem>>, %arg10: memref<128x128xf32, #tpu.memory_space<vmem>>, %arg11: memref<128x128xbf16, #tpu.memory_space<vmem>>, %arg12: memref<128x128xf32, #tpu.memory_space<vmem>>) attributes {dimension_semantics = [#tpu.dimension_semantics<parallel>, #tpu.dimension_semantics<arbitrary>], iteration_bounds = array<i64: 4, 2>, scalar_prefetch = 0 : i64, scratch_operands = 3 : i64, tpu.core_type = #tpu.core_type<tc>, window_params = [{transform_indices = @transform_0, window_bounds = array<i64: 128, 128>}, {transform_indices = @transform_1, window_bounds = array<i64: 128, 128>}, {pipeline_mode = #tpu.pipeline_mode<synchronous>, transform_indices = @transform_2, window_bounds = array<i64: 128, 128>}, {pipeline_mode = #tpu.pipeline_mode<synchronous>, transform_indices = @transform_3, window_bounds = array<i64: 1, 128>}, {pipeline_mode = #tpu.pipeline_mode<synchronous>, transform_indices = @transform_4, window_bounds = array<i64: 1, 128>}, {transform_indices = @transform_5, window_bounds = array<i64: 128, 256>}, {transform_indices = @transform_6, window_bounds = array<i64: 128, 128>}, {transform_indices = @transform_7, window_bounds = array<i64: 128, 128>}]} {
    %c0_i32 = arith.constant 0 : i32
    %0 = arith.cmpi eq, %arg1, %c0_i32 : i32
    %1 = arith.extui %0 : i1 to i32
    %c0_i32_0 = arith.constant 0 : i32
    %2 = arith.cmpi ne, %1, %c0_i32_0 : i32
    scf.if %2 {
      %c0_13 = arith.constant 0 : index
      %c0_14 = arith.constant 0 : index
      %24 = vector.load %arg3[%c0_13, %c0_14] : memref<128x128xbf16, #tpu.memory_space<vmem>>, vector<128x128xbf16>
      %c0_15 = arith.constant 0 : index
      %c0_16 = arith.constant 0 : index
      %25 = vector.load %arg4[%c0_15, %c0_16] : memref<128x128xbf16, #tpu.memory_space<vmem>>, vector<128x128xbf16>
      %cst_17 = arith.constant dense<0.000000e+00> : vector<128x128xf32>
      %26 = tpu.matmul %24, %25, %cst_17 {dimension_numbers = #tpu.dot_dimension_numbers<[1], [0], [0], [1], [0, 0, 1, 1], [], []>} : vector<128x128xbf16>, vector<128x128xbf16>, vector<128x128xf32> -> vector<128x128xf32>
      %c0_18 = arith.constant 0 : index
      %c0_19 = arith.constant 0 : index
      %27 = vector.load %arg2[%c0_18, %c0_19] : memref<128x128xbf16, #tpu.memory_space<vmem>>, vector<128x128xbf16>
      %28 = arith.extf %27 : vector<128x128xbf16> to vector<128x128xf32>
      %29 = arith.addf %28, %26 : vector<128x128xf32>
      %c0_20 = arith.constant 0 : index
      %c0_21 = arith.constant 0 : index
      %30 = vector.load %arg5[%c0_20, %c0_21] : memref<1x128xbf16, #tpu.memory_space<vmem>>, vector<1x128xbf16>
      %31 = arith.extf %30 : vector<1x128xbf16> to vector<1x128xf32>
      %32 = vector.broadcast %31 : vector<1x128xf32> to vector<128x128xf32>
      %33 = arith.addf %29, %32 : vector<128x128xf32>
      %c0_22 = arith.constant 0 : index
      %c0_23 = arith.constant 0 : index
      %34 = vector.load %arg10[%c0_22, %c0_23] : memref<128x128xf32, #tpu.memory_space<vmem>>, vector<128x128xf32>
      tpu.vector_store %arg10[%c0_22, %c0_23], %33 {strides = array<i32>} : memref<128x128xf32, #tpu.memory_space<vmem>>, vector<128x128xf32>,
      %35 = arith.mulf %33, %33 : vector<128x128xf32>
      %cst_24 = arith.constant dense<0.000000e+00> : vector<128xf32>
      %36 = vector.multi_reduction <add>, %35, %cst_24 [1] : vector<128x128xf32> to vector<128xf32>
      %37 = vector.shape_cast %36 : vector<128xf32> to vector<128x1xf32>
      %cst_25 = arith.constant 1.280000e+02 : f32
      %38 = vector.broadcast %cst_25 : f32 to vector<128x1xf32>
      %39 = arith.divf %37, %38 : vector<128x1xf32>
      %cst_26 = arith.constant 9.99999974E-6 : f32
      %40 = vector.broadcast %cst_26 : f32 to vector<128x1xf32>
      %41 = arith.addf %39, %40 : vector<128x1xf32>
      %42 = math.rsqrt %41 : vector<128x1xf32>
      %43 = vector.broadcast %42 : vector<128x1xf32> to vector<128x128xf32>
      %44 = arith.mulf %33, %43 : vector<128x128xf32>
      %c0_27 = arith.constant 0 : index
      %c0_28 = arith.constant 0 : index
      %45 = vector.load %arg6[%c0_27, %c0_28] : memref<1x128xbf16, #tpu.memory_space<vmem>>, vector<1x128xbf16>
      %46 = arith.extf %45 : vector<1x128xbf16> to vector<1x128xf32>
      %47 = vector.broadcast %46 : vector<1x128xf32> to vector<128x128xf32>
      %48 = arith.mulf %44, %47 : vector<128x128xf32>
      %49 = arith.truncf %48 : vector<128x128xf32> to vector<128x128xbf16>
      %c0_29 = arith.constant 0 : index
      %c0_30 = arith.constant 0 : index
      %50 = vector.load %arg11[%c0_29, %c0_30] : memref<128x128xbf16, #tpu.memory_space<vmem>>, vector<128x128xbf16>
      tpu.vector_store %arg11[%c0_29, %c0_30], %49 {strides = array<i32>} : memref<128x128xbf16, #tpu.memory_space<vmem>>, vector<128x128xbf16>,
      %cst_31 = arith.constant 0.000000e+00 : f32
      %51 = vector.broadcast %cst_31 : f32 to vector<128x128xf32>
      %c0_32 = arith.constant 0 : index
      %c0_33 = arith.constant 0 : index
      %52 = vector.load %arg12[%c0_32, %c0_33] : memref<128x128xf32, #tpu.memory_space<vmem>>, vector<128x128xf32>
      tpu.vector_store %arg12[%c0_32, %c0_33], %51 {strides = array<i32>} : memref<128x128xf32, #tpu.memory_space<vmem>>, vector<128x128xf32>,
    } else {
    }
    %c0 = arith.constant 0 : index
    %c0_1 = arith.constant 0 : index
    %3 = vector.load %arg11[%c0, %c0_1] : memref<128x128xbf16, #tpu.memory_space<vmem>>, vector<128x128xbf16>
    %c0_2 = arith.constant 0 : index
    %c0_3 = arith.constant 0 : index
    %4 = vector.load %arg7[%c0_2, %c0_3] : memref<128x256xbf16, #tpu.memory_space<vmem>>, vector<128x256xbf16>
    %cst = arith.constant dense<0.000000e+00> : vector<128x256xf32>
    %5 = tpu.matmul %3, %4, %cst {dimension_numbers = #tpu.dot_dimension_numbers<[1], [0], [0], [1], [0, 0, 1, 1], [], []>} : vector<128x128xbf16>, vector<128x256xbf16>, vector<128x256xf32> -> vector<128x256xf32>
    %6 = vector.extract_strided_slice %5 {offsets = [0, 0], sizes = [128, 128], strides = [1, 1]} : vector<128x256xf32> to vector<128x128xf32>
    %7 = vector.extract_strided_slice %5 {offsets = [0, 128], sizes = [128, 128], strides = [1, 1]} : vector<128x256xf32> to vector<128x128xf32>
    %8 = arith.negf %6 : vector<128x128xf32>
    %9 = math.exp %8 : vector<128x128xf32>
    %cst_4 = arith.constant 1.000000e+00 : f32
    %10 = vector.broadcast %cst_4 : f32 to vector<128x128xf32>
    %11 = arith.addf %10, %9 : vector<128x128xf32>
    %12 = arith.divf %10, %11 : vector<128x128xf32>
    %13 = arith.mulf %6, %12 : vector<128x128xf32>
    %14 = arith.mulf %13, %7 : vector<128x128xf32>
    %15 = arith.truncf %14 : vector<128x128xf32> to vector<128x128xbf16>
    %c0_5 = arith.constant 0 : index
    %c0_6 = arith.constant 0 : index
    %16 = vector.load %arg12[%c0_5, %c0_6] : memref<128x128xf32, #tpu.memory_space<vmem>>, vector<128x128xf32>
    %c0_7 = arith.constant 0 : index
    %c0_8 = arith.constant 0 : index
    %17 = vector.load %arg8[%c0_7, %c0_8] : memref<128x128xbf16, #tpu.memory_space<vmem>>, vector<128x128xbf16>
    %cst_9 = arith.constant dense<0.000000e+00> : vector<128x128xf32>
    %18 = tpu.matmul %15, %17, %cst_9 {dimension_numbers = #tpu.dot_dimension_numbers<[1], [0], [0], [1], [0, 0, 1, 1], [], []>} : vector<128x128xbf16>, vector<128x128xbf16>, vector<128x128xf32> -> vector<128x128xf32>
    %19 = arith.addf %16, %18 : vector<128x128xf32>
    %c0_10 = arith.constant 0 : index
    %c0_11 = arith.constant 0 : index
    %20 = vector.load %arg12[%c0_10, %c0_11] : memref<128x128xf32, #tpu.memory_space<vmem>>, vector<128x128xf32>
    tpu.vector_store %arg12[%c0_10, %c0_11], %19 {strides = array<i32>} : memref<128x128xf32, #tpu.memory_space<vmem>>, vector<128x128xf32>,
    %c1_i32 = arith.constant 1 : i32
    %21 = arith.cmpi eq, %arg1, %c1_i32 : i32
    %22 = arith.extui %21 : i1 to i32
    %c0_i32_12 = arith.constant 0 : i32
    %23 = arith.cmpi ne, %22, %c0_i32_12 : i32
    scf.if %23 {
      %c0_13 = arith.constant 0 : index
      %c0_14 = arith.constant 0 : index
      %24 = vector.load %arg10[%c0_13, %c0_14] : memref<128x128xf32, #tpu.memory_space<vmem>>, vector<128x128xf32>
      %c0_15 = arith.constant 0 : index
      %c0_16 = arith.constant 0 : index
      %25 = vector.load %arg12[%c0_15, %c0_16] : memref<128x128xf32, #tpu.memory_space<vmem>>, vector<128x128xf32>
      %26 = arith.addf %24, %25 : vector<128x128xf32>
      %27 = arith.truncf %26 : vector<128x128xf32> to vector<128x128xbf16>
      %c0_17 = arith.constant 0 : index
      %c0_18 = arith.constant 0 : index
      %28 = vector.load %arg9[%c0_17, %c0_18] : memref<128x128xbf16, #tpu.memory_space<vmem>>, vector<128x128xbf16>
      tpu.vector_store %arg9[%c0_17, %c0_18], %27 {strides = array<i32>} : memref<128x128xbf16, #tpu.memory_space<vmem>>, vector<128x128xbf16>,
    } else {
    }
    return
  }
  func.func @transform_0(%arg0: i32, %arg1: i32) -> (i32, i32) {
    %c0_i32 = arith.constant 0 : i32
    %c0_i32_0 = arith.constant 0 : i32
    return %arg0, %c0_i32 : i32, i32
  }
  func.func @transform_1(%arg0: i32, %arg1: i32) -> (i32, i32) {
    %c0_i32 = arith.constant 0 : i32
    %c0_i32_0 = arith.constant 0 : i32
    return %arg0, %c0_i32 : i32, i32
  }
  func.func @transform_2(%arg0: i32, %arg1: i32) -> (i32, i32) {
    %c0_i32 = arith.constant 0 : i32
    %c0_i32_0 = arith.constant 0 : i32
    %c0_i32_1 = arith.constant 0 : i32
    return %c0_i32, %c0_i32_0 : i32, i32
  }
  func.func @transform_3(%arg0: i32, %arg1: i32) -> (i32, i32) {
    %c0_i32 = arith.constant 0 : i32
    %c0_i32_0 = arith.constant 0 : i32
    %c0_i32_1 = arith.constant 0 : i32
    return %c0_i32, %c0_i32_0 : i32, i32
  }
  func.func @transform_4(%arg0: i32, %arg1: i32) -> (i32, i32) {
    %c0_i32 = arith.constant 0 : i32
    %c0_i32_0 = arith.constant 0 : i32
    %c0_i32_1 = arith.constant 0 : i32
    return %c0_i32, %c0_i32_0 : i32, i32
  }
  func.func @transform_5(%arg0: i32, %arg1: i32) -> (i32, i32) {
    %c0_i32 = arith.constant 0 : i32
    %c0_i32_0 = arith.constant 0 : i32
    return %c0_i32, %arg1 : i32, i32
  }
  func.func @transform_6(%arg0: i32, %arg1: i32) -> (i32, i32) {
    %c0_i32 = arith.constant 0 : i32
    %c0_i32_0 = arith.constant 0 : i32
    return %arg1, %c0_i32 : i32, i32
  }
  func.func @transform_7(%arg0: i32, %arg1: i32) -> (i32, i32) {
    %c0_i32 = arith.constant 0 : i32
    %c0_i32_0 = arith.constant 0 : i32
    return %arg0, %c0_i32 : i32, i32
  }
}

module attributes {stable_mosaic.version = 11 : i64} {
  func.func @_mlp_block_kernel(%arg0: i32, %arg1: i32, %arg2: memref<128x128xbf16, #tpu.memory_space<vmem>>, %arg3: memref<128x128xbf16, #tpu.memory_space<vmem>>, %arg4: memref<128x128xbf16, #tpu.memory_space<vmem>>, %arg5: memref<1x128xbf16, #tpu.memory_space<vmem>>, %arg6: memref<1x128xbf16, #tpu.memory_space<vmem>>, %arg7: memref<128x256xbf16, #tpu.memory_space<vmem>>, %arg8: memref<128x128xbf16, #tpu.memory_space<vmem>>, %arg9: memref<128x128xbf16, #tpu.memory_space<vmem>>, %arg10: memref<128x128xf32, #tpu.memory_space<vmem>>, %arg11: memref<128x128xbf16, #tpu.memory_space<vmem>>, %arg12: memref<128x128xf32, #tpu.memory_space<vmem>>) attributes {dimension_semantics = [#tpu.dimension_semantics<parallel>, #tpu.dimension_semantics<arbitrary>], iteration_bounds = array<i64: 4, 2>, scalar_prefetch = 0 : i64, scratch_operands = 3 : i64, tpu.core_type = #tpu.core_type<tc>, window_params = [{transform_indices = @transform_0, window_bounds = array<i64: 128, 128>}, {transform_indices = @transform_1, window_bounds = array<i64: 128, 128>}, {pipeline_mode = #tpu.pipeline_mode<synchronous>, transform_indices = @transform_2, window_bounds = array<i64: 128, 128>}, {pipeline_mode = #tpu.pipeline_mode<synchronous>, transform_indices = @transform_3, window_bounds = array<i64: 1, 128>}, {pipeline_mode = #tpu.pipeline_mode<synchronous>, transform_indices = @transform_4, window_bounds = array<i64: 1, 128>}, {transform_indices = @transform_5, window_bounds = array<i64: 128, 256>}, {transform_indices = @transform_6, window_bounds = array<i64: 128, 128>}, {transform_indices = @transform_7, window_bounds = array<i64: 128, 128>}]} {
    %c0_i32 = arith.constant 0 : i32
    %0 = arith.cmpi eq, %arg1, %c0_i32 : i32
    %1 = arith.extui %0 : i1 to i32
    %c0_i32_0 = arith.constant 0 : i32
    %2 = arith.cmpi ne, %1, %c0_i32_0 : i32
    scf.if %2 {
      %c0_13 = arith.constant 0 : index
      %c0_14 = arith.constant 0 : index
      %24 = vector.load %arg3[%c0_13, %c0_14] : memref<128x128xbf16, #tpu.memory_space<vmem>>, vector<128x128xbf16>
      %c0_15 = arith.constant 0 : index
      %c0_16 = arith.constant 0 : index
      %25 = vector.load %arg4[%c0_15, %c0_16] : memref<128x128xbf16, #tpu.memory_space<vmem>>, vector<128x128xbf16>
      %cst_17 = arith.constant dense<0.000000e+00> : vector<128x128xf32>
      %26 = tpu.matmul %24, %25, %cst_17 {dimension_numbers = #tpu.dot_dimension_numbers<[1], [0], [0], [1], [0, 0, 1, 1], [], []>} : vector<128x128xbf16>, vector<128x128xbf16>, vector<128x128xf32> -> vector<128x128xf32>
      %c0_18 = arith.constant 0 : index
      %c0_19 = arith.constant 0 : index
      %27 = vector.load %arg2[%c0_18, %c0_19] : memref<128x128xbf16, #tpu.memory_space<vmem>>, vector<128x128xbf16>
      %28 = arith.extf %27 : vector<128x128xbf16> to vector<128x128xf32>
      %29 = arith.addf %28, %26 : vector<128x128xf32>
      %c0_20 = arith.constant 0 : index
      %c0_21 = arith.constant 0 : index
      %30 = vector.load %arg5[%c0_20, %c0_21] : memref<1x128xbf16, #tpu.memory_space<vmem>>, vector<1x128xbf16>
      %31 = arith.extf %30 : vector<1x128xbf16> to vector<1x128xf32>
      %32 = vector.broadcast %31 : vector<1x128xf32> to vector<128x128xf32>
      %33 = arith.addf %29, %32 : vector<128x128xf32>
      %c0_22 = arith.constant 0 : index
      %c0_23 = arith.constant 0 : index
      %34 = vector.load %arg10[%c0_22, %c0_23] : memref<128x128xf32, #tpu.memory_space<vmem>>, vector<128x128xf32>
      tpu.vector_store %arg10[%c0_22, %c0_23], %33 {strides = array<i32>} : memref<128x128xf32, #tpu.memory_space<vmem>>, vector<128x128xf32>,
      %35 = arith.mulf %33, %33 : vector<128x128xf32>
      %cst_24 = arith.constant dense<0.000000e+00> : vector<128xf32>
      %36 = vector.multi_reduction <add>, %35, %cst_24 [1] : vector<128x128xf32> to vector<128xf32>
      %37 = vector.shape_cast %36 : vector<128xf32> to vector<128x1xf32>
      %cst_25 = arith.constant 1.280000e+02 : f32
      %38 = vector.broadcast %cst_25 : f32 to vector<128x1xf32>
      %39 = arith.divf %37, %38 : vector<128x1xf32>
      %cst_26 = arith.constant 9.99999974E-6 : f32
      %40 = vector.broadcast %cst_26 : f32 to vector<128x1xf32>
      %41 = arith.addf %39, %40 : vector<128x1xf32>
      %42 = math.rsqrt %41 : vector<128x1xf32>
      %43 = vector.broadcast %42 : vector<128x1xf32> to vector<128x128xf32>
      %44 = arith.mulf %33, %43 : vector<128x128xf32>
      %c0_27 = arith.constant 0 : index
      %c0_28 = arith.constant 0 : index
      %45 = vector.load %arg6[%c0_27, %c0_28] : memref<1x128xbf16, #tpu.memory_space<vmem>>, vector<1x128xbf16>
      %46 = arith.extf %45 : vector<1x128xbf16> to vector<1x128xf32>
      %47 = vector.broadcast %46 : vector<1x128xf32> to vector<128x128xf32>
      %48 = arith.mulf %44, %47 : vector<128x128xf32>
      %49 = arith.truncf %48 : vector<128x128xf32> to vector<128x128xbf16>
      %c0_29 = arith.constant 0 : index
      %c0_30 = arith.constant 0 : index
      %50 = vector.load %arg11[%c0_29, %c0_30] : memref<128x128xbf16, #tpu.memory_space<vmem>>, vector<128x128xbf16>
      tpu.vector_store %arg11[%c0_29, %c0_30], %49 {strides = array<i32>} : memref<128x128xbf16, #tpu.memory_space<vmem>>, vector<128x128xbf16>,
      %cst_31 = arith.constant 0.000000e+00 : f32
      %51 = vector.broadcast %cst_31 : f32 to vector<128x128xf32>
      %c0_32 = arith.constant 0 : index
      %c0_33 = arith.constant 0 : index
      %52 = vector.load %arg12[%c0_32, %c0_33] : memref<128x128xf32, #tpu.memory_space<vmem>>, vector<128x128xf32>
      tpu.vector_store %arg12[%c0_32, %c0_33], %51 {strides = array<i32>} : memref<128x128xf32, #tpu.memory_space<vmem>>, vector<128x128xf32>,
    } else {
    }
    %c0 = arith.constant 0 : index
    %c0_1 = arith.constant 0 : index
    %3 = vector.load %arg11[%c0, %c0_1] : memref<128x128xbf16, #tpu.memory_space<vmem>>, vector<128x128xbf16>
    %c0_2 = arith.constant 0 : index
    %c0_3 = arith.constant 0 : index
    %4 = vector.load %arg7[%c0_2, %c0_3] : memref<128x256xbf16, #tpu.memory_space<vmem>>, vector<128x256xbf16>
    %cst = arith.constant dense<0.000000e+00> : vector<128x256xf32>
    %5 = tpu.matmul %3, %4, %cst {dimension_numbers = #tpu.dot_dimension_numbers<[1], [0], [0], [1], [0, 0, 1, 1], [], []>} : vector<128x128xbf16>, vector<128x256xbf16>, vector<128x256xf32> -> vector<128x256xf32>
    %6 = vector.extract_strided_slice %5 {offsets = [0, 0], sizes = [128, 128], strides = [1, 1]} : vector<128x256xf32> to vector<128x128xf32>
    %7 = vector.extract_strided_slice %5 {offsets = [0, 128], sizes = [128, 128], strides = [1, 1]} : vector<128x256xf32> to vector<128x128xf32>
    %8 = arith.negf %6 : vector<128x128xf32>
    %9 = math.exp %8 : vector<128x128xf32>
    %cst_4 = arith.constant 1.000000e+00 : f32
    %10 = vector.broadcast %cst_4 : f32 to vector<128x128xf32>
    %11 = arith.addf %10, %9 : vector<128x128xf32>
    %12 = arith.divf %10, %11 : vector<128x128xf32>
    %13 = arith.mulf %6, %12 : vector<128x128xf32>
    %14 = arith.mulf %13, %7 : vector<128x128xf32>
    %15 = arith.truncf %14 : vector<128x128xf32> to vector<128x128xbf16>
    %c0_5 = arith.constant 0 : index
    %c0_6 = arith.constant 0 : index
    %16 = vector.load %arg12[%c0_5, %c0_6] : memref<128x128xf32, #tpu.memory_space<vmem>>, vector<128x128xf32>
    %c0_7 = arith.constant 0 : index
    %c0_8 = arith.constant 0 : index
    %17 = vector.load %arg8[%c0_7, %c0_8] : memref<128x128xbf16, #tpu.memory_space<vmem>>, vector<128x128xbf16>
    %cst_9 = arith.constant dense<0.000000e+00> : vector<128x128xf32>
    %18 = tpu.matmul %15, %17, %cst_9 {dimension_numbers = #tpu.dot_dimension_numbers<[1], [0], [0], [1], [0, 0, 1, 1], [], []>} : vector<128x128xbf16>, vector<128x128xbf16>, vector<128x128xf32> -> vector<128x128xf32>
    %19 = arith.addf %16, %18 : vector<128x128xf32>
    %c0_10 = arith.constant 0 : index
    %c0_11 = arith.constant 0 : index
    %20 = vector.load %arg12[%c0_10, %c0_11] : memref<128x128xf32, #tpu.memory_space<vmem>>, vector<128x128xf32>
    tpu.vector_store %arg12[%c0_10, %c0_11], %19 {strides = array<i32>} : memref<128x128xf32, #tpu.memory_space<vmem>>, vector<128x128xf32>,
    %c1_i32 = arith.constant 1 : i32
    %21 = arith.cmpi eq, %arg1, %c1_i32 : i32
    %22 = arith.extui %21 : i1 to i32
    %c0_i32_12 = arith.constant 0 : i32
    %23 = arith.cmpi ne, %22, %c0_i32_12 : i32
    scf.if %23 {
      %c0_13 = arith.constant 0 : index
      %c0_14 = arith.constant 0 : index
      %24 = vector.load %arg10[%c0_13, %c0_14] : memref<128x128xf32, #tpu.memory_space<vmem>>, vector<128x128xf32>
      %c0_15 = arith.constant 0 : index
      %c0_16 = arith.constant 0 : index
      %25 = vector.load %arg12[%c0_15, %c0_16] : memref<128x128xf32, #tpu.memory_space<vmem>>, vector<128x128xf32>
      %26 = arith.addf %24, %25 : vector<128x128xf32>
      %27 = arith.truncf %26 : vector<128x128xf32> to vector<128x128xbf16>
      %c0_17 = arith.constant 0 : index
      %c0_18 = arith.constant 0 : index
      %28 = vector.load %arg9[%c0_17, %c0_18] : memref<128x128xbf16, #tpu.memory_space<vmem>>, vector<128x128xbf16>
      tpu.vector_store %arg9[%c0_17, %c0_18], %27 {strides = array<i32>} : memref<128x128xbf16, #tpu.memory_space<vmem>>, vector<128x128xbf16>,
    } else {
    }
    return
  }
  func.func @transform_0(%arg0: i32, %arg1: i32) -> (i32, i32) {
    %c0_i32 = arith.constant 0 : i32
    %c0_i32_0 = arith.constant 0 : i32
    return %arg0, %c0_i32 : i32, i32
  }
  func.func @transform_1(%arg0: i32, %arg1: i32) -> (i32, i32) {
    %c0_i32 = arith.constant 0 : i32
    %c0_i32_0 = arith.constant 0 : i32
    return %arg0, %c0_i32 : i32, i32
  }
  func.func @transform_2(%arg0: i32, %arg1: i32) -> (i32, i32) {
    %c0_i32 = arith.constant 0 : i32
    %c0_i32_0 = arith.constant 0 : i32
    %c0_i32_1 = arith.constant 0 : i32
    return %c0_i32, %c0_i32_0 : i32, i32
  }
  func.func @transform_3(%arg0: i32, %arg1: i32) -> (i32, i32) {
    %c0_i32 = arith.constant 0 : i32
    %c0_i32_0 = arith.constant 0 : i32
    %c0_i32_1 = arith.constant 0 : i32
    return %c0_i32, %c0_i32_0 : i32, i32
  }
  func.func @transform_4(%arg0: i32, %arg1: i32) -> (i32, i32) {
    %c0_i32 = arith.constant 0 : i32
    %c0_i32_0 = arith.constant 0 : i32
    %c0_i32_1 = arith.constant 0 : i32
    return %c0_i32, %c0_i32_0 : i32, i32
  }
  func.func @transform_5(%arg0: i32, %arg1: i32) -> (i32, i32) {
    %c0_i32 = arith.constant 0 : i32
    %c0_i32_0 = arith.constant 0 : i32
    return %c0_i32, %arg1 : i32, i32
  }
  func.func @transform_6(%arg0: i32, %arg1: i32) -> (i32, i32) {
    %c0_i32 = arith.constant 0 : i32
    %c0_i32_0 = arith.constant 0 : i32
    return %arg1, %c0_i32 : i32, i32
  }
  func.func @transform_7(%arg0: i32, %arg1: i32) -> (i32, i32) {
    %c0_i32 = arith.constant 0 : i32
    %c0_i32_0 = arith.constant 0 : i32
    return %arg0, %c0_i32 : i32, i32
  }
}

module attributes {stable_mosaic.version = 11 : i64} {
  func.func @_flash_attn_kernel(%arg0: i32, %arg1: i32, %arg2: i32, %arg3: memref<1x128x128xbf16, #tpu.memory_space<vmem>>, %arg4: memref<1x128x128xbf16, #tpu.memory_space<vmem>>, %arg5: memref<1x128x128xbf16, #tpu.memory_space<vmem>>, %arg6: memref<1x128x128xbf16, #tpu.memory_space<vmem>>, %arg7: memref<128x2xf32, #tpu.memory_space<vmem>>, %arg8: memref<128x2xf32, #tpu.memory_space<vmem>>, %arg9: memref<128x128xf32, #tpu.memory_space<vmem>>) attributes {dimension_semantics = [#tpu.dimension_semantics<parallel>, #tpu.dimension_semantics<parallel>, #tpu.dimension_semantics<arbitrary>], iteration_bounds = array<i64: 2, 2, 2>, scalar_prefetch = 0 : i64, scratch_operands = 3 : i64, tpu.core_type = #tpu.core_type<tc>, window_params = [{transform_indices = @transform_0, window_bounds = array<i64: 1, 128, 128>}, {transform_indices = @transform_1, window_bounds = array<i64: 1, 128, 128>}, {transform_indices = @transform_2, window_bounds = array<i64: 1, 128, 128>}, {transform_indices = @transform_3, window_bounds = array<i64: 1, 128, 128>}]} {
    %c0_i32 = arith.constant 0 : i32
    %0 = arith.cmpi eq, %arg2, %c0_i32 : i32
    %1 = arith.extui %0 : i1 to i32
    %c0_i32_0 = arith.constant 0 : i32
    %2 = arith.cmpi ne, %1, %c0_i32_0 : i32
    scf.if %2 {
      %cst_39 = arith.constant -1.000000e+30 : f32
      %66 = vector.broadcast %cst_39 : f32 to vector<128x2xf32>
      %c0_40 = arith.constant 0 : index
      %c0_41 = arith.constant 0 : index
      %67 = vector.load %arg7[%c0_40, %c0_41] : memref<128x2xf32, #tpu.memory_space<vmem>>, vector<128x2xf32>
      tpu.vector_store %arg7[%c0_40, %c0_41], %66 {strides = array<i32>} : memref<128x2xf32, #tpu.memory_space<vmem>>, vector<128x2xf32>,
      %cst_42 = arith.constant 0.000000e+00 : f32
      %68 = vector.broadcast %cst_42 : f32 to vector<128x2xf32>
      %c0_43 = arith.constant 0 : index
      %c0_44 = arith.constant 0 : index
      %69 = vector.load %arg8[%c0_43, %c0_44] : memref<128x2xf32, #tpu.memory_space<vmem>>, vector<128x2xf32>
      tpu.vector_store %arg8[%c0_43, %c0_44], %68 {strides = array<i32>} : memref<128x2xf32, #tpu.memory_space<vmem>>, vector<128x2xf32>,
      %cst_45 = arith.constant 0.000000e+00 : f32
      %70 = vector.broadcast %cst_45 : f32 to vector<128x128xf32>
      %c0_46 = arith.constant 0 : index
      %c0_47 = arith.constant 0 : index
      %71 = vector.load %arg9[%c0_46, %c0_47] : memref<128x128xf32, #tpu.memory_space<vmem>>, vector<128x128xf32>
      tpu.vector_store %arg9[%c0_46, %c0_47], %70 {strides = array<i32>} : memref<128x128xf32, #tpu.memory_space<vmem>>, vector<128x128xf32>,
    } else {
    }
    %c0 = arith.constant 0 : index
    %c0_1 = arith.constant 0 : index
    %c0_2 = arith.constant 0 : index
    %3 = vector.load %arg3[%c0, %c0_1, %c0_2] : memref<1x128x128xbf16, #tpu.memory_space<vmem>>, vector<1x128x128xbf16>
    %4 = vector.shape_cast %3 : vector<1x128x128xbf16> to vector<128x128xbf16>
    %c0_3 = arith.constant 0 : index
    %c0_4 = arith.constant 0 : index
    %c0_5 = arith.constant 0 : index
    %5 = vector.load %arg4[%c0_3, %c0_4, %c0_5] : memref<1x128x128xbf16, #tpu.memory_space<vmem>>, vector<1x128x128xbf16>
    %6 = vector.shape_cast %5 : vector<1x128x128xbf16> to vector<128x128xbf16>
    %c0_6 = arith.constant 0 : index
    %c0_7 = arith.constant 0 : index
    %c0_8 = arith.constant 0 : index
    %7 = vector.load %arg5[%c0_6, %c0_7, %c0_8] : memref<1x128x128xbf16, #tpu.memory_space<vmem>>, vector<1x128x128xbf16>
    %8 = vector.shape_cast %7 : vector<1x128x128xbf16> to vector<128x128xbf16>
    %9 = vector.extract_strided_slice %4 {offsets = [0, 0], sizes = [128, 64], strides = [1, 1]} : vector<128x128xbf16> to vector<128x64xbf16>
    %10 = vector.extract_strided_slice %6 {offsets = [0, 0], sizes = [128, 64], strides = [1, 1]} : vector<128x128xbf16> to vector<128x64xbf16>
    %cst = arith.constant dense<0.000000e+00> : vector<128x128xf32>
    %11 = tpu.matmul %9, %10, %cst {dimension_numbers = #tpu.dot_dimension_numbers<[1], [1], [0], [0], [0, 0, 1, 0], [], []>} : vector<128x64xbf16>, vector<128x64xbf16>, vector<128x128xf32> -> vector<128x128xf32>
    %c0_9 = arith.constant 0 : index
    %c0_10 = arith.constant 0 : index
    %12 = vector.load %arg7[%c0_9, %c0_10] : memref<128x2xf32, #tpu.memory_space<vmem>>, vector<128x1xf32>
    %cst_11 = arith.constant dense<0xFF800000> : vector<128xf32>
    %13 = vector.multi_reduction <maximumf>, %11, %cst_11 [1] : vector<128x128xf32> to vector<128xf32>
    %14 = vector.shape_cast %13 : vector<128xf32> to vector<128x1xf32>
    %15 = arith.maximumf %12, %14 : vector<128x1xf32>
    %16 = arith.subf %12, %15 : vector<128x1xf32>
    %17 = math.exp %16 : vector<128x1xf32>
    %18 = vector.broadcast %15 : vector<128x1xf32> to vector<128x128xf32>
    %19 = arith.subf %11, %18 : vector<128x128xf32>
    %20 = math.exp %19 : vector<128x128xf32>
    %c0_12 = arith.constant 0 : index
    %c0_13 = arith.constant 0 : index
    %21 = vector.load %arg8[%c0_12, %c0_13] : memref<128x2xf32, #tpu.memory_space<vmem>>, vector<128x1xf32>
    %22 = arith.mulf %17, %21 : vector<128x1xf32>
    %cst_14 = arith.constant dense<0.000000e+00> : vector<128xf32>
    %23 = vector.multi_reduction <add>, %20, %cst_14 [1] : vector<128x128xf32> to vector<128xf32>
    %24 = vector.shape_cast %23 : vector<128xf32> to vector<128x1xf32>
    %25 = arith.addf %22, %24 : vector<128x1xf32>
    %c0_15 = arith.constant 0 : index
    %c0_16 = arith.constant 0 : index
    %26 = vector.load %arg8[%c0_15, %c0_16] : memref<128x2xf32, #tpu.memory_space<vmem>>, vector<128x1xf32>
    tpu.vector_store %arg8[%c0_15, %c0_16], %25 {strides = array<i32>} : memref<128x2xf32, #tpu.memory_space<vmem>>, vector<128x1xf32>,
    %c0_17 = arith.constant 0 : index
    %c0_18 = arith.constant 0 : index
    %27 = vector.load %arg9[%c0_17, %c0_18] : memref<128x128xf32, #tpu.memory_space<vmem>>, vector<128x64xf32>
    %28 = vector.broadcast %17 : vector<128x1xf32> to vector<128x64xf32>
    %29 = arith.mulf %28, %27 : vector<128x64xf32>
    %30 = arith.truncf %20 : vector<128x128xf32> to vector<128x128xbf16>
    %31 = vector.extract_strided_slice %8 {offsets = [0, 0], sizes = [128, 64], strides = [1, 1]} : vector<128x128xbf16> to vector<128x64xbf16>
    %cst_19 = arith.constant dense<0.000000e+00> : vector<128x64xf32>
    %32 = tpu.matmul %30, %31, %cst_19 {dimension_numbers = #tpu.dot_dimension_numbers<[1], [0], [0], [1], [0, 0, 1, 1], [], []>} : vector<128x128xbf16>, vector<128x64xbf16>, vector<128x64xf32> -> vector<128x64xf32>
    %33 = arith.addf %29, %32 : vector<128x64xf32>
    %c0_20 = arith.constant 0 : index
    %c0_21 = arith.constant 0 : index
    %34 = vector.load %arg9[%c0_20, %c0_21] : memref<128x128xf32, #tpu.memory_space<vmem>>, vector<128x64xf32>
    tpu.vector_store %arg9[%c0_20, %c0_21], %33 {strides = array<i32>} : memref<128x128xf32, #tpu.memory_space<vmem>>, vector<128x64xf32>,
    %c0_22 = arith.constant 0 : index
    %c0_23 = arith.constant 0 : index
    %35 = vector.load %arg7[%c0_22, %c0_23] : memref<128x2xf32, #tpu.memory_space<vmem>>, vector<128x1xf32>
    tpu.vector_store %arg7[%c0_22, %c0_23], %15 {strides = array<i32>} : memref<128x2xf32, #tpu.memory_space<vmem>>, vector<128x1xf32>,
    %36 = vector.extract_strided_slice %4 {offsets = [0, 64], sizes = [128, 64], strides = [1, 1]} : vector<128x128xbf16> to vector<128x64xbf16>
    %37 = vector.extract_strided_slice %6 {offsets = [0, 64], sizes = [128, 64], strides = [1, 1]} : vector<128x128xbf16> to vector<128x64xbf16>
    %cst_24 = arith.constant dense<0.000000e+00> : vector<128x128xf32>
    %38 = tpu.matmul %36, %37, %cst_24 {dimension_numbers = #tpu.dot_dimension_numbers<[1], [1], [0], [0], [0, 0, 1, 0], [], []>} : vector<128x64xbf16>, vector<128x64xbf16>, vector<128x128xf32> -> vector<128x128xf32>
    %c0_25 = arith.constant 0 : index
    %c1 = arith.constant 1 : index
    %39 = vector.load %arg7[%c0_25, %c1] : memref<128x2xf32, #tpu.memory_space<vmem>>, vector<128x1xf32>
    %cst_26 = arith.constant dense<0xFF800000> : vector<128xf32>
    %40 = vector.multi_reduction <maximumf>, %38, %cst_26 [1] : vector<128x128xf32> to vector<128xf32>
    %41 = vector.shape_cast %40 : vector<128xf32> to vector<128x1xf32>
    %42 = arith.maximumf %39, %41 : vector<128x1xf32>
    %43 = arith.subf %39, %42 : vector<128x1xf32>
    %44 = math.exp %43 : vector<128x1xf32>
    %45 = vector.broadcast %42 : vector<128x1xf32> to vector<128x128xf32>
    %46 = arith.subf %38, %45 : vector<128x128xf32>
    %47 = math.exp %46 : vector<128x128xf32>
    %c0_27 = arith.constant 0 : index
    %c1_28 = arith.constant 1 : index
    %48 = vector.load %arg8[%c0_27, %c1_28] : memref<128x2xf32, #tpu.memory_space<vmem>>, vector<128x1xf32>
    %49 = arith.mulf %44, %48 : vector<128x1xf32>
    %cst_29 = arith.constant dense<0.000000e+00> : vector<128xf32>
    %50 = vector.multi_reduction <add>, %47, %cst_29 [1] : vector<128x128xf32> to vector<128xf32>
    %51 = vector.shape_cast %50 : vector<128xf32> to vector<128x1xf32>
    %52 = arith.addf %49, %51 : vector<128x1xf32>
    %c0_30 = arith.constant 0 : index
    %c1_31 = arith.constant 1 : index
    %53 = vector.load %arg8[%c0_30, %c1_31] : memref<128x2xf32, #tpu.memory_space<vmem>>, vector<128x1xf32>
    tpu.vector_store %arg8[%c0_30, %c1_31], %52 {strides = array<i32>} : memref<128x2xf32, #tpu.memory_space<vmem>>, vector<128x1xf32>,
    %c0_32 = arith.constant 0 : index
    %c64 = arith.constant 64 : index
    %54 = vector.load %arg9[%c0_32, %c64] : memref<128x128xf32, #tpu.memory_space<vmem>>, vector<128x64xf32>
    %55 = vector.broadcast %44 : vector<128x1xf32> to vector<128x64xf32>
    %56 = arith.mulf %55, %54 : vector<128x64xf32>
    %57 = arith.truncf %47 : vector<128x128xf32> to vector<128x128xbf16>
    %58 = vector.extract_strided_slice %8 {offsets = [0, 64], sizes = [128, 64], strides = [1, 1]} : vector<128x128xbf16> to vector<128x64xbf16>
    %cst_33 = arith.constant dense<0.000000e+00> : vector<128x64xf32>
    %59 = tpu.matmul %57, %58, %cst_33 {dimension_numbers = #tpu.dot_dimension_numbers<[1], [0], [0], [1], [0, 0, 1, 1], [], []>} : vector<128x128xbf16>, vector<128x64xbf16>, vector<128x64xf32> -> vector<128x64xf32>
    %60 = arith.addf %56, %59 : vector<128x64xf32>
    %c0_34 = arith.constant 0 : index
    %c64_35 = arith.constant 64 : index
    %61 = vector.load %arg9[%c0_34, %c64_35] : memref<128x128xf32, #tpu.memory_space<vmem>>, vector<128x64xf32>
    tpu.vector_store %arg9[%c0_34, %c64_35], %60 {strides = array<i32>} : memref<128x128xf32, #tpu.memory_space<vmem>>, vector<128x64xf32>,
    %c0_36 = arith.constant 0 : index
    %c1_37 = arith.constant 1 : index
    %62 = vector.load %arg7[%c0_36, %c1_37] : memref<128x2xf32, #tpu.memory_space<vmem>>, vector<128x1xf32>
    tpu.vector_store %arg7[%c0_36, %c1_37], %42 {strides = array<i32>} : memref<128x2xf32, #tpu.memory_space<vmem>>, vector<128x1xf32>,
    %c1_i32 = arith.constant 1 : i32
    %63 = arith.cmpi eq, %arg2, %c1_i32 : i32
    %64 = arith.extui %63 : i1 to i32
    %c0_i32_38 = arith.constant 0 : i32
    %65 = arith.cmpi ne, %64, %c0_i32_38 : i32
    scf.if %65 {
      %c0_39 = arith.constant 0 : index
      %c0_40 = arith.constant 0 : index
      %66 = vector.load %arg8[%c0_39, %c0_40] : memref<128x2xf32, #tpu.memory_space<vmem>>, vector<128x1xf32>
      %cst_41 = arith.constant 1.000000e-30 : f32
      %67 = vector.broadcast %cst_41 : f32 to vector<128x1xf32>
      %68 = arith.maximumf %66, %67 : vector<128x1xf32>
      %69 = tpu.reciprocal %68 {approx = true} : vector<128x1xf32> -> vector<128x1xf32>
      %c0_42 = arith.constant 0 : index
      %c0_43 = arith.constant 0 : index
      %70 = vector.load %arg9[%c0_42, %c0_43] : memref<128x128xf32, #tpu.memory_space<vmem>>, vector<128x64xf32>
      %71 = vector.broadcast %69 : vector<128x1xf32> to vector<128x64xf32>
      %72 = arith.mulf %70, %71 : vector<128x64xf32>
      %c0_44 = arith.constant 0 : index
      %c1_45 = arith.constant 1 : index
      %73 = vector.load %arg8[%c0_44, %c1_45] : memref<128x2xf32, #tpu.memory_space<vmem>>, vector<128x1xf32>
      %cst_46 = arith.constant 1.000000e-30 : f32
      %74 = vector.broadcast %cst_46 : f32 to vector<128x1xf32>
      %75 = arith.maximumf %73, %74 : vector<128x1xf32>
      %76 = tpu.reciprocal %75 {approx = true} : vector<128x1xf32> -> vector<128x1xf32>
      %c0_47 = arith.constant 0 : index
      %c64_48 = arith.constant 64 : index
      %77 = vector.load %arg9[%c0_47, %c64_48] : memref<128x128xf32, #tpu.memory_space<vmem>>, vector<128x64xf32>
      %78 = vector.broadcast %76 : vector<128x1xf32> to vector<128x64xf32>
      %79 = arith.mulf %77, %78 : vector<128x64xf32>
      %80 = tpu.concatenate %72, %79 in 1 : vector<128x64xf32>, vector<128x64xf32> -> vector<128x128xf32>
      %81 = arith.truncf %80 : vector<128x128xf32> to vector<128x128xbf16>
      %c0_49 = arith.constant 0 : index
      %c0_50 = arith.constant 0 : index
      %c0_51 = arith.constant 0 : index
      %82 = vector.load %arg6[%c0_49, %c0_50, %c0_51] : memref<1x128x128xbf16, #tpu.memory_space<vmem>>, vector<1x128x128xbf16>
      %83 = vector.shape_cast %82 : vector<1x128x128xbf16> to vector<128x128xbf16>
      %84 = vector.shape_cast %81 : vector<128x128xbf16> to vector<1x128x128xbf16>
      tpu.vector_store %arg6[%c0_49, %c0_50, %c0_51], %84 {strides = array<i32>} : memref<1x128x128xbf16, #tpu.memory_space<vmem>>, vector<1x128x128xbf16>,
    } else {
    }
    return
  }
  func.func @transform_0(%arg0: i32, %arg1: i32, %arg2: i32) -> (i32, i32, i32) {
    %c0_i32 = arith.constant 0 : i32
    %c0_i32_0 = arith.constant 0 : i32
    return %arg0, %arg1, %c0_i32 : i32, i32, i32
  }
  func.func @transform_1(%arg0: i32, %arg1: i32, %arg2: i32) -> (i32, i32, i32) {
    %c0_i32 = arith.constant 0 : i32
    %c0_i32_0 = arith.constant 0 : i32
    return %arg0, %arg2, %c0_i32 : i32, i32, i32
  }
  func.func @transform_2(%arg0: i32, %arg1: i32, %arg2: i32) -> (i32, i32, i32) {
    %c0_i32 = arith.constant 0 : i32
    %c0_i32_0 = arith.constant 0 : i32
    return %arg0, %arg2, %c0_i32 : i32, i32, i32
  }
  func.func @transform_3(%arg0: i32, %arg1: i32, %arg2: i32) -> (i32, i32, i32) {
    %c0_i32 = arith.constant 0 : i32
    %c0_i32_0 = arith.constant 0 : i32
    return %arg0, %arg1, %c0_i32 : i32, i32, i32
  }
}

module attributes {stable_mosaic.version = 11 : i64} {
  func.func @_qkv_rope_kernel(%arg0: i32, %arg1: memref<128x128xbf16, #tpu.memory_space<vmem>>, %arg2: memref<1x128xbf16, #tpu.memory_space<vmem>>, %arg3: memref<128x384xbf16, #tpu.memory_space<vmem>>, %arg4: memref<1x384xbf16, #tpu.memory_space<vmem>>, %arg5: memref<128x64xf32, #tpu.memory_space<vmem>>, %arg6: memref<128x64xf32, #tpu.memory_space<vmem>>, %arg7: memref<128x128xbf16, #tpu.memory_space<vmem>>, %arg8: memref<128x128xbf16, #tpu.memory_space<vmem>>, %arg9: memref<128x128xbf16, #tpu.memory_space<vmem>>) attributes {dimension_semantics = [#tpu.dimension_semantics<parallel>], iteration_bounds = array<i64: 4>, scalar_prefetch = 0 : i64, scratch_operands = 0 : i64, tpu.core_type = #tpu.core_type<tc>, window_params = [{transform_indices = @transform_0, window_bounds = array<i64: 128, 128>}, {pipeline_mode = #tpu.pipeline_mode<synchronous>, transform_indices = @transform_1, window_bounds = array<i64: 1, 128>}, {pipeline_mode = #tpu.pipeline_mode<synchronous>, transform_indices = @transform_2, window_bounds = array<i64: 128, 384>}, {pipeline_mode = #tpu.pipeline_mode<synchronous>, transform_indices = @transform_3, window_bounds = array<i64: 1, 384>}, {transform_indices = @transform_4, window_bounds = array<i64: 128, 64>}, {transform_indices = @transform_5, window_bounds = array<i64: 128, 64>}, {transform_indices = @transform_6, window_bounds = array<i64: 128, 128>}, {transform_indices = @transform_7, window_bounds = array<i64: 128, 128>}, {transform_indices = @transform_8, window_bounds = array<i64: 128, 128>}]} {
    %c0 = arith.constant 0 : index
    %c0_0 = arith.constant 0 : index
    %0 = vector.load %arg1[%c0, %c0_0] : memref<128x128xbf16, #tpu.memory_space<vmem>>, vector<128x128xbf16>
    %1 = arith.extf %0 : vector<128x128xbf16> to vector<128x128xf32>
    %2 = arith.mulf %1, %1 : vector<128x128xf32>
    %cst = arith.constant dense<0.000000e+00> : vector<128xf32>
    %3 = vector.multi_reduction <add>, %2, %cst [1] : vector<128x128xf32> to vector<128xf32>
    %4 = vector.shape_cast %3 : vector<128xf32> to vector<128x1xf32>
    %cst_1 = arith.constant 1.280000e+02 : f32
    %5 = vector.broadcast %cst_1 : f32 to vector<128x1xf32>
    %6 = arith.divf %4, %5 : vector<128x1xf32>
    %cst_2 = arith.constant 9.99999974E-6 : f32
    %7 = vector.broadcast %cst_2 : f32 to vector<128x1xf32>
    %8 = arith.addf %6, %7 : vector<128x1xf32>
    %9 = math.rsqrt %8 : vector<128x1xf32>
    %10 = vector.broadcast %9 : vector<128x1xf32> to vector<128x128xf32>
    %11 = arith.mulf %1, %10 : vector<128x128xf32>
    %c0_3 = arith.constant 0 : index
    %c0_4 = arith.constant 0 : index
    %12 = vector.load %arg2[%c0_3, %c0_4] : memref<1x128xbf16, #tpu.memory_space<vmem>>, vector<1x128xbf16>
    %13 = arith.extf %12 : vector<1x128xbf16> to vector<1x128xf32>
    %14 = vector.broadcast %13 : vector<1x128xf32> to vector<128x128xf32>
    %15 = arith.mulf %11, %14 : vector<128x128xf32>
    %16 = arith.truncf %15 : vector<128x128xf32> to vector<128x128xbf16>
    %c0_5 = arith.constant 0 : index
    %c0_6 = arith.constant 0 : index
    %17 = vector.load %arg3[%c0_5, %c0_6] : memref<128x384xbf16, #tpu.memory_space<vmem>>, vector<128x384xbf16>
    %cst_7 = arith.constant dense<0.000000e+00> : vector<128x384xf32>
    %18 = tpu.matmul %16, %17, %cst_7 {dimension_numbers = #tpu.dot_dimension_numbers<[1], [0], [0], [1], [0, 0, 1, 1], [], []>} : vector<128x128xbf16>, vector<128x384xbf16>, vector<128x384xf32> -> vector<128x384xf32>
    %c0_8 = arith.constant 0 : index
    %c0_9 = arith.constant 0 : index
    %19 = vector.load %arg4[%c0_8, %c0_9] : memref<1x384xbf16, #tpu.memory_space<vmem>>, vector<1x384xbf16>
    %20 = arith.extf %19 : vector<1x384xbf16> to vector<1x384xf32>
    %21 = vector.broadcast %20 : vector<1x384xf32> to vector<128x384xf32>
    %22 = arith.addf %18, %21 : vector<128x384xf32>
    %23 = vector.extract_strided_slice %22 {offsets = [0, 0], sizes = [128, 128], strides = [1, 1]} : vector<128x384xf32> to vector<128x128xf32>
    %24 = vector.extract_strided_slice %22 {offsets = [0, 128], sizes = [128, 128], strides = [1, 1]} : vector<128x384xf32> to vector<128x128xf32>
    %25 = vector.extract_strided_slice %22 {offsets = [0, 256], sizes = [128, 128], strides = [1, 1]} : vector<128x384xf32> to vector<128x128xf32>
    %c0_10 = arith.constant 0 : index
    %c0_11 = arith.constant 0 : index
    %26 = vector.load %arg5[%c0_10, %c0_11] : memref<128x64xf32, #tpu.memory_space<vmem>>, vector<128x64xf32>
    %27 = tpu.concatenate %26, %26 in 1 : vector<128x64xf32>, vector<128x64xf32> -> vector<128x128xf32>
    %c0_12 = arith.constant 0 : index
    %c0_13 = arith.constant 0 : index
    %28 = vector.load %arg6[%c0_12, %c0_13] : memref<128x64xf32, #tpu.memory_space<vmem>>, vector<128x64xf32>
    %29 = tpu.concatenate %28, %28 in 1 : vector<128x64xf32>, vector<128x64xf32> -> vector<128x128xf32>
    %30 = tpu.iota {dimensions = array<i32: 1>} : vector<1x128xi32>
    %c64_i32 = arith.constant 64 : i32
    %c0_i32 = arith.constant 0 : i32
    %31 = arith.cmpi eq, %c64_i32, %c0_i32 : i32
    %c1_i32 = arith.constant 1 : i32
    %32 = arith.select %31, %c1_i32, %c64_i32 : i32
    %33 = vector.broadcast %32 : i32 to vector<1x128xi32>
    %34 = arith.remsi %30, %33 : vector<1x128xi32>
    %c0_i32_14 = arith.constant 0 : i32
    %35 = vector.broadcast %c0_i32_14 : i32 to vector<1x128xi32>
    %36 = arith.cmpi ne, %34, %35 : vector<1x128xi32>
    %c0_i32_15 = arith.constant 0 : i32
    %37 = vector.broadcast %c0_i32_15 : i32 to vector<1x128xi32>
    %38 = arith.cmpi slt, %34, %37 : vector<1x128xi32>
    %c0_i32_16 = arith.constant 0 : i32
    %39 = arith.cmpi slt, %32, %c0_i32_16 : i32
    %40 = vector.broadcast %39 : i1 to vector<1x128xi1>
    %41 = vector.broadcast %40 : vector<1x128xi1> to vector<1x128xi1>
    %42 = arith.xori %38, %41 : vector<1x128xi1>
    %43 = arith.andi %42, %36 : vector<1x128xi1>
    %44 = vector.broadcast %32 : i32 to vector<1x128xi32>
    %45 = arith.addi %34, %44 : vector<1x128xi32>
    %46 = arith.select %43, %45, %34 : vector<1x128xi1>, vector<1x128xi32>
    %c32_i32 = arith.constant 32 : i32
    %47 = vector.broadcast %c32_i32 : i32 to vector<1x128xi32>
    %48 = arith.cmpi slt, %46, %47 : vector<1x128xi32>
    %c96_i32 = arith.constant 96 : i32
    %49 = tpu.dynamic_rotate %23 by %c96_i32 dim 1 : vector<128x128xf32>, i32 -> vector<128x128xf32>
    %c32_i32_17 = arith.constant 32 : i32
    %50 = tpu.dynamic_rotate %23 by %c32_i32_17 dim 1 : vector<128x128xf32>, i32 -> vector<128x128xf32>
    %51 = vector.shape_cast %48 : vector<1x128xi1> to vector<1x128xi1>
    %52 = vector.broadcast %51 : vector<1x128xi1> to vector<128x128xi1>
    %53 = arith.select %52, %49, %50 : vector<128x128xi1>, vector<128x128xf32>
    %54 = arith.mulf %23, %27 : vector<128x128xf32>
    %55 = arith.mulf %53, %29 : vector<128x128xf32>
    %56 = arith.addf %54, %55 : vector<128x128xf32>
    %cst_18 = arith.constant 1.250000e-01 : f32
    %57 = vector.broadcast %cst_18 : f32 to vector<128x128xf32>
    %58 = arith.mulf %56, %57 : vector<128x128xf32>
    %59 = arith.truncf %58 : vector<128x128xf32> to vector<128x128xbf16>
    %c0_19 = arith.constant 0 : index
    %c0_20 = arith.constant 0 : index
    %60 = vector.load %arg7[%c0_19, %c0_20] : memref<128x128xbf16, #tpu.memory_space<vmem>>, vector<128x128xbf16>
    tpu.vector_store %arg7[%c0_19, %c0_20], %59 {strides = array<i32>} : memref<128x128xbf16, #tpu.memory_space<vmem>>, vector<128x128xbf16>,
    %c96_i32_21 = arith.constant 96 : i32
    %61 = tpu.dynamic_rotate %24 by %c96_i32_21 dim 1 : vector<128x128xf32>, i32 -> vector<128x128xf32>
    %c32_i32_22 = arith.constant 32 : i32
    %62 = tpu.dynamic_rotate %24 by %c32_i32_22 dim 1 : vector<128x128xf32>, i32 -> vector<128x128xf32>
    %63 = vector.shape_cast %48 : vector<1x128xi1> to vector<1x128xi1>
    %64 = vector.broadcast %63 : vector<1x128xi1> to vector<128x128xi1>
    %65 = arith.select %64, %61, %62 : vector<128x128xi1>, vector<128x128xf32>
    %66 = arith.mulf %24, %27 : vector<128x128xf32>
    %67 = arith.mulf %65, %29 : vector<128x128xf32>
    %68 = arith.addf %66, %67 : vector<128x128xf32>
    %69 = arith.truncf %68 : vector<128x128xf32> to vector<128x128xbf16>
    %c0_23 = arith.constant 0 : index
    %c0_24 = arith.constant 0 : index
    %70 = vector.load %arg8[%c0_23, %c0_24] : memref<128x128xbf16, #tpu.memory_space<vmem>>, vector<128x128xbf16>
    tpu.vector_store %arg8[%c0_23, %c0_24], %69 {strides = array<i32>} : memref<128x128xbf16, #tpu.memory_space<vmem>>, vector<128x128xbf16>,
    %71 = arith.truncf %25 : vector<128x128xf32> to vector<128x128xbf16>
    %c0_25 = arith.constant 0 : index
    %c0_26 = arith.constant 0 : index
    %72 = vector.load %arg9[%c0_25, %c0_26] : memref<128x128xbf16, #tpu.memory_space<vmem>>, vector<128x128xbf16>
    tpu.vector_store %arg9[%c0_25, %c0_26], %71 {strides = array<i32>} : memref<128x128xbf16, #tpu.memory_space<vmem>>, vector<128x128xbf16>,
    return
  }
  func.func @transform_0(%arg0: i32) -> (i32, i32) {
    %c0_i32 = arith.constant 0 : i32
    %c0_i32_0 = arith.constant 0 : i32
    return %arg0, %c0_i32 : i32, i32
  }
  func.func @transform_1(%arg0: i32) -> (i32, i32) {
    %c0_i32 = arith.constant 0 : i32
    %c0_i32_0 = arith.constant 0 : i32
    %c0_i32_1 = arith.constant 0 : i32
    return %c0_i32, %c0_i32_0 : i32, i32
  }
  func.func @transform_2(%arg0: i32) -> (i32, i32) {
    %c0_i32 = arith.constant 0 : i32
    %c0_i32_0 = arith.constant 0 : i32
    %c0_i32_1 = arith.constant 0 : i32
    return %c0_i32, %c0_i32_0 : i32, i32
  }
  func.func @transform_3(%arg0: i32) -> (i32, i32) {
    %c0_i32 = arith.constant 0 : i32
    %c0_i32_0 = arith.constant 0 : i32
    %c0_i32_1 = arith.constant 0 : i32
    return %c0_i32, %c0_i32_0 : i32, i32
  }
  func.func @transform_4(%arg0: i32) -> (i32, i32) {
    %c2_i32 = arith.constant 2 : i32
    %c0_i32 = arith.constant 0 : i32
    %0 = arith.cmpi eq, %c2_i32, %c0_i32 : i32
    %c1_i32 = arith.constant 1 : i32
    %1 = arith.select %0, %c1_i32, %c2_i32 : i32
    %2 = arith.remsi %arg0, %1 : i32
    %c0_i32_0 = arith.constant 0 : i32
    %3 = arith.cmpi ne, %2, %c0_i32_0 : i32
    %c0_i32_1 = arith.constant 0 : i32
    %4 = arith.cmpi slt, %2, %c0_i32_1 : i32
    %c0_i32_2 = arith.constant 0 : i32
    %5 = arith.cmpi slt, %1, %c0_i32_2 : i32
    %6 = arith.xori %4, %5 : i1
    %7 = arith.andi %6, %3 : i1
    %8 = arith.addi %2, %1 : i32
    %9 = arith.select %7, %8, %2 : i32
    %c0_i32_3 = arith.constant 0 : i32
    %c0_i32_4 = arith.constant 0 : i32
    return %9, %c0_i32_3 : i32, i32
  }
  func.func @transform_5(%arg0: i32) -> (i32, i32) {
    %c2_i32 = arith.constant 2 : i32
    %c0_i32 = arith.constant 0 : i32
    %0 = arith.cmpi eq, %c2_i32, %c0_i32 : i32
    %c1_i32 = arith.constant 1 : i32
    %1 = arith.select %0, %c1_i32, %c2_i32 : i32
    %2 = arith.remsi %arg0, %1 : i32
    %c0_i32_0 = arith.constant 0 : i32
    %3 = arith.cmpi ne, %2, %c0_i32_0 : i32
    %c0_i32_1 = arith.constant 0 : i32
    %4 = arith.cmpi slt, %2, %c0_i32_1 : i32
    %c0_i32_2 = arith.constant 0 : i32
    %5 = arith.cmpi slt, %1, %c0_i32_2 : i32
    %6 = arith.xori %4, %5 : i1
    %7 = arith.andi %6, %3 : i1
    %8 = arith.addi %2, %1 : i32
    %9 = arith.select %7, %8, %2 : i32
    %c0_i32_3 = arith.constant 0 : i32
    %c0_i32_4 = arith.constant 0 : i32
    return %9, %c0_i32_3 : i32, i32
  }
  func.func @transform_6(%arg0: i32) -> (i32, i32) {
    %c0_i32 = arith.constant 0 : i32
    %c0_i32_0 = arith.constant 0 : i32
    return %arg0, %c0_i32 : i32, i32
  }
  func.func @transform_7(%arg0: i32) -> (i32, i32) {
    %c0_i32 = arith.constant 0 : i32
    %c0_i32_0 = arith.constant 0 : i32
    return %arg0, %c0_i32 : i32, i32
  }
  func.func @transform_8(%arg0: i32) -> (i32, i32) {
    %c0_i32 = arith.constant 0 : i32
    %c0_i32_0 = arith.constant 0 : i32
    return %arg0, %c0_i32 : i32, i32
  }
}

</mosaic_0001>

<bundles_post_ra>
// kernel: pixtral_transformer_forward.8
= control target key start
LH: loop header
LB: loop body
LE: loop exit
PB: predicated region body
PF: predicated region fallthrough
CT: control target
= control target key end

     0   :  { %s3675_s0 = inlined_call_operand.vmem [shape: bf16[512,128], index: 0, kind: input, shape index: {}]   ;;  %s3676_s1 = inlined_call_operand.vmem [shape: bf16[512,128], index: 1, kind: input, shape index: {}]   ;;  %s3677_s2 = inlined_call_operand.vmem [shape: bf16[128,128], index: 2, kind: input, shape index: {}]   ;;  %s3678_s3 = inlined_call_operand.vmem [shape: bf16[1,128], index: 3, kind: input, shape index: {}]   ;;  %s3679_s4 = inlined_call_operand.vmem [shape: bf16[1,128], index: 4, kind: input, shape index: {}]   ;;  %s3680_s5 = inlined_call_operand.vmem [shape: bf16[128,512], index: 5, kind: input, shape index: {}]   ;;  %s3681_s6 = inlined_call_operand.vmem [shape: bf16[256,128], index: 6, kind: input, shape index: {}]   ;;  %s3682_s7 = inlined_call_operand.vmem [shape: bf16[512,128], index: 7, kind: output, shape index: {}]  }
   0x1   :  { %3683 = sst [smem:[#allocation6_spill]] %s3680_s5 }
   0x2   :  { %s2719_s24 = smov 0   ;;  %s2721_s25 = smov 0  }
   0x3   :  { %s2723_s26 = smov 0   ;;  %s2725_s27 = smov 0  }
   0x4   :  { %s2727_s28 = smov 0   ;;  %s2729_s29 = smov 0  }
   0x5   :  { %s2731_s30 = smov 0  }
   0x6 LB: > { %s26_s8 = sadd.s32 1, %s2667_s28  ;;  %s29_s9 = sadd.s32 1, %s2671_s29  ;;  %s2675_s30 = sphi %s2731_s30, %s17_s30   ;;  %s2671_s29 = sphi %s2729_s29, %s3736_s29   ;;  %s2667_s28 = sphi %s2727_s28, %s3735_s28   ;;  %s2663_s27 = sphi %s2725_s27, %s3734_s27   ;;  %s2659_s26 = sphi %s2723_s26, %s3733_s26   ;;  %s2655_s25 = sphi %s2721_s25, %s3732_s25   ;;  %s2651_s24 = sphi %s2719_s24, %s3731_s24  }
   0x7   : > { %p27_p0 = scmp.ge.s32.totalorder %s26_s8, 2  ;;  %s151_s10 = sadd.s32 1, %s2655_s25 }
   0x8   : > { %p158_p1 = scmp.ne.s32.totalorder %s2655_s25, %s2651_s24  ;;  %p159_p2 = scmp.eq.s32.totalorder %s2675_s30, 0 }
   0x9   : > { %s3738_s8 = smov (%p27_p0, %s26_s8), 0  ;;  %s3740_s9 = smov (!%p27_p0, %s29_s9), %s2671_s29 }
   0xa   : > { %s148_s11 = ssub.s32 %s2667_s28, %s3738_s8  ;;  %p160_p3 = por %p159_p2, %p158_p1 }
   0xb   : > { %p31_p4 = scmp.ge.s32.totalorder %s3740_s9, 4  ;;  %p149_p5 = scmp.eq.s32.totalorder %s148_s11, 0 }
   0xc   : > { %p2009_p6 = scmp.ge.s32.totalorder %s2675_s30, 8 }
   0xd   : > { %s3742_s9 = smov (%p31_p4, %s3740_s9), 0 }
   0xe   : > { %s2768_s12 = scalar_select %p149_p5, %s2655_s25, %s151_s10  }
   0xf   : > { %245 = sbr.rel (%p2009_p6) target bundleno = 46 (0x2e), region = 28 }
  0x14   : > { %266 = sbr.rel (!%p160_p3) target bundleno = 46 (0x2e), region = 40  ;;  %s268_s13 = sand.u32 (%p160_p3), 1, %s2655_s25  }
  0x15   : > { %s2235_s14 = sshll.u32 (%p160_p3), %s2667_s28, 3  ;;  %s2010_s15 = sshll.u32 (%p160_p3), %s268_s13, 7 }
  0x16   : > { %s3684_s5 = sld [smem:[#allocation6_spill]] (%p160_p3)  ;;  %s270_s19 = scalar_lea.vmem (%p160_p3), [#allocation5], %s2010_s15 }
  0x1c   : > { %s2776_s18 = scalar_lea.vmem %s3684_s5, %s2235_s14 }
  0x1d   : > { %v332_v0 = vld [vmem:[%s2776_s18] sm:$0xff]  ;;  %v334_v1 = vld [vmem:[%s2776_s18 + $0x10] sm:$0xff] }
  0x1e   : > { %v336_v2 = vld [vmem:[%s2776_s18 + $0x20] sm:$0xff]  ;;  %333 = vst [vmem:[%s270_s19] sm:$0xff] %v332_v0  ;;  %v338_v3 = vld [vmem:[%s2776_s18 + $0x30] sm:$0xff] }
  0x1f   : > { %335 = vst [vmem:[%s270_s19 + $0x8] sm:$0xff] %v334_v1  ;;  %v340_v4 = vld [vmem:[%s2776_s18 + $0x40] sm:$0xff]  ;;  %v342_v5 = vld [vmem:[%s2776_s18 + $0x50] sm:$0xff] }
  0x20   : > { %337 = vst [vmem:[%s270_s19 + $0x10] sm:$0xff] %v336_v2  ;;  %v344_v6 = vld [vmem:[%s2776_s18 + $0x60] sm:$0xff]  ;;  %v346_v7 = vld [vmem:[%s2776_s18 + $0x70] sm:$0xff] }
  0x21   : > { %339 = vst [vmem:[%s270_s19 + $0x18] sm:$0xff] %v338_v3  ;;  %v348_v8 = vld [vmem:[%s2776_s18 + $0x80] sm:$0xff]  ;;  %v350_v9 = vld [vmem:[%s2776_s18 + $0x90] sm:$0xff] }
  0x22   : > { %341 = vst [vmem:[%s270_s19 + $0x20] sm:$0xff] %v340_v4  ;;  %v352_v10 = vld [vmem:[%s2776_s18 + $0xa0] sm:$0xff]  ;;  %v354_v11 = vld [vmem:[%s2776_s18 + $0xb0] sm:$0xff] }
  0x23   : > { %343 = vst [vmem:[%s270_s19 + $0x28] sm:$0xff] %v342_v5  ;;  %v356_v12 = vld [vmem:[%s2776_s18 + $0xc0] sm:$0xff]  ;;  %v358_v13 = vld [vmem:[%s2776_s18 + $0xd0] sm:$0xff] }
  0x24   : > { %345 = vst [vmem:[%s270_s19 + $0x30] sm:$0xff] %v344_v6  ;;  %v360_v14 = vld [vmem:[%s2776_s18 + $0xe0] sm:$0xff]  ;;  %v362_v15 = vld [vmem:[%s2776_s18 + $0xf0] sm:$0xff] }
  0x25   : > { %347 = vst [vmem:[%s270_s19 + $0x38] sm:$0xff] %v346_v7 }
  0x26   : > { %349 = vst [vmem:[%s270_s19 + $0x40] sm:$0xff] %v348_v8 }
  0x27   : > { %351 = vst [vmem:[%s270_s19 + $0x48] sm:$0xff] %v350_v9 }
  0x28   : > { %353 = vst [vmem:[%s270_s19 + $0x50] sm:$0xff] %v352_v10 }
  0x29   : > { %355 = vst [vmem:[%s270_s19 + $0x58] sm:$0xff] %v354_v11 }
  0x2a   : > { %357 = vst [vmem:[%s270_s19 + $0x60] sm:$0xff] %v356_v12 }
  0x2b   : > { %359 = vst [vmem:[%s270_s19 + $0x68] sm:$0xff] %v358_v13 }
  0x2c   : > { %361 = vst [vmem:[%s270_s19 + $0x70] sm:$0xff] %v360_v14 }
  0x2d   : > { %363 = vst [vmem:[%s270_s19 + $0x78] sm:$0xff] %v362_v15 }
  0x2e PF: > { %p2013_p7 = scmp.ge.s32.totalorder %s2675_s30, 1  ;;  %p377_p8 = scmp.lt.s32.totalorder %s2675_s30, 9 }
  0x30   : > { %p378_p9 = pnand %p2013_p7, %p377_p8 }
  0x31   : > { %s384_s20 = sand.u32 (!%p378_p9), 1, %s2651_s24   ;;  %s2015_s21 = sshll.u32 (!%p378_p9), %s2663_s27, 4 }
  0x32   : > { %381 = sbr.rel (%p378_p9) target bundleno = 866 (0x362), region = 82  ;;  %s2014_s22 = sshll.u32 (!%p378_p9), %s384_s20, 7 }
  0x33   : > { %p431_p10 = scmp.lt.s32.totalorder (!%p378_p9), %s2015_s21, 63  ;;  %s2019_s23 = sshll.u32 (!%p378_p9), %s2659_s26, 4 }
  0x34   : > { %p444_p11 = scmp.lt.s32.totalorder (!%p378_p9), %s2019_s23, 31  ;;  %s2819_s11 = scalar_lea.vmem (!%p378_p9), [#allocation5], %s2014_s22 }
  0x35   : > { %p2023_p12 = scmp.ne.s32.totalorder (!%p378_p9), %s2659_s26, 0 }
  0x37   : > { %s3744_s21 = smov (!%p431_p10, %s2015_s21), 63  ;;  %s3746_s23 = smov (!%p444_p11, %s2019_s23), 31 }
  0x38   : > { %s2016_s10 = sshll.u32 %s3744_s21, 2  ;;  %s2020_s19 = sshll.u32 %s3746_s23, 2 }
  0x39   : > { %s2802_s14 = scalar_lea.vmem %s3675_s0, %s2016_s10  ;;  %s2807_s17 = scalar_lea.vmem %s3676_s1, %s2016_s10 }
  0x3a   : > { %s2812_s27 = scalar_lea.vmem %s3682_s7, %s2016_s10  ;;  %s2817_s21 = scalar_lea.vmem %s3681_s6, %s2020_s19 }
  0x3b   : > { %458 = sbr.rel (%p2023_p12) target bundleno = 422 (0x1a6), region = 90 }
  0x40   : > { %v2251_v16 = vld [vmem:[%s3677_s2 + $0x38] sm:$0xff]  ;;  %v2250_v17 = vld [vmem:[%s3677_s2 + $0x30] sm:$0xff]  ;;  %v2249_v18 = vld [vmem:[%s3677_s2 + $0x28] sm:$0xff] }
  0x41   : > { %587 = vmatpush.bf16.msra.mxu0 %v2251_v16  ;;  %2417 = vmatpush.bf16.msra.mxu1 %v2251_v16  ;;  %v2248_v19 = vld [vmem:[%s3677_s2 + $0x20] sm:$0xff]  ;;  %v2247_v20 = vld [vmem:[%s3677_s2 + $0x18] sm:$0xff]  ;;  %v2246_v21 = vld [vmem:[%s3677_s2 + $0x10] sm:$0xff] }
  0x42   : > { %2418 = vmatpush.bf16.msra.mxu2 %v2251_v16  ;;  %2419 = vmatpush.bf16.msra.mxu3 %v2251_v16  ;;  %v2245_v22 = vld [vmem:[%s3677_s2 + $0x8] sm:$0xff]  ;;  %v2244_v23 = vld [vmem:[%s3677_s2] sm:$0xff]  ;;  %v2238_v25 = vld [vmem:[%s2807_s17 + $0x10] sm:$0xff] }
  0x43   : > { %v2236_v24 = vld [vmem:[%s2807_s17] sm:$0xff]  ;;  %v2242_v27 = vld [vmem:[%s2807_s17 + $0x30] sm:$0xff]  ;;  %v2237_v28 = vld [vmem:[%s2807_s17 + $0x8] sm:$0xff] }
  0x44   : > { %v2240_v26 = vld [vmem:[%s2807_s17 + $0x20] sm:$0xff]  ;;  %v2239_v29 = vld [vmem:[%s2807_s17 + $0x18] sm:$0xff]  ;;  %v2241_v30 = vld [vmem:[%s2807_s17 + $0x28] sm:$0xff] }
  0x45   : > { %588 = vmatpush.bf16.msra.mxu0 %v2250_v17  ;;  %2420 = vmatpush.bf16.msra.mxu1 %v2250_v17  ;;  %v2243_v31 = vld [vmem:[%s2807_s17 + $0x38] sm:$0xff]  ;;  %v684_v32 = vld [vmem:[%s3678_s3] sm:$0x1]  ;;  %v2397_v34 = vld [vmem:[%s2802_s14 + $0x10] sm:$0xff]  }
  0x46   : > { %2421 = vmatpush.bf16.msra.mxu2 %v2250_v17  ;;  %2422 = vmatpush.bf16.msra.mxu3 %v2250_v17  ;;  %v2285_v33 = vld [vmem:[%s2802_s14] sm:$0xff]   ;;  %v685_v35 = vunpack.c.l.bf16 %v684_v32  ;;  %v2294_v37 = vunpack.c.l.bf16 %v2397_v34  ;;  %v2401_v44 = vld [vmem:[%s2802_s14 + $0x30] sm:$0xff]   ;;  %v2295_v52 = vunpack.c.h.bf16 %v2397_v34  ;;  %v2396_v63 = vld [vmem:[%s2802_s14 + $0x8] sm:$0xff]  }
  0x47   : > { %v2286_v36 = vunpack.c.l.bf16 %v2285_v33  ;;  %v2399_v43 = vld [vmem:[%s2802_s14 + $0x20] sm:$0xff]   ;;  %v2310_v48 = vunpack.c.l.bf16 %v2401_v44  ;;  %v2287_v51 = vunpack.c.h.bf16 %v2285_v33  ;;  %v2398_v0 = vld [vmem:[%s2802_s14 + $0x18] sm:$0xff]   ;;  %v2311_v6 = vunpack.c.h.bf16 %v2401_v44  ;;  %v2400_v16 = vld [vmem:[%s2802_s14 + $0x28] sm:$0xff]  }
  0x48   : > { %v2859_v38 = vperm.slane %v685_v35, 0  ;;  %v2302_v47 = vunpack.c.l.bf16 %v2399_v43  ;;  %v2303_v3 = vunpack.c.h.bf16 %v2399_v43  ;;  %v2290_v7 = vunpack.c.l.bf16 %v2396_v63 }
  0x49   : > { %589 = vmatpush.bf16.msra.mxu0 %v2249_v18  ;;  %2423 = vmatpush.bf16.msra.mxu1 %v2249_v18  ;;  %v2298_v8 = vunpack.c.l.bf16 %v2398_v0 }
  0x4a   : > { %2424 = vmatpush.bf16.msra.mxu2 %v2249_v18  ;;  %2425 = vmatpush.bf16.msra.mxu3 %v2249_v18 }
  0x4d   : > { %590 = vmatpush.bf16.msra.mxu0 %v2248_v19  ;;  %2426 = vmatpush.bf16.msra.mxu1 %v2248_v19 }
  0x4e   : > { %2427 = vmatpush.bf16.msra.mxu2 %v2248_v19  ;;  %2428 = vmatpush.bf16.msra.mxu3 %v2248_v19 }
  0x51   : > { %591 = vmatpush.bf16.msra.mxu0 %v2247_v20  ;;  %2429 = vmatpush.bf16.msra.mxu1 %v2247_v20 }
  0x52   : > { %2430 = vmatpush.bf16.msra.mxu2 %v2247_v20  ;;  %2431 = vmatpush.bf16.msra.mxu3 %v2247_v20  ;;  %v2402_v20 = vld [vmem:[%s2802_s14 + $0x38] sm:$0xff]  }
  0x53   : > { %v2315_v44 = vunpack.c.h.bf16 %v2402_v20 }
  0x55   : > { %592 = vmatpush.bf16.msra.mxu0 %v2246_v21  ;;  %2432 = vmatpush.bf16.msra.mxu1 %v2246_v21 }
  0x56   : > { %2433 = vmatpush.bf16.msra.mxu2 %v2246_v21  ;;  %2434 = vmatpush.bf16.msra.mxu3 %v2246_v21 }
  0x59   : > { %593 = vmatpush.bf16.msra.mxu0 %v2245_v22  ;;  %2435 = vmatpush.bf16.msra.mxu1 %v2245_v22 }
  0x5a   : > { %2436 = vmatpush.bf16.msra.mxu2 %v2245_v22  ;;  %2437 = vmatpush.bf16.msra.mxu3 %v2245_v22 }
  0x5d   : > { %594 = vmatpush.bf16.msra.mxu0 %v2244_v23  ;;  %2438 = vmatpush.bf16.msra.mxu1 %v2244_v23 }
  0x5e   : > { %2439 = vmatpush.bf16.msra.mxu2 %v2244_v23  ;;  %2440 = vmatpush.bf16.msra.mxu3 %v2244_v23 }
  0x60   : > { %595 = vmatmul.bf16.vlgmr.msra.gmra.mxu0 %v2236_v24  ;;  %605 = vmatmul.bf16.vlgmr.msra.gmra.mxu1 %v2238_v25  ;;  %v2306_v24 = vunpack.c.l.bf16 %v2400_v16  ;;  %v2291_v25 = vunpack.c.h.bf16 %v2396_v63  ;;  %v2677_v63 = vmov 128.0  }
  0x61   : > { %615 = vmatmul.bf16.vlgmr.msra.gmra.mxu2 %v2240_v26  ;;  %625 = vmatmul.bf16.vlgmr.msra.gmra.mxu3 %v2242_v27  ;;  %2523 = vrcp.f32 %v2677_v63 }
  0x70   : > { %600 = vmatmul.bf16.gmra.mxu0 %v2237_v28  ;;  %610 = vmatmul.bf16.gmra.mxu1 %v2239_v29  ;;  %v2299_v28 = vunpack.c.h.bf16 %v2398_v0  ;;  %v2314_v29 = vunpack.c.l.bf16 %v2402_v20  ;;  %v2524_v0 = vpop.eup %2523 }
  0x71   : > { %620 = vmatmul.bf16.gmra.mxu2 %v2241_v30  ;;  %630 = vmatmul.bf16.gmra.mxu3 %v2243_v31  ;;  %vm772_vm0 = vweird.f32 %v2524_v0 }
  0xdd   : > { %v596_v39 = vpop.f32.mrf.mxu0  ;;  %v606_v40 = vpop.f32.mrf.mxu1 }
  0xde   : > { %v668_v41 = vadd.f32 %v2286_v36, %v596_v39  ;;  %v672_v42 = vadd.f32 %v2294_v37, %v606_v40 }
  0xe0   : > { %v2864_v45 = vadd.f32 %v2859_v38, %v668_v41  ;;  %v2867_v46 = vadd.f32 %v2859_v38, %v672_v42  ;;  %v2307_v42 = vunpack.c.h.bf16 %v2400_v16 }
  0xe2   : > { %703 = vst [vmem:[#allocation2 + $0x30] sm:$0xff] %v2864_v45  ;;  %v723_v49 = vmul.f32 %v2867_v46, %v2867_v46  ;;  %v719_v50 = vmul.f32 %v2864_v45, %v2864_v45 }
  0xe3   : > { %707 = vst [vmem:[#allocation2 + $0x50] sm:$0xff] %v2867_v46 }
  0xe4   : > { %v616_v53 = vpop.f32.mrf.mxu2  ;;  %743 = vadd.xlane.f32.xlu2 %v723_v49  ;;  %735 = vadd.xlane.f32.xlu0 %v719_v50  ;;  %v626_v54 = vpop.f32.mrf.mxu3 }
  0xe5   : > { %v676_v55 = vadd.f32 %v2302_v47, %v616_v53  ;;  %v598_v56 = vpop.f32.mrf.mxu0  ;;  %v680_v57 = vadd.f32 %v2310_v48, %v626_v54  ;;  %v608_v58 = vpop.f32.mrf.mxu1 }
  0xe6   : > { %v669_v59 = vadd.f32 %v2287_v51, %v598_v56  ;;  %v673_v60 = vadd.f32 %v2295_v52, %v608_v58 }
  0xe7   : > { %v2876_v61 = vadd.f32 %v2859_v38, %v676_v55  ;;  %v2879_v62 = vadd.f32 %v2859_v38, %v680_v57 }
  0xe8   : > { %v2884_v1 = vadd.f32 %v2859_v38, %v669_v59  ;;  %v2887_v2 = vadd.f32 %v2859_v38, %v673_v60 }
  0xe9   : > { %711 = vst [vmem:[#allocation2 + $0x40] sm:$0xff] %v2876_v61  ;;  %v727_v4 = vmul.f32 %v2876_v61, %v2876_v61  ;;  %v731_v5 = vmul.f32 %v2879_v62, %v2879_v62 }
  0xea   : > { %704 = vst [vmem:[#allocation2] sm:$0xff] %v2884_v1  ;;  %v724_v22 = vmul.f32 %v2887_v2, %v2887_v2  ;;  %v720_v26 = vmul.f32 %v2884_v1, %v2884_v1 }
  0xeb   : > { %715 = vst [vmem:[#allocation2 + $0x60] sm:$0xff] %v2879_v62 }
  0xec   : > { %v618_v9 = vpop.f32.mrf.mxu2  ;;  %751 = vadd.xlane.f32.xlu2 %v727_v4  ;;  %759 = vadd.xlane.f32.xlu0 %v731_v5  ;;  %708 = vst [vmem:[#allocation2 + $0x68] sm:$0xff] %v2887_v2  ;;  %v628_v10 = vpop.f32.mrf.mxu3 }
  0xed   : > { %v677_v11 = vadd.f32 %v2303_v3, %v618_v9  ;;  %v601_v12 = vpop.f32.mrf.mxu0  ;;  %v681_v13 = vadd.f32 %v2311_v6, %v628_v10  ;;  %v611_v14 = vpop.f32.mrf.mxu1  ;;  %v768_v3 = vmul.f32 128.0, %v2524_v0 }
  0xee   : > { %v670_v15 = vadd.f32 %v2290_v7, %v601_v12  ;;  %v674_v17 = vadd.f32 %v2298_v8, %v611_v14 }
  0xef   : > { %v2899_v18 = vadd.f32 %v2859_v38, %v677_v11  ;;  %v2902_v19 = vadd.f32 %v2859_v38, %v681_v13  ;;  %v769_v4 = vsub.f32 1.0, %v768_v3 }
  0xf0   : > { %v2906_v21 = vadd.f32 %v2859_v38, %v670_v15  ;;  %v2911_v23 = vadd.f32 %v2859_v38, %v674_v17 }
  0xf1   : > { %712 = vst [vmem:[#allocation2 + $0x20] sm:$0xff] %v2899_v18  ;;  %v728_v47 = vmul.f32 %v2899_v18, %v2899_v18  ;;  %v732_v60 = vmul.f32 %v2902_v19, %v2902_v19  ;;  %v770_v5 = vmul.f32 %v2524_v0, %v769_v4 }
  0xf2   : > { %705 = vst [vmem:[#allocation2 + $0x58] sm:$0xff] %v2906_v21  ;;  %v721_v27 = vmul.f32 %v2906_v21, %v2906_v21  ;;  %v725_v55 = vmul.f32 %v2911_v23, %v2911_v23 }
  0xf3   : > { %716 = vst [vmem:[#allocation2 + $0x70] sm:$0xff] %v2902_v19  ;;  %v771_v6 = vadd.f32 %v2524_v0, %v770_v5 }
  0xf4   : > { %v621_v30 = vpop.f32.mrf.mxu2  ;;  %745 = vadd.xlane.f32.xlu2 %v724_v22  ;;  %737 = vadd.xlane.f32.xlu0 %v720_v26  ;;  %709 = vst [vmem:[#allocation2 + $0x8] sm:$0xff] %v2911_v23  ;;  %v631_v31 = vpop.f32.mrf.mxu3 }
  0xf5   : > { %v678_v32 = vadd.f32 %v2306_v24, %v621_v30  ;;  %739 = vadd.xlane.f32.xlu1 %v721_v27  ;;  %v603_v33 = vpop.f32.mrf.mxu0  ;;  %v613_v34 = vpop.f32.mrf.mxu1  ;;  %v682_v37 = vadd.f32 %v2314_v29, %v631_v31  ;;  %v2963_v7 = vsel %vm772_vm0, %v2524_v0, %v771_v6 }
  0xf6   : > { %v671_v35 = vadd.f32 %v2291_v25, %v603_v33  ;;  %v675_v36 = vadd.f32 %v2299_v28, %v613_v34 }
  0xf7   : > { %v2922_v39 = vadd.f32 %v2859_v38, %v678_v32  ;;  %v2937_v48 = vadd.f32 %v2859_v38, %v682_v37 }
  0xf8   : > { %v2925_v40 = vadd.f32 %v2859_v38, %v671_v35  ;;  %v2928_v41 = vadd.f32 %v2859_v38, %v675_v36 }
  0xf9   : > { %713 = vst [vmem:[#allocation2 + $0x10] sm:$0xff] %v2922_v39  ;;  %v729_v43 = vmul.f32 %v2922_v39, %v2922_v39 }
  0xfa   : > { %706 = vst [vmem:[#allocation2 + $0x18] sm:$0xff] %v2925_v40  ;;  %v722_v57 = vmul.f32 %v2925_v40, %v2925_v40  ;;  %v726_v59 = vmul.f32 %v2928_v41, %v2928_v41 }
  0xfb   : > { %710 = vst [vmem:[#allocation2 + $0x48] sm:$0xff] %v2928_v41 }
  0xfc   : > { %v623_v49 = vpop.f32.mrf.mxu2  ;;  %753 = vadd.xlane.f32.xlu0 %v728_v47  ;;  %717 = vst [vmem:[#allocation2 + $0x78] sm:$0xff] %v2937_v48  ;;  %v633_v50 = vpop.f32.mrf.mxu3 }
  0xfd   : > { %v679_v51 = vadd.f32 %v2307_v42, %v623_v49  ;;  %755 = vadd.xlane.f32.xlu1 %v729_v43  ;;  %v683_v52 = vadd.f32 %v2315_v44, %v633_v50 }
  0xff   : > { %v2942_v53 = vadd.f32 %v2859_v38, %v679_v51  ;;  %v2945_v54 = vadd.f32 %v2859_v38, %v683_v52  ;;  %v733_v38 = vmul.f32 %v2937_v48, %v2937_v48  ;;  %v982_v51 = vld [vmem:[%s3679_s4] sm:$0x1] }
 0x101   : > { %714 = vst [vmem:[#allocation2 + $0x38] sm:$0xff] %v2942_v53  ;;  %v730_v56 = vmul.f32 %v2942_v53, %v2942_v53  ;;  %v734_v58 = vmul.f32 %v2945_v54, %v2945_v54 }
 0x102   : > { %718 = vst [vmem:[#allocation2 + $0x28] sm:$0xff] %v2945_v54 }
 0x103   : > { %757 = vadd.xlane.f32.xlu2 %v730_v56 }
 0x104   : > { %747 = vadd.xlane.f32.xlu0 %v725_v55 }
 0x105   : > { %741 = vadd.xlane.f32.xlu1 %v722_v57 }
 0x10b   : > { %763 = vadd.xlane.f32.xlu2 %v733_v38 }
 0x10c   : > { %765 = vadd.xlane.f32.xlu0 %v734_v58 }
 0x10d   : > { %749 = vadd.xlane.f32.xlu1 %v726_v59 }
 0x115   : > { %761 = vadd.xlane.f32.xlu1 %v732_v60  ;;  %v983_v60 = vunpack.c.l.bf16 %v982_v51 }
 0x157   : > { %v744_v8 = vpop.xlane.xlu2 %743  ;;  %v736_v9 = vpop.xlane.xlu0 %735 }
 0x158   : > { %v778_v10 = vmul.f32 %v2963_v7, %v744_v8  ;;  %v774_v11 = vmul.f32 %v2963_v7, %v736_v9 }
 0x15a   : > { %v794_v12 = vadd.f32 1e-05, %v778_v10  ;;  %v2967_v13 = vadd.f32 1e-05, %v774_v11 }
 0x15c   : > { %2525 = vrsqrt.f32 %v794_v12  ;;  %vm852_vm1 = vweird.f32 %v794_v12  ;;  %vm812_vm5 = vweird.f32 %v2967_v13 }
 0x15d   : > { %2527 = vrsqrt.f32 %v2967_v13 }
 0x15f   : > { %v752_v14 = vpop.xlane.xlu2 %751  ;;  %v760_v15 = vpop.xlane.xlu0 %759 }
 0x160   : > { %v782_v16 = vmul.f32 %v2963_v7, %v752_v14  ;;  %v786_v25 = vmul.f32 %v2963_v7, %v760_v15 }
 0x162   : > { %v2971_v17 = vpop.eup %2525  ;;  %v2973_v20 = vadd.f32 1e-05, %v782_v16  ;;  %v2984_v29 = vadd.f32 1e-05, %v786_v25  ;;  %v3033_v16 = vperm.slane %v983_v60, 0 }
 0x163   : > { %v2975_v22 = vpop.eup %2527  ;;  %v847_v24 = vmul.f32 %v2971_v17, %v794_v12  ;;  %vm853_vm2 = vweird.f32 %v2971_v17 }
 0x164   : > { %v807_v26 = vmul.f32 %v2975_v22, %v2967_v13  ;;  %2529 = vrsqrt.f32 %v2973_v20  ;;  %vm3012_vm3 = vmor %vm852_vm1, %vm853_vm2  ;;  %vm813_vm4 = vweird.f32 %v2975_v22  ;;  %vm892_vm7 = vweird.f32 %v2973_v20 }
 0x165   : > { %v848_v27 = vmul.f32 %v2971_v17, %v847_v24  ;;  %2531 = vrsqrt.f32 %v2984_v29  ;;  %vm3039_vm6 = vmor %vm812_vm5, %vm813_vm4 }
 0x166   : > { %v808_v28 = vmul.f32 %v2975_v22, %v807_v26 }
 0x167   : > { %v746_v30 = vpop.xlane.xlu2 %745  ;;  %v738_v31 = vpop.xlane.xlu0 %737  ;;  %v849_v32 = vmul.f32 0.5, %v848_v27 }
 0x168   : > { %v779_v33 = vmul.f32 %v2963_v7, %v746_v30  ;;  %v775_v34 = vmul.f32 %v2963_v7, %v738_v31  ;;  %v740_v35 = vpop.xlane.xlu1 %739  ;;  %v809_v44 = vmul.f32 0.5, %v808_v28 }
 0x169   : > { %v776_v36 = vmul.f32 %v2963_v7, %v740_v35  ;;  %v850_v50 = vsub.f32 1.5, %v849_v32 }
 0x16a   : > { %v2989_v37 = vpop.eup %2529  ;;  %v2991_v42 = vadd.f32 1e-05, %v779_v33  ;;  %v2993_v43 = vadd.f32 1e-05, %v775_v34  ;;  %v810_v52 = vsub.f32 1.5, %v809_v44 }
 0x16b   : > { %v887_v47 = vmul.f32 %v2989_v37, %v2973_v20  ;;  %v2998_v49 = vadd.f32 1e-05, %v776_v36  ;;  %v851_v57 = vmul.f32 %v2971_v17, %v850_v50  ;;  %v3010_v59 = vpop.eup %2531  ;;  %vm893_vm8 = vweird.f32 %v2989_v37 }
 0x16c   : > { %2533 = vrsqrt.f32 %v2991_v42  ;;  %v811_v6 = vmul.f32 %v2975_v22, %v810_v52  ;;  %v927_v12 = vmul.f32 %v3010_v59, %v2984_v29  ;;  %vm862_vm9 = vweird.f32 %v2991_v42  ;;  %vm3084_vm15 = vmor %vm892_vm7, %vm893_vm8 }
 0x16d   : > { %2535 = vrsqrt.f32 %v2993_v43  ;;  %v888_v55 = vmul.f32 %v2989_v37, %v887_v47  ;;  %v855_v11 = vsel %vm3012_vm3, %v2971_v17, %v851_v57  ;;  %vm822_vm11 = vweird.f32 %v2993_v43 }
 0x16e   : > { %2537 = vrsqrt.f32 %v2998_v49  ;;  %v970_v27 = vmul.f32 %v855_v11, %v2867_v46  ;;  %v815_v13 = vsel %vm3039_vm6, %v2975_v22, %v811_v6  ;;  %v928_v32 = vmul.f32 %v3010_v59, %v927_v12 }
 0x16f   : > { %v754_v56 = vpop.xlane.xlu0 %753  ;;  %v889_v8 = vmul.f32 0.5, %v888_v55  ;;  %v966_v22 = vmul.f32 %v815_v13, %v2864_v45  ;;  %vm832_vm2 = vweird.f32 %v2998_v49 }
 0x170   : > { %v783_v38 = vmul.f32 %v2963_v7, %v754_v56  ;;  %v756_v58 = vpop.xlane.xlu1 %755 }
 0x171   : > { %v784_v0 = vmul.f32 %v2963_v7, %v756_v58  ;;  %v890_v28 = vsub.f32 1.5, %v889_v8 }
 0x172   : > { %v2534_v3 = vpop.eup %2533  ;;  %v3018_v4 = vadd.f32 1e-05, %v783_v38 }
 0x173   : > { %v2536_v5 = vpop.eup %2535  ;;  %v857_v9 = vmul.f32 %v2534_v3, %v2991_v42  ;;  %v3022_v10 = vadd.f32 1e-05, %v784_v0  ;;  %vm863_vm10 = vweird.f32 %v2534_v3  ;;  %v891_v55 = vmul.f32 %v2989_v37, %v890_v28 }
 0x174   : > { %v817_v14 = vmul.f32 %v2536_v5, %v2993_v43  ;;  %2539 = vrsqrt.f32 %v3018_v4  ;;  %v3031_v15 = vpop.eup %2537  ;;  %vm823_vm12 = vweird.f32 %v2536_v5  ;;  %vm864_vm13 = vmor %vm862_vm9, %vm863_vm10  ;;  %v989_v0 = vmul.f32 %v3033_v16, %v970_v27 }
 0x175   : > { %v858_v24 = vmul.f32 %v2534_v3, %v857_v9  ;;  %2541 = vrsqrt.f32 %v3022_v10  ;;  %v827_v34 = vmul.f32 %v3031_v15, %v2998_v49  ;;  %vm824_vm14 = vmor %vm822_vm11, %vm823_vm12  ;;  %v985_v42 = vmul.f32 %v3033_v16, %v966_v22 }
 0x176   : > { %v818_v25 = vmul.f32 %v2536_v5, %v817_v14  ;;  %v758_v26 = vpop.xlane.xlu2 %757  ;;  %v895_v14 = vsel %vm3084_vm15, %v2989_v37, %v891_v55  ;;  %vm902_vm1 = vweird.f32 %v3018_v4  ;;  %vm912_vm5 = vweird.f32 %v3022_v10 }
 0x177   : > { %v859_v30 = vmul.f32 0.5, %v858_v24  ;;  %v748_v31 = vpop.xlane.xlu0 %747  ;;  %v785_v35 = vmul.f32 %v2963_v7, %v758_v26  ;;  %v828_v45 = vmul.f32 %v3031_v15, %v827_v34  ;;  %vm833_vm6 = vweird.f32 %v3031_v15 }
 0x178   : > { %v819_v33 = vmul.f32 0.5, %v818_v25  ;;  %v742_v36 = vpop.xlane.xlu1 %741  ;;  %v780_v46 = vmul.f32 %v2963_v7, %v748_v31  ;;  %vm3165_vm9 = vmor %vm832_vm2, %vm833_vm6 }
 0x179   : > { %v860_v44 = vsub.f32 1.5, %v859_v30  ;;  %v3059_v51 = vadd.f32 1e-05, %v785_v35  ;;  %v777_v63 = vmul.f32 %v2963_v7, %v742_v36  ;;  %v829_v25 = vmul.f32 0.5, %v828_v45 }
 0x17a   : > { %v3056_v47 = vpop.eup %2539  ;;  %v820_v50 = vsub.f32 1.5, %v819_v33  ;;  %v3066_v38 = vadd.f32 1e-05, %v780_v46  ;;  %v974_v33 = vmul.f32 %v895_v14, %v2876_v61 }
 0x17b   : > { %v3061_v52 = vpop.eup %2541  ;;  %v861_v56 = vmul.f32 %v2534_v3, %v860_v44  ;;  %v897_v57 = vmul.f32 %v3056_v47, %v3018_v4  ;;  %2543 = vrsqrt.f32 %v3059_v51  ;;  %v3096_v27 = vadd.f32 1e-05, %v777_v63 }
 0x17c   : > { %v821_v58 = vmul.f32 %v2536_v5, %v820_v50  ;;  %v907_v60 = vmul.f32 %v3061_v52, %v3022_v10  ;;  %2545 = vrsqrt.f32 %v3066_v38  ;;  %vm903_vm0 = vweird.f32 %v3056_v47 }
 0x17d   : > { %v865_v6 = vsel %vm864_vm13, %v2534_v3, %v861_v56  ;;  %v898_v8 = vmul.f32 %v3056_v47, %v897_v57  ;;  %2547 = vrsqrt.f32 %v3096_v27  ;;  %v3110_v44 = vmul.f32 0.5, %v928_v32  ;;  %vm904_vm3 = vmor %vm902_vm1, %vm903_vm0 }
 0x17e   : > { %v971_v11 = vmul.f32 %v865_v6, %v2887_v2  ;;  %v825_v3 = vsel %vm824_vm14, %v2536_v5, %v821_v58  ;;  %v908_v43 = vmul.f32 %v3061_v52, %v907_v60  ;;  %v764_v12 = vpop.xlane.xlu2 %763  ;;  %v830_v46 = vsub.f32 1.5, %v829_v25 }
 0x17f   : > { %v967_v24 = vmul.f32 %v825_v3, %v2884_v1  ;;  %v899_v17 = vmul.f32 0.5, %v898_v8  ;;  %v788_v28 = vmul.f32 %v2963_v7, %v764_v12  ;;  %v766_v37 = vpop.xlane.xlu0 %765  ;;  %vm913_vm4 = vweird.f32 %v3061_v52 }
 0x180   : > { %v990_v20 = vmul.f32 %v3033_v16, %v971_v11  ;;  %v909_v26 = vmul.f32 0.5, %v908_v43  ;;  %v750_v2 = vpop.xlane.xlu1 %749  ;;  %v789_v22 = vmul.f32 %v2963_v7, %v766_v37  ;;  %v993_v45 = vmul.f32 %v3033_v16, %v974_v33  ;;  %vm3142_vm7 = vmor %vm912_vm5, %vm913_vm4 }
 0x181   : > { %v986_v5 = vmul.f32 %v3033_v16, %v967_v24  ;;  %v900_v13 = vsub.f32 1.5, %v899_v17  ;;  %v3103_v31 = vpop.eup %2543  ;;  %v3108_v36 = vadd.f32 1e-05, %v788_v28  ;;  %v781_v32 = vmul.f32 %v2963_v7, %v750_v2 }
 0x182   : > { %v2329_v30 = vpack.c.bf16 %v990_v20, %v989_v0  ;;  %v910_v1 = vsub.f32 1.5, %v909_v26  ;;  %v917_v4 = vmul.f32 %v3103_v31, %v3059_v51  ;;  %v3117_v61 = vpop.eup %2545  ;;  %v2678_v11 = vmov 0.0  }
 0x183   : > { %v2319_v34 = vpack.c.bf16 %v986_v5, %v985_v42  ;;  %v901_v35 = vmul.f32 %v3056_v47, %v900_v13  ;;  %2549 = vrsqrt.f32 %v3108_v36  ;;  %v867_v58 = vmul.f32 %v3117_v61, %v3066_v38  ;;  %v3134_v63 = vpop.eup %2547  ;;  %1033 = vst [vmem:[#allocation4 + $0x30] sm:$0xff] %v2678_v11 }
 0x184   : > { %2404 = vst [vmem:[#allocation3 + $0x10] sm:$0xff] %v2329_v30   ;;  %v911_v56 = vmul.f32 %v3061_v52, %v910_v1  ;;  %v918_v57 = vmul.f32 %v3103_v31, %v917_v4  ;;  %v3132_v60 = vadd.f32 1e-05, %v781_v32  ;;  %v831_v42 = vmul.f32 %v3031_v15, %v830_v46 }
 0x185   : > { %2320 = vst [vmem:[#allocation3 + $0x28] sm:$0xff] %v2319_v34   ;;  %v905_v50 = vsel %vm904_vm3, %v3056_v47, %v901_v35  ;;  %v3130_v47 = vadd.f32 1e-05, %v789_v22  ;;  %v868_v6 = vmul.f32 %v3117_v61, %v867_v58  ;;  %v837_v9 = vmul.f32 %v3134_v63, %v3096_v27 }
 0x186   : > { %v975_v55 = vmul.f32 %v905_v50, %v2899_v18  ;;  %v919_v18 = vmul.f32 0.5, %v918_v57  ;;  %v915_v43 = vsel %vm3142_vm7, %v3061_v52, %v911_v56  ;;  %vm923_vm8 = vweird.f32 %v3103_v31  ;;  %1034 = vst [vmem:[#allocation4] sm:$0xff] %v2678_v11 }
 0x187   : > { %2551 = vrsqrt.f32 %v3130_v47  ;;  %v869_v24 = vmul.f32 0.5, %v868_v6  ;;  %v838_v17 = vmul.f32 %v3134_v63, %v837_v9  ;;  %1035 = vst [vmem:[#allocation4 + $0x40] sm:$0xff] %v2678_v11  ;;  %vm922_vm10 = vweird.f32 %v3059_v51 }
 0x188   : > { %v994_v0 = vmul.f32 %v3033_v16, %v975_v55  ;;  %v762_v8 = vpop.xlane.xlu1 %761  ;;  %v920_v12 = vsub.f32 1.5, %v919_v18  ;;  %2553 = vrsqrt.f32 %v3132_v60  ;;  %v976_v2 = vmul.f32 %v915_v43, %v2922_v39  ;;  %vm924_vm11 = vmor %vm922_vm10, %vm923_vm8  ;;  %1036 = vst [vmem:[#allocation4 + $0x58] sm:$0xff] %v2678_v11 }
 0x189   : > { %v3155_v14 = vpop.eup %2549  ;;  %v787_v20 = vmul.f32 %v2963_v7, %v762_v8  ;;  %v835_v7 = vsel %vm3165_vm9, %v3031_v15, %v831_v42  ;;  %v839_v49 = vmul.f32 0.5, %v838_v17  ;;  %v930_v13 = vsub.f32 1.5, %v3110_v44  ;;  %1037 = vst [vmem:[#allocation4 + $0x8] sm:$0xff] %v2678_v11 }
 0x18a   : > { %v2339_v3 = vpack.c.bf16 %v994_v0, %v993_v45  ;;  %v921_v25 = vmul.f32 %v3103_v31, %v920_v12  ;;  %v947_v26 = vmul.f32 %v3155_v14, %v3108_v36  ;;  %vm843_vm12 = vweird.f32 %v3134_v63  ;;  %1038 = vst [vmem:[#allocation4 + $0x28] sm:$0xff] %v2678_v11 }
 0x18b   : > { %v3179_v5 = vadd.f32 1e-05, %v787_v20  ;;  %vm932_vm13 = vweird.f32 %v2984_v29  ;;  %v870_v37 = vsub.f32 1.5, %v869_v24  ;;  %v840_v30 = vsub.f32 1.5, %v839_v49  ;;  %1039 = vst [vmem:[#allocation4 + $0x38] sm:$0xff] %v2678_v11 }
 0x18c   : > { %2406 = vst [vmem:[#allocation3 + $0x18] sm:$0xff] %v2339_v3   ;;  %v925_v51 = vsel %vm924_vm11, %v3103_v31, %v921_v25  ;;  %v948_v28 = vmul.f32 %v3155_v14, %v947_v26  ;;  %v968_v1 = vmul.f32 %v835_v7, %v2906_v21  ;;  %vm842_vm14 = vweird.f32 %v3096_v27 }
 0x18d   : > { %v3187_v15 = vpop.eup %2551  ;;  %v977_v39 = vmul.f32 %v925_v51, %v2942_v53  ;;  %2555 = vrsqrt.f32 %v3179_v5  ;;  %v995_v53 = vmul.f32 %v3033_v16, %v976_v2  ;;  %v841_v44 = vmul.f32 %v3134_v63, %v840_v30  ;;  %1040 = vst [vmem:[#allocation4 + $0x20] sm:$0xff] %v2678_v11  ;;  %vm844_vm0 = vmor %vm842_vm14, %vm843_vm12 }
 0x18e   : > { %v949_v31 = vmul.f32 0.5, %v948_v28  ;;  %v957_v33 = vmul.f32 %v3187_v15, %v3130_v47  ;;  %v3198_v34 = vpop.eup %2553  ;;  %vm952_vm15 = vweird.f32 %v3108_v36  ;;  %vm953_vm1 = vweird.f32 %v3155_v14  ;;  %1041 = vst [vmem:[#allocation4 + $0x78] sm:$0xff] %v2678_v11 }
 0x18f   : > { %v996_v35 = vmul.f32 %v3033_v16, %v977_v39  ;;  %v877_v46 = vmul.f32 %v3198_v34, %v3132_v60  ;;  %v871_v22 = vmul.f32 %v3117_v61, %v870_v37  ;;  %vm873_vm2 = vweird.f32 %v3117_v61  ;;  %1042 = vst [vmem:[#allocation4 + $0x50] sm:$0xff] %v2678_v11  ;;  %vm3227_vm5 = vmor %vm952_vm15, %vm953_vm1 }
 0x190   : > { %v950_v21 = vsub.f32 1.5, %v949_v31  ;;  %v958_v27 = vmul.f32 %v3187_v15, %v957_v33  ;;  %v845_v50 = vsel %vm844_vm0, %v3134_v63, %v841_v44  ;;  %1043 = vst [vmem:[#allocation4 + $0x18] sm:$0xff] %v2678_v11  ;;  %vm933_vm3 = vweird.f32 %v3010_v59 }
 0x191   : > { %v2344_v4 = vpack.c.bf16 %v996_v35, %v995_v53  ;;  %v969_v32 = vmul.f32 %v845_v50, %v2925_v40  ;;  %v878_v57 = vmul.f32 %v3198_v34, %v877_v46  ;;  %v987_v45 = vmul.f32 %v3033_v16, %v968_v1  ;;  %1044 = vst [vmem:[#allocation4 + $0x70] sm:$0xff] %v2678_v11  ;;  %vm3261_vm11 = vmor %vm932_vm13, %vm933_vm3 }
 0x192   : > { %v951_v55 = vmul.f32 %v3155_v14, %v950_v21  ;;  %v959_v56 = vmul.f32 0.5, %v958_v27  ;;  %vm872_vm4 = vweird.f32 %v3066_v38  ;;  %vm963_vm6 = vweird.f32 %v3187_v15  ;;  %1045 = vst [vmem:[#allocation4 + $0x60] sm:$0xff] %v2678_v11 }
 0x193   : > { %v2556_v58 = vpop.eup %2555  ;;  %2407 = vst [vmem:[#allocation3 + $0x8] sm:$0xff] %v2344_v4   ;;  %vm3234_vm7 = vmor %vm872_vm4, %vm873_vm2  ;;  %v988_v0 = vmul.f32 %v3033_v16, %v969_v32  ;;  %v879_v36 = vmul.f32 0.5, %v878_v57  ;;  %v931_v6 = vmul.f32 %v3010_v59, %v930_v13  ;;  %vm962_vm8 = vweird.f32 %v3130_v47 }
 0x194   : > { %v955_v38 = vsel %vm3227_vm5, %v3155_v14, %v951_v55  ;;  %v960_v18 = vsub.f32 1.5, %v959_v56  ;;  %v875_v8 = vsel %vm3234_vm7, %v3117_v61, %v871_v22  ;;  %v937_v42 = vmul.f32 %v2556_v58, %v3179_v5  ;;  %1046 = vst [vmem:[#allocation4 + $0x10] sm:$0xff] %v2678_v11  ;;  %vm964_vm10 = vmor %vm962_vm8, %vm963_vm6 }
 0x195   : > { %v2324_v10 = vpack.c.bf16 %v988_v0, %v987_v45  ;;  %v880_v3 = vsub.f32 1.5, %v879_v36  ;;  %vm883_vm9 = vweird.f32 %v3198_v34  ;;  %v980_v43 = vmul.f32 %v955_v38, %v2937_v48  ;;  %1047 = vst [vmem:[#allocation4 + $0x68] sm:$0xff] %v2678_v11 }
 0x196   : > { %v961_v9 = vmul.f32 %v3187_v15, %v960_v18  ;;  %v938_v61 = vmul.f32 %v2556_v58, %v937_v42  ;;  %vm882_vm12 = vweird.f32 %v3132_v60  ;;  %v972_v48 = vmul.f32 %v875_v8, %v2911_v23  ;;  %1048 = vst [vmem:[#allocation4 + $0x48] sm:$0xff] %v2678_v11 }
 0x197   : > { %2403 = vst [vmem:[#allocation3] sm:$0xff] %v2324_v10   ;;  %v881_v14 = vmul.f32 %v3198_v34, %v880_v3  ;;  %vm884_vm14 = vmor %vm882_vm12, %vm883_vm9  ;;  %v935_v29 = vsel %vm3261_vm11, %v3010_v59, %v931_v6  ;;  %vm943_vm13 = vweird.f32 %v2556_v58  ;;  %v999_v52 = vmul.f32 %v3033_v16, %v980_v43 }
 0x198   : > { %v965_v12 = vsel %vm964_vm10, %v3187_v15, %v961_v9  ;;  %v939_v17 = vmul.f32 0.5, %v938_v61  ;;  %vm942_vm15 = vweird.f32 %v3179_v5  ;;  %v978_v59 = vmul.f32 %v935_v29, %v2879_v62 }
 0x199   : > { %v981_v24 = vmul.f32 %v965_v12, %v2945_v54  ;;  %v885_v20 = vsel %vm884_vm14, %v3198_v34, %v881_v14  ;;  %v991_v54 = vmul.f32 %v3033_v16, %v972_v48  ;;  %vm944_vm0 = vmor %vm942_vm15, %vm943_vm13 }
 0x19a   : > { %v973_v60 = vmul.f32 %v885_v20, %v2928_v41  ;;  %v940_v23 = vsub.f32 1.5, %v939_v17  ;;  %v997_v41 = vmul.f32 %v3033_v16, %v978_v59 }
 0x19b   : > { %v1000_v25 = vmul.f32 %v3033_v16, %v981_v24 }
 0x19c   : > { %v992_v11 = vmul.f32 %v3033_v16, %v973_v60  ;;  %v941_v7 = vmul.f32 %v2556_v58, %v940_v23 }
 0x19d   : > { %v2354_v26 = vpack.c.bf16 %v1000_v25, %v999_v52 }
 0x19e   : > { %v2334_v2 = vpack.c.bf16 %v992_v11, %v991_v54  ;;  %v945_v49 = vsel %vm944_vm0, %v2556_v58, %v941_v7 }
 0x19f   : > { %2409 = vst [vmem:[#allocation3 + $0x30] sm:$0xff] %v2354_v26   ;;  %v979_v13 = vmul.f32 %v945_v49, %v2902_v19 }
 0x1a0   : > { %2405 = vst [vmem:[#allocation3 + $0x20] sm:$0xff] %v2334_v2  }
 0x1a1   : > { %v998_v51 = vmul.f32 %v3033_v16, %v979_v13 }
 0x1a3   : > { %v2349_v5 = vpack.c.bf16 %v998_v51, %v997_v41 }
 0x1a5   : > { %2408 = vst [vmem:[#allocation3 + $0x38] sm:$0xff] %v2349_v5  }
 0x1a6 PF: > { %v2178_v62 = vld [vmem:[%s2819_s11 + $0x70] sm:$0xf]  ;;  %v2275_v19 = vld [vmem:[%s2819_s11 + $0x74] sm:$0xf0]  ;;  %v2170_v28 = vld [vmem:[%s2819_s11 + $0x60] sm:$0xf] }
 0x1a7   : > { %v2179_v15 = vor.u32 %v2275_v19, %v2178_v62  ;;  %v2273_v16 = vld [vmem:[%s2819_s11 + $0x64] sm:$0xf0]  ;;  %v2162_v37 = vld [vmem:[%s2819_s11 + $0x50] sm:$0xf]  ;;  %v2271_v30 = vld [vmem:[%s2819_s11 + $0x54] sm:$0xf0] }
 0x1a8   : > { %v2171_v39 = vor.u32 %v2273_v16, %v2170_v28  ;;  %v2274_v1 = vld [vmem:[%s2819_s11 + $0x74] sm:$0xf]  ;;  %v2180_v31 = vld [vmem:[%s2819_s11 + $0x78] sm:$0xf0]  ;;  %v2272_v34 = vld [vmem:[%s2819_s11 + $0x64] sm:$0xf]  ;;  %v2163_v35 = vor.u32 %v2271_v30, %v2162_v37 }
 0x1a9   : > { %1209 = vmatpush.bf16.msra.mxu0 %v2179_v15  ;;  %2441 = vmatpush.bf16.msra.mxu3 %v2179_v15  ;;  %v2183_v33 = vor.u32 %v2274_v1, %v2180_v31  ;;  %v2172_v53 = vld [vmem:[%s2819_s11 + $0x68] sm:$0xf0]  ;;  %v2154_v44 = vld [vmem:[%s2819_s11 + $0x40] sm:$0xf]  ;;  %v2269_v21 = vld [vmem:[%s2819_s11 + $0x44] sm:$0xf0] }
 0x1aa   : > { %v2175_v27 = vor.u32 %v2272_v34, %v2172_v53  ;;  %v2270_v46 = vld [vmem:[%s2819_s11 + $0x54] sm:$0xf]  ;;  %v2164_v4 = vld [vmem:[%s2819_s11 + $0x58] sm:$0xf0]  ;;  %v2155_v22 = vor.u32 %v2269_v21, %v2154_v44  ;;  %v2146_v50 = vld [vmem:[%s2819_s11 + $0x30] sm:$0xf] }
 0x1ab   : > { %1258 = vmatpush.bf16.msra.mxu1 %v2183_v33  ;;  %v2267_v32 = vld [vmem:[%s2819_s11 + $0x34] sm:$0xf0]  ;;  %v2167_v55 = vor.u32 %v2270_v46, %v2164_v4  ;;  %v2268_v56 = vld [vmem:[%s2819_s11 + $0x44] sm:$0xf]  ;;  %v2156_v57 = vld [vmem:[%s2819_s11 + $0x48] sm:$0xf0] }
 0x1ac   : > { %v2147_v58 = vor.u32 %v2267_v32, %v2146_v50  ;;  %v2138_v45 = vld [vmem:[%s2819_s11 + $0x20] sm:$0xf]  ;;  %v2265_v40 = vld [vmem:[%s2819_s11 + $0x24] sm:$0xf0]  ;;  %v2159_v63 = vor.u32 %v2268_v56, %v2156_v57  ;;  %v2266_v0 = vld [vmem:[%s2819_s11 + $0x34] sm:$0xf] }
 0x1ad   : > { %1210 = vmatpush.bf16.msra.mxu0 %v2171_v39  ;;  %2442 = vmatpush.bf16.msra.mxu3 %v2171_v39  ;;  %v2148_v38 = vld [vmem:[%s2819_s11 + $0x38] sm:$0xf0]  ;;  %v2139_v18 = vor.u32 %v2265_v40, %v2138_v45  ;;  %v2130_v36 = vld [vmem:[%s2819_s11 + $0x10] sm:$0xf]  ;;  %v2263_v6 = vld [vmem:[%s2819_s11 + $0x14] sm:$0xf0] }
 0x1ae   : > { %v2151_v8 = vor.u32 %v2266_v0, %v2148_v38  ;;  %v2264_v42 = vld [vmem:[%s2819_s11 + $0x24] sm:$0xf]  ;;  %v2140_v10 = vld [vmem:[%s2819_s11 + $0x28] sm:$0xf0]  ;;  %v2131_v9 = vor.u32 %v2263_v6, %v2130_v36  ;;  %v2122_v3 = vld [vmem:[%s2819_s11] sm:$0xf] }
 0x1af   : > { %1259 = vmatpush.bf16.msra.mxu1 %v2175_v27  ;;  %v2261_v43 = vld [vmem:[%s2819_s11 + $0x4] sm:$0xf0]  ;;  %v2143_v61 = vor.u32 %v2264_v42, %v2140_v10  ;;  %v2262_v47 = vld [vmem:[%s2819_s11 + $0x14] sm:$0xf]  ;;  %v2132_v12 = vld [vmem:[%s2819_s11 + $0x18] sm:$0xf0] }
 0x1b0   : > { %v2123_v14 = vor.u32 %v2261_v43, %v2122_v3  ;;  %v2135_v48 = vor.u32 %v2262_v47, %v2132_v12  ;;  %v2260_v24 = vld [vmem:[%s2819_s11 + $0x4] sm:$0xf]  ;;  %v2124_v17 = vld [vmem:[%s2819_s11 + $0x8] sm:$0xf0]  ;;  %v2258_v20 = vld [vmem:[#allocation3 + $0x38] sm:$0xff]  ;;  %p2232_p13 = scmp.ne.s32.totalorder %s2659_s26, 1 }
 0x1b1   : > { %1211 = vmatpush.bf16.msra.mxu0 %v2163_v35  ;;  %2443 = vmatpush.bf16.msra.mxu3 %v2163_v35  ;;  %v2252_v29 = vld [vmem:[#allocation3 + $0x28] sm:$0xff]  ;;  %v2127_v52 = vor.u32 %v2260_v24, %v2124_v17  ;;  %v2253_v25 = vld [vmem:[#allocation3] sm:$0xff]  ;;  %v2259_v60 = vld [vmem:[#allocation3 + $0x30] sm:$0xff] }
 0x1b2   : > { %v2254_v23 = vld [vmem:[#allocation3 + $0x10] sm:$0xff]  ;;  %v2255_v54 = vld [vmem:[#allocation3 + $0x20] sm:$0xff]  ;;  %v2256_v26 = vld [vmem:[#allocation3 + $0x18] sm:$0xff] }
 0x1b3   : > { %1260 = vmatpush.bf16.msra.mxu1 %v2167_v55  ;;  %v2257_v11 = vld [vmem:[#allocation3 + $0x8] sm:$0xff]  ;;  %v2283_v7 = vld [vmem:[%s2817_s21 + $0x38] sm:$0xff]  ;;  %v2282_v59 = vld [vmem:[%s2817_s21 + $0x30] sm:$0xff] }
 0x1b4   : > { %1731 = vmatpush.bf16.msra.mxu2 %v2283_v7  ;;  %v2281_v2 = vld [vmem:[%s2817_s21 + $0x28] sm:$0xff]  ;;  %v2280_v49 = vld [vmem:[%s2817_s21 + $0x20] sm:$0xff]  ;;  %v2279_v13 = vld [vmem:[%s2817_s21 + $0x18] sm:$0xff] }
 0x1b5   : > { %1212 = vmatpush.bf16.msra.mxu0 %v2155_v22  ;;  %2444 = vmatpush.bf16.msra.mxu3 %v2155_v22  ;;  %v2278_v5 = vld [vmem:[%s2817_s21 + $0x10] sm:$0xff]  ;;  %v2277_v19 = vld [vmem:[%s2817_s21 + $0x8] sm:$0xff]  ;;  %v2276_v30 = vld [vmem:[%s2817_s21] sm:$0xff] }
 0x1b7   : > { %1261 = vmatpush.bf16.msra.mxu1 %v2159_v63 }
 0x1b8   : > { %1732 = vmatpush.bf16.msra.mxu2 %v2282_v59 }
 0x1b9   : > { %1213 = vmatpush.bf16.msra.mxu0 %v2147_v58  ;;  %2445 = vmatpush.bf16.msra.mxu3 %v2147_v58 }
 0x1bb   : > { %1262 = vmatpush.bf16.msra.mxu1 %v2151_v8 }
 0x1bc   : > { %1733 = vmatpush.bf16.msra.mxu2 %v2281_v2 }
 0x1bd   : > { %1214 = vmatpush.bf16.msra.mxu0 %v2139_v18  ;;  %2446 = vmatpush.bf16.msra.mxu3 %v2139_v18 }
 0x1bf   : > { %1263 = vmatpush.bf16.msra.mxu1 %v2143_v61 }
 0x1c0   : > { %1734 = vmatpush.bf16.msra.mxu2 %v2280_v49 }
 0x1c1   : > { %1215 = vmatpush.bf16.msra.mxu0 %v2131_v9  ;;  %2447 = vmatpush.bf16.msra.mxu3 %v2131_v9 }
 0x1c3   : > { %1264 = vmatpush.bf16.msra.mxu1 %v2135_v48 }
 0x1c4   : > { %1735 = vmatpush.bf16.msra.mxu2 %v2279_v13 }
 0x1c5   : > { %1216 = vmatpush.bf16.msra.mxu0 %v2123_v14  ;;  %2448 = vmatpush.bf16.msra.mxu3 %v2123_v14 }
 0x1c7   : > { %1265 = vmatpush.bf16.msra.mxu1 %v2127_v52 }
 0x1c8   : > { %1217 = vmatmul.bf16.vlgmr.msra.gmra.mxu0 %v2252_v29  ;;  %1247 = vmatmul.bf16.vlgmr.msra.gmra.mxu3 %v2258_v20 }
 0x1c9   : > { %2449 = vmatpush.bf16.msrb.mxu3 %v2183_v33  ;;  %1736 = vmatpush.bf16.msra.mxu2 %v2278_v5 }
 0x1ca   : > { %1266 = vmatmul.bf16.vlgmr.msra.gmra.mxu1 %v2252_v29 }
 0x1cd   : > { %2450 = vmatpush.bf16.msrb.mxu3 %v2175_v27  ;;  %1737 = vmatpush.bf16.msra.mxu2 %v2277_v19 }
 0x1d1   : > { %2451 = vmatpush.bf16.msrb.mxu3 %v2167_v55  ;;  %1738 = vmatpush.bf16.msra.mxu2 %v2276_v30 }
 0x1d5   : > { %2452 = vmatpush.bf16.msrb.mxu3 %v2159_v63 }
 0x1d8   : > { %1222 = vmatmul.bf16.gmra.mxu0 %v2253_v25  ;;  %1252 = vmatmul.bf16.gmra.mxu3 %v2259_v60 }
 0x1d9   : > { %2453 = vmatpush.bf16.msrb.mxu3 %v2151_v8 }
 0x1da   : > { %1271 = vmatmul.bf16.gmra.mxu1 %v2253_v25 }
 0x1dd   : > { %2454 = vmatpush.bf16.msrb.mxu3 %v2143_v61 }
 0x1e1   : > { %2455 = vmatpush.bf16.msrb.mxu3 %v2135_v48 }
 0x1e5   : > { %2456 = vmatpush.bf16.msrb.mxu3 %v2127_v52 }
 0x1e8   : > { %1227 = vmatmul.bf16.gmra.mxu0 %v2254_v23  ;;  %1296 = vmatmul.bf16.vlgmr.msrb.gmra.mxu3 %v2258_v20 }
 0x1e9   : > { %2457 = vmatpush.bf16.msra.mxu3 %v2283_v7 }
 0x1ea   : > { %1276 = vmatmul.bf16.gmra.mxu1 %v2254_v23 }
 0x1ed   : > { %2458 = vmatpush.bf16.msra.mxu3 %v2282_v59 }
 0x1f1   : > { %2459 = vmatpush.bf16.msra.mxu3 %v2281_v2 }
 0x1f5   : > { %2460 = vmatpush.bf16.msra.mxu3 %v2280_v49 }
 0x1f8   : > { %1232 = vmatmul.bf16.gmra.mxu0 %v2255_v54  ;;  %1301 = vmatmul.bf16.gmra.mxu3 %v2259_v60 }
 0x1f9   : > { %2461 = vmatpush.bf16.msra.mxu3 %v2279_v13 }
 0x1fa   : > { %1281 = vmatmul.bf16.gmra.mxu1 %v2255_v54 }
 0x1fd   : > { %2462 = vmatpush.bf16.msra.mxu3 %v2278_v5 }
 0x201   : > { %2463 = vmatpush.bf16.msra.mxu3 %v2277_v19 }
 0x205   : > { %2464 = vmatpush.bf16.msra.mxu3 %v2276_v30 }
 0x208   : > { %1237 = vmatmul.bf16.gmra.mxu0 %v2256_v26 }
 0x20a   : > { %1286 = vmatmul.bf16.gmra.mxu1 %v2256_v26 }
 0x218   : > { %1242 = vmatmul.bf16.gmra.mxu0 %v2257_v11 }
 0x21a   : > { %1291 = vmatmul.bf16.gmra.mxu1 %v2257_v11 }
 0x245   : > { %v3322_v41 = vpop.f32.mrf.mxu0 }
 0x246   : > { %v2184_v51 = vmul.f32 -1.442695, %v3322_v41 }
 0x247   : > { %v3334_v1 = vpop.f32.mrf.mxu1 }
 0x248   : > { %2557 = vpow2.f32 %v2184_v51 }
 0x24b   : > { %v3326_v62 = vpop.f32.mrf.mxu3 }
 0x24c   : > { %v2196_v28 = vmul.f32 -1.442695, %v3326_v62 }
 0x24d   : > { %v3330_v15 = vpop.f32.mrf.mxu0 }
 0x24e   : > { %v2558_v16 = vpop.eup %2557  ;;  %v2185_v39 = vmul.f32 -1.442695, %v3330_v15  ;;  %2559 = vpow2.f32 %v2196_v28 }
 0x24f   : > { %v1355_v37 = vadd.f32 1.0, %v2558_v16  ;;  %v3348_v50 = vpop.f32.mrf.mxu1 }
 0x250   : > { %2561 = vpow2.f32 %v2185_v39 }
 0x251   : > { %2563 = vrcp.f32 %v1355_v37  ;;  %v1380_v57 = vand.u32 2147483647, %v1355_v37  ;;  %v1382_v18 = vand.u32 2147483648, %v1355_v37  ;;  %vm1376_vm1 = vweird.f32 %v1355_v37 }
 0x253   : > { %v3336_v31 = vpop.f32.mrf.mxu3  ;;  %vm3365_vm2 = vcmp.eq.f32.partialorder %v1380_v57, 8.507059e+37  ;;  %v1383_v61 = vor.u32 1.1754944e-38, %v1382_v18 }
 0x254   : > { %v2560_v33 = vpop.eup %2559  ;;  %v2197_v34 = vmul.f32 -1.442695, %v3336_v31 }
 0x255   : > { %v3339_v53 = vpop.f32.mrf.mxu0  ;;  %v3341_v35 = vadd.f32 1.0, %v2560_v33 }
 0x256   : > { %v2562_v44 = vpop.eup %2561  ;;  %v2186_v21 = vmul.f32 -1.442695, %v3339_v53  ;;  %2565 = vpow2.f32 %v2197_v34 }
 0x257   : > { %v3344_v27 = vpop.eup %2563  ;;  %v1356_v46 = vadd.f32 1.0, %v2562_v44  ;;  %2567 = vrcp.f32 %v3341_v35  ;;  %v1560_v12 = vand.u32 2147483647, %v3341_v35  ;;  %vm1556_vm5 = vweird.f32 %v3341_v35  ;;  %v3387_v25 = vpop.f32.mrf.mxu1 }
 0x258   : > { %v1372_v4 = vmul.f32 %v3344_v27, %v1355_v37  ;;  %2569 = vpow2.f32 %v2186_v21  ;;  %vm1377_vm3 = vweird.f32 %v3344_v27  ;;  %v1562_v20 = vand.u32 2147483648, %v3341_v35 }
 0x259   : > { %2571 = vrcp.f32 %v1356_v46  ;;  %v1395_v47 = vand.u32 2147483647, %v1356_v46  ;;  %v1397_v24 = vand.u32 2147483648, %v1356_v46  ;;  %vm3380_vm6 = vmor %vm1376_vm1, %vm1377_vm3  ;;  %vm1391_vm7 = vweird.f32 %v1356_v46 }
 0x25a   : > { %v1373_v22 = vsub.f32 1.0, %v1372_v4  ;;  %vm3407_vm10 = vcmp.eq.f32.partialorder %v1560_v12, 8.507059e+37 }
 0x25b   : > { %v3350_v32 = vpop.f32.mrf.mxu3  ;;  %vm3403_vm9 = vcmp.eq.f32.partialorder %v1395_v47, 8.507059e+37  ;;  %v1398_v5 = vor.u32 1.1754944e-38, %v1397_v24 }
 0x25c   : > { %v2566_v55 = vpop.eup %2565  ;;  %v1374_v63 = vmul.f32 %v3344_v27, %v1373_v22  ;;  %v2198_v10 = vmul.f32 -1.442695, %v3350_v32 }
 0x25d   : > { %v3352_v56 = vpop.eup %2567  ;;  %v3354_v58 = vpop.f32.mrf.mxu0  ;;  %v3356_v45 = vadd.f32 1.0, %v2566_v55 }
 0x25e   : > { %v2570_v40 = vpop.eup %2569  ;;  %v1552_v0 = vmul.f32 %v3352_v56, %v3341_v35  ;;  %v2187_v6 = vmul.f32 -1.442695, %v3354_v58  ;;  %v1375_v9 = vadd.f32 %v3344_v27, %v1374_v63  ;;  %vm1557_vm11 = vweird.f32 %v3352_v56 }
 0x25f   : > { %v2572_v38 = vpop.eup %2571  ;;  %v3361_v36 = vadd.f32 1.0, %v2570_v40  ;;  %2573 = vrcp.f32 %v3356_v45  ;;  %vm1571_vm12 = vweird.f32 %v3356_v45  ;;  %vm3428_vm13 = vmor %vm1556_vm5, %vm1557_vm11  ;;  %v1577_v4 = vand.u32 2147483648, %v3356_v45 }
 0x260   : > { %v1387_v8 = vmul.f32 %v2572_v38, %v1356_v46  ;;  %v1553_v43 = vsub.f32 1.0, %v1552_v0  ;;  %vm1392_vm4 = vweird.f32 %v2572_v38  ;;  %v1379_v23 = vsel %vm3380_vm6, %v3344_v27, %v1375_v9 }
 0x261   : > { %2575 = vrcp.f32 %v3361_v36  ;;  %vm3399_vm8 = vmor %vm1391_vm7, %vm1392_vm4  ;;  %v1384_v16 = vsel %vm3365_vm2, %v1383_v61, %v1379_v23  ;;  %v1563_v27 = vor.u32 1.1754944e-38, %v1562_v20  ;;  %vm1406_vm15 = vweird.f32 %v3361_v36 }
 0x262   : > { %v1388_v3 = vsub.f32 1.0, %v1387_v8  ;;  %2577 = vpow2.f32 %v2187_v6  ;;  %v1554_v26 = vmul.f32 %v3352_v56, %v1553_v43  ;;  %v1575_v57 = vand.u32 2147483647, %v3356_v45  ;;  %v3464_v43 = vpop.f32.mrf.mxu1 }
 0x263   : > { %v3374_v14 = vpop.f32.mrf.mxu3  ;;  %2579 = vpow2.f32 %v2198_v10  ;;  %v1611_v40 = vmul.f32 %v1384_v16, %v3322_v41  ;;  %v1410_v63 = vand.u32 2147483647, %v3361_v36  ;;  %v1412_v41 = vand.u32 2147483648, %v3361_v36 }
 0x264   : > { %v1389_v48 = vmul.f32 %v2572_v38, %v1388_v3  ;;  %v2199_v60 = vmul.f32 -1.442695, %v3374_v14  ;;  %v1555_v30 = vadd.f32 %v3352_v56, %v1554_v26  ;;  %v1578_v3 = vor.u32 1.1754944e-38, %v1577_v4 }
 0x265   : > { %v3377_v17 = vpop.eup %2573  ;;  %v3385_v52 = vpop.f32.mrf.mxu0  ;;  %vm1576_vm2 = vcmp.eq.f32.partialorder %v1575_v57, 8.507059e+37  ;;  %vm3483_vm4 = vcmp.eq.f32.partialorder %v1410_v63, 8.507059e+37  ;;  %v1413_v23 = vor.u32 1.1754944e-38, %v1412_v41  ;;  %v1627_v59 = vmul.f32 %v1611_v40, %v3334_v1 }
 0x266   : > { %v1390_v54 = vadd.f32 %v2572_v38, %v1389_v48  ;;  %v1567_v11 = vmul.f32 %v3377_v17, %v3356_v45  ;;  %v2188_v13 = vmul.f32 -1.442695, %v3385_v52  ;;  %2581 = vpow2.f32 %v2199_v60 }
 0x267   : > { %v3396_v7 = vpop.eup %2575  ;;  %vm1572_vm14 = vweird.f32 %v3377_v17  ;;  %v1559_v42 = vsel %vm3428_vm13, %v3352_v56, %v1555_v30 }
 0x268   : > { %v1394_v51 = vsel %vm3399_vm8, %v2572_v38, %v1390_v54  ;;  %v1402_v19 = vmul.f32 %v3396_v7, %v3361_v36  ;;  %v2578_v28 = vpop.eup %2577  ;;  %v1568_v39 = vsub.f32 1.0, %v1567_v11  ;;  %2583 = vpow2.f32 %v2188_v13  ;;  %vm3447_vm0 = vmor %vm1571_vm12, %vm1572_vm14 }
 0x269   : > { %v3421_v33 = vadd.f32 1.0, %v2578_v28  ;;  %v2580_v34 = vpop.eup %2579  ;;  %v1399_v44 = vsel %vm3403_vm9, %v1398_v5, %v1394_v51  ;;  %vm1407_vm1 = vweird.f32 %v3396_v7  ;;  %v1564_v47 = vsel %vm3407_vm10, %v1563_v27, %v1559_v42 }
 0x26a   : > { %v1403_v37 = vsub.f32 1.0, %v1402_v19  ;;  %v1569_v46 = vmul.f32 %v3377_v17, %v1568_v39  ;;  %v3451_v18 = vadd.f32 1.0, %v2580_v34  ;;  %v1612_v8 = vmul.f32 %v1399_v44, %v3330_v15  ;;  %vm3479_vm3 = vmor %vm1406_vm15, %vm1407_vm1 }
 0x26b   : > { %v3434_v22 = vpop.f32.mrf.mxu3  ;;  %2585 = vrcp.f32 %v3421_v33  ;;  %v1425_v12 = vand.u32 2147483647, %v3421_v33  ;;  %v1427_v48 = vand.u32 2147483648, %v3421_v33  ;;  %v1623_v11 = vmul.f32 %v1564_v47, %v3326_v62 }
 0x26c   : > { %v1404_v55 = vmul.f32 %v3396_v7, %v1403_v37  ;;  %v2582_v35 = vpop.eup %2581  ;;  %v1570_v0 = vadd.f32 %v3377_v17, %v1569_v46  ;;  %2587 = vrcp.f32 %v3451_v18  ;;  %v1628_v20 = vmul.f32 %v1612_v8, %v3348_v50  ;;  %v3522_v46 = vpop.f32.mrf.mxu1 }
 0x26d   : > { %v3453_v6 = vpop.f32.mrf.mxu0  ;;  %v3471_v56 = vadd.f32 1.0, %v2582_v35  ;;  %vm1421_vm5 = vweird.f32 %v3421_v33  ;;  %vm3499_vm6 = vcmp.eq.f32.partialorder %v1425_v12, 8.507059e+37  ;;  %vm1586_vm7 = vweird.f32 %v3451_v18 }
 0x26e   : > { %v2189_v10 = vmul.f32 -1.442695, %v3453_v6  ;;  %v2584_v9 = vpop.eup %2583  ;;  %v1405_v45 = vadd.f32 %v3396_v7, %v1404_v55  ;;  %v1574_v15 = vsel %vm3447_vm0, %v3377_v17, %v1570_v0  ;;  %v1643_v5 = vpack.c.bf16 %v1628_v20, %v1627_v59 }
 0x26f   : > { %v3469_v61 = vadd.f32 1.0, %v2584_v9  ;;  %v1579_v36 = vsel %vm1576_vm2, %v1578_v3, %v1574_v15  ;;  %v1592_v16 = vand.u32 2147483648, %v3451_v18  ;;  %v1590_v34 = vand.u32 2147483647, %v3451_v18 }
 0x270   : > { %2589 = vpow2.f32 %v2189_v10  ;;  %v1409_v60 = vsel %vm3479_vm3, %v3396_v7, %v1405_v45  ;;  %v1428_v7 = vor.u32 1.1754944e-38, %v1427_v48  ;;  %v1624_v1 = vmul.f32 %v1579_v36, %v3336_v31  ;;  %1739 = vmatmul.bf16.vlgmr.msra.gmra.mxu2 %v1643_v5 }
 0x271   : > { %v2586_v24 = vpop.eup %2585  ;;  %2591 = vrcp.f32 %v3469_v61  ;;  %v1414_v62 = vsel %vm3483_vm4, %v1413_v23, %v1409_v60  ;;  %v1639_v57 = vmul.f32 %v1623_v11, %v3434_v22  ;;  %v1593_v63 = vor.u32 1.1754944e-38, %v1592_v16 }
 0x272   : > { %v1417_v54 = vmul.f32 %v2586_v24, %v3421_v33  ;;  %2593 = vrcp.f32 %v3471_v56  ;;  %v3497_v50 = vpop.eup %2587  ;;  %vm1422_vm8 = vweird.f32 %v2586_v24  ;;  %v1613_v31 = vmul.f32 %v1414_v62, %v3339_v53 }
 0x273   : > { %v1299_v26 = vpop.f32.mrf.mxu3  ;;  %v1582_v51 = vmul.f32 %v3497_v50, %v3451_v18  ;;  %vm1587_vm9 = vweird.f32 %v3497_v50  ;;  %vm1423_vm10 = vmor %vm1421_vm5, %vm1422_vm8  ;;  %v1607_v0 = vand.u32 2147483648, %v3471_v56  ;;  %vm1601_vm12 = vweird.f32 %v3471_v56 }
 0x274   : > { %v1418_v2 = vsub.f32 1.0, %v1417_v54  ;;  %v1640_v35 = vmul.f32 %v1624_v1, %v1299_v26  ;;  %vm3534_vm11 = vmor %vm1586_vm7, %vm1587_vm9  ;;  %v1605_v10 = vand.u32 2147483647, %v3471_v56  ;;  %vm1591_vm13 = vcmp.eq.f32.partialorder %v1590_v34, 8.507059e+37  ;;  %v1279_v59 = vpop.f32.mrf.mxu1 }
 0x275   : > { %v3504_v13 = vpop.f32.mrf.mxu0  ;;  %v1583_v30 = vsub.f32 1.0, %v1582_v51  ;;  %v1608_v48 = vor.u32 1.1754944e-38, %v1607_v0  ;;  %v1442_v36 = vand.u32 2147483648, %v3469_v61  ;;  %v1629_v26 = vmul.f32 %v1613_v31, %v3387_v25 }
 0x276   : > { %v2590_v19 = vpop.eup %2589  ;;  %v1419_v28 = vmul.f32 %v2586_v24, %v1418_v2  ;;  %v2190_v39 = vmul.f32 -1.442695, %v3504_v13  ;;  %v1649_v15 = vpack.c.bf16 %v1640_v35, %v1639_v57  ;;  %vm1606_vm0 = vcmp.eq.f32.partialorder %v1605_v10, 8.507059e+37 }
 0x277   : > { %v3513_v37 = vpop.eup %2591  ;;  %v3517_v44 = vadd.f32 1.0, %v2590_v19  ;;  %v1584_v55 = vmul.f32 %v3497_v50, %v1583_v30  ;;  %vm1436_vm3 = vweird.f32 %v3469_v61  ;;  %v1443_v16 = vor.u32 1.1754944e-38, %v1442_v36 }
 0x278   : > { %v1420_v21 = vadd.f32 %v2586_v24, %v1419_v28  ;;  %v1432_v27 = vmul.f32 %v3513_v37, %v3469_v61  ;;  %2595 = vpow2.f32 %v2190_v39  ;;  %v2594_v4 = vpop.eup %2593  ;;  %1769 = vmatmul.bf16.vlgmr.msra.gmra.mxu3 %v1649_v15  ;;  %vm1437_vm1 = vweird.f32 %v3513_v37 }
 0x279   : > { %2597 = vrcp.f32 %v3517_v44  ;;  %v1597_v33 = vmul.f32 %v2594_v4, %v3471_v56  ;;  %v1585_v41 = vadd.f32 %v3497_v50, %v1584_v55  ;;  %vm1602_vm14 = vweird.f32 %v2594_v4  ;;  %vm3581_vm4 = vmor %vm1436_vm3, %vm1437_vm1 }
 0x27a   : > { %v1424_v53 = vsel %vm1423_vm10, %v2586_v24, %v1420_v21  ;;  %v1433_v22 = vsub.f32 1.0, %v1432_v27  ;;  %vm3555_vm15 = vmor %vm1601_vm12, %vm1602_vm14  ;;  %v1455_v25 = vand.u32 2147483647, %v3517_v44  ;;  %v1440_v28 = vand.u32 2147483647, %v3469_v61 }
 0x27b   : > { %v1302_v38 = vpop.f32.mrf.mxu3  ;;  %v1429_v8 = vsel %vm3499_vm6, %v1428_v7, %v1424_v53  ;;  %v1598_v42 = vsub.f32 1.0, %v1597_v33  ;;  %v1589_v45 = vsel %vm3534_vm11, %v3497_v50, %v1585_v41  ;;  %vm1451_vm5 = vweird.f32 %v3517_v44 }
 0x27c   : > { %v1614_v18 = vmul.f32 %v1429_v8, %v3354_v58  ;;  %v1434_v58 = vmul.f32 %v3513_v37, %v1433_v22  ;;  %v1594_v60 = vsel %vm1591_vm13, %v1593_v63, %v1589_v45  ;;  %vm1456_vm7 = vcmp.eq.f32.partialorder %v1455_v25, 8.507059e+37 }
 0x27d   : > { %v3546_v9 = vpop.f32.mrf.mxu0  ;;  %v1599_v12 = vmul.f32 %v2594_v4, %v1598_v42  ;;  %v1625_v2 = vmul.f32 %v1594_v60, %v3350_v32  ;;  %vm1441_vm8 = vcmp.eq.f32.partialorder %v1440_v28, 8.507059e+37 }
 0x27e   : > { %v2191_v3 = vmul.f32 -1.442695, %v3546_v9  ;;  %v2596_v47 = vpop.eup %2595  ;;  %v1630_v17 = vmul.f32 %v1614_v18, %v3464_v43  ;;  %v1457_v43 = vand.u32 2147483648, %v3517_v44  ;;  %v1435_v50 = vadd.f32 %v3513_v37, %v1434_v58 }
 0x27f   : > { %v2598_v24 = vpop.eup %2597  ;;  %v3560_v20 = vadd.f32 1.0, %v2596_v47  ;;  %v1600_v54 = vadd.f32 %v2594_v4, %v1599_v12  ;;  %v1641_v21 = vmul.f32 %v1625_v2, %v1302_v38 }
 0x280   : > { %2599 = vpow2.f32 %v2191_v3  ;;  %v1447_v23 = vmul.f32 %v2598_v24, %v3517_v44  ;;  %v1644_v7 = vpack.c.bf16 %v1630_v17, %v1629_v26  ;;  %vm1452_vm2 = vweird.f32 %v2598_v24 }
 0x281   : > { %2601 = vrcp.f32 %v3560_v20  ;;  %v1604_v11 = vsel %vm3555_vm15, %v2594_v4, %v1600_v54  ;;  %v1439_v61 = vsel %vm3581_vm4, %v3513_v37, %v1435_v50  ;;  %vm1453_vm6 = vmor %vm1451_vm5, %vm1452_vm2  ;;  %v1282_v37 = vpop.f32.mrf.mxu1  ;;  %vm1466_vm11 = vweird.f32 %v3560_v20 }
 0x282   : > { %v1448_v56 = vsub.f32 1.0, %v1447_v23  ;;  %v1609_v49 = vsel %vm1606_vm0, %v1608_v48, %v1604_v11  ;;  %1744 = vmatmul.bf16.gmra.mxu2 %v1644_v7  ;;  %v1444_v57 = vsel %vm1441_vm8, %v1443_v16, %v1439_v61  ;;  %v1472_v12 = vand.u32 2147483648, %v3560_v20 }
 0x283   : > { %v1626_v1 = vmul.f32 %v1609_v49, %v3374_v14  ;;  %v1304_v5 = vpop.f32.mrf.mxu3  ;;  %v1458_v14 = vor.u32 1.1754944e-38, %v1457_v43  ;;  %v1615_v0 = vmul.f32 %v1444_v57, %v3385_v52 }
 0x284   : > { %v1449_v62 = vmul.f32 %v2598_v24, %v1448_v56 }
 0x285   : > { %v3574_v51 = vpop.f32.mrf.mxu0  ;;  %v1642_v27 = vmul.f32 %v1626_v1, %v1304_v5 }
 0x286   : > { %v2600_v19 = vpop.eup %2599  ;;  %v2192_v39 = vmul.f32 -1.442695, %v3574_v51  ;;  %v1450_v30 = vadd.f32 %v2598_v24, %v1449_v62 }
 0x287   : > { %v1362_v34 = vadd.f32 1.0, %v2600_v19  ;;  %v3586_v31 = vpop.eup %2601  ;;  %v1650_v40 = vpack.c.bf16 %v1642_v27, %v1641_v21  ;;  %v1655_v27 = vld [vmem:[#allocation4 + $0x8] sm:$0xff] }
 0x288   : > { %2603 = vpow2.f32 %v2192_v39  ;;  %v1454_v4 = vsel %vm1453_vm6, %v2598_v24, %v1450_v30  ;;  %v1462_v55 = vmul.f32 %v3586_v31, %v3560_v20  ;;  %vm1467_vm9 = vweird.f32 %v3586_v31 }
 0x289   : > { %2605 = vrcp.f32 %v1362_v34  ;;  %v1459_v44 = vsel %vm1456_vm7, %v1458_v14, %v1454_v4  ;;  %1774 = vmatmul.bf16.gmra.mxu3 %v1650_v40  ;;  %v1485_v45 = vand.u32 2147483647, %v1362_v34  ;;  %v1487_v52 = vand.u32 2147483648, %v1362_v34  ;;  %vm3610_vm12 = vmor %vm1466_vm11, %vm1467_vm9  ;;  %v1284_v36 = vpop.f32.mrf.mxu1 }
 0x28a   : > { %v1616_v35 = vmul.f32 %v1459_v44, %v3453_v6  ;;  %v1463_v53 = vsub.f32 1.0, %v1462_v55  ;;  %v1631_v6 = vmul.f32 %v1615_v0, %v3522_v46  ;;  %v1470_v46 = vand.u32 2147483647, %v3560_v20 }
 0x28b   : > { %vm1481_vm14 = vweird.f32 %v1362_v34  ;;  %vm1486_vm15 = vcmp.eq.f32.partialorder %v1485_v45, 8.507059e+37  ;;  %v1488_v23 = vor.u32 1.1754944e-38, %v1487_v52  ;;  %v1473_v20 = vor.u32 1.1754944e-38, %v1472_v12 }
 0x28c   : > { %v1464_v41 = vmul.f32 %v3586_v31, %v1463_v53  ;;  %v1632_v42 = vmul.f32 %v1616_v35, %v1279_v59  ;;  %vm1471_vm0 = vcmp.eq.f32.partialorder %v1470_v46, 8.507059e+37 }
 0x28d   : > { %v3595_v63 = vpop.f32.mrf.mxu0 }
 0x28e   : > { %v2604_v33 = vpop.eup %2603  ;;  %v2193_v38 = vmul.f32 -1.442695, %v3595_v63  ;;  %v1465_v3 = vadd.f32 %v3586_v31, %v1464_v41  ;;  %v1645_v47 = vpack.c.bf16 %v1632_v42, %v1631_v6 }
 0x28f   : > { %v2606_v8 = vpop.eup %2605  ;;  %v3599_v22 = vadd.f32 1.0, %v2604_v33 }
 0x290   : > { %v1477_v18 = vmul.f32 %v2606_v8, %v1362_v34  ;;  %2607 = vpow2.f32 %v2193_v38  ;;  %vm1482_vm10 = vweird.f32 %v2606_v8  ;;  %v1469_v26 = vsel %vm3610_vm12, %v3586_v31, %v1465_v3 }
 0x291   : > { %2609 = vrcp.f32 %v3599_v22  ;;  %vm1483_vm13 = vmor %vm1481_vm14, %vm1482_vm10  ;;  %v1474_v59 = vsel %vm1471_vm0, %v1473_v20, %v1469_v26  ;;  %v1287_v39 = vpop.f32.mrf.mxu1  ;;  %vm1496_vm3 = vweird.f32 %v3599_v22  ;;  %v1502_v61 = vand.u32 2147483648, %v3599_v22 }
 0x292   : > { %v1478_v10 = vsub.f32 1.0, %v1477_v18  ;;  %1749 = vmatmul.bf16.gmra.mxu2 %v1645_v47  ;;  %v1617_v62 = vmul.f32 %v1474_v59, %v3504_v13  ;;  %v1500_v4 = vand.u32 2147483647, %v3599_v22 }
 0x293   : > { %v1503_v33 = vor.u32 1.1754944e-38, %v1502_v61 }
 0x294   : > { %v1479_v15 = vmul.f32 %v2606_v8, %v1478_v10  ;;  %v1633_v32 = vmul.f32 %v1617_v62, %v1282_v37  ;;  %vm1501_vm8 = vcmp.eq.f32.partialorder %v1500_v4, 8.507059e+37  ;;  %v1666_v4 = vld [vmem:[#allocation4 + $0x48] sm:$0xff] }
 0x295   : > { %v3608_v48 = vpop.f32.mrf.mxu0 }
 0x296   : > { %v2608_v24 = vpop.eup %2607  ;;  %v1480_v29 = vadd.f32 %v2606_v8, %v1479_v15  ;;  %v2194_v17 = vmul.f32 -1.442695, %v3608_v48 }
 0x297   : > { %v2610_v60 = vpop.eup %2609  ;;  %v1364_v54 = vadd.f32 1.0, %v2608_v24 }
 0x298   : > { %v1484_v56 = vsel %vm1483_vm13, %v2606_v8, %v1480_v29  ;;  %v1492_v43 = vmul.f32 %v2610_v60, %v3599_v22  ;;  %2611 = vpow2.f32 %v2194_v17  ;;  %vm1497_vm1 = vweird.f32 %v2610_v60 }
 0x299   : > { %v1489_v11 = vsel %vm1486_vm15, %v1488_v23, %v1484_v56  ;;  %2613 = vrcp.f32 %v1364_v54  ;;  %v1515_v30 = vand.u32 2147483647, %v1364_v54  ;;  %v1517_v14 = vand.u32 2147483648, %v1364_v54  ;;  %vm3630_vm4 = vmor %vm1496_vm3, %vm1497_vm1  ;;  %v1289_v8 = vpop.f32.mrf.mxu1 }
 0x29a   : > { %v1618_v50 = vmul.f32 %v1489_v11, %v3546_v9  ;;  %v1493_v2 = vsub.f32 1.0, %v1492_v43  ;;  %vm1511_vm5 = vweird.f32 %v1364_v54 }
 0x29b   : > { %v1518_v57 = vor.u32 1.1754944e-38, %v1517_v14  ;;  %vm1516_vm7 = vcmp.eq.f32.partialorder %v1515_v30, 8.507059e+37  ;;  %v1654_v14 = vld [vmem:[#allocation4 + $0x58] sm:$0xff] }
 0x29c   : > { %v1494_v19 = vmul.f32 %v2610_v60, %v1493_v2  ;;  %v1634_v16 = vmul.f32 %v1618_v50, %v1284_v36  ;;  %v1651_v2 = vld [vmem:[#allocation4 + $0x30] sm:$0xff] }
 0x29d   : > { %v3621_v49 = vpop.f32.mrf.mxu0 }
 0x29e   : > { %v2612_v7 = vpop.eup %2611  ;;  %v2195_v25 = vmul.f32 -1.442695, %v3621_v49  ;;  %v1495_v34 = vadd.f32 %v2610_v60, %v1494_v19  ;;  %v1646_v13 = vpack.c.bf16 %v1634_v16, %v1633_v32 }
 0x29f   : > { %v2614_v1 = vpop.eup %2613  ;;  %v3625_v5 = vadd.f32 1.0, %v2612_v7 }
 0x2a0   : > { %v1507_v28 = vmul.f32 %v2614_v1, %v1364_v54  ;;  %2615 = vpow2.f32 %v2195_v25  ;;  %vm1512_vm2 = vweird.f32 %v2614_v1  ;;  %v1499_v53 = vsel %vm3630_vm4, %v2610_v60, %v1495_v34  ;;  %v1652_v25 = vld [vmem:[#allocation4] sm:$0xff]  ;;  %v1665_v34 = vld [vmem:[#allocation4 + $0x68] sm:$0xff] }
 0x2a1   : > { %2617 = vrcp.f32 %v3625_v5  ;;  %vm1513_vm6 = vmor %vm1511_vm5, %vm1512_vm2  ;;  %v1504_v38 = vsel %vm1501_vm8, %v1503_v33, %v1499_v53  ;;  %vm1526_vm11 = vweird.f32 %v3625_v5  ;;  %v1292_v46 = vpop.f32.mrf.mxu1  ;;  %v1656_v53 = vld [vmem:[#allocation4 + $0x28] sm:$0xff]  ;;  %v1657_v33 = vld [vmem:[#allocation4 + $0x38] sm:$0xff] }
 0x2a2   : > { %v1508_v9 = vsub.f32 1.0, %v1507_v28  ;;  %1754 = vmatmul.bf16.gmra.mxu2 %v1646_v13  ;;  %v1619_v18 = vmul.f32 %v1504_v38, %v3574_v51  ;;  %v1530_v51 = vand.u32 2147483647, %v3625_v5 }
 0x2a4   : > { %v1509_v31 = vmul.f32 %v2614_v1, %v1508_v9  ;;  %v1635_v52 = vmul.f32 %v1619_v18, %v1287_v39  ;;  %vm1531_vm0 = vcmp.eq.f32.partialorder %v1530_v51, 8.507059e+37  ;;  %v1664_v39 = vld [vmem:[#allocation4 + $0x10] sm:$0xff]  ;;  %v1659_v18 = vld [vmem:[#allocation4 + $0x78] sm:$0xff] }
 0x2a6   : > { %v2616_v21 = vpop.eup %2615  ;;  %v1510_v55 = vadd.f32 %v2614_v1, %v1509_v31 }
 0x2a7   : > { %v2618_v44 = vpop.eup %2617  ;;  %v1366_v35 = vadd.f32 1.0, %v2616_v21 }
 0x2a8   : > { %v1514_v40 = vsel %vm1513_vm6, %v2614_v1, %v1510_v55  ;;  %v1522_v37 = vmul.f32 %v2618_v44, %v3625_v5  ;;  %vm1527_vm9 = vweird.f32 %v2618_v44  ;;  %v1663_v1 = vld [vmem:[#allocation4 + $0x60] sm:$0xff] }
 0x2a9   : > { %v1519_v0 = vsel %vm1516_vm7, %v1518_v57, %v1514_v40  ;;  %2619 = vrcp.f32 %v1366_v35  ;;  %v1545_v15 = vand.u32 2147483647, %v1366_v35  ;;  %v1547_v47 = vand.u32 2147483648, %v1366_v35  ;;  %vm1528_vm12 = vmor %vm1526_vm11, %vm1527_vm9  ;;  %v1294_v20 = vpop.f32.mrf.mxu1 }
 0x2aa   : > { %v1620_v22 = vmul.f32 %v1519_v0, %v3595_v63  ;;  %v1523_v41 = vsub.f32 1.0, %v1522_v37  ;;  %v1532_v63 = vand.u32 2147483648, %v3625_v5  ;;  %vm1541_vm14 = vweird.f32 %v1366_v35 }
 0x2ab   : > { %v1548_v17 = vor.u32 1.1754944e-38, %v1547_v47  ;;  %vm1546_vm15 = vcmp.eq.f32.partialorder %v1545_v15, 8.507059e+37 }
 0x2ac   : > { %v1524_v6 = vmul.f32 %v2618_v44, %v1523_v41  ;;  %v1636_v45 = vmul.f32 %v1620_v22, %v1289_v8  ;;  %v1533_v54 = vor.u32 1.1754944e-38, %v1532_v63  ;;  %v1658_v8 = vld [vmem:[#allocation4 + $0x20] sm:$0xff] }
 0x2ae   : > { %v1525_v12 = vadd.f32 %v2618_v44, %v1524_v6  ;;  %v1647_v58 = vpack.c.bf16 %v1636_v45, %v1635_v52 }
 0x2af   : > { %v2620_v42 = vpop.eup %2619 }
 0x2b0   : > { %v1537_v10 = vmul.f32 %v2620_v42, %v1366_v35  ;;  %vm1542_vm10 = vweird.f32 %v2620_v42  ;;  %v1529_v60 = vsel %vm1528_vm12, %v2618_v44, %v1525_v12  ;;  %v1662_v12 = vld [vmem:[#allocation4 + $0x70] sm:$0xff] }
 0x2b1   : > { %vm1543_vm13 = vmor %vm1541_vm14, %vm1542_vm10  ;;  %v1534_v26 = vsel %vm1531_vm0, %v1533_v54, %v1529_v60 }
 0x2b2   : > { %v1538_v3 = vsub.f32 1.0, %v1537_v10  ;;  %1759 = vmatmul.bf16.gmra.mxu2 %v1647_v58  ;;  %v1621_v43 = vmul.f32 %v1534_v26, %v3608_v48  ;;  %v1660_v10 = vld [vmem:[#allocation4 + $0x50] sm:$0xff] }
 0x2b4   : > { %v1539_v24 = vmul.f32 %v2620_v42, %v1538_v3  ;;  %v1637_v59 = vmul.f32 %v1621_v43, %v1292_v46  ;;  %v1661_v3 = vld [vmem:[#allocation4 + $0x18] sm:$0xff] }
 0x2b6   : > { %v1540_v29 = vadd.f32 %v2620_v42, %v1539_v24 }
 0x2b8   : > { %v1544_v23 = vsel %vm1543_vm13, %v2620_v42, %v1540_v29 }
 0x2b9   : > { %v1549_v36 = vsel %vm1546_vm15, %v1548_v17, %v1544_v23 }
 0x2ba   : > { %v1622_v56 = vmul.f32 %v1549_v36, %v3621_v49  ;;  %v1653_v49 = vld [vmem:[#allocation4 + $0x40] sm:$0xff] }
 0x2bc   : > { %v1638_v11 = vmul.f32 %v1622_v56, %v1294_v20 }
 0x2be   : > { %v1648_v50 = vpack.c.bf16 %v1638_v11, %v1637_v59 }
 0x2c2   : > { %1764 = vmatmul.bf16.gmra.mxu2 %v1648_v50 }
 0x2f3   : > { %v1740_v7 = vpop.f32.mrf.mxu2 }
 0x2f4   : > { %v1780_v62 = vadd.f32 %v1740_v7, %v1651_v2 }
 0x2f6   : > { %1796 = vst [vmem:[#allocation4 + $0x30] sm:$0xff] %v1780_v62 }
 0x2fb   : > { %v1742_v5 = vpop.f32.mrf.mxu2  ;;  %v1770_v19 = vpop.f32.mrf.mxu3 }
 0x2fc   : > { %v1781_v28 = vadd.f32 %v1742_v5, %v1652_v25  ;;  %v1792_v16 = vadd.f32 %v1770_v19, %v1663_v1 }
 0x2fe   : > { %1797 = vst [vmem:[#allocation4] sm:$0xff] %v1781_v28 }
 0x2ff   : > { %1808 = vst [vmem:[#allocation4 + $0x60] sm:$0xff] %v1792_v16 }
 0x303   : > { %v1772_v32 = vpop.f32.mrf.mxu3 }
 0x304   : > { %v1793_v30 = vadd.f32 %v1772_v32, %v1664_v39 }
 0x305   : > { %v1745_v48 = vpop.f32.mrf.mxu2 }
 0x306   : > { %v1782_v9 = vadd.f32 %v1745_v48, %v1653_v49  ;;  %1809 = vst [vmem:[#allocation4 + $0x10] sm:$0xff] %v1793_v30 }
 0x308   : > { %1798 = vst [vmem:[#allocation4 + $0x40] sm:$0xff] %v1782_v9 }
 0x30c   : > { %v1775_v13 = vpop.f32.mrf.mxu3 }
 0x30d   : > { %v1747_v31 = vpop.f32.mrf.mxu2  ;;  %v1794_v21 = vadd.f32 %v1775_v13, %v1665_v34 }
 0x30e   : > { %v1783_v61 = vadd.f32 %v1747_v31, %v1654_v14 }
 0x30f   : > { %1810 = vst [vmem:[#allocation4 + $0x68] sm:$0xff] %v1794_v21 }
 0x310   : > { %1799 = vst [vmem:[#allocation4 + $0x58] sm:$0xff] %v1783_v61 }
 0x314   : > { %v1777_v44 = vpop.f32.mrf.mxu3 }
 0x315   : > { %v1750_v55 = vpop.f32.mrf.mxu2  ;;  %v1795_v35 = vadd.f32 %v1777_v44, %v1666_v4 }
 0x316   : > { %v1784_v57 = vadd.f32 %v1750_v55, %v1655_v27 }
 0x317   : > { %1811 = vst [vmem:[#allocation4 + $0x48] sm:$0xff] %v1795_v35 }
 0x318   : > { %1800 = vst [vmem:[#allocation4 + $0x8] sm:$0xff] %v1784_v57 }
 0x31d   : > { %v1752_v40 = vpop.f32.mrf.mxu2 }
 0x31e   : > { %v1785_v37 = vadd.f32 %v1752_v40, %v1656_v53 }
 0x320   : > { %1801 = vst [vmem:[#allocation4 + $0x28] sm:$0xff] %v1785_v37 }
 0x325   : > { %v1755_v0 = vpop.f32.mrf.mxu2 }
 0x326   : > { %v1786_v38 = vadd.f32 %v1755_v0, %v1657_v33 }
 0x328   : > { %1802 = vst [vmem:[#allocation4 + $0x38] sm:$0xff] %v1786_v38 }
 0x32d   : > { %v1757_v22 = vpop.f32.mrf.mxu2 }
 0x32e   : > { %v1787_v41 = vadd.f32 %v1757_v22, %v1658_v8 }
 0x330   : > { %1803 = vst [vmem:[#allocation4 + $0x20] sm:$0xff] %v1787_v41 }
 0x335   : > { %v1760_v42 = vpop.f32.mrf.mxu2 }
 0x336   : > { %v1788_v6 = vadd.f32 %v1760_v42, %v1659_v18 }
 0x338   : > { %1804 = vst [vmem:[#allocation4 + $0x78] sm:$0xff] %v1788_v6 }
 0x33d   : > { %v1762_v45 = vpop.f32.mrf.mxu2 }
 0x33e   : > { %v1789_v52 = vadd.f32 %v1762_v45, %v1660_v10 }
 0x340   : > { %1805 = vst [vmem:[#allocation4 + $0x50] sm:$0xff] %v1789_v52 }
 0x345   : > { %v1765_v15 = vpop.f32.mrf.mxu2 }
 0x346   : > { %v1790_v47 = vadd.f32 %v1765_v15, %v1661_v3 }
 0x348   : > { %1806 = vst [vmem:[#allocation4 + $0x18] sm:$0xff] %v1790_v47 }
 0x34c   : > { %1815 = sbr.rel (%p2232_p13) target bundleno = 866 (0x362), region = 94 }
 0x34d   : > { %v1767_v24 = vpop.f32.mrf.mxu2 }
 0x34e   : > { %v1791_v58 = vadd.f32 %v1767_v24, %v1662_v12 }
 0x350   : > { %1807 = vst [vmem:[#allocation4 + $0x70] sm:$0xff] %v1791_v58 }
 0x351   : > { %v1816_v63 = vld [vmem:[#allocation2 + $0x30] sm:$0xff]  ;;  %v1817_v46 = vld [vmem:[#allocation2] sm:$0xff]  ;;  %v1818_v60 = vld [vmem:[#allocation2 + $0x58] sm:$0xff] }
 0x352   : > { %v1832_v51 = vld [vmem:[#allocation4 + $0x30] sm:$0xff]  ;;  %v1833_v29 = vld [vmem:[#allocation4] sm:$0xff]  ;;  %v1819_v23 = vld [vmem:[#allocation2 + $0x18] sm:$0xff] }
 0x353   : > { %v1848_v17 = vadd.f32 %v1832_v51, %v1816_v63  ;;  %v1849_v54 = vadd.f32 %v1833_v29, %v1817_v46  ;;  %v1834_v36 = vld [vmem:[#allocation4 + $0x40] sm:$0xff]  ;;  %v1835_v26 = vld [vmem:[#allocation4 + $0x58] sm:$0xff]  ;;  %v1820_v56 = vld [vmem:[#allocation2 + $0x50] sm:$0xff] }
 0x354   : > { %v1850_v43 = vadd.f32 %v1834_v36, %v1818_v60  ;;  %v1851_v20 = vadd.f32 %v1835_v26, %v1819_v23  ;;  %v1821_v11 = vld [vmem:[#allocation2 + $0x68] sm:$0xff]  ;;  %v1838_v5 = vld [vmem:[#allocation4 + $0x38] sm:$0xff]  ;;  %v1839_v28 = vld [vmem:[#allocation4 + $0x20] sm:$0xff] }
 0x355   : > { %v1836_v59 = vld [vmem:[#allocation4 + $0x8] sm:$0xff]  ;;  %v2359_v2 = vpack.c.bf16 %v1849_v54, %v1848_v17  ;;  %v1824_v49 = vld [vmem:[#allocation2 + $0x40] sm:$0xff]  ;;  %v1840_v9 = vld [vmem:[#allocation4 + $0x78] sm:$0xff] }
 0x356   : > { %v1837_v50 = vld [vmem:[#allocation4 + $0x28] sm:$0xff]  ;;  %v1852_v7 = vadd.f32 %v1836_v59, %v1820_v56  ;;  %v2364_v19 = vpack.c.bf16 %v1851_v20, %v1850_v43  ;;  %v1825_v39 = vld [vmem:[#allocation2 + $0x20] sm:$0xff]  ;;  %v1841_v30 = vld [vmem:[#allocation4 + $0x50] sm:$0xff]  ;;  %v1856_v34 = vadd.f32 %v1840_v9, %v1824_v49 }
 0x357   : > { %v1853_v62 = vadd.f32 %v1837_v50, %v1821_v11  ;;  %v1822_v25 = vld [vmem:[#allocation2 + $0x8] sm:$0xff]  ;;  %2360 = vst [vmem:[%s2812_s27] sm:$0xff] %v2359_v2   ;;  %v1826_v14 = vld [vmem:[#allocation2 + $0x10] sm:$0xff]  ;;  %v1857_v31 = vadd.f32 %v1841_v30, %v1825_v39  ;;  %v1827_v13 = vld [vmem:[#allocation2 + $0x38] sm:$0xff] }
 0x358   : > { %v1823_v1 = vld [vmem:[#allocation2 + $0x48] sm:$0xff]  ;;  %v1854_v16 = vadd.f32 %v1838_v5, %v1822_v25  ;;  %2410 = vst [vmem:[%s2812_s27 + $0x8] sm:$0xff] %v2364_v19   ;;  %v1842_v61 = vld [vmem:[#allocation4 + $0x18] sm:$0xff]  ;;  %v1843_v21 = vld [vmem:[#allocation4 + $0x70] sm:$0xff] }
 0x359   : > { %v2369_v48 = vpack.c.bf16 %v1853_v62, %v1852_v7  ;;  %v1855_v32 = vadd.f32 %v1839_v28, %v1823_v1  ;;  %v1858_v4 = vadd.f32 %v1842_v61, %v1826_v14  ;;  %v1859_v55 = vadd.f32 %v1843_v21, %v1827_v13  ;;  %v1828_v44 = vld [vmem:[#allocation2 + $0x60] sm:$0xff]  ;;  %v1829_v57 = vld [vmem:[#allocation2 + $0x70] sm:$0xff]  ;;  %v1830_v33 = vld [vmem:[#allocation2 + $0x78] sm:$0xff] }
 0x35a   : > { %v1844_v35 = vld [vmem:[#allocation4 + $0x60] sm:$0xff]  ;;  %v2379_v53 = vpack.c.bf16 %v1857_v31, %v1856_v34  ;;  %v1845_v40 = vld [vmem:[#allocation4 + $0x10] sm:$0xff]  ;;  %v1831_v0 = vld [vmem:[#allocation2 + $0x28] sm:$0xff] }
 0x35b   : > { %2411 = vst [vmem:[%s2812_s27 + $0x10] sm:$0xff] %v2369_v48   ;;  %v2374_v27 = vpack.c.bf16 %v1855_v32, %v1854_v16  ;;  %v1860_v37 = vadd.f32 %v1844_v35, %v1828_v44  ;;  %v2384_v38 = vpack.c.bf16 %v1859_v55, %v1858_v4  ;;  %v1861_v8 = vadd.f32 %v1845_v40, %v1829_v57  ;;  %v1846_v22 = vld [vmem:[#allocation4 + $0x68] sm:$0xff] }
 0x35c   : > { %v1847_v41 = vld [vmem:[#allocation4 + $0x48] sm:$0xff]  ;;  %2413 = vst [vmem:[%s2812_s27 + $0x20] sm:$0xff] %v2379_v53   ;;  %v1862_v18 = vadd.f32 %v1846_v22, %v1830_v33 }
 0x35d   : > { %2412 = vst [vmem:[%s2812_s27 + $0x18] sm:$0xff] %v2374_v27   ;;  %v1863_v42 = vadd.f32 %v1847_v41, %v1831_v0  ;;  %v2389_v6 = vpack.c.bf16 %v1861_v8, %v1860_v37 }
 0x35e   : > { %2414 = vst [vmem:[%s2812_s27 + $0x28] sm:$0xff] %v2384_v38  }
 0x35f   : > { %v2394_v10 = vpack.c.bf16 %v1863_v42, %v1862_v18  ;;  %2415 = vst [vmem:[%s2812_s27 + $0x30] sm:$0xff] %v2389_v6  }
 0x361   : > { %2416 = vst [vmem:[%s2812_s27 + $0x38] sm:$0xff] %v2394_v10  }
 0x362 PF: > { %s17_s30 = sadd.s32 1, %s2675_s30   ;;  %s3731_s24 = smov %s2655_s25 }
 0x363   : > { %p14_p0 = scmp.ge.s32.totalorder %s17_s30, 10   ;;  %s3732_s25 = smov %s2768_s12 }
 0x364   : > { %s3733_s26 = smov %s2667_s28  ;;  %s3734_s27 = smov %s2671_s29 }
 0x365   : > { %s3735_s28 = smov %s3738_s8  ;;  %s3736_s29 = smov %s3742_s9 }
 0x366   :  { %16 = sbr.rel (!%p14_p0) target bundleno = 6 (0x6), region = 138 }

// kernel: pixtral_transformer_forward.11
= control target key start
LH: loop header
LB: loop body
LE: loop exit
PB: predicated region body
PF: predicated region fallthrough
CT: control target
= control target key end

     0   :  { %s3859_s0 = inlined_call_operand.vmem [shape: bf16[512,128], index: 0, kind: input, shape index: {}]   ;;  %s3860_s1 = inlined_call_operand.vmem [shape: bf16[512,128], index: 1, kind: input, shape index: {}]   ;;  %s3861_s2 = inlined_call_operand.vmem [shape: bf16[128,128], index: 2, kind: input, shape index: {}]   ;;  %s3862_s3 = inlined_call_operand.vmem [shape: bf16[1,128], index: 3, kind: input, shape index: {}]   ;;  %s3863_s4 = inlined_call_operand.vmem [shape: bf16[1,128], index: 4, kind: input, shape index: {}]   ;;  %s3864_s5 = inlined_call_operand.vmem [shape: bf16[128,512], index: 5, kind: input, shape index: {}]   ;;  %s3865_s6 = inlined_call_operand.vmem [shape: bf16[256,128], index: 6, kind: input, shape index: {}]   ;;  %s3866_s7 = inlined_call_operand.hbm [shape: bf16[512,128], index: 7, kind: output, shape index: {}]  }
   0x1   :  { %3874 = sst [smem:[#allocation17_spill]] %s3864_s5 }
   0x2   :  { %12 = vsyncpa [#allocation7], 0 }
   0x3   :  { %14 = vsyncpa [#allocation7 + $0x1], 0  ;;  %s2832_s24 = smov 0   ;;  %s2834_s25 = smov 0  }
   0x4   :  { %s2836_s26 = smov 0   ;;  %s2838_s27 = smov 0  }
   0x5   :  { %s2840_s28 = smov 0   ;;  %s2842_s29 = smov 0  }
   0x6   :  { %s2844_s30 = smov 0   ;;  %s2846_s8 = smov 0  }
   0x7   :  { %s2848_s9 = smov 0   ;;  %s2850_s10 = smov 0  }
   0x8 LB: > { %3875 = sst [smem:[#allocation9_spill]] %s2758_s26  ;;  %s2025_s11 = sadd.s32 4294967295, %s2786_s10   ;;  %s2786_s10 = sphi %s2850_s10, %s20_s10   ;;  %s2782_s9 = sphi %s2848_s9, %s3941_s9   ;;  %s2778_s8 = sphi %s2846_s8, %s3940_s8   ;;  %s2774_s30 = sphi %s2844_s30, %s3939_s30   ;;  %s2770_s29 = sphi %s2842_s29, %s3938_s29   ;;  %s2766_s28 = sphi %s2840_s28, %s3944_s28   ;;  %s2762_s27 = sphi %s2838_s27, %s3936_s27   ;;  %s2758_s26 = sphi %s2836_s26, %s3935_s26   ;;  %s2754_s25 = sphi %s2834_s25, %s3943_s25   ;;  %s2750_s24 = sphi %s2832_s24, %s3942_s24  }
   0x9   : > { %3876 = sst [smem:[#allocation10_spill]] %s2766_s28  ;;  %s2026_s12 = sadd.s32 4294967294, %s2786_s10  }
   0xa   : > { %3877 = sst [smem:[#allocation11_spill]] %s2778_s8  ;;  %s29_s13 = sadd.s32 1, %s2778_s8 }
   0xb   : > { %3878 = sst [smem:[#allocation12_spill]] %s2782_s9  ;;  %s32_s14 = sadd.s32 1, %s2782_s9 }
   0xc   : > { %p30_p0 = scmp.ge.s32.totalorder %s29_s13, 2  ;;  %s154_s15 = sadd.s32 1, %s2766_s28 }
   0xd   : > { %p161_p1 = scmp.ne.s32.totalorder %s2766_s28, %s2762_s27  ;;  %p162_p2 = scmp.eq.s32.totalorder %s2786_s10, 0 }
   0xe   : > { %s3946_s13 = smov (%p30_p0, %s29_s13), 0  ;;  %s3948_s14 = smov (!%p30_p0, %s32_s14), %s2782_s9 }
   0xf   : > { %3879 = sst [smem:[#allocation13_spill]] %s3946_s13  ;;  %s151_s16 = ssub.s32 %s2778_s8, %s3946_s13 }
  0x10   : > { %p2895_p3 = por %p162_p2, %p161_p1  ;;  %p34_p4 = scmp.ge.s32.totalorder %s3948_s14, 4 }
  0x11   : > { %p152_p5 = scmp.eq.s32.totalorder %s151_s16, 0  ;;  %s206_s18 = sadd.s32 1, %s2758_s26 }
  0x12   : > { %p216_p6 = scmp.ne.s32.totalorder %s2758_s26, %s2754_s25  ;;  %s3950_s14 = smov (%p34_p4, %s3948_s14), 0 }
  0x13   : > { %3881 = sst [smem:[#allocation14_spill]] %s3950_s14  ;;  %s203_s20 = ssub.s32 %s2782_s9, %s3950_s14 }
  0x14   : > { %s2905_s19 = scalar_select %p152_p5, %s2766_s28, %s154_s15  }
  0x15   : > { %p217_p7 = scmp.eq.s32.totalorder %s2025_s11, 7  ;;  %p204_p8 = scmp.eq.s32.totalorder %s203_s20, 0 }
  0x16   : > { %3882 = sst [smem:[#allocation15_spill]] %s2905_s19  ;;  %p222_p9 = scmp.ne.s32.totalorder %s2754_s25, %s2750_s24 }
  0x17   : > { %p2911_p10 = por %p217_p7, %p216_p6  ;;  %p223_p11 = scmp.eq.s32.totalorder %s2026_s12, 7 }
  0x18   : > { %s2916_s22 = scalar_select %p204_p8, %s2758_s26, %s206_s18  }
  0x19   : > { %p2918_p12 = por %p223_p11, %p222_p9  ;;  %p2028_p13 = scmp.ge.s32.totalorder %s2786_s10, 8 }
  0x1a   : > { %3884 = sst [smem:[#allocation16_spill]] %s2916_s22 }
  0x1b   : > { %248 = sbr.rel (%p2028_p13) target bundleno = 58 (0x3a), region = 28 }
  0x20   : > { %269 = sbr.rel (!%p2895_p3) target bundleno = 58 (0x3a), region = 40  ;;  %s271_s11 = sand.u32 (%p2895_p3), 1, %s2766_s28  }
  0x21   : > { %s2256_s15 = sshll.u32 (%p2895_p3), %s2778_s8, 3  ;;  %s2029_s16 = sshll.u32 (%p2895_p3), %s271_s11, 7 }
  0x22   : > { %s3886_s5 = sld [smem:[#allocation17_spill]] (%p2895_p3)  ;;  %s273_s17 = scalar_lea.vmem (%p2895_p3), [#allocation5], %s2029_s16 }
  0x28   : > { %s2930_s12 = scalar_lea.vmem %s3886_s5, %s2256_s15 }
  0x29   : > { %v335_v0 = vld [vmem:[%s2930_s12] sm:$0xff]  ;;  %v337_v1 = vld [vmem:[%s2930_s12 + $0x10] sm:$0xff] }
  0x2a   : > { %v339_v2 = vld [vmem:[%s2930_s12 + $0x20] sm:$0xff]  ;;  %336 = vst [vmem:[%s273_s17] sm:$0xff] %v335_v0  ;;  %v341_v3 = vld [vmem:[%s2930_s12 + $0x30] sm:$0xff] }
  0x2b   : > { %338 = vst [vmem:[%s273_s17 + $0x8] sm:$0xff] %v337_v1  ;;  %v343_v4 = vld [vmem:[%s2930_s12 + $0x40] sm:$0xff]  ;;  %v345_v5 = vld [vmem:[%s2930_s12 + $0x50] sm:$0xff] }
  0x2c   : > { %340 = vst [vmem:[%s273_s17 + $0x10] sm:$0xff] %v339_v2  ;;  %v347_v6 = vld [vmem:[%s2930_s12 + $0x60] sm:$0xff]  ;;  %v349_v7 = vld [vmem:[%s2930_s12 + $0x70] sm:$0xff] }
  0x2d   : > { %342 = vst [vmem:[%s273_s17 + $0x18] sm:$0xff] %v341_v3  ;;  %v351_v8 = vld [vmem:[%s2930_s12 + $0x80] sm:$0xff]  ;;  %v353_v9 = vld [vmem:[%s2930_s12 + $0x90] sm:$0xff] }
  0x2e   : > { %344 = vst [vmem:[%s273_s17 + $0x20] sm:$0xff] %v343_v4  ;;  %v355_v10 = vld [vmem:[%s2930_s12 + $0xa0] sm:$0xff]  ;;  %v357_v11 = vld [vmem:[%s2930_s12 + $0xb0] sm:$0xff] }
  0x2f   : > { %346 = vst [vmem:[%s273_s17 + $0x28] sm:$0xff] %v345_v5  ;;  %v359_v12 = vld [vmem:[%s2930_s12 + $0xc0] sm:$0xff]  ;;  %v361_v13 = vld [vmem:[%s2930_s12 + $0xd0] sm:$0xff] }
  0x30   : > { %348 = vst [vmem:[%s273_s17 + $0x30] sm:$0xff] %v347_v6  ;;  %v363_v14 = vld [vmem:[%s2930_s12 + $0xe0] sm:$0xff]  ;;  %v365_v15 = vld [vmem:[%s2930_s12 + $0xf0] sm:$0xff] }
  0x31   : > { %350 = vst [vmem:[%s273_s17 + $0x38] sm:$0xff] %v349_v7 }
  0x32   : > { %352 = vst [vmem:[%s273_s17 + $0x40] sm:$0xff] %v351_v8 }
  0x33   : > { %354 = vst [vmem:[%s273_s17 + $0x48] sm:$0xff] %v353_v9 }
  0x34   : > { %356 = vst [vmem:[%s273_s17 + $0x50] sm:$0xff] %v355_v10 }
  0x35   : > { %358 = vst [vmem:[%s273_s17 + $0x58] sm:$0xff] %v357_v11 }
  0x36   : > { %360 = vst [vmem:[%s273_s17 + $0x60] sm:$0xff] %v359_v12 }
  0x37   : > { %362 = vst [vmem:[%s273_s17 + $0x68] sm:$0xff] %v361_v13 }
  0x38   : > { %364 = vst [vmem:[%s273_s17 + $0x70] sm:$0xff] %v363_v14 }
  0x39   : > { %366 = vst [vmem:[%s273_s17 + $0x78] sm:$0xff] %v365_v15 }
  0x3a PF: > { %p2032_p0 = scmp.ge.s32.totalorder %s2786_s10, 1  ;;  %p380_p1 = scmp.lt.s32.totalorder %s2786_s10, 9 }
  0x3c   : > { %p381_p2 = pnand %p2032_p0, %p380_p1 }
  0x3d   : > { %s387_s14 = sand.u32 (!%p381_p2), 1, %s2762_s27   ;;  %s3871_s18 = sand.u32 (!%p381_p2), 1, %s2754_s25  }
  0x3e   : > { %384 = sbr.rel (%p381_p2) target bundleno = 893 (0x37d), region = 82  ;;  %s2033_s11 = sshll.u32 (!%p381_p2), %s387_s14, 7 }
  0x3f   : > { %s2034_s15 = sshll.u32 (!%p381_p2), %s3871_s18, 6  ;;  %s2035_s16 = sshll.u32 (!%p381_p2), %s2774_s30, 4 }
  0x40   : > { %s2039_s20 = sshll.u32 (!%p381_p2), %s2770_s29, 4  ;;  %p434_p3 = scmp.lt.s32.totalorder (!%p381_p2), %s2035_s16, 63 }
  0x41   : > { %p447_p4 = scmp.lt.s32.totalorder (!%p381_p2), %s2039_s20, 31  ;;  %s2971_s22 = scalar_lea.vmem (!%p381_p2), [#allocation5], %s2033_s11 }
  0x42   : > { %s2973_s26 = scalar_lea.vmem (!%p381_p2), [#allocation6], %s2034_s15  ;;  %p2041_p5 = scmp.ne.s32.totalorder (!%p381_p2), %s2770_s29, 0 }
  0x43   : > { %s3952_s16 = smov (!%p434_p3, %s2035_s16), 63  ;;  %s3954_s20 = smov (!%p447_p4, %s2039_s20), 31 }
  0x44   : > { %s2036_s12 = sshll.u32 %s3952_s16, 2  ;;  %s2040_s14 = sshll.u32 %s3954_s20, 2 }
  0x45   : > { %s2959_s13 = scalar_lea.vmem %s3859_s0, %s2036_s12  ;;  %s2964_s27 = scalar_lea.vmem %s3860_s1, %s2036_s12 }
  0x46   : > { %s2969_s28 = scalar_lea.vmem %s3865_s6, %s2040_s14  ;;  %456 = sbr.rel (%p2041_p5) target bundleno = 433 (0x1b1), region = 90 }
  0x4b   : > { %v2272_v16 = vld [vmem:[%s3861_s2 + $0x38] sm:$0xff]  ;;  %v2271_v17 = vld [vmem:[%s3861_s2 + $0x30] sm:$0xff]  ;;  %v2270_v18 = vld [vmem:[%s3861_s2 + $0x28] sm:$0xff] }
  0x4c   : > { %585 = vmatpush.bf16.msra.mxu0 %v2272_v16  ;;  %2439 = vmatpush.bf16.msra.mxu1 %v2272_v16  ;;  %v2269_v19 = vld [vmem:[%s3861_s2 + $0x20] sm:$0xff]  ;;  %v2268_v20 = vld [vmem:[%s3861_s2 + $0x18] sm:$0xff]  ;;  %v2267_v21 = vld [vmem:[%s3861_s2 + $0x10] sm:$0xff] }
  0x4d   : > { %2440 = vmatpush.bf16.msra.mxu2 %v2272_v16  ;;  %2441 = vmatpush.bf16.msra.mxu3 %v2272_v16  ;;  %v2266_v22 = vld [vmem:[%s3861_s2 + $0x8] sm:$0xff]  ;;  %v2265_v23 = vld [vmem:[%s3861_s2] sm:$0xff]  ;;  %v2259_v25 = vld [vmem:[%s2964_s27 + $0x10] sm:$0xff] }
  0x4e   : > { %v2257_v24 = vld [vmem:[%s2964_s27] sm:$0xff]  ;;  %v2263_v27 = vld [vmem:[%s2964_s27 + $0x30] sm:$0xff]  ;;  %v2258_v28 = vld [vmem:[%s2964_s27 + $0x8] sm:$0xff] }
  0x4f   : > { %v2261_v26 = vld [vmem:[%s2964_s27 + $0x20] sm:$0xff]  ;;  %v2260_v29 = vld [vmem:[%s2964_s27 + $0x18] sm:$0xff]  ;;  %v2262_v30 = vld [vmem:[%s2964_s27 + $0x28] sm:$0xff] }
  0x50   : > { %586 = vmatpush.bf16.msra.mxu0 %v2271_v17  ;;  %2442 = vmatpush.bf16.msra.mxu1 %v2271_v17  ;;  %v2264_v31 = vld [vmem:[%s2964_s27 + $0x38] sm:$0xff]  ;;  %v682_v32 = vld [vmem:[%s3862_s3] sm:$0x1]  ;;  %v2419_v34 = vld [vmem:[%s2959_s13 + $0x10] sm:$0xff]  }
  0x51   : > { %2443 = vmatpush.bf16.msra.mxu2 %v2271_v17  ;;  %2444 = vmatpush.bf16.msra.mxu3 %v2271_v17  ;;  %v2307_v33 = vld [vmem:[%s2959_s13] sm:$0xff]   ;;  %v683_v35 = vunpack.c.l.bf16 %v682_v32  ;;  %v2316_v37 = vunpack.c.l.bf16 %v2419_v34  ;;  %v2423_v44 = vld [vmem:[%s2959_s13 + $0x30] sm:$0xff]   ;;  %v2317_v52 = vunpack.c.h.bf16 %v2419_v34  ;;  %v2418_v63 = vld [vmem:[%s2959_s13 + $0x8] sm:$0xff]  }
  0x52   : > { %v2308_v36 = vunpack.c.l.bf16 %v2307_v33  ;;  %v2421_v43 = vld [vmem:[%s2959_s13 + $0x20] sm:$0xff]   ;;  %v2332_v48 = vunpack.c.l.bf16 %v2423_v44  ;;  %v2309_v51 = vunpack.c.h.bf16 %v2307_v33  ;;  %v2420_v0 = vld [vmem:[%s2959_s13 + $0x18] sm:$0xff]   ;;  %v2333_v6 = vunpack.c.h.bf16 %v2423_v44  ;;  %v2422_v16 = vld [vmem:[%s2959_s13 + $0x28] sm:$0xff]  }
  0x53   : > { %v3013_v38 = vperm.slane %v683_v35, 0  ;;  %v2324_v47 = vunpack.c.l.bf16 %v2421_v43  ;;  %v2325_v3 = vunpack.c.h.bf16 %v2421_v43  ;;  %v2312_v7 = vunpack.c.l.bf16 %v2418_v63 }
  0x54   : > { %587 = vmatpush.bf16.msra.mxu0 %v2270_v18  ;;  %2445 = vmatpush.bf16.msra.mxu1 %v2270_v18  ;;  %v2320_v8 = vunpack.c.l.bf16 %v2420_v0 }
  0x55   : > { %2446 = vmatpush.bf16.msra.mxu2 %v2270_v18  ;;  %2447 = vmatpush.bf16.msra.mxu3 %v2270_v18 }
  0x58   : > { %588 = vmatpush.bf16.msra.mxu0 %v2269_v19  ;;  %2448 = vmatpush.bf16.msra.mxu1 %v2269_v19 }
  0x59   : > { %2449 = vmatpush.bf16.msra.mxu2 %v2269_v19  ;;  %2450 = vmatpush.bf16.msra.mxu3 %v2269_v19 }
  0x5c   : > { %589 = vmatpush.bf16.msra.mxu0 %v2268_v20  ;;  %2451 = vmatpush.bf16.msra.mxu1 %v2268_v20 }
  0x5d   : > { %2452 = vmatpush.bf16.msra.mxu2 %v2268_v20  ;;  %2453 = vmatpush.bf16.msra.mxu3 %v2268_v20  ;;  %v2424_v20 = vld [vmem:[%s2959_s13 + $0x38] sm:$0xff]  }
  0x5e   : > { %v2337_v44 = vunpack.c.h.bf16 %v2424_v20 }
  0x60   : > { %590 = vmatpush.bf16.msra.mxu0 %v2267_v21  ;;  %2454 = vmatpush.bf16.msra.mxu1 %v2267_v21 }
  0x61   : > { %2455 = vmatpush.bf16.msra.mxu2 %v2267_v21  ;;  %2456 = vmatpush.bf16.msra.mxu3 %v2267_v21 }
  0x64   : > { %591 = vmatpush.bf16.msra.mxu0 %v2266_v22  ;;  %2457 = vmatpush.bf16.msra.mxu1 %v2266_v22 }
  0x65   : > { %2458 = vmatpush.bf16.msra.mxu2 %v2266_v22  ;;  %2459 = vmatpush.bf16.msra.mxu3 %v2266_v22 }
  0x68   : > { %592 = vmatpush.bf16.msra.mxu0 %v2265_v23  ;;  %2460 = vmatpush.bf16.msra.mxu1 %v2265_v23 }
  0x69   : > { %2461 = vmatpush.bf16.msra.mxu2 %v2265_v23  ;;  %2462 = vmatpush.bf16.msra.mxu3 %v2265_v23 }
  0x6b   : > { %593 = vmatmul.bf16.vlgmr.msra.gmra.mxu0 %v2257_v24  ;;  %603 = vmatmul.bf16.vlgmr.msra.gmra.mxu1 %v2259_v25  ;;  %v2328_v24 = vunpack.c.l.bf16 %v2422_v16  ;;  %v2313_v25 = vunpack.c.h.bf16 %v2418_v63  ;;  %v2788_v63 = vmov 128.0  }
  0x6c   : > { %613 = vmatmul.bf16.vlgmr.msra.gmra.mxu2 %v2261_v26  ;;  %623 = vmatmul.bf16.vlgmr.msra.gmra.mxu3 %v2263_v27  ;;  %2578 = vrcp.f32 %v2788_v63 }
  0x7b   : > { %598 = vmatmul.bf16.gmra.mxu0 %v2258_v28  ;;  %608 = vmatmul.bf16.gmra.mxu1 %v2260_v29  ;;  %v2321_v28 = vunpack.c.h.bf16 %v2420_v0  ;;  %v2336_v29 = vunpack.c.l.bf16 %v2424_v20  ;;  %v2579_v0 = vpop.eup %2578 }
  0x7c   : > { %618 = vmatmul.bf16.gmra.mxu2 %v2262_v30  ;;  %628 = vmatmul.bf16.gmra.mxu3 %v2264_v31  ;;  %vm770_vm0 = vweird.f32 %v2579_v0 }
  0xe8   : > { %v594_v39 = vpop.f32.mrf.mxu0  ;;  %v604_v40 = vpop.f32.mrf.mxu1 }
  0xe9   : > { %v666_v41 = vadd.f32 %v2308_v36, %v594_v39  ;;  %v670_v42 = vadd.f32 %v2316_v37, %v604_v40 }
  0xeb   : > { %v3018_v45 = vadd.f32 %v3013_v38, %v666_v41  ;;  %v3021_v46 = vadd.f32 %v3013_v38, %v670_v42  ;;  %v2329_v42 = vunpack.c.h.bf16 %v2422_v16 }
  0xed   : > { %701 = vst [vmem:[#allocation2 + $0x30] sm:$0xff] %v3018_v45  ;;  %v721_v49 = vmul.f32 %v3021_v46, %v3021_v46  ;;  %v717_v50 = vmul.f32 %v3018_v45, %v3018_v45 }
  0xee   : > { %705 = vst [vmem:[#allocation2 + $0x50] sm:$0xff] %v3021_v46 }
  0xef   : > { %v614_v53 = vpop.f32.mrf.mxu2  ;;  %741 = vadd.xlane.f32.xlu2 %v721_v49  ;;  %733 = vadd.xlane.f32.xlu0 %v717_v50  ;;  %v624_v54 = vpop.f32.mrf.mxu3 }
  0xf0   : > { %v674_v55 = vadd.f32 %v2324_v47, %v614_v53  ;;  %v596_v56 = vpop.f32.mrf.mxu0  ;;  %v678_v57 = vadd.f32 %v2332_v48, %v624_v54  ;;  %v606_v58 = vpop.f32.mrf.mxu1 }
  0xf1   : > { %v667_v59 = vadd.f32 %v2309_v51, %v596_v56  ;;  %v671_v60 = vadd.f32 %v2317_v52, %v606_v58 }
  0xf2   : > { %v3030_v61 = vadd.f32 %v3013_v38, %v674_v55  ;;  %v3033_v62 = vadd.f32 %v3013_v38, %v678_v57 }
  0xf3   : > { %v3038_v1 = vadd.f32 %v3013_v38, %v667_v59  ;;  %v3041_v2 = vadd.f32 %v3013_v38, %v671_v60 }
  0xf4   : > { %709 = vst [vmem:[#allocation2 + $0x40] sm:$0xff] %v3030_v61  ;;  %v725_v4 = vmul.f32 %v3030_v61, %v3030_v61  ;;  %v729_v5 = vmul.f32 %v3033_v62, %v3033_v62 }
  0xf5   : > { %702 = vst [vmem:[#allocation2] sm:$0xff] %v3038_v1  ;;  %v722_v22 = vmul.f32 %v3041_v2, %v3041_v2  ;;  %v718_v26 = vmul.f32 %v3038_v1, %v3038_v1 }
  0xf6   : > { %713 = vst [vmem:[#allocation2 + $0x60] sm:$0xff] %v3033_v62 }
  0xf7   : > { %v616_v9 = vpop.f32.mrf.mxu2  ;;  %749 = vadd.xlane.f32.xlu2 %v725_v4  ;;  %757 = vadd.xlane.f32.xlu0 %v729_v5  ;;  %706 = vst [vmem:[#allocation2 + $0x68] sm:$0xff] %v3041_v2  ;;  %v626_v10 = vpop.f32.mrf.mxu3 }
  0xf8   : > { %v675_v11 = vadd.f32 %v2325_v3, %v616_v9  ;;  %v599_v12 = vpop.f32.mrf.mxu0  ;;  %v679_v13 = vadd.f32 %v2333_v6, %v626_v10  ;;  %v609_v14 = vpop.f32.mrf.mxu1  ;;  %v766_v3 = vmul.f32 128.0, %v2579_v0 }
  0xf9   : > { %v668_v15 = vadd.f32 %v2312_v7, %v599_v12  ;;  %v672_v17 = vadd.f32 %v2320_v8, %v609_v14 }
  0xfa   : > { %v3053_v18 = vadd.f32 %v3013_v38, %v675_v11  ;;  %v3056_v19 = vadd.f32 %v3013_v38, %v679_v13  ;;  %v767_v4 = vsub.f32 1.0, %v766_v3 }
  0xfb   : > { %v3060_v21 = vadd.f32 %v3013_v38, %v668_v15  ;;  %v3065_v23 = vadd.f32 %v3013_v38, %v672_v17 }
  0xfc   : > { %710 = vst [vmem:[#allocation2 + $0x20] sm:$0xff] %v3053_v18  ;;  %v726_v47 = vmul.f32 %v3053_v18, %v3053_v18  ;;  %v730_v60 = vmul.f32 %v3056_v19, %v3056_v19  ;;  %v768_v5 = vmul.f32 %v2579_v0, %v767_v4 }
  0xfd   : > { %703 = vst [vmem:[#allocation2 + $0x58] sm:$0xff] %v3060_v21  ;;  %v719_v27 = vmul.f32 %v3060_v21, %v3060_v21  ;;  %v723_v55 = vmul.f32 %v3065_v23, %v3065_v23 }
  0xfe   : > { %714 = vst [vmem:[#allocation2 + $0x70] sm:$0xff] %v3056_v19  ;;  %v769_v6 = vadd.f32 %v2579_v0, %v768_v5 }
  0xff   : > { %v619_v30 = vpop.f32.mrf.mxu2  ;;  %743 = vadd.xlane.f32.xlu2 %v722_v22  ;;  %735 = vadd.xlane.f32.xlu0 %v718_v26  ;;  %707 = vst [vmem:[#allocation2 + $0x8] sm:$0xff] %v3065_v23  ;;  %v629_v31 = vpop.f32.mrf.mxu3 }
 0x100   : > { %v676_v32 = vadd.f32 %v2328_v24, %v619_v30  ;;  %737 = vadd.xlane.f32.xlu1 %v719_v27  ;;  %v601_v33 = vpop.f32.mrf.mxu0  ;;  %v611_v34 = vpop.f32.mrf.mxu1  ;;  %v680_v37 = vadd.f32 %v2336_v29, %v629_v31  ;;  %v3117_v7 = vsel %vm770_vm0, %v2579_v0, %v769_v6 }
 0x101   : > { %v669_v35 = vadd.f32 %v2313_v25, %v601_v33  ;;  %v673_v36 = vadd.f32 %v2321_v28, %v611_v34 }
 0x102   : > { %v3076_v39 = vadd.f32 %v3013_v38, %v676_v32  ;;  %v3091_v48 = vadd.f32 %v3013_v38, %v680_v37 }
 0x103   : > { %v3079_v40 = vadd.f32 %v3013_v38, %v669_v35  ;;  %v3082_v41 = vadd.f32 %v3013_v38, %v673_v36 }
 0x104   : > { %711 = vst [vmem:[#allocation2 + $0x10] sm:$0xff] %v3076_v39  ;;  %v727_v43 = vmul.f32 %v3076_v39, %v3076_v39 }
 0x105   : > { %704 = vst [vmem:[#allocation2 + $0x18] sm:$0xff] %v3079_v40  ;;  %v720_v57 = vmul.f32 %v3079_v40, %v3079_v40  ;;  %v724_v59 = vmul.f32 %v3082_v41, %v3082_v41 }
 0x106   : > { %708 = vst [vmem:[#allocation2 + $0x48] sm:$0xff] %v3082_v41 }
 0x107   : > { %v621_v49 = vpop.f32.mrf.mxu2  ;;  %751 = vadd.xlane.f32.xlu0 %v726_v47  ;;  %715 = vst [vmem:[#allocation2 + $0x78] sm:$0xff] %v3091_v48  ;;  %v631_v50 = vpop.f32.mrf.mxu3 }
 0x108   : > { %v677_v51 = vadd.f32 %v2329_v42, %v621_v49  ;;  %753 = vadd.xlane.f32.xlu1 %v727_v43  ;;  %v681_v52 = vadd.f32 %v2337_v44, %v631_v50 }
 0x10a   : > { %v3096_v53 = vadd.f32 %v3013_v38, %v677_v51  ;;  %v3099_v54 = vadd.f32 %v3013_v38, %v681_v52  ;;  %v731_v38 = vmul.f32 %v3091_v48, %v3091_v48  ;;  %v980_v51 = vld [vmem:[%s3863_s4] sm:$0x1] }
 0x10c   : > { %712 = vst [vmem:[#allocation2 + $0x38] sm:$0xff] %v3096_v53  ;;  %v728_v56 = vmul.f32 %v3096_v53, %v3096_v53  ;;  %v732_v58 = vmul.f32 %v3099_v54, %v3099_v54 }
 0x10d   : > { %716 = vst [vmem:[#allocation2 + $0x28] sm:$0xff] %v3099_v54 }
 0x10e   : > { %755 = vadd.xlane.f32.xlu2 %v728_v56 }
 0x10f   : > { %745 = vadd.xlane.f32.xlu0 %v723_v55 }
 0x110   : > { %739 = vadd.xlane.f32.xlu1 %v720_v57 }
 0x116   : > { %761 = vadd.xlane.f32.xlu2 %v731_v38 }
 0x117   : > { %763 = vadd.xlane.f32.xlu0 %v732_v58 }
 0x118   : > { %747 = vadd.xlane.f32.xlu1 %v724_v59 }
 0x120   : > { %759 = vadd.xlane.f32.xlu1 %v730_v60  ;;  %v981_v60 = vunpack.c.l.bf16 %v980_v51 }
 0x162   : > { %v742_v8 = vpop.xlane.xlu2 %741  ;;  %v734_v9 = vpop.xlane.xlu0 %733 }
 0x163   : > { %v776_v10 = vmul.f32 %v3117_v7, %v742_v8  ;;  %v772_v11 = vmul.f32 %v3117_v7, %v734_v9 }
 0x165   : > { %v792_v12 = vadd.f32 1e-05, %v776_v10  ;;  %v3121_v13 = vadd.f32 1e-05, %v772_v11 }
 0x167   : > { %2580 = vrsqrt.f32 %v792_v12  ;;  %vm850_vm1 = vweird.f32 %v792_v12  ;;  %vm810_vm5 = vweird.f32 %v3121_v13 }
 0x168   : > { %2582 = vrsqrt.f32 %v3121_v13 }
 0x16a   : > { %v750_v14 = vpop.xlane.xlu2 %749  ;;  %v758_v15 = vpop.xlane.xlu0 %757 }
 0x16b   : > { %v780_v16 = vmul.f32 %v3117_v7, %v750_v14  ;;  %v784_v25 = vmul.f32 %v3117_v7, %v758_v15 }
 0x16d   : > { %v3125_v17 = vpop.eup %2580  ;;  %v3127_v20 = vadd.f32 1e-05, %v780_v16  ;;  %v3138_v29 = vadd.f32 1e-05, %v784_v25  ;;  %v3187_v16 = vperm.slane %v981_v60, 0 }
 0x16e   : > { %v3129_v22 = vpop.eup %2582  ;;  %v845_v24 = vmul.f32 %v3125_v17, %v792_v12  ;;  %vm851_vm2 = vweird.f32 %v3125_v17 }
 0x16f   : > { %v805_v26 = vmul.f32 %v3129_v22, %v3121_v13  ;;  %2584 = vrsqrt.f32 %v3127_v20  ;;  %vm3166_vm3 = vmor %vm850_vm1, %vm851_vm2  ;;  %vm811_vm4 = vweird.f32 %v3129_v22  ;;  %vm890_vm7 = vweird.f32 %v3127_v20 }
 0x170   : > { %v846_v27 = vmul.f32 %v3125_v17, %v845_v24  ;;  %2586 = vrsqrt.f32 %v3138_v29  ;;  %vm3193_vm6 = vmor %vm810_vm5, %vm811_vm4 }
 0x171   : > { %v806_v28 = vmul.f32 %v3129_v22, %v805_v26 }
 0x172   : > { %v744_v30 = vpop.xlane.xlu2 %743  ;;  %v736_v31 = vpop.xlane.xlu0 %735  ;;  %v847_v32 = vmul.f32 0.5, %v846_v27 }
 0x173   : > { %v777_v33 = vmul.f32 %v3117_v7, %v744_v30  ;;  %v773_v34 = vmul.f32 %v3117_v7, %v736_v31  ;;  %v738_v35 = vpop.xlane.xlu1 %737  ;;  %v807_v44 = vmul.f32 0.5, %v806_v28 }
 0x174   : > { %v774_v36 = vmul.f32 %v3117_v7, %v738_v35  ;;  %v848_v50 = vsub.f32 1.5, %v847_v32 }
 0x175   : > { %v3143_v37 = vpop.eup %2584  ;;  %v3145_v42 = vadd.f32 1e-05, %v777_v33  ;;  %v3147_v43 = vadd.f32 1e-05, %v773_v34  ;;  %v808_v52 = vsub.f32 1.5, %v807_v44 }
 0x176   : > { %v885_v47 = vmul.f32 %v3143_v37, %v3127_v20  ;;  %v3152_v49 = vadd.f32 1e-05, %v774_v36  ;;  %v849_v57 = vmul.f32 %v3125_v17, %v848_v50  ;;  %v3164_v59 = vpop.eup %2586  ;;  %vm891_vm8 = vweird.f32 %v3143_v37 }
 0x177   : > { %2588 = vrsqrt.f32 %v3145_v42  ;;  %v809_v6 = vmul.f32 %v3129_v22, %v808_v52  ;;  %v925_v12 = vmul.f32 %v3164_v59, %v3138_v29  ;;  %vm860_vm9 = vweird.f32 %v3145_v42  ;;  %vm3238_vm15 = vmor %vm890_vm7, %vm891_vm8 }
 0x178   : > { %2590 = vrsqrt.f32 %v3147_v43  ;;  %v886_v55 = vmul.f32 %v3143_v37, %v885_v47  ;;  %v853_v11 = vsel %vm3166_vm3, %v3125_v17, %v849_v57  ;;  %vm820_vm11 = vweird.f32 %v3147_v43 }
 0x179   : > { %2592 = vrsqrt.f32 %v3152_v49  ;;  %v968_v27 = vmul.f32 %v853_v11, %v3021_v46  ;;  %v813_v13 = vsel %vm3193_vm6, %v3129_v22, %v809_v6  ;;  %v926_v32 = vmul.f32 %v3164_v59, %v925_v12 }
 0x17a   : > { %v752_v56 = vpop.xlane.xlu0 %751  ;;  %v887_v8 = vmul.f32 0.5, %v886_v55  ;;  %v964_v22 = vmul.f32 %v813_v13, %v3018_v45  ;;  %vm830_vm2 = vweird.f32 %v3152_v49 }
 0x17b   : > { %v781_v38 = vmul.f32 %v3117_v7, %v752_v56  ;;  %v754_v58 = vpop.xlane.xlu1 %753 }
 0x17c   : > { %v782_v0 = vmul.f32 %v3117_v7, %v754_v58  ;;  %v888_v28 = vsub.f32 1.5, %v887_v8 }
 0x17d   : > { %v2589_v3 = vpop.eup %2588  ;;  %v3172_v4 = vadd.f32 1e-05, %v781_v38 }
 0x17e   : > { %v2591_v5 = vpop.eup %2590  ;;  %v855_v9 = vmul.f32 %v2589_v3, %v3145_v42  ;;  %v3176_v10 = vadd.f32 1e-05, %v782_v0  ;;  %vm861_vm10 = vweird.f32 %v2589_v3  ;;  %v889_v55 = vmul.f32 %v3143_v37, %v888_v28 }
 0x17f   : > { %v815_v14 = vmul.f32 %v2591_v5, %v3147_v43  ;;  %2594 = vrsqrt.f32 %v3172_v4  ;;  %v3185_v15 = vpop.eup %2592  ;;  %vm821_vm12 = vweird.f32 %v2591_v5  ;;  %vm862_vm13 = vmor %vm860_vm9, %vm861_vm10  ;;  %v987_v0 = vmul.f32 %v3187_v16, %v968_v27 }
 0x180   : > { %v856_v24 = vmul.f32 %v2589_v3, %v855_v9  ;;  %2596 = vrsqrt.f32 %v3176_v10  ;;  %v825_v34 = vmul.f32 %v3185_v15, %v3152_v49  ;;  %vm822_vm14 = vmor %vm820_vm11, %vm821_vm12  ;;  %v983_v42 = vmul.f32 %v3187_v16, %v964_v22 }
 0x181   : > { %v816_v25 = vmul.f32 %v2591_v5, %v815_v14  ;;  %v756_v26 = vpop.xlane.xlu2 %755  ;;  %v893_v14 = vsel %vm3238_vm15, %v3143_v37, %v889_v55  ;;  %vm900_vm1 = vweird.f32 %v3172_v4  ;;  %vm910_vm5 = vweird.f32 %v3176_v10 }
 0x182   : > { %v857_v30 = vmul.f32 0.5, %v856_v24  ;;  %v746_v31 = vpop.xlane.xlu0 %745  ;;  %v783_v35 = vmul.f32 %v3117_v7, %v756_v26  ;;  %v826_v45 = vmul.f32 %v3185_v15, %v825_v34  ;;  %vm831_vm6 = vweird.f32 %v3185_v15 }
 0x183   : > { %v817_v33 = vmul.f32 0.5, %v816_v25  ;;  %v740_v36 = vpop.xlane.xlu1 %739  ;;  %v778_v46 = vmul.f32 %v3117_v7, %v746_v31  ;;  %vm3319_vm9 = vmor %vm830_vm2, %vm831_vm6 }
 0x184   : > { %v858_v44 = vsub.f32 1.5, %v857_v30  ;;  %v3213_v51 = vadd.f32 1e-05, %v783_v35  ;;  %v775_v63 = vmul.f32 %v3117_v7, %v740_v36  ;;  %v827_v25 = vmul.f32 0.5, %v826_v45 }
 0x185   : > { %v3210_v47 = vpop.eup %2594  ;;  %v818_v50 = vsub.f32 1.5, %v817_v33  ;;  %v3220_v38 = vadd.f32 1e-05, %v778_v46  ;;  %v972_v33 = vmul.f32 %v893_v14, %v3030_v61 }
 0x186   : > { %v3215_v52 = vpop.eup %2596  ;;  %v859_v56 = vmul.f32 %v2589_v3, %v858_v44  ;;  %v895_v57 = vmul.f32 %v3210_v47, %v3172_v4  ;;  %2598 = vrsqrt.f32 %v3213_v51  ;;  %v3250_v27 = vadd.f32 1e-05, %v775_v63 }
 0x187   : > { %v819_v58 = vmul.f32 %v2591_v5, %v818_v50  ;;  %v905_v60 = vmul.f32 %v3215_v52, %v3176_v10  ;;  %2600 = vrsqrt.f32 %v3220_v38  ;;  %vm901_vm0 = vweird.f32 %v3210_v47 }
 0x188   : > { %v863_v6 = vsel %vm862_vm13, %v2589_v3, %v859_v56  ;;  %v896_v8 = vmul.f32 %v3210_v47, %v895_v57  ;;  %2602 = vrsqrt.f32 %v3250_v27  ;;  %v3264_v44 = vmul.f32 0.5, %v926_v32  ;;  %vm902_vm3 = vmor %vm900_vm1, %vm901_vm0 }
 0x189   : > { %v969_v11 = vmul.f32 %v863_v6, %v3041_v2  ;;  %v823_v3 = vsel %vm822_vm14, %v2591_v5, %v819_v58  ;;  %v906_v43 = vmul.f32 %v3215_v52, %v905_v60  ;;  %v762_v12 = vpop.xlane.xlu2 %761  ;;  %v828_v46 = vsub.f32 1.5, %v827_v25 }
 0x18a   : > { %v965_v24 = vmul.f32 %v823_v3, %v3038_v1  ;;  %v897_v17 = vmul.f32 0.5, %v896_v8  ;;  %v786_v28 = vmul.f32 %v3117_v7, %v762_v12  ;;  %v764_v37 = vpop.xlane.xlu0 %763  ;;  %vm911_vm4 = vweird.f32 %v3215_v52 }
 0x18b   : > { %v988_v20 = vmul.f32 %v3187_v16, %v969_v11  ;;  %v907_v26 = vmul.f32 0.5, %v906_v43  ;;  %v748_v2 = vpop.xlane.xlu1 %747  ;;  %v787_v22 = vmul.f32 %v3117_v7, %v764_v37  ;;  %v991_v45 = vmul.f32 %v3187_v16, %v972_v33  ;;  %vm3296_vm7 = vmor %vm910_vm5, %vm911_vm4 }
 0x18c   : > { %v984_v5 = vmul.f32 %v3187_v16, %v965_v24  ;;  %v898_v13 = vsub.f32 1.5, %v897_v17  ;;  %v3257_v31 = vpop.eup %2598  ;;  %v3262_v36 = vadd.f32 1e-05, %v786_v28  ;;  %v779_v32 = vmul.f32 %v3117_v7, %v748_v2 }
 0x18d   : > { %v2351_v30 = vpack.c.bf16 %v988_v20, %v987_v0  ;;  %v908_v1 = vsub.f32 1.5, %v907_v26  ;;  %v915_v4 = vmul.f32 %v3257_v31, %v3213_v51  ;;  %v3271_v61 = vpop.eup %2600  ;;  %v2789_v11 = vmov 0.0  }
 0x18e   : > { %v2341_v34 = vpack.c.bf16 %v984_v5, %v983_v42  ;;  %v899_v35 = vmul.f32 %v3210_v47, %v898_v13  ;;  %2604 = vrsqrt.f32 %v3262_v36  ;;  %v865_v58 = vmul.f32 %v3271_v61, %v3220_v38  ;;  %v3288_v63 = vpop.eup %2602  ;;  %1031 = vst [vmem:[#allocation4 + $0x30] sm:$0xff] %v2789_v11 }
 0x18f   : > { %2426 = vst [vmem:[#allocation3 + $0x10] sm:$0xff] %v2351_v30   ;;  %v909_v56 = vmul.f32 %v3215_v52, %v908_v1  ;;  %v916_v57 = vmul.f32 %v3257_v31, %v915_v4  ;;  %v3286_v60 = vadd.f32 1e-05, %v779_v32  ;;  %v829_v42 = vmul.f32 %v3185_v15, %v828_v46 }
 0x190   : > { %2342 = vst [vmem:[#allocation3 + $0x28] sm:$0xff] %v2341_v34   ;;  %v903_v50 = vsel %vm902_vm3, %v3210_v47, %v899_v35  ;;  %v3284_v47 = vadd.f32 1e-05, %v787_v22  ;;  %v866_v6 = vmul.f32 %v3271_v61, %v865_v58  ;;  %v835_v9 = vmul.f32 %v3288_v63, %v3250_v27 }
 0x191   : > { %v973_v55 = vmul.f32 %v903_v50, %v3053_v18  ;;  %v917_v18 = vmul.f32 0.5, %v916_v57  ;;  %v913_v43 = vsel %vm3296_vm7, %v3215_v52, %v909_v56  ;;  %vm921_vm8 = vweird.f32 %v3257_v31  ;;  %1032 = vst [vmem:[#allocation4] sm:$0xff] %v2789_v11 }
 0x192   : > { %2606 = vrsqrt.f32 %v3284_v47  ;;  %v867_v24 = vmul.f32 0.5, %v866_v6  ;;  %v836_v17 = vmul.f32 %v3288_v63, %v835_v9  ;;  %1033 = vst [vmem:[#allocation4 + $0x40] sm:$0xff] %v2789_v11  ;;  %vm920_vm10 = vweird.f32 %v3213_v51 }
 0x193   : > { %v992_v0 = vmul.f32 %v3187_v16, %v973_v55  ;;  %v760_v8 = vpop.xlane.xlu1 %759  ;;  %v918_v12 = vsub.f32 1.5, %v917_v18  ;;  %2608 = vrsqrt.f32 %v3286_v60  ;;  %v974_v2 = vmul.f32 %v913_v43, %v3076_v39  ;;  %vm922_vm11 = vmor %vm920_vm10, %vm921_vm8  ;;  %1034 = vst [vmem:[#allocation4 + $0x58] sm:$0xff] %v2789_v11 }
 0x194   : > { %v3309_v14 = vpop.eup %2604  ;;  %v785_v20 = vmul.f32 %v3117_v7, %v760_v8  ;;  %v833_v7 = vsel %vm3319_vm9, %v3185_v15, %v829_v42  ;;  %v837_v49 = vmul.f32 0.5, %v836_v17  ;;  %v928_v13 = vsub.f32 1.5, %v3264_v44  ;;  %1035 = vst [vmem:[#allocation4 + $0x8] sm:$0xff] %v2789_v11 }
 0x195   : > { %v2361_v3 = vpack.c.bf16 %v992_v0, %v991_v45  ;;  %v919_v25 = vmul.f32 %v3257_v31, %v918_v12  ;;  %v945_v26 = vmul.f32 %v3309_v14, %v3262_v36  ;;  %vm841_vm12 = vweird.f32 %v3288_v63  ;;  %1036 = vst [vmem:[#allocation4 + $0x28] sm:$0xff] %v2789_v11 }
 0x196   : > { %v3333_v5 = vadd.f32 1e-05, %v785_v20  ;;  %vm930_vm13 = vweird.f32 %v3138_v29  ;;  %v868_v37 = vsub.f32 1.5, %v867_v24  ;;  %v838_v30 = vsub.f32 1.5, %v837_v49  ;;  %1037 = vst [vmem:[#allocation4 + $0x38] sm:$0xff] %v2789_v11 }
 0x197   : > { %2428 = vst [vmem:[#allocation3 + $0x18] sm:$0xff] %v2361_v3   ;;  %v923_v51 = vsel %vm922_vm11, %v3257_v31, %v919_v25  ;;  %v946_v28 = vmul.f32 %v3309_v14, %v945_v26  ;;  %v966_v1 = vmul.f32 %v833_v7, %v3060_v21  ;;  %vm840_vm14 = vweird.f32 %v3250_v27 }
 0x198   : > { %v3341_v15 = vpop.eup %2606  ;;  %v975_v39 = vmul.f32 %v923_v51, %v3096_v53  ;;  %2610 = vrsqrt.f32 %v3333_v5  ;;  %v993_v53 = vmul.f32 %v3187_v16, %v974_v2  ;;  %v839_v44 = vmul.f32 %v3288_v63, %v838_v30  ;;  %1038 = vst [vmem:[#allocation4 + $0x20] sm:$0xff] %v2789_v11  ;;  %vm842_vm0 = vmor %vm840_vm14, %vm841_vm12 }
 0x199   : > { %v947_v31 = vmul.f32 0.5, %v946_v28  ;;  %v955_v33 = vmul.f32 %v3341_v15, %v3284_v47  ;;  %v3352_v34 = vpop.eup %2608  ;;  %vm950_vm15 = vweird.f32 %v3262_v36  ;;  %vm951_vm1 = vweird.f32 %v3309_v14  ;;  %1039 = vst [vmem:[#allocation4 + $0x78] sm:$0xff] %v2789_v11 }
 0x19a   : > { %v994_v35 = vmul.f32 %v3187_v16, %v975_v39  ;;  %v875_v46 = vmul.f32 %v3352_v34, %v3286_v60  ;;  %v869_v22 = vmul.f32 %v3271_v61, %v868_v37  ;;  %vm871_vm2 = vweird.f32 %v3271_v61  ;;  %1040 = vst [vmem:[#allocation4 + $0x50] sm:$0xff] %v2789_v11  ;;  %vm3381_vm5 = vmor %vm950_vm15, %vm951_vm1 }
 0x19b   : > { %v948_v21 = vsub.f32 1.5, %v947_v31  ;;  %v956_v27 = vmul.f32 %v3341_v15, %v955_v33  ;;  %v843_v50 = vsel %vm842_vm0, %v3288_v63, %v839_v44  ;;  %1041 = vst [vmem:[#allocation4 + $0x18] sm:$0xff] %v2789_v11  ;;  %vm931_vm3 = vweird.f32 %v3164_v59 }
 0x19c   : > { %v2366_v4 = vpack.c.bf16 %v994_v35, %v993_v53  ;;  %v967_v32 = vmul.f32 %v843_v50, %v3079_v40  ;;  %v876_v57 = vmul.f32 %v3352_v34, %v875_v46  ;;  %v985_v45 = vmul.f32 %v3187_v16, %v966_v1  ;;  %1042 = vst [vmem:[#allocation4 + $0x70] sm:$0xff] %v2789_v11  ;;  %vm3415_vm11 = vmor %vm930_vm13, %vm931_vm3 }
 0x19d   : > { %v949_v55 = vmul.f32 %v3309_v14, %v948_v21  ;;  %v957_v56 = vmul.f32 0.5, %v956_v27  ;;  %vm870_vm4 = vweird.f32 %v3220_v38  ;;  %vm961_vm6 = vweird.f32 %v3341_v15  ;;  %1043 = vst [vmem:[#allocation4 + $0x60] sm:$0xff] %v2789_v11 }
 0x19e   : > { %v2611_v58 = vpop.eup %2610  ;;  %2429 = vst [vmem:[#allocation3 + $0x8] sm:$0xff] %v2366_v4   ;;  %vm3388_vm7 = vmor %vm870_vm4, %vm871_vm2  ;;  %v986_v0 = vmul.f32 %v3187_v16, %v967_v32  ;;  %v877_v36 = vmul.f32 0.5, %v876_v57  ;;  %v929_v6 = vmul.f32 %v3164_v59, %v928_v13  ;;  %vm960_vm8 = vweird.f32 %v3284_v47 }
 0x19f   : > { %v953_v38 = vsel %vm3381_vm5, %v3309_v14, %v949_v55  ;;  %v958_v18 = vsub.f32 1.5, %v957_v56  ;;  %v873_v8 = vsel %vm3388_vm7, %v3271_v61, %v869_v22  ;;  %v935_v42 = vmul.f32 %v2611_v58, %v3333_v5  ;;  %1044 = vst [vmem:[#allocation4 + $0x10] sm:$0xff] %v2789_v11  ;;  %vm962_vm10 = vmor %vm960_vm8, %vm961_vm6 }
 0x1a0   : > { %v2346_v10 = vpack.c.bf16 %v986_v0, %v985_v45  ;;  %v878_v3 = vsub.f32 1.5, %v877_v36  ;;  %vm881_vm9 = vweird.f32 %v3352_v34  ;;  %v978_v43 = vmul.f32 %v953_v38, %v3091_v48  ;;  %1045 = vst [vmem:[#allocation4 + $0x68] sm:$0xff] %v2789_v11 }
 0x1a1   : > { %v959_v9 = vmul.f32 %v3341_v15, %v958_v18  ;;  %v936_v61 = vmul.f32 %v2611_v58, %v935_v42  ;;  %vm880_vm12 = vweird.f32 %v3286_v60  ;;  %v970_v48 = vmul.f32 %v873_v8, %v3065_v23  ;;  %1046 = vst [vmem:[#allocation4 + $0x48] sm:$0xff] %v2789_v11 }
 0x1a2   : > { %2425 = vst [vmem:[#allocation3] sm:$0xff] %v2346_v10   ;;  %v879_v14 = vmul.f32 %v3352_v34, %v878_v3  ;;  %vm882_vm14 = vmor %vm880_vm12, %vm881_vm9  ;;  %v933_v29 = vsel %vm3415_vm11, %v3164_v59, %v929_v6  ;;  %vm941_vm13 = vweird.f32 %v2611_v58  ;;  %v997_v52 = vmul.f32 %v3187_v16, %v978_v43 }
 0x1a3   : > { %v963_v12 = vsel %vm962_vm10, %v3341_v15, %v959_v9  ;;  %v937_v17 = vmul.f32 0.5, %v936_v61  ;;  %vm940_vm15 = vweird.f32 %v3333_v5  ;;  %v976_v59 = vmul.f32 %v933_v29, %v3033_v62 }
 0x1a4   : > { %v979_v24 = vmul.f32 %v963_v12, %v3099_v54  ;;  %v883_v20 = vsel %vm882_vm14, %v3352_v34, %v879_v14  ;;  %v989_v54 = vmul.f32 %v3187_v16, %v970_v48  ;;  %vm942_vm0 = vmor %vm940_vm15, %vm941_vm13 }
 0x1a5   : > { %v971_v60 = vmul.f32 %v883_v20, %v3082_v41  ;;  %v938_v23 = vsub.f32 1.5, %v937_v17  ;;  %v995_v41 = vmul.f32 %v3187_v16, %v976_v59 }
 0x1a6   : > { %v998_v25 = vmul.f32 %v3187_v16, %v979_v24 }
 0x1a7   : > { %v990_v11 = vmul.f32 %v3187_v16, %v971_v60  ;;  %v939_v7 = vmul.f32 %v2611_v58, %v938_v23 }
 0x1a8   : > { %v2376_v26 = vpack.c.bf16 %v998_v25, %v997_v52 }
 0x1a9   : > { %v2356_v2 = vpack.c.bf16 %v990_v11, %v989_v54  ;;  %v943_v49 = vsel %vm942_vm0, %v2611_v58, %v939_v7 }
 0x1aa   : > { %2431 = vst [vmem:[#allocation3 + $0x30] sm:$0xff] %v2376_v26   ;;  %v977_v13 = vmul.f32 %v943_v49, %v3056_v19 }
 0x1ab   : > { %2427 = vst [vmem:[#allocation3 + $0x20] sm:$0xff] %v2356_v2  }
 0x1ac   : > { %v996_v51 = vmul.f32 %v3187_v16, %v977_v13 }
 0x1ae   : > { %v2371_v5 = vpack.c.bf16 %v996_v51, %v995_v41 }
 0x1b0   : > { %2430 = vst [vmem:[#allocation3 + $0x38] sm:$0xff] %v2371_v5  }
 0x1b1 PF: > { %v2196_v62 = vld [vmem:[%s2971_s22 + $0x70] sm:$0xf]  ;;  %v2296_v19 = vld [vmem:[%s2971_s22 + $0x74] sm:$0xf0]  ;;  %v2188_v28 = vld [vmem:[%s2971_s22 + $0x60] sm:$0xf] }
 0x1b2   : > { %v2197_v15 = vor.u32 %v2296_v19, %v2196_v62  ;;  %v2294_v16 = vld [vmem:[%s2971_s22 + $0x64] sm:$0xf0]  ;;  %v2180_v37 = vld [vmem:[%s2971_s22 + $0x50] sm:$0xf]  ;;  %v2292_v30 = vld [vmem:[%s2971_s22 + $0x54] sm:$0xf0] }
 0x1b3   : > { %v2189_v39 = vor.u32 %v2294_v16, %v2188_v28  ;;  %v2295_v1 = vld [vmem:[%s2971_s22 + $0x74] sm:$0xf]  ;;  %v2198_v31 = vld [vmem:[%s2971_s22 + $0x78] sm:$0xf0]  ;;  %v2293_v34 = vld [vmem:[%s2971_s22 + $0x64] sm:$0xf]  ;;  %v2181_v35 = vor.u32 %v2292_v30, %v2180_v37 }
 0x1b4   : > { %1207 = vmatpush.bf16.msra.mxu0 %v2197_v15  ;;  %2463 = vmatpush.bf16.msra.mxu3 %v2197_v15  ;;  %v2201_v33 = vor.u32 %v2295_v1, %v2198_v31  ;;  %v2190_v53 = vld [vmem:[%s2971_s22 + $0x68] sm:$0xf0]  ;;  %v2172_v44 = vld [vmem:[%s2971_s22 + $0x40] sm:$0xf]  ;;  %v2290_v21 = vld [vmem:[%s2971_s22 + $0x44] sm:$0xf0] }
 0x1b5   : > { %v2193_v27 = vor.u32 %v2293_v34, %v2190_v53  ;;  %v2291_v46 = vld [vmem:[%s2971_s22 + $0x54] sm:$0xf]  ;;  %v2182_v4 = vld [vmem:[%s2971_s22 + $0x58] sm:$0xf0]  ;;  %v2173_v22 = vor.u32 %v2290_v21, %v2172_v44  ;;  %v2164_v50 = vld [vmem:[%s2971_s22 + $0x30] sm:$0xf] }
 0x1b6   : > { %1256 = vmatpush.bf16.msra.mxu1 %v2201_v33  ;;  %v2288_v32 = vld [vmem:[%s2971_s22 + $0x34] sm:$0xf0]  ;;  %v2185_v55 = vor.u32 %v2291_v46, %v2182_v4  ;;  %v2289_v56 = vld [vmem:[%s2971_s22 + $0x44] sm:$0xf]  ;;  %v2174_v57 = vld [vmem:[%s2971_s22 + $0x48] sm:$0xf0] }
 0x1b7   : > { %v2165_v58 = vor.u32 %v2288_v32, %v2164_v50  ;;  %v2156_v45 = vld [vmem:[%s2971_s22 + $0x20] sm:$0xf]  ;;  %v2286_v40 = vld [vmem:[%s2971_s22 + $0x24] sm:$0xf0]  ;;  %v2177_v63 = vor.u32 %v2289_v56, %v2174_v57  ;;  %v2287_v0 = vld [vmem:[%s2971_s22 + $0x34] sm:$0xf] }
 0x1b8   : > { %1208 = vmatpush.bf16.msra.mxu0 %v2189_v39  ;;  %2464 = vmatpush.bf16.msra.mxu3 %v2189_v39  ;;  %v2166_v38 = vld [vmem:[%s2971_s22 + $0x38] sm:$0xf0]  ;;  %v2157_v18 = vor.u32 %v2286_v40, %v2156_v45  ;;  %v2148_v36 = vld [vmem:[%s2971_s22 + $0x10] sm:$0xf]  ;;  %v2284_v6 = vld [vmem:[%s2971_s22 + $0x14] sm:$0xf0] }
 0x1b9   : > { %v2169_v8 = vor.u32 %v2287_v0, %v2166_v38  ;;  %v2285_v42 = vld [vmem:[%s2971_s22 + $0x24] sm:$0xf]  ;;  %v2158_v10 = vld [vmem:[%s2971_s22 + $0x28] sm:$0xf0]  ;;  %v2149_v9 = vor.u32 %v2284_v6, %v2148_v36  ;;  %v2140_v3 = vld [vmem:[%s2971_s22] sm:$0xf] }
 0x1ba   : > { %1257 = vmatpush.bf16.msra.mxu1 %v2193_v27  ;;  %v2282_v43 = vld [vmem:[%s2971_s22 + $0x4] sm:$0xf0]  ;;  %v2161_v61 = vor.u32 %v2285_v42, %v2158_v10  ;;  %v2283_v47 = vld [vmem:[%s2971_s22 + $0x14] sm:$0xf]  ;;  %v2150_v12 = vld [vmem:[%s2971_s22 + $0x18] sm:$0xf0] }
 0x1bb   : > { %v2141_v14 = vor.u32 %v2282_v43, %v2140_v3  ;;  %v2153_v48 = vor.u32 %v2283_v47, %v2150_v12  ;;  %v2281_v24 = vld [vmem:[%s2971_s22 + $0x4] sm:$0xf]  ;;  %v2142_v17 = vld [vmem:[%s2971_s22 + $0x8] sm:$0xf0]  ;;  %v2279_v20 = vld [vmem:[#allocation3 + $0x38] sm:$0xff]  ;;  %p2250_p6 = scmp.ne.s32.totalorder %s2770_s29, 1 }
 0x1bc   : > { %1209 = vmatpush.bf16.msra.mxu0 %v2181_v35  ;;  %2465 = vmatpush.bf16.msra.mxu3 %v2181_v35  ;;  %v2273_v29 = vld [vmem:[#allocation3 + $0x28] sm:$0xff]  ;;  %v2145_v52 = vor.u32 %v2281_v24, %v2142_v17  ;;  %v2274_v25 = vld [vmem:[#allocation3] sm:$0xff]  ;;  %v2280_v60 = vld [vmem:[#allocation3 + $0x30] sm:$0xff] }
 0x1bd   : > { %v2275_v23 = vld [vmem:[#allocation3 + $0x10] sm:$0xff]  ;;  %v2276_v54 = vld [vmem:[#allocation3 + $0x20] sm:$0xff]  ;;  %v2277_v26 = vld [vmem:[#allocation3 + $0x18] sm:$0xff] }
 0x1be   : > { %1258 = vmatpush.bf16.msra.mxu1 %v2185_v55  ;;  %v2278_v11 = vld [vmem:[#allocation3 + $0x8] sm:$0xff]  ;;  %v2304_v7 = vld [vmem:[%s2969_s28 + $0x38] sm:$0xff]  ;;  %v2303_v59 = vld [vmem:[%s2969_s28 + $0x30] sm:$0xff] }
 0x1bf   : > { %1729 = vmatpush.bf16.msra.mxu2 %v2304_v7  ;;  %v2302_v2 = vld [vmem:[%s2969_s28 + $0x28] sm:$0xff]  ;;  %v2301_v49 = vld [vmem:[%s2969_s28 + $0x20] sm:$0xff]  ;;  %v2300_v13 = vld [vmem:[%s2969_s28 + $0x18] sm:$0xff] }
 0x1c0   : > { %1210 = vmatpush.bf16.msra.mxu0 %v2173_v22  ;;  %2466 = vmatpush.bf16.msra.mxu3 %v2173_v22  ;;  %v2299_v5 = vld [vmem:[%s2969_s28 + $0x10] sm:$0xff]  ;;  %v2298_v19 = vld [vmem:[%s2969_s28 + $0x8] sm:$0xff]  ;;  %v2297_v30 = vld [vmem:[%s2969_s28] sm:$0xff] }
 0x1c2   : > { %1259 = vmatpush.bf16.msra.mxu1 %v2177_v63 }
 0x1c3   : > { %1730 = vmatpush.bf16.msra.mxu2 %v2303_v59 }
 0x1c4   : > { %1211 = vmatpush.bf16.msra.mxu0 %v2165_v58  ;;  %2467 = vmatpush.bf16.msra.mxu3 %v2165_v58 }
 0x1c6   : > { %1260 = vmatpush.bf16.msra.mxu1 %v2169_v8 }
 0x1c7   : > { %1731 = vmatpush.bf16.msra.mxu2 %v2302_v2 }
 0x1c8   : > { %1212 = vmatpush.bf16.msra.mxu0 %v2157_v18  ;;  %2468 = vmatpush.bf16.msra.mxu3 %v2157_v18 }
 0x1ca   : > { %1261 = vmatpush.bf16.msra.mxu1 %v2161_v61 }
 0x1cb   : > { %1732 = vmatpush.bf16.msra.mxu2 %v2301_v49 }
 0x1cc   : > { %1213 = vmatpush.bf16.msra.mxu0 %v2149_v9  ;;  %2469 = vmatpush.bf16.msra.mxu3 %v2149_v9 }
 0x1ce   : > { %1262 = vmatpush.bf16.msra.mxu1 %v2153_v48 }
 0x1cf   : > { %1733 = vmatpush.bf16.msra.mxu2 %v2300_v13 }
 0x1d0   : > { %1214 = vmatpush.bf16.msra.mxu0 %v2141_v14  ;;  %2470 = vmatpush.bf16.msra.mxu3 %v2141_v14 }
 0x1d2   : > { %1263 = vmatpush.bf16.msra.mxu1 %v2145_v52 }
 0x1d3   : > { %1215 = vmatmul.bf16.vlgmr.msra.gmra.mxu0 %v2273_v29  ;;  %1245 = vmatmul.bf16.vlgmr.msra.gmra.mxu3 %v2279_v20 }
 0x1d4   : > { %2471 = vmatpush.bf16.msrb.mxu3 %v2201_v33  ;;  %1734 = vmatpush.bf16.msra.mxu2 %v2299_v5 }
 0x1d5   : > { %1264 = vmatmul.bf16.vlgmr.msra.gmra.mxu1 %v2273_v29 }
 0x1d8   : > { %2472 = vmatpush.bf16.msrb.mxu3 %v2193_v27  ;;  %1735 = vmatpush.bf16.msra.mxu2 %v2298_v19 }
 0x1dc   : > { %2473 = vmatpush.bf16.msrb.mxu3 %v2185_v55  ;;  %1736 = vmatpush.bf16.msra.mxu2 %v2297_v30 }
 0x1e0   : > { %2474 = vmatpush.bf16.msrb.mxu3 %v2177_v63 }
 0x1e3   : > { %1220 = vmatmul.bf16.gmra.mxu0 %v2274_v25  ;;  %1250 = vmatmul.bf16.gmra.mxu3 %v2280_v60 }
 0x1e4   : > { %2475 = vmatpush.bf16.msrb.mxu3 %v2169_v8 }
 0x1e5   : > { %1269 = vmatmul.bf16.gmra.mxu1 %v2274_v25 }
 0x1e8   : > { %2476 = vmatpush.bf16.msrb.mxu3 %v2161_v61 }
 0x1ec   : > { %2477 = vmatpush.bf16.msrb.mxu3 %v2153_v48 }
 0x1f0   : > { %2478 = vmatpush.bf16.msrb.mxu3 %v2145_v52 }
 0x1f3   : > { %1225 = vmatmul.bf16.gmra.mxu0 %v2275_v23  ;;  %1294 = vmatmul.bf16.vlgmr.msrb.gmra.mxu3 %v2279_v20 }
 0x1f4   : > { %2479 = vmatpush.bf16.msra.mxu3 %v2304_v7 }
 0x1f5   : > { %1274 = vmatmul.bf16.gmra.mxu1 %v2275_v23 }
 0x1f8   : > { %2480 = vmatpush.bf16.msra.mxu3 %v2303_v59 }
 0x1fc   : > { %2481 = vmatpush.bf16.msra.mxu3 %v2302_v2 }
 0x200   : > { %2482 = vmatpush.bf16.msra.mxu3 %v2301_v49 }
 0x203   : > { %1230 = vmatmul.bf16.gmra.mxu0 %v2276_v54  ;;  %1299 = vmatmul.bf16.gmra.mxu3 %v2280_v60 }
 0x204   : > { %2483 = vmatpush.bf16.msra.mxu3 %v2300_v13 }
 0x205   : > { %1279 = vmatmul.bf16.gmra.mxu1 %v2276_v54 }
 0x208   : > { %2484 = vmatpush.bf16.msra.mxu3 %v2299_v5 }
 0x20c   : > { %2485 = vmatpush.bf16.msra.mxu3 %v2298_v19 }
 0x210   : > { %2486 = vmatpush.bf16.msra.mxu3 %v2297_v30 }
 0x213   : > { %1235 = vmatmul.bf16.gmra.mxu0 %v2277_v26 }
 0x215   : > { %1284 = vmatmul.bf16.gmra.mxu1 %v2277_v26 }
 0x223   : > { %1240 = vmatmul.bf16.gmra.mxu0 %v2278_v11 }
 0x225   : > { %1289 = vmatmul.bf16.gmra.mxu1 %v2278_v11 }
 0x250   : > { %v3476_v41 = vpop.f32.mrf.mxu0 }
 0x251   : > { %v2202_v51 = vmul.f32 -1.442695, %v3476_v41 }
 0x252   : > { %v3488_v1 = vpop.f32.mrf.mxu1 }
 0x253   : > { %2612 = vpow2.f32 %v2202_v51 }
 0x256   : > { %v3480_v62 = vpop.f32.mrf.mxu3 }
 0x257   : > { %v2214_v28 = vmul.f32 -1.442695, %v3480_v62 }
 0x258   : > { %v3484_v15 = vpop.f32.mrf.mxu0 }
 0x259   : > { %v2613_v16 = vpop.eup %2612  ;;  %v2203_v39 = vmul.f32 -1.442695, %v3484_v15  ;;  %2614 = vpow2.f32 %v2214_v28 }
 0x25a   : > { %v1353_v37 = vadd.f32 1.0, %v2613_v16  ;;  %v3502_v50 = vpop.f32.mrf.mxu1 }
 0x25b   : > { %2616 = vpow2.f32 %v2203_v39 }
 0x25c   : > { %2618 = vrcp.f32 %v1353_v37  ;;  %v1378_v57 = vand.u32 2147483647, %v1353_v37  ;;  %v1380_v18 = vand.u32 2147483648, %v1353_v37  ;;  %vm1374_vm1 = vweird.f32 %v1353_v37 }
 0x25e   : > { %v3490_v31 = vpop.f32.mrf.mxu3  ;;  %vm3519_vm2 = vcmp.eq.f32.partialorder %v1378_v57, 8.507059e+37  ;;  %v1381_v61 = vor.u32 1.1754944e-38, %v1380_v18 }
 0x25f   : > { %v2615_v33 = vpop.eup %2614  ;;  %v2215_v34 = vmul.f32 -1.442695, %v3490_v31 }
 0x260   : > { %v3493_v53 = vpop.f32.mrf.mxu0  ;;  %v3495_v35 = vadd.f32 1.0, %v2615_v33 }
 0x261   : > { %v2617_v44 = vpop.eup %2616  ;;  %v2204_v21 = vmul.f32 -1.442695, %v3493_v53  ;;  %2620 = vpow2.f32 %v2215_v34 }
 0x262   : > { %v3498_v27 = vpop.eup %2618  ;;  %v1354_v46 = vadd.f32 1.0, %v2617_v44  ;;  %2622 = vrcp.f32 %v3495_v35  ;;  %v1558_v12 = vand.u32 2147483647, %v3495_v35  ;;  %vm1554_vm5 = vweird.f32 %v3495_v35  ;;  %v3541_v25 = vpop.f32.mrf.mxu1 }
 0x263   : > { %v1370_v4 = vmul.f32 %v3498_v27, %v1353_v37  ;;  %2624 = vpow2.f32 %v2204_v21  ;;  %vm1375_vm3 = vweird.f32 %v3498_v27  ;;  %v1560_v20 = vand.u32 2147483648, %v3495_v35 }
 0x264   : > { %2626 = vrcp.f32 %v1354_v46  ;;  %v1393_v47 = vand.u32 2147483647, %v1354_v46  ;;  %v1395_v24 = vand.u32 2147483648, %v1354_v46  ;;  %vm3534_vm6 = vmor %vm1374_vm1, %vm1375_vm3  ;;  %vm1389_vm7 = vweird.f32 %v1354_v46 }
 0x265   : > { %v1371_v22 = vsub.f32 1.0, %v1370_v4  ;;  %vm3561_vm10 = vcmp.eq.f32.partialorder %v1558_v12, 8.507059e+37 }
 0x266   : > { %v3504_v32 = vpop.f32.mrf.mxu3  ;;  %vm3557_vm9 = vcmp.eq.f32.partialorder %v1393_v47, 8.507059e+37  ;;  %v1396_v5 = vor.u32 1.1754944e-38, %v1395_v24 }
 0x267   : > { %v2621_v55 = vpop.eup %2620  ;;  %v1372_v63 = vmul.f32 %v3498_v27, %v1371_v22  ;;  %v2216_v10 = vmul.f32 -1.442695, %v3504_v32 }
 0x268   : > { %v3506_v56 = vpop.eup %2622  ;;  %v3508_v58 = vpop.f32.mrf.mxu0  ;;  %v3510_v45 = vadd.f32 1.0, %v2621_v55 }
 0x269   : > { %v2625_v40 = vpop.eup %2624  ;;  %v1550_v0 = vmul.f32 %v3506_v56, %v3495_v35  ;;  %v2205_v6 = vmul.f32 -1.442695, %v3508_v58  ;;  %v1373_v9 = vadd.f32 %v3498_v27, %v1372_v63  ;;  %vm1555_vm11 = vweird.f32 %v3506_v56 }
 0x26a   : > { %v2627_v38 = vpop.eup %2626  ;;  %v3515_v36 = vadd.f32 1.0, %v2625_v40  ;;  %2628 = vrcp.f32 %v3510_v45  ;;  %vm1569_vm12 = vweird.f32 %v3510_v45  ;;  %vm3582_vm13 = vmor %vm1554_vm5, %vm1555_vm11  ;;  %v1575_v4 = vand.u32 2147483648, %v3510_v45 }
 0x26b   : > { %v1385_v8 = vmul.f32 %v2627_v38, %v1354_v46  ;;  %v1551_v43 = vsub.f32 1.0, %v1550_v0  ;;  %vm1390_vm4 = vweird.f32 %v2627_v38  ;;  %v1377_v23 = vsel %vm3534_vm6, %v3498_v27, %v1373_v9 }
 0x26c   : > { %2630 = vrcp.f32 %v3515_v36  ;;  %vm3553_vm8 = vmor %vm1389_vm7, %vm1390_vm4  ;;  %v1382_v16 = vsel %vm3519_vm2, %v1381_v61, %v1377_v23  ;;  %v1561_v27 = vor.u32 1.1754944e-38, %v1560_v20  ;;  %vm1404_vm15 = vweird.f32 %v3515_v36 }
 0x26d   : > { %v1386_v3 = vsub.f32 1.0, %v1385_v8  ;;  %2632 = vpow2.f32 %v2205_v6  ;;  %v1552_v26 = vmul.f32 %v3506_v56, %v1551_v43  ;;  %v1573_v57 = vand.u32 2147483647, %v3510_v45  ;;  %v3618_v43 = vpop.f32.mrf.mxu1 }
 0x26e   : > { %v3528_v14 = vpop.f32.mrf.mxu3  ;;  %2634 = vpow2.f32 %v2216_v10  ;;  %v1609_v40 = vmul.f32 %v1382_v16, %v3476_v41  ;;  %v1408_v63 = vand.u32 2147483647, %v3515_v36  ;;  %v1410_v41 = vand.u32 2147483648, %v3515_v36 }
 0x26f   : > { %v1387_v48 = vmul.f32 %v2627_v38, %v1386_v3  ;;  %v2217_v60 = vmul.f32 -1.442695, %v3528_v14  ;;  %v1553_v30 = vadd.f32 %v3506_v56, %v1552_v26  ;;  %v1576_v3 = vor.u32 1.1754944e-38, %v1575_v4 }
 0x270   : > { %v3531_v17 = vpop.eup %2628  ;;  %v3539_v52 = vpop.f32.mrf.mxu0  ;;  %vm1574_vm2 = vcmp.eq.f32.partialorder %v1573_v57, 8.507059e+37  ;;  %vm3637_vm4 = vcmp.eq.f32.partialorder %v1408_v63, 8.507059e+37  ;;  %v1411_v23 = vor.u32 1.1754944e-38, %v1410_v41  ;;  %v1625_v59 = vmul.f32 %v1609_v40, %v3488_v1 }
 0x271   : > { %v1388_v54 = vadd.f32 %v2627_v38, %v1387_v48  ;;  %v1565_v11 = vmul.f32 %v3531_v17, %v3510_v45  ;;  %v2206_v13 = vmul.f32 -1.442695, %v3539_v52  ;;  %2636 = vpow2.f32 %v2217_v60 }
 0x272   : > { %v3550_v7 = vpop.eup %2630  ;;  %vm1570_vm14 = vweird.f32 %v3531_v17  ;;  %v1557_v42 = vsel %vm3582_vm13, %v3506_v56, %v1553_v30 }
 0x273   : > { %v1392_v51 = vsel %vm3553_vm8, %v2627_v38, %v1388_v54  ;;  %v1400_v19 = vmul.f32 %v3550_v7, %v3515_v36  ;;  %v2633_v28 = vpop.eup %2632  ;;  %v1566_v39 = vsub.f32 1.0, %v1565_v11  ;;  %2638 = vpow2.f32 %v2206_v13  ;;  %vm3601_vm0 = vmor %vm1569_vm12, %vm1570_vm14 }
 0x274   : > { %v3575_v33 = vadd.f32 1.0, %v2633_v28  ;;  %v2635_v34 = vpop.eup %2634  ;;  %v1397_v44 = vsel %vm3557_vm9, %v1396_v5, %v1392_v51  ;;  %vm1405_vm1 = vweird.f32 %v3550_v7  ;;  %v1562_v47 = vsel %vm3561_vm10, %v1561_v27, %v1557_v42 }
 0x275   : > { %v1401_v37 = vsub.f32 1.0, %v1400_v19  ;;  %v1567_v46 = vmul.f32 %v3531_v17, %v1566_v39  ;;  %v3605_v18 = vadd.f32 1.0, %v2635_v34  ;;  %v1610_v8 = vmul.f32 %v1397_v44, %v3484_v15  ;;  %vm3633_vm3 = vmor %vm1404_vm15, %vm1405_vm1 }
 0x276   : > { %v3588_v22 = vpop.f32.mrf.mxu3  ;;  %2640 = vrcp.f32 %v3575_v33  ;;  %v1423_v12 = vand.u32 2147483647, %v3575_v33  ;;  %v1425_v48 = vand.u32 2147483648, %v3575_v33  ;;  %v1621_v11 = vmul.f32 %v1562_v47, %v3480_v62 }
 0x277   : > { %v1402_v55 = vmul.f32 %v3550_v7, %v1401_v37  ;;  %v2637_v35 = vpop.eup %2636  ;;  %v1568_v0 = vadd.f32 %v3531_v17, %v1567_v46  ;;  %2642 = vrcp.f32 %v3605_v18  ;;  %v1626_v20 = vmul.f32 %v1610_v8, %v3502_v50  ;;  %v3676_v46 = vpop.f32.mrf.mxu1 }
 0x278   : > { %v3607_v6 = vpop.f32.mrf.mxu0  ;;  %v3625_v56 = vadd.f32 1.0, %v2637_v35  ;;  %vm1419_vm5 = vweird.f32 %v3575_v33  ;;  %vm3653_vm6 = vcmp.eq.f32.partialorder %v1423_v12, 8.507059e+37  ;;  %vm1584_vm7 = vweird.f32 %v3605_v18 }
 0x279   : > { %v2207_v10 = vmul.f32 -1.442695, %v3607_v6  ;;  %v2639_v9 = vpop.eup %2638  ;;  %v1403_v45 = vadd.f32 %v3550_v7, %v1402_v55  ;;  %v1572_v15 = vsel %vm3601_vm0, %v3531_v17, %v1568_v0  ;;  %v1641_v5 = vpack.c.bf16 %v1626_v20, %v1625_v59 }
 0x27a   : > { %v3623_v61 = vadd.f32 1.0, %v2639_v9  ;;  %v1577_v36 = vsel %vm1574_vm2, %v1576_v3, %v1572_v15  ;;  %v1590_v16 = vand.u32 2147483648, %v3605_v18  ;;  %v1588_v34 = vand.u32 2147483647, %v3605_v18 }
 0x27b   : > { %2644 = vpow2.f32 %v2207_v10  ;;  %v1407_v60 = vsel %vm3633_vm3, %v3550_v7, %v1403_v45  ;;  %v1426_v7 = vor.u32 1.1754944e-38, %v1425_v48  ;;  %v1622_v1 = vmul.f32 %v1577_v36, %v3490_v31  ;;  %1737 = vmatmul.bf16.vlgmr.msra.gmra.mxu2 %v1641_v5 }
 0x27c   : > { %v2641_v24 = vpop.eup %2640  ;;  %2646 = vrcp.f32 %v3623_v61  ;;  %v1412_v62 = vsel %vm3637_vm4, %v1411_v23, %v1407_v60  ;;  %v1637_v57 = vmul.f32 %v1621_v11, %v3588_v22  ;;  %v1591_v63 = vor.u32 1.1754944e-38, %v1590_v16 }
 0x27d   : > { %v1415_v54 = vmul.f32 %v2641_v24, %v3575_v33  ;;  %2648 = vrcp.f32 %v3625_v56  ;;  %v3651_v50 = vpop.eup %2642  ;;  %vm1420_vm8 = vweird.f32 %v2641_v24  ;;  %v1611_v31 = vmul.f32 %v1412_v62, %v3493_v53 }
 0x27e   : > { %v1297_v26 = vpop.f32.mrf.mxu3  ;;  %v1580_v51 = vmul.f32 %v3651_v50, %v3605_v18  ;;  %vm1585_vm9 = vweird.f32 %v3651_v50  ;;  %vm1421_vm10 = vmor %vm1419_vm5, %vm1420_vm8  ;;  %v1605_v0 = vand.u32 2147483648, %v3625_v56  ;;  %vm1599_vm12 = vweird.f32 %v3625_v56 }
 0x27f   : > { %v1416_v2 = vsub.f32 1.0, %v1415_v54  ;;  %v1638_v35 = vmul.f32 %v1622_v1, %v1297_v26  ;;  %vm3688_vm11 = vmor %vm1584_vm7, %vm1585_vm9  ;;  %v1603_v10 = vand.u32 2147483647, %v3625_v56  ;;  %vm1589_vm13 = vcmp.eq.f32.partialorder %v1588_v34, 8.507059e+37  ;;  %v1277_v59 = vpop.f32.mrf.mxu1 }
 0x280   : > { %v3658_v13 = vpop.f32.mrf.mxu0  ;;  %v1581_v30 = vsub.f32 1.0, %v1580_v51  ;;  %v1606_v48 = vor.u32 1.1754944e-38, %v1605_v0  ;;  %v1440_v36 = vand.u32 2147483648, %v3623_v61  ;;  %v1627_v26 = vmul.f32 %v1611_v31, %v3541_v25 }
 0x281   : > { %v2645_v19 = vpop.eup %2644  ;;  %v1417_v28 = vmul.f32 %v2641_v24, %v1416_v2  ;;  %v2208_v39 = vmul.f32 -1.442695, %v3658_v13  ;;  %v1647_v15 = vpack.c.bf16 %v1638_v35, %v1637_v57  ;;  %vm1604_vm0 = vcmp.eq.f32.partialorder %v1603_v10, 8.507059e+37 }
 0x282   : > { %v3667_v37 = vpop.eup %2646  ;;  %v3671_v44 = vadd.f32 1.0, %v2645_v19  ;;  %v1582_v55 = vmul.f32 %v3651_v50, %v1581_v30  ;;  %vm1434_vm3 = vweird.f32 %v3623_v61  ;;  %v1441_v16 = vor.u32 1.1754944e-38, %v1440_v36 }
 0x283   : > { %v1418_v21 = vadd.f32 %v2641_v24, %v1417_v28  ;;  %v1430_v27 = vmul.f32 %v3667_v37, %v3623_v61  ;;  %2650 = vpow2.f32 %v2208_v39  ;;  %v2649_v4 = vpop.eup %2648  ;;  %1767 = vmatmul.bf16.vlgmr.msra.gmra.mxu3 %v1647_v15  ;;  %vm1435_vm1 = vweird.f32 %v3667_v37 }
 0x284   : > { %2652 = vrcp.f32 %v3671_v44  ;;  %v1595_v33 = vmul.f32 %v2649_v4, %v3625_v56  ;;  %v1583_v41 = vadd.f32 %v3651_v50, %v1582_v55  ;;  %vm1600_vm14 = vweird.f32 %v2649_v4  ;;  %vm3735_vm4 = vmor %vm1434_vm3, %vm1435_vm1 }
 0x285   : > { %v1422_v53 = vsel %vm1421_vm10, %v2641_v24, %v1418_v21  ;;  %v1431_v22 = vsub.f32 1.0, %v1430_v27  ;;  %vm3709_vm15 = vmor %vm1599_vm12, %vm1600_vm14  ;;  %v1453_v25 = vand.u32 2147483647, %v3671_v44  ;;  %v1438_v28 = vand.u32 2147483647, %v3623_v61 }
 0x286   : > { %v1300_v38 = vpop.f32.mrf.mxu3  ;;  %v1427_v8 = vsel %vm3653_vm6, %v1426_v7, %v1422_v53  ;;  %v1596_v42 = vsub.f32 1.0, %v1595_v33  ;;  %v1587_v45 = vsel %vm3688_vm11, %v3651_v50, %v1583_v41  ;;  %vm1449_vm5 = vweird.f32 %v3671_v44 }
 0x287   : > { %v1612_v18 = vmul.f32 %v1427_v8, %v3508_v58  ;;  %v1432_v58 = vmul.f32 %v3667_v37, %v1431_v22  ;;  %v1592_v60 = vsel %vm1589_vm13, %v1591_v63, %v1587_v45  ;;  %vm1454_vm7 = vcmp.eq.f32.partialorder %v1453_v25, 8.507059e+37 }
 0x288   : > { %v3700_v9 = vpop.f32.mrf.mxu0  ;;  %v1597_v12 = vmul.f32 %v2649_v4, %v1596_v42  ;;  %v1623_v2 = vmul.f32 %v1592_v60, %v3504_v32  ;;  %vm1439_vm8 = vcmp.eq.f32.partialorder %v1438_v28, 8.507059e+37 }
 0x289   : > { %v2209_v3 = vmul.f32 -1.442695, %v3700_v9  ;;  %v2651_v47 = vpop.eup %2650  ;;  %v1628_v17 = vmul.f32 %v1612_v18, %v3618_v43  ;;  %v1455_v43 = vand.u32 2147483648, %v3671_v44  ;;  %v1433_v50 = vadd.f32 %v3667_v37, %v1432_v58 }
 0x28a   : > { %v2653_v24 = vpop.eup %2652  ;;  %v3714_v20 = vadd.f32 1.0, %v2651_v47  ;;  %v1598_v54 = vadd.f32 %v2649_v4, %v1597_v12  ;;  %v1639_v21 = vmul.f32 %v1623_v2, %v1300_v38 }
 0x28b   : > { %2654 = vpow2.f32 %v2209_v3  ;;  %v1445_v23 = vmul.f32 %v2653_v24, %v3671_v44  ;;  %v1642_v7 = vpack.c.bf16 %v1628_v17, %v1627_v26  ;;  %vm1450_vm2 = vweird.f32 %v2653_v24 }
 0x28c   : > { %2656 = vrcp.f32 %v3714_v20  ;;  %v1602_v11 = vsel %vm3709_vm15, %v2649_v4, %v1598_v54  ;;  %v1437_v61 = vsel %vm3735_vm4, %v3667_v37, %v1433_v50  ;;  %vm1451_vm6 = vmor %vm1449_vm5, %vm1450_vm2  ;;  %v1280_v37 = vpop.f32.mrf.mxu1  ;;  %vm1464_vm11 = vweird.f32 %v3714_v20 }
 0x28d   : > { %v1446_v56 = vsub.f32 1.0, %v1445_v23  ;;  %v1607_v49 = vsel %vm1604_vm0, %v1606_v48, %v1602_v11  ;;  %1742 = vmatmul.bf16.gmra.mxu2 %v1642_v7  ;;  %v1442_v57 = vsel %vm1439_vm8, %v1441_v16, %v1437_v61  ;;  %v1470_v12 = vand.u32 2147483648, %v3714_v20 }
 0x28e   : > { %v1624_v1 = vmul.f32 %v1607_v49, %v3528_v14  ;;  %v1302_v5 = vpop.f32.mrf.mxu3  ;;  %v1456_v14 = vor.u32 1.1754944e-38, %v1455_v43  ;;  %v1613_v0 = vmul.f32 %v1442_v57, %v3539_v52 }
 0x28f   : > { %v1447_v62 = vmul.f32 %v2653_v24, %v1446_v56 }
 0x290   : > { %v3728_v51 = vpop.f32.mrf.mxu0  ;;  %v1640_v27 = vmul.f32 %v1624_v1, %v1302_v5 }
 0x291   : > { %v2655_v19 = vpop.eup %2654  ;;  %v2210_v39 = vmul.f32 -1.442695, %v3728_v51  ;;  %v1448_v30 = vadd.f32 %v2653_v24, %v1447_v62 }
 0x292   : > { %v1360_v34 = vadd.f32 1.0, %v2655_v19  ;;  %v3740_v31 = vpop.eup %2656  ;;  %v1648_v40 = vpack.c.bf16 %v1640_v27, %v1639_v21  ;;  %v1653_v27 = vld [vmem:[#allocation4 + $0x8] sm:$0xff] }
 0x293   : > { %2658 = vpow2.f32 %v2210_v39  ;;  %v1452_v4 = vsel %vm1451_vm6, %v2653_v24, %v1448_v30  ;;  %v1460_v55 = vmul.f32 %v3740_v31, %v3714_v20  ;;  %vm1465_vm9 = vweird.f32 %v3740_v31 }
 0x294   : > { %2660 = vrcp.f32 %v1360_v34  ;;  %v1457_v44 = vsel %vm1454_vm7, %v1456_v14, %v1452_v4  ;;  %1772 = vmatmul.bf16.gmra.mxu3 %v1648_v40  ;;  %v1483_v45 = vand.u32 2147483647, %v1360_v34  ;;  %v1485_v52 = vand.u32 2147483648, %v1360_v34  ;;  %vm3764_vm12 = vmor %vm1464_vm11, %vm1465_vm9  ;;  %v1282_v36 = vpop.f32.mrf.mxu1 }
 0x295   : > { %v1614_v35 = vmul.f32 %v1457_v44, %v3607_v6  ;;  %v1461_v53 = vsub.f32 1.0, %v1460_v55  ;;  %v1629_v6 = vmul.f32 %v1613_v0, %v3676_v46  ;;  %v1468_v46 = vand.u32 2147483647, %v3714_v20 }
 0x296   : > { %vm1479_vm14 = vweird.f32 %v1360_v34  ;;  %vm1484_vm15 = vcmp.eq.f32.partialorder %v1483_v45, 8.507059e+37  ;;  %v1486_v23 = vor.u32 1.1754944e-38, %v1485_v52  ;;  %v1471_v20 = vor.u32 1.1754944e-38, %v1470_v12 }
 0x297   : > { %v1462_v41 = vmul.f32 %v3740_v31, %v1461_v53  ;;  %v1630_v42 = vmul.f32 %v1614_v35, %v1277_v59  ;;  %vm1469_vm0 = vcmp.eq.f32.partialorder %v1468_v46, 8.507059e+37 }
 0x298   : > { %v3749_v63 = vpop.f32.mrf.mxu0 }
 0x299   : > { %v2659_v33 = vpop.eup %2658  ;;  %v2211_v38 = vmul.f32 -1.442695, %v3749_v63  ;;  %v1463_v3 = vadd.f32 %v3740_v31, %v1462_v41  ;;  %v1643_v47 = vpack.c.bf16 %v1630_v42, %v1629_v6 }
 0x29a   : > { %v2661_v8 = vpop.eup %2660  ;;  %v3753_v22 = vadd.f32 1.0, %v2659_v33 }
 0x29b   : > { %v1475_v18 = vmul.f32 %v2661_v8, %v1360_v34  ;;  %2662 = vpow2.f32 %v2211_v38  ;;  %vm1480_vm10 = vweird.f32 %v2661_v8  ;;  %v1467_v26 = vsel %vm3764_vm12, %v3740_v31, %v1463_v3 }
 0x29c   : > { %2664 = vrcp.f32 %v3753_v22  ;;  %vm1481_vm13 = vmor %vm1479_vm14, %vm1480_vm10  ;;  %v1472_v59 = vsel %vm1469_vm0, %v1471_v20, %v1467_v26  ;;  %v1285_v39 = vpop.f32.mrf.mxu1  ;;  %vm1494_vm3 = vweird.f32 %v3753_v22  ;;  %v1500_v61 = vand.u32 2147483648, %v3753_v22 }
 0x29d   : > { %v1476_v10 = vsub.f32 1.0, %v1475_v18  ;;  %1747 = vmatmul.bf16.gmra.mxu2 %v1643_v47  ;;  %v1615_v62 = vmul.f32 %v1472_v59, %v3658_v13  ;;  %v1498_v4 = vand.u32 2147483647, %v3753_v22 }
 0x29e   : > { %v1501_v33 = vor.u32 1.1754944e-38, %v1500_v61 }
 0x29f   : > { %v1477_v15 = vmul.f32 %v2661_v8, %v1476_v10  ;;  %v1631_v32 = vmul.f32 %v1615_v62, %v1280_v37  ;;  %vm1499_vm8 = vcmp.eq.f32.partialorder %v1498_v4, 8.507059e+37  ;;  %v1664_v4 = vld [vmem:[#allocation4 + $0x48] sm:$0xff] }
 0x2a0   : > { %v3762_v48 = vpop.f32.mrf.mxu0 }
 0x2a1   : > { %v2663_v24 = vpop.eup %2662  ;;  %v1478_v29 = vadd.f32 %v2661_v8, %v1477_v15  ;;  %v2212_v17 = vmul.f32 -1.442695, %v3762_v48 }
 0x2a2   : > { %v2665_v60 = vpop.eup %2664  ;;  %v1362_v54 = vadd.f32 1.0, %v2663_v24 }
 0x2a3   : > { %v1482_v56 = vsel %vm1481_vm13, %v2661_v8, %v1478_v29  ;;  %v1490_v43 = vmul.f32 %v2665_v60, %v3753_v22  ;;  %2666 = vpow2.f32 %v2212_v17  ;;  %vm1495_vm1 = vweird.f32 %v2665_v60 }
 0x2a4   : > { %v1487_v11 = vsel %vm1484_vm15, %v1486_v23, %v1482_v56  ;;  %2668 = vrcp.f32 %v1362_v54  ;;  %v1513_v30 = vand.u32 2147483647, %v1362_v54  ;;  %v1515_v14 = vand.u32 2147483648, %v1362_v54  ;;  %vm3784_vm4 = vmor %vm1494_vm3, %vm1495_vm1  ;;  %v1287_v8 = vpop.f32.mrf.mxu1 }
 0x2a5   : > { %v1616_v50 = vmul.f32 %v1487_v11, %v3700_v9  ;;  %v1491_v2 = vsub.f32 1.0, %v1490_v43  ;;  %vm1509_vm5 = vweird.f32 %v1362_v54 }
 0x2a6   : > { %v1516_v57 = vor.u32 1.1754944e-38, %v1515_v14  ;;  %vm1514_vm7 = vcmp.eq.f32.partialorder %v1513_v30, 8.507059e+37  ;;  %v1652_v14 = vld [vmem:[#allocation4 + $0x58] sm:$0xff] }
 0x2a7   : > { %v1492_v19 = vmul.f32 %v2665_v60, %v1491_v2  ;;  %v1632_v16 = vmul.f32 %v1616_v50, %v1282_v36  ;;  %v1649_v2 = vld [vmem:[#allocation4 + $0x30] sm:$0xff] }
 0x2a8   : > { %v3775_v49 = vpop.f32.mrf.mxu0 }
 0x2a9   : > { %v2667_v7 = vpop.eup %2666  ;;  %v2213_v25 = vmul.f32 -1.442695, %v3775_v49  ;;  %v1493_v34 = vadd.f32 %v2665_v60, %v1492_v19  ;;  %v1644_v13 = vpack.c.bf16 %v1632_v16, %v1631_v32 }
 0x2aa   : > { %v2669_v1 = vpop.eup %2668  ;;  %v3779_v5 = vadd.f32 1.0, %v2667_v7 }
 0x2ab   : > { %v1505_v28 = vmul.f32 %v2669_v1, %v1362_v54  ;;  %2670 = vpow2.f32 %v2213_v25  ;;  %vm1510_vm2 = vweird.f32 %v2669_v1  ;;  %v1497_v53 = vsel %vm3784_vm4, %v2665_v60, %v1493_v34  ;;  %v1650_v25 = vld [vmem:[#allocation4] sm:$0xff]  ;;  %v1663_v34 = vld [vmem:[#allocation4 + $0x68] sm:$0xff] }
 0x2ac   : > { %2672 = vrcp.f32 %v3779_v5  ;;  %vm1511_vm6 = vmor %vm1509_vm5, %vm1510_vm2  ;;  %v1502_v38 = vsel %vm1499_vm8, %v1501_v33, %v1497_v53  ;;  %vm1524_vm11 = vweird.f32 %v3779_v5  ;;  %v1290_v46 = vpop.f32.mrf.mxu1  ;;  %v1654_v53 = vld [vmem:[#allocation4 + $0x28] sm:$0xff]  ;;  %v1655_v33 = vld [vmem:[#allocation4 + $0x38] sm:$0xff] }
 0x2ad   : > { %v1506_v9 = vsub.f32 1.0, %v1505_v28  ;;  %1752 = vmatmul.bf16.gmra.mxu2 %v1644_v13  ;;  %v1617_v18 = vmul.f32 %v1502_v38, %v3728_v51  ;;  %v1528_v51 = vand.u32 2147483647, %v3779_v5 }
 0x2af   : > { %v1507_v31 = vmul.f32 %v2669_v1, %v1506_v9  ;;  %v1633_v52 = vmul.f32 %v1617_v18, %v1285_v39  ;;  %vm1529_vm0 = vcmp.eq.f32.partialorder %v1528_v51, 8.507059e+37  ;;  %v1662_v39 = vld [vmem:[#allocation4 + $0x10] sm:$0xff]  ;;  %v1657_v18 = vld [vmem:[#allocation4 + $0x78] sm:$0xff] }
 0x2b1   : > { %v2671_v21 = vpop.eup %2670  ;;  %v1508_v55 = vadd.f32 %v2669_v1, %v1507_v31 }
 0x2b2   : > { %v2673_v44 = vpop.eup %2672  ;;  %v1364_v35 = vadd.f32 1.0, %v2671_v21 }
 0x2b3   : > { %v1512_v40 = vsel %vm1511_vm6, %v2669_v1, %v1508_v55  ;;  %v1520_v37 = vmul.f32 %v2673_v44, %v3779_v5  ;;  %vm1525_vm9 = vweird.f32 %v2673_v44  ;;  %v1661_v1 = vld [vmem:[#allocation4 + $0x60] sm:$0xff] }
 0x2b4   : > { %v1517_v0 = vsel %vm1514_vm7, %v1516_v57, %v1512_v40  ;;  %2674 = vrcp.f32 %v1364_v35  ;;  %v1543_v15 = vand.u32 2147483647, %v1364_v35  ;;  %v1545_v47 = vand.u32 2147483648, %v1364_v35  ;;  %vm1526_vm12 = vmor %vm1524_vm11, %vm1525_vm9  ;;  %v1292_v20 = vpop.f32.mrf.mxu1 }
 0x2b5   : > { %v1618_v22 = vmul.f32 %v1517_v0, %v3749_v63  ;;  %v1521_v41 = vsub.f32 1.0, %v1520_v37  ;;  %v1530_v63 = vand.u32 2147483648, %v3779_v5  ;;  %vm1539_vm14 = vweird.f32 %v1364_v35 }
 0x2b6   : > { %v1546_v17 = vor.u32 1.1754944e-38, %v1545_v47  ;;  %vm1544_vm15 = vcmp.eq.f32.partialorder %v1543_v15, 8.507059e+37 }
 0x2b7   : > { %v1522_v6 = vmul.f32 %v2673_v44, %v1521_v41  ;;  %v1634_v45 = vmul.f32 %v1618_v22, %v1287_v8  ;;  %v1531_v54 = vor.u32 1.1754944e-38, %v1530_v63  ;;  %v1656_v8 = vld [vmem:[#allocation4 + $0x20] sm:$0xff] }
 0x2b9   : > { %v1523_v12 = vadd.f32 %v2673_v44, %v1522_v6  ;;  %v1645_v58 = vpack.c.bf16 %v1634_v45, %v1633_v52 }
 0x2ba   : > { %v2675_v42 = vpop.eup %2674 }
 0x2bb   : > { %v1535_v10 = vmul.f32 %v2675_v42, %v1364_v35  ;;  %vm1540_vm10 = vweird.f32 %v2675_v42  ;;  %v1527_v60 = vsel %vm1526_vm12, %v2673_v44, %v1523_v12  ;;  %v1660_v12 = vld [vmem:[#allocation4 + $0x70] sm:$0xff] }
 0x2bc   : > { %vm1541_vm13 = vmor %vm1539_vm14, %vm1540_vm10  ;;  %v1532_v26 = vsel %vm1529_vm0, %v1531_v54, %v1527_v60 }
 0x2bd   : > { %v1536_v3 = vsub.f32 1.0, %v1535_v10  ;;  %1757 = vmatmul.bf16.gmra.mxu2 %v1645_v58  ;;  %v1619_v43 = vmul.f32 %v1532_v26, %v3762_v48  ;;  %v1658_v10 = vld [vmem:[#allocation4 + $0x50] sm:$0xff] }
 0x2bf   : > { %v1537_v24 = vmul.f32 %v2675_v42, %v1536_v3  ;;  %v1635_v59 = vmul.f32 %v1619_v43, %v1290_v46  ;;  %v1659_v3 = vld [vmem:[#allocation4 + $0x18] sm:$0xff] }
 0x2c1   : > { %v1538_v29 = vadd.f32 %v2675_v42, %v1537_v24 }
 0x2c3   : > { %v1542_v23 = vsel %vm1541_vm13, %v2675_v42, %v1538_v29 }
 0x2c4   : > { %v1547_v36 = vsel %vm1544_vm15, %v1546_v17, %v1542_v23 }
 0x2c5   : > { %v1620_v56 = vmul.f32 %v1547_v36, %v3775_v49  ;;  %v1651_v49 = vld [vmem:[#allocation4 + $0x40] sm:$0xff] }
 0x2c7   : > { %v1636_v11 = vmul.f32 %v1620_v56, %v1292_v20 }
 0x2c9   : > { %v1646_v50 = vpack.c.bf16 %v1636_v11, %v1635_v59 }
 0x2cd   : > { %1762 = vmatmul.bf16.gmra.mxu2 %v1646_v50 }
 0x2fe   : > { %v1738_v7 = vpop.f32.mrf.mxu2 }
 0x2ff   : > { %v1778_v62 = vadd.f32 %v1738_v7, %v1649_v2 }
 0x301   : > { %1794 = vst [vmem:[#allocation4 + $0x30] sm:$0xff] %v1778_v62 }
 0x306   : > { %v1740_v5 = vpop.f32.mrf.mxu2  ;;  %v1768_v19 = vpop.f32.mrf.mxu3 }
 0x307   : > { %v1779_v28 = vadd.f32 %v1740_v5, %v1650_v25  ;;  %v1790_v16 = vadd.f32 %v1768_v19, %v1661_v1 }
 0x309   : > { %1795 = vst [vmem:[#allocation4] sm:$0xff] %v1779_v28 }
 0x30a   : > { %1806 = vst [vmem:[#allocation4 + $0x60] sm:$0xff] %v1790_v16 }
 0x30e   : > { %v1770_v32 = vpop.f32.mrf.mxu3 }
 0x30f   : > { %v1791_v30 = vadd.f32 %v1770_v32, %v1662_v39 }
 0x310   : > { %v1743_v48 = vpop.f32.mrf.mxu2 }
 0x311   : > { %v1780_v9 = vadd.f32 %v1743_v48, %v1651_v49  ;;  %1807 = vst [vmem:[#allocation4 + $0x10] sm:$0xff] %v1791_v30 }
 0x313   : > { %1796 = vst [vmem:[#allocation4 + $0x40] sm:$0xff] %v1780_v9 }
 0x317   : > { %v1773_v13 = vpop.f32.mrf.mxu3 }
 0x318   : > { %v1745_v31 = vpop.f32.mrf.mxu2  ;;  %v1792_v21 = vadd.f32 %v1773_v13, %v1663_v34 }
 0x319   : > { %v1781_v61 = vadd.f32 %v1745_v31, %v1652_v14 }
 0x31a   : > { %1808 = vst [vmem:[#allocation4 + $0x68] sm:$0xff] %v1792_v21 }
 0x31b   : > { %1797 = vst [vmem:[#allocation4 + $0x58] sm:$0xff] %v1781_v61 }
 0x31f   : > { %v1775_v44 = vpop.f32.mrf.mxu3 }
 0x320   : > { %v1748_v55 = vpop.f32.mrf.mxu2  ;;  %v1793_v35 = vadd.f32 %v1775_v44, %v1664_v4 }
 0x321   : > { %v1782_v57 = vadd.f32 %v1748_v55, %v1653_v27 }
 0x322   : > { %1809 = vst [vmem:[#allocation4 + $0x48] sm:$0xff] %v1793_v35 }
 0x323   : > { %1798 = vst [vmem:[#allocation4 + $0x8] sm:$0xff] %v1782_v57 }
 0x328   : > { %v1750_v40 = vpop.f32.mrf.mxu2 }
 0x329   : > { %v1783_v37 = vadd.f32 %v1750_v40, %v1654_v53 }
 0x32b   : > { %1799 = vst [vmem:[#allocation4 + $0x28] sm:$0xff] %v1783_v37 }
 0x330   : > { %v1753_v0 = vpop.f32.mrf.mxu2 }
 0x331   : > { %v1784_v38 = vadd.f32 %v1753_v0, %v1655_v33 }
 0x333   : > { %1800 = vst [vmem:[#allocation4 + $0x38] sm:$0xff] %v1784_v38 }
 0x338   : > { %v1755_v22 = vpop.f32.mrf.mxu2 }
 0x339   : > { %v1785_v41 = vadd.f32 %v1755_v22, %v1656_v8 }
 0x33b   : > { %1801 = vst [vmem:[#allocation4 + $0x20] sm:$0xff] %v1785_v41 }
 0x340   : > { %v1758_v42 = vpop.f32.mrf.mxu2 }
 0x341   : > { %v1786_v6 = vadd.f32 %v1758_v42, %v1657_v18 }
 0x343   : > { %1802 = vst [vmem:[#allocation4 + $0x78] sm:$0xff] %v1786_v6 }
 0x348   : > { %v1760_v45 = vpop.f32.mrf.mxu2 }
 0x349   : > { %v1787_v52 = vadd.f32 %v1760_v45, %v1658_v10 }
 0x34b   : > { %1803 = vst [vmem:[#allocation4 + $0x50] sm:$0xff] %v1787_v52 }
 0x350   : > { %v1763_v15 = vpop.f32.mrf.mxu2 }
 0x351   : > { %v1788_v47 = vadd.f32 %v1763_v15, %v1659_v3 }
 0x353   : > { %1804 = vst [vmem:[#allocation4 + $0x18] sm:$0xff] %v1788_v47 }
 0x357   : > { %1813 = sbr.rel (%p2250_p6) target bundleno = 877 (0x36d), region = 94 }
 0x358   : > { %v1765_v24 = vpop.f32.mrf.mxu2 }
 0x359   : > { %v1789_v58 = vadd.f32 %v1765_v24, %v1660_v12 }
 0x35b   : > { %1805 = vst [vmem:[#allocation4 + $0x70] sm:$0xff] %v1789_v58 }
 0x35c   : > { %v1814_v63 = vld [vmem:[#allocation2 + $0x30] sm:$0xff]  ;;  %v1815_v46 = vld [vmem:[#allocation2] sm:$0xff]  ;;  %v1816_v60 = vld [vmem:[#allocation2 + $0x58] sm:$0xff] }
 0x35d   : > { %v1830_v51 = vld [vmem:[#allocation4 + $0x30] sm:$0xff]  ;;  %v1831_v29 = vld [vmem:[#allocation4] sm:$0xff]  ;;  %v1817_v23 = vld [vmem:[#allocation2 + $0x18] sm:$0xff] }
 0x35e   : > { %v1846_v17 = vadd.f32 %v1830_v51, %v1814_v63  ;;  %v1847_v54 = vadd.f32 %v1831_v29, %v1815_v46  ;;  %v1832_v36 = vld [vmem:[#allocation4 + $0x40] sm:$0xff]  ;;  %v1833_v26 = vld [vmem:[#allocation4 + $0x58] sm:$0xff]  ;;  %v1818_v56 = vld [vmem:[#allocation2 + $0x50] sm:$0xff] }
 0x35f   : > { %v1848_v43 = vadd.f32 %v1832_v36, %v1816_v60  ;;  %v1849_v20 = vadd.f32 %v1833_v26, %v1817_v23  ;;  %v1819_v11 = vld [vmem:[#allocation2 + $0x68] sm:$0xff]  ;;  %v1836_v5 = vld [vmem:[#allocation4 + $0x38] sm:$0xff]  ;;  %v1837_v28 = vld [vmem:[#allocation4 + $0x20] sm:$0xff] }
 0x360   : > { %v1834_v59 = vld [vmem:[#allocation4 + $0x8] sm:$0xff]  ;;  %v2381_v2 = vpack.c.bf16 %v1847_v54, %v1846_v17  ;;  %v1822_v49 = vld [vmem:[#allocation2 + $0x40] sm:$0xff]  ;;  %v1838_v9 = vld [vmem:[#allocation4 + $0x78] sm:$0xff] }
 0x361   : > { %v1835_v50 = vld [vmem:[#allocation4 + $0x28] sm:$0xff]  ;;  %v1850_v7 = vadd.f32 %v1834_v59, %v1818_v56  ;;  %v2386_v19 = vpack.c.bf16 %v1849_v20, %v1848_v43  ;;  %v1823_v39 = vld [vmem:[#allocation2 + $0x20] sm:$0xff]  ;;  %v1839_v30 = vld [vmem:[#allocation4 + $0x50] sm:$0xff]  ;;  %v1854_v34 = vadd.f32 %v1838_v9, %v1822_v49 }
 0x362   : > { %v1851_v62 = vadd.f32 %v1835_v50, %v1819_v11  ;;  %v1820_v25 = vld [vmem:[#allocation2 + $0x8] sm:$0xff]  ;;  %2382 = vst [vmem:[%s2973_s26] sm:$0xff] %v2381_v2   ;;  %v1824_v14 = vld [vmem:[#allocation2 + $0x10] sm:$0xff]  ;;  %v1855_v31 = vadd.f32 %v1839_v30, %v1823_v39  ;;  %v1825_v13 = vld [vmem:[#allocation2 + $0x38] sm:$0xff] }
 0x363   : > { %v1821_v1 = vld [vmem:[#allocation2 + $0x48] sm:$0xff]  ;;  %v1852_v16 = vadd.f32 %v1836_v5, %v1820_v25  ;;  %2432 = vst [vmem:[%s2973_s26 + $0x8] sm:$0xff] %v2386_v19   ;;  %v1840_v61 = vld [vmem:[#allocation4 + $0x18] sm:$0xff]  ;;  %v1841_v21 = vld [vmem:[#allocation4 + $0x70] sm:$0xff] }
 0x364   : > { %v2391_v48 = vpack.c.bf16 %v1851_v62, %v1850_v7  ;;  %v1853_v32 = vadd.f32 %v1837_v28, %v1821_v1  ;;  %v1856_v4 = vadd.f32 %v1840_v61, %v1824_v14  ;;  %v1857_v55 = vadd.f32 %v1841_v21, %v1825_v13  ;;  %v1826_v44 = vld [vmem:[#allocation2 + $0x60] sm:$0xff]  ;;  %v1827_v57 = vld [vmem:[#allocation2 + $0x70] sm:$0xff]  ;;  %v1828_v33 = vld [vmem:[#allocation2 + $0x78] sm:$0xff] }
 0x365   : > { %v1842_v35 = vld [vmem:[#allocation4 + $0x60] sm:$0xff]  ;;  %v2401_v53 = vpack.c.bf16 %v1855_v31, %v1854_v34  ;;  %v1843_v40 = vld [vmem:[#allocation4 + $0x10] sm:$0xff]  ;;  %v1829_v0 = vld [vmem:[#allocation2 + $0x28] sm:$0xff] }
 0x366   : > { %2433 = vst [vmem:[%s2973_s26 + $0x10] sm:$0xff] %v2391_v48   ;;  %v2396_v27 = vpack.c.bf16 %v1853_v32, %v1852_v16  ;;  %v1858_v37 = vadd.f32 %v1842_v35, %v1826_v44  ;;  %v2406_v38 = vpack.c.bf16 %v1857_v55, %v1856_v4  ;;  %v1859_v8 = vadd.f32 %v1843_v40, %v1827_v57  ;;  %v1844_v22 = vld [vmem:[#allocation4 + $0x68] sm:$0xff] }
 0x367   : > { %v1845_v41 = vld [vmem:[#allocation4 + $0x48] sm:$0xff]  ;;  %2435 = vst [vmem:[%s2973_s26 + $0x20] sm:$0xff] %v2401_v53   ;;  %v1860_v18 = vadd.f32 %v1844_v22, %v1828_v33 }
 0x368   : > { %2434 = vst [vmem:[%s2973_s26 + $0x18] sm:$0xff] %v2396_v27   ;;  %v1861_v42 = vadd.f32 %v1845_v41, %v1829_v0  ;;  %v2411_v6 = vpack.c.bf16 %v1859_v8, %v1858_v37 }
 0x369   : > { %2436 = vst [vmem:[%s2973_s26 + $0x28] sm:$0xff] %v2406_v38  }
 0x36a   : > { %v2416_v10 = vpack.c.bf16 %v1861_v42, %v1860_v18  ;;  %2437 = vst [vmem:[%s2973_s26 + $0x30] sm:$0xff] %v2411_v6  }
 0x36c   : > { %2438 = vst [vmem:[%s2973_s26 + $0x38] sm:$0xff] %v2416_v10  }
 0x36d PF: > { %s2305_s28 = sshll.u32 %s2774_s30, 6  ;;  %s1907_s15 = sshll.u32 %s2973_s26, 4  ;;  %s1908_s15 = int_to_ptr.vmem [resolvable:$true] %s1907_s15 }
 0x36e   : > { %s1906_s11 = scalar_lea.hbm %s3866_s7, %s2305_s28  ;;  %s3933_s12 = sand.u32 1, %s2754_s25  }
 0x36f   : > { %s1909_s20 = sshll.u32 %s1906_s11, 4  ;;  %s1895_s17 = scalar_lea.sflag [#allocation7], %s3933_s12  ;;  %s1910_s20 = int_to_ptr.hbm [resolvable:$true] %s1909_s20 }
 0x370   : > { %s2690_s14 = sshra.s32 %s1910_s20, 4  ;;  %s2696_s30 = scalar_lea.hbm %s3866_s7, 256  ;;  %s2691_s14 = int_to_ptr.hbm [resolvable:$true] %s2690_s14 }
 0x371   : > { %s2692_s5 = scalar_lea.hbm %s2691_s14, 64  ;;  %p2697_p11 = scmp.lt.s32.totalorder %s2691_s14, %s3866_s7 }
 0x372   : > { %p2693_p7 = scmp.ne.s32.totalorder %s2691_s14, %s2692_s5  ;;  %p2698_p13 = scmp.lt.s32.totalorder %s2696_s30, %s2692_s5 }
 0x374   : > { %p2694_p8 = pnand %p2693_p7, %p2911_p10  ;;  %p2699_p0 = por %p2698_p13, %p2697_p11 }
 0x376   : > { %p2695_p9 = pneg %p2694_p8 }
 0x378   : > { %p2700_p1 = pnand %p2699_p0, %p2695_p9 }
 0x37a   : > { %2703 = shalt.err (!%p2700_p1)
}
 0x37b   : > { %s2790_s26 = smov 64   ;;  %s2791_s18 = smov 4  }
 0x37c   : > { %2487 = dma.vmem_to_hbm [thread:$0]  (%p2911_p10), %s1908_s15, 1024, %s1910_s20, %s1895_s17, %s2790_s26, %s2790_s26, %s2791_s18  }
 0x37d PF: > { %p2493_p2 = scmp.ge.s32.totalorder %s2786_s10, 2  ;;  %s1924_s13 = sand.u32 1, %s2750_s24  }
 0x37e   : > { %s1925_s27 = scalar_lea.sflag [#allocation7], %s1924_s13 }
 0x37f   : > { %p2490_p3 = pnand %p2493_p2, %p2918_p12 }
 0x381   : > { %p2491_p4 = pneg %p2490_p3 }
 0x383   : > { %2745 = dma.done.wait (%p2491_p4), %s1925_s27, 1024  }
 0x384   : > { %2747 = vsyncadd (%p2491_p4), %s1925_s27, 4294966272  ;;  %s20_s10 = sadd.s32 1, %s2786_s10   ;;  %s3934_s28 = sld [smem:[#allocation9_spill]] }
 0x385   : > { %p17_p5 = scmp.ge.s32.totalorder %s20_s10, 10   ;;  %s3935_s26 = sld [smem:[#allocation16_spill]] }
 0x386   : > { %s3936_s27 = sld [smem:[#allocation10_spill]]  ;;  %s3942_s24 = smov %s2754_s25 }
 0x387   : > { %s3937_s21 = sld [smem:[#allocation15_spill]] }
 0x388   : > { %s3938_s29 = sld [smem:[#allocation11_spill]] }
 0x389   : > { %s3939_s30 = sld [smem:[#allocation12_spill]]  ;;  %19 = sbr.rel (!%p17_p5) target bundleno = 8 (0x8), region = 143 }
 0x38a   : > { %s3940_s8 = sld [smem:[#allocation13_spill]]  ;;  %s3943_s25 = smov %s3934_s28 }
 0x38b   : > { %s3941_s9 = sld [smem:[#allocation14_spill]] }
 0x38d   : > { %s3944_s28 = smov %s3937_s21 }
 0x38e   :  { %1931 = vsyncpa [#allocation7], 1 }
 0x38f   :  { %1933 = vsyncpa [#allocation7 + $0x1], 1 }

// kernel: pixtral_transformer_forward.6
= control target key start
LH: loop header
LB: loop body
LE: loop exit
PB: predicated region body
PF: predicated region fallthrough
CT: control target
= control target key end

     0   :  { %s2384_s27 = smov 0   ;;  %s3837_s0 = inlined_call_operand.vmem [shape: bf16[512,128], index: 0, kind: input, shape index: {}]   ;;  %s3838_s1 = inlined_call_operand.vmem [shape: bf16[1,128], index: 1, kind: input, shape index: {}]   ;;  %s3839_s2 = inlined_call_operand.vmem [shape: bf16[128,384], index: 2, kind: input, shape index: {}]   ;;  %s3840_s3 = inlined_call_operand.vmem [shape: bf16[1,384], index: 3, kind: input, shape index: {}]   ;;  %s3841_s4 = inlined_call_operand.vmem [shape: f32[256,64], index: 4, kind: input, shape index: {}]   ;;  %s3842_s5 = inlined_call_operand.vmem [shape: f32[256,64], index: 5, kind: input, shape index: {}]   ;;  %s3843_s6 = inlined_call_operand.vmem [shape: bf16[512,128], index: 6, kind: output, shape index: {0}]   ;;  %s3844_s7 = inlined_call_operand.vmem [shape: bf16[512,128], index: 7, kind: output, shape index: {1}]   ;;  %s3845_s8 = inlined_call_operand.vmem [shape: bf16[512,128], index: 8, kind: output, shape index: {2}]  }
   0x1 LB: > { %s2390_s28 = sadd.s32 4294967295, %s2333_s27   ;;  %p1931_p0 = scmp.ge.s32.totalorder %s2333_s27, 1  ;;  %s2333_s27 = sphi %s2384_s27, %s19_s27  }
   0x2   : > { %p386_p1 = scmp.lt.s32.totalorder %s2333_s27, 5 }
   0x4   : > { %p387_p2 = pnand %p1931_p0, %p386_p1 }
   0x6   : > { %390 = sbr.rel (%p387_p2) target bundleno = 611 (0x263), region = 44 }
   0xb   : > { %s1932_s29 = sshll.u32 %s2390_s28, 4  ;;  %v2335_v40 = vmov 128.0   ;;  %v2036_v41 = vld [vmem:[%s3839_s2 + $0xa8] sm:$0xf]  ;;  %v2070_v42 = vld [vmem:[%s3839_s2 + $0xb0] sm:$0xf0] }
   0xc   : > { %p465_p3 = scmp.lt.s32.totalorder %s1932_s29, 63  ;;  %2288 = vrcp.f32 %v2335_v40  ;;  %v2069_v43 = vld [vmem:[%s3839_s2 + $0xac] sm:$0xf]  ;;  %v2037_v44 = vor.u32 %v2070_v42, %v2036_v41  ;;  %v2038_v45 = vld [vmem:[%s3839_s2 + $0xb4] sm:$0xf0]  ;;  %s471_s17 = ssub.s32 0, %s2390_s28 }
   0xd   : > { %v2044_v46 = vld [vmem:[%s3839_s2 + $0xb0] sm:$0xf]  ;;  %v2071_v47 = vld [vmem:[%s3839_s2 + $0xb8] sm:$0xf0]  ;;  %v2493_v48 = vor.u32 %v2069_v43, %v2038_v45  ;;  %v2066_v53 = vld [vmem:[%s3839_s2 + $0x94] sm:$0xf] }
   0xe   : > { %s3937_s29 = smov (!%p465_p3, %s1932_s29), 63  ;;  %v2495_v49 = vor.u32 %v2071_v47, %v2044_v46  ;;  %1042 = vmatpush.bf16.msra.mxu0 %v2037_v44  ;;  %2252 = vmatpush.bf16.msra.mxu3 %v2037_v44  ;;  %v2024_v51 = vld [vmem:[%s3839_s2 + $0x90] sm:$0xf]  ;;  %v2067_v52 = vld [vmem:[%s3839_s2 + $0x98] sm:$0xf0]  ;;  %p470_p4 = scmp.lt.s32.totalorder %s2390_s28, 0 }
   0xf   : > { %s2395_s30 = sshll.u32 %s3937_s29, 2  ;;  %1091 = vmatpush.bf16.msra.mxu1 %v2493_v48  ;;  %v2025_v54 = vor.u32 %v2067_v52, %v2024_v51  ;;  %v2026_v55 = vld [vmem:[%s3839_s2 + $0x9c] sm:$0xf0]  ;;  %v2032_v56 = vld [vmem:[%s3839_s2 + $0x98] sm:$0xf]  ;;  %s2336_s29 = smov 64  }
  0x10   : > { %s2401_s11 = scalar_lea.vmem %s3837_s0, %s2395_s30  ;;  %1140 = vmatpush.bf16.msra.mxu2 %v2495_v49  ;;  %v2068_v57 = vld [vmem:[%s3839_s2 + $0xa0] sm:$0xf0]  ;;  %v2519_v58 = vor.u32 %v2066_v53, %v2026_v55  ;;  %v2012_v61 = vld [vmem:[%s3839_s2 + $0x78] sm:$0xf]  ;;  %v2063_v63 = vld [vmem:[%s3839_s2 + $0x7c] sm:$0xf] }
  0x11   : > { %v2225_v0 = vld [vmem:[%s2401_s11 + $0x10] sm:$0xff]   ;;  %v2224_v1 = vld [vmem:[%s2401_s11 + $0x8] sm:$0xff]   ;;  %v2073_v2 = vld [vmem:[%s2401_s11] sm:$0xff]   ;;  %v2521_v59 = vor.u32 %v2068_v57, %v2032_v56  ;;  %s2337_s13 = smov 96   ;;  %s2338_s15 = smov 32  }
  0x12   : > { %v2406_v3 = vunpack.c.l.bf16 %v2225_v0  ;;  %v2408_v4 = vunpack.c.l.bf16 %v2224_v1  ;;  %v2410_v5 = vunpack.c.l.bf16 %v2073_v2  ;;  %v2418_v9 = vunpack.c.h.bf16 %v2225_v0  ;;  %v2227_v15 = vld [vmem:[%s2401_s11 + $0x20] sm:$0xff]   ;;  %v2226_v16 = vld [vmem:[%s2401_s11 + $0x18] sm:$0xff]   ;;  %v2228_v23 = vld [vmem:[%s2401_s11 + $0x28] sm:$0xff]   ;;  %v2499_v50 = vpop.eup %2288  ;;  %1043 = vmatpush.bf16.msra.mxu0 %v2025_v54  ;;  %2253 = vmatpush.bf16.msra.mxu3 %v2025_v54 }
  0x13   : > { %v2420_v10 = vunpack.c.h.bf16 %v2224_v1  ;;  %v2422_v11 = vunpack.c.h.bf16 %v2073_v2  ;;  %v2432_v17 = vunpack.c.l.bf16 %v2227_v15  ;;  %v2434_v18 = vunpack.c.h.bf16 %v2226_v16  ;;  %v2229_v30 = vld [vmem:[%s2401_s11 + $0x30] sm:$0xff]   ;;  %v2230_v31 = vld [vmem:[%s2401_s11 + $0x38] sm:$0xff]   ;;  %1092 = vmatpush.bf16.msra.mxu1 %v2519_v58  ;;  %v2064_v62 = vld [vmem:[%s3839_s2 + $0x80] sm:$0xf0]  ;;  %s2550_s11 = smin.u32 %s2390_s28, %s471_s17  ;;  %s3312_s17 = scalar_lea.vmem %s3845_s8, %s2395_s30 }
  0x14   : > { %v584_v6 = vmul.f32 %v2406_v3, %v2406_v3  ;;  %v582_v7 = vmul.f32 %v2408_v4, %v2408_v4  ;;  %v580_v8 = vmul.f32 %v2410_v5, %v2410_v5  ;;  %v585_v12 = vmul.f32 %v2418_v9, %v2418_v9  ;;  %1141 = vmatpush.bf16.msra.mxu2 %v2521_v59  ;;  %v2014_v1 = vld [vmem:[%s3839_s2 + $0x84] sm:$0xf0]  ;;  %v2020_v2 = vld [vmem:[%s3839_s2 + $0x80] sm:$0xf]  ;;  %s473_s12 = sand.u32 1, %s2550_s11  }
  0x15   : > { %v583_v13 = vmul.f32 %v2420_v10, %v2420_v10  ;;  %v581_v14 = vmul.f32 %v2422_v11, %v2422_v11  ;;  %v2436_v19 = vunpack.c.l.bf16 %v2226_v16  ;;  %v588_v20 = vmul.f32 %v2432_v17, %v2432_v17  ;;  %s474_s25 = ssub.s32 0, %s473_s12  ;;  %v1976_v43 = vld [vmem:[%s3839_s2 + $0x30] sm:$0xf]  ;;  %v2055_v44 = vld [vmem:[%s3839_s2 + $0x38] sm:$0xf0] }
  0x16   : > { %604 = vadd.xlane.f32.xlu2 %v584_v6  ;;  %600 = vadd.xlane.f32.xlu1 %v582_v7  ;;  %v587_v21 = vmul.f32 %v2434_v18, %v2434_v18  ;;  %v2445_v24 = vunpack.c.h.bf16 %v2228_v23  ;;  %v2447_v25 = vunpack.c.l.bf16 %v2228_v23  ;;  %v2449_v26 = vunpack.c.h.bf16 %v2227_v15  ;;  %v2065_v6 = vld [vmem:[%s3839_s2 + $0x88] sm:$0xf0]  ;;  %v2060_v15 = vld [vmem:[%s3839_s2 + $0x64] sm:$0xf]  ;;  %s3939_s25 = smov (!%p470_p4, %s474_s25), %s473_s12  ;;  %v2054_v45 = vld [vmem:[%s3839_s2 + $0x34] sm:$0xf] }
  0x17   : > { %596 = vadd.xlane.f32.xlu0 %v580_v8  ;;  %v586_v22 = vmul.f32 %v2436_v19, %v2436_v19  ;;  %v2459_v32 = vunpack.c.h.bf16 %v2229_v30  ;;  %v2461_v33 = vunpack.c.l.bf16 %v2230_v31  ;;  %v2463_v34 = vunpack.c.l.bf16 %v2229_v30  ;;  %v2058_v30 = vld [vmem:[%s3839_s2 + $0x50] sm:$0xf0]  ;;  %v1978_v47 = vld [vmem:[%s3839_s2 + $0x3c] sm:$0xf0]  ;;  %v1984_v51 = vld [vmem:[%s3839_s2 + $0x38] sm:$0xf] }
  0x18   : > { %v591_v27 = vmul.f32 %v2445_v24, %v2445_v24  ;;  %v590_v28 = vmul.f32 %v2447_v25, %v2447_v25  ;;  %v589_v29 = vmul.f32 %v2449_v26, %v2449_v26  ;;  %v2471_v38 = vunpack.c.h.bf16 %v2230_v31  ;;  %v2057_v31 = vld [vmem:[%s3839_s2 + $0x4c] sm:$0xf]  ;;  %v2056_v52 = vld [vmem:[%s3839_s2 + $0x40] sm:$0xf0]  ;;  %p1936_p5 = scmp.lt.s32.totalorder %s3939_s25, 0  ;;  %s480_s14 = sadd.s32 2, %s3939_s25 }
  0x19   : > { %v593_v35 = vmul.f32 %v2459_v32, %v2459_v32  ;;  %v594_v36 = vmul.f32 %v2461_v33, %v2461_v33  ;;  %v592_v37 = vmul.f32 %v2463_v34, %v2463_v34  ;;  %v629_v60 = vmul.f32 128.0, %v2499_v50 }
  0x1a   : > { %v595_v39 = vmul.f32 %v2471_v38, %v2471_v38  ;;  %v2013_v0 = vor.u32 %v2064_v62, %v2012_v61  ;;  %v2545_v7 = vor.u32 %v2063_v63, %v2014_v1  ;;  %v2547_v8 = vor.u32 %v2065_v6, %v2020_v2  ;;  %v2052_v62 = vld [vmem:[%s3839_s2 + $0x20] sm:$0xf0]  ;;  %v2051_v63 = vld [vmem:[%s3839_s2 + $0x1c] sm:$0xf]  ;;  %v1966_v2 = vld [vmem:[%s3839_s2 + $0x24] sm:$0xf0]  ;;  %s3941_s14 = smov (!%p1936_p5, %s480_s14), %s3939_s25 }
  0x1b   : > { %vm633_vm0 = vweird.f32 %v2499_v50  ;;  %v1977_v46 = vor.u32 %v2055_v44, %v1976_v43  ;;  %v2636_v54 = vor.u32 %v2054_v45, %v1978_v47  ;;  %v2638_v55 = vor.u32 %v2056_v52, %v1984_v51  ;;  %v1972_v6 = vld [vmem:[%s3839_s2 + $0x20] sm:$0xf]  ;;  %s1937_s25 = sshll.u32 %s3941_s14, 4 }
  0x1c   : > { %1044 = vmatpush.bf16.msra.mxu0 %v2013_v0  ;;  %2254 = vmatpush.bf16.msra.mxu3 %v2013_v0  ;;  %p483_p6 = scmp.lt.s32.totalorder %s1937_s25, 31 }
  0x1d   : > { %1093 = vmatpush.bf16.msra.mxu1 %v2545_v7  ;;  %1142 = vmatpush.bf16.msra.mxu2 %v2547_v8 }
  0x1e   : > { %606 = vadd.xlane.f32.xlu2 %v585_v12  ;;  %602 = vadd.xlane.f32.xlu1 %v583_v13  ;;  %v630_v12 = vsub.f32 1.0, %v629_v60  ;;  %v2000_v13 = vld [vmem:[%s3839_s2 + $0x60] sm:$0xf]  ;;  %s3943_s25 = smov (!%p483_p6, %s1937_s25), 31 }
  0x1f   : > { %598 = vadd.xlane.f32.xlu0 %v581_v14  ;;  %v2061_v14 = vld [vmem:[%s3839_s2 + $0x68] sm:$0xf0]  ;;  %s1938_s22 = sshll.u32 %s3943_s25, 3  ;;  %s3570_s25 = scalar_lea.vmem %s3843_s6, %s2395_s30 }
  0x20   : > { %v2001_v16 = vor.u32 %v2061_v14, %v2000_v13  ;;  %v631_v23 = vmul.f32 %v2499_v50, %v630_v12  ;;  %v2053_v12 = vld [vmem:[%s3839_s2 + $0x28] sm:$0xf0]  ;;  %v2665_v14 = vor.u32 %v2051_v63, %v1966_v2  ;;  %s2761_s26 = scalar_lea.vmem %s3841_s4, %s1938_s22  ;;  %s3149_s12 = scalar_lea.vmem %s3842_s5, %s1938_s22 }
  0x21   : > { %s3627_s22 = scalar_lea.vmem %s3844_s7, %s2395_s30 }
  0x22   : > { %1045 = vmatpush.bf16.msra.mxu0 %v2001_v16  ;;  %2255 = vmatpush.bf16.msra.mxu3 %v2001_v16  ;;  %v632_v40 = vadd.f32 %v2499_v50, %v631_v23  ;;  %v2048_v23 = vld [vmem:[%s3839_s2 + $0x4] sm:$0xf] }
  0x24   : > { %v2634_v53 = vsel %vm633_vm0, %v2499_v50, %v632_v40  ;;  %v1964_v50 = vld [vmem:[%s3839_s2 + $0x18] sm:$0xf] }
  0x25   : > { %v1965_v1 = vor.u32 %v2052_v62, %v1964_v50 }
  0x26   : > { %612 = vadd.xlane.f32.xlu2 %v588_v20  ;;  %610 = vadd.xlane.f32.xlu1 %v587_v21  ;;  %v2002_v20 = vld [vmem:[%s3839_s2 + $0x6c] sm:$0xf0]  ;;  %v2008_v21 = vld [vmem:[%s3839_s2 + $0x68] sm:$0xf] }
  0x27   : > { %608 = vadd.xlane.f32.xlu0 %v586_v22  ;;  %v2062_v22 = vld [vmem:[%s3839_s2 + $0x70] sm:$0xf0] }
  0x2e   : > { %618 = vadd.xlane.f32.xlu2 %v591_v27  ;;  %616 = vadd.xlane.f32.xlu1 %v590_v28  ;;  %v2574_v27 = vor.u32 %v2060_v15, %v2002_v20  ;;  %v2576_v28 = vor.u32 %v2062_v22, %v2008_v21  ;;  %v2667_v15 = vor.u32 %v2053_v12, %v1972_v6  ;;  %v1952_v21 = vld [vmem:[%s3839_s2] sm:$0xf]  ;;  %v2049_v22 = vld [vmem:[%s3839_s2 + $0x8] sm:$0xf0] }
  0x2f   : > { %614 = vadd.xlane.f32.xlu0 %v589_v29  ;;  %v1988_v29 = vld [vmem:[%s3839_s2 + $0x48] sm:$0xf] }
  0x30   : > { %1094 = vmatpush.bf16.msra.mxu1 %v2574_v27  ;;  %1143 = vmatpush.bf16.msra.mxu2 %v2576_v28 }
  0x36   : > { %622 = vadd.xlane.f32.xlu1 %v593_v35  ;;  %624 = vadd.xlane.f32.xlu2 %v594_v36  ;;  %v1989_v35 = vor.u32 %v2058_v30, %v1988_v29  ;;  %v1990_v36 = vld [vmem:[%s3839_s2 + $0x54] sm:$0xf0]  ;;  %v1953_v29 = vor.u32 %v2049_v22, %v1952_v21  ;;  %v1954_v30 = vld [vmem:[%s3839_s2 + $0xc] sm:$0xf0] }
  0x37   : > { %620 = vadd.xlane.f32.xlu0 %v592_v37  ;;  %v1996_v37 = vld [vmem:[%s3839_s2 + $0x50] sm:$0xf]  ;;  %v2602_v41 = vor.u32 %v2057_v31, %v1990_v36  ;;  %v1960_v31 = vld [vmem:[%s3839_s2 + $0x8] sm:$0xf] }
  0x38   : > { %1046 = vmatpush.bf16.msra.mxu0 %v1989_v35  ;;  %2256 = vmatpush.bf16.msra.mxu3 %v1989_v35  ;;  %v2050_v35 = vld [vmem:[%s3839_s2 + $0x10] sm:$0xf0] }
  0x39   : > { %1095 = vmatpush.bf16.msra.mxu1 %v2602_v41 }
  0x3c   : > { %1047 = vmatpush.bf16.msra.mxu0 %v1977_v46  ;;  %2257 = vmatpush.bf16.msra.mxu3 %v1977_v46 }
  0x3d   : > { %1096 = vmatpush.bf16.msra.mxu1 %v2636_v54 }
  0x3f   : > { %626 = vadd.xlane.f32.xlu0 %v595_v39  ;;  %v2059_v39 = vld [vmem:[%s3839_s2 + $0x58] sm:$0xf0] }
  0x40   : > { %v2604_v42 = vor.u32 %v2059_v39, %v1996_v37  ;;  %1048 = vmatpush.bf16.msra.mxu0 %v1965_v1  ;;  %2258 = vmatpush.bf16.msra.mxu3 %v1965_v1  ;;  %v2701_v37 = vor.u32 %v2048_v23, %v1954_v30  ;;  %v2703_v39 = vor.u32 %v2050_v35, %v1960_v31  ;;  %v843_v1 = vld [vmem:[%s3838_s1] sm:$0x1] }
  0x41   : > { %1097 = vmatpush.bf16.msra.mxu1 %v2665_v14  ;;  %v844_v22 = vunpack.c.l.bf16 %v843_v1 }
  0x42   : > { %1144 = vmatpush.bf16.msra.mxu2 %v2604_v42  ;;  %3862 = vst [vmem:[#allocation2_spill] sm:$0xff] %v2703_v39 }
  0x44   : > { %1049 = vmatpush.bf16.msra.mxu0 %v1953_v29  ;;  %2259 = vmatpush.bf16.msra.mxu3 %v1953_v29 }
  0x45   : > { %1098 = vmatpush.bf16.msra.mxu1 %v2701_v37 }
  0x46   : > { %1145 = vmatpush.bf16.msra.mxu2 %v2638_v55 }
  0x48   : > { %2260 = vmatpush.bf16.msrb.mxu3 %v2493_v48 }
  0x4a   : > { %1146 = vmatpush.bf16.msra.mxu2 %v2667_v15 }
  0x4c   : > { %2261 = vmatpush.bf16.msrb.mxu3 %v2519_v58 }
  0x4e   : > { %1147 = vmatpush.bf16.msra.mxu2 %v2703_v39 }
  0x50   : > { %2262 = vmatpush.bf16.msrb.mxu3 %v2545_v7 }
  0x54   : > { %2263 = vmatpush.bf16.msrb.mxu3 %v2574_v27 }
  0x58   : > { %2264 = vmatpush.bf16.msrb.mxu3 %v2602_v41 }
  0x5c   : > { %2265 = vmatpush.bf16.msrb.mxu3 %v2636_v54 }
  0x60   : > { %2266 = vmatpush.bf16.msrb.mxu3 %v2665_v14 }
  0x64   : > { %2267 = vmatpush.bf16.msrb.mxu3 %v2701_v37 }
  0x89   : > { %v605_v56 = vpop.xlane.xlu2 %604  ;;  %v601_v57 = vpop.xlane.xlu1 %600 }
  0x8a   : > { %v639_v60 = vmul.f32 %v2634_v53, %v605_v56  ;;  %v597_v61 = vpop.xlane.xlu0 %596  ;;  %v637_v13 = vmul.f32 %v2634_v53, %v601_v57 }
  0x8b   : > { %v635_v0 = vmul.f32 %v2634_v53, %v597_v61 }
  0x8c   : > { %v2669_v16 = vadd.f32 1e-05, %v639_v60  ;;  %v2698_v36 = vadd.f32 1e-05, %v637_v13 }
  0x8d   : > { %v2671_v20 = vadd.f32 1e-05, %v635_v0 }
  0x8e   : > { %vm693_vm6 = vweird.f32 %v2698_v36 }
  0x8f   : > { %2290 = vrsqrt.f32 %v2671_v20  ;;  %vm673_vm1 = vweird.f32 %v2671_v20 }
  0x90   : > { %2292 = vrsqrt.f32 %v2669_v16 }
  0x91   : > { %v607_v40 = vpop.xlane.xlu2 %606  ;;  %v603_v43 = vpop.xlane.xlu1 %602  ;;  %2294 = vrsqrt.f32 %v2698_v36 }
  0x92   : > { %v638_v44 = vmul.f32 %v2634_v53, %v603_v43  ;;  %v599_v45 = vpop.xlane.xlu0 %598  ;;  %v640_v47 = vmul.f32 %v2634_v53, %v607_v40 }
  0x93   : > { %v636_v46 = vmul.f32 %v2634_v53, %v599_v45 }
  0x94   : > { %v2718_v56 = vadd.f32 1e-05, %v638_v44  ;;  %v2723_v60 = vadd.f32 1e-05, %v640_v47 }
  0x95   : > { %v2714_v51 = vadd.f32 1e-05, %v636_v46  ;;  %v2716_v52 = vpop.eup %2290  ;;  %v2768_v46 = vperm.slane %v844_v22, 0 }
  0x96   : > { %v668_v57 = vmul.f32 %v2716_v52, %v2671_v20  ;;  %v2726_v48 = vpop.eup %2292  ;;  %vm674_vm2 = vweird.f32 %v2716_v52  ;;  %vm703_vm9 = vweird.f32 %v2718_v56 }
  0x97   : > { %2296 = vrsqrt.f32 %v2714_v51  ;;  %v2730_v62 = vpop.eup %2294  ;;  %v708_v2 = vmul.f32 %v2726_v48, %v2669_v16  ;;  %vm683_vm4 = vweird.f32 %v2714_v51  ;;  %vm2808_vm5 = vmor %vm673_vm1, %vm674_vm2 }
  0x98   : > { %v669_v63 = vmul.f32 %v2716_v52, %v668_v57  ;;  %2298 = vrsqrt.f32 %v2718_v56  ;;  %v688_v12 = vmul.f32 %v2730_v62, %v2698_v36  ;;  %vm694_vm7 = vweird.f32 %v2730_v62 }
  0x99   : > { %v613_v61 = vpop.xlane.xlu2 %612  ;;  %v611_v50 = vpop.xlane.xlu1 %610  ;;  %2300 = vrsqrt.f32 %v2723_v60  ;;  %v709_v29 = vmul.f32 %v2726_v48, %v708_v2  ;;  %vm2887_vm12 = vmor %vm693_vm6, %vm694_vm7 }
  0x9a   : > { %v643_v0 = vmul.f32 %v2634_v53, %v613_v61  ;;  %v609_v58 = vpop.xlane.xlu0 %608  ;;  %v670_v21 = vmul.f32 0.5, %v669_v63  ;;  %v689_v30 = vmul.f32 %v2730_v62, %v688_v12 }
  0x9b   : > { %v710_v2 = vmul.f32 0.5, %v709_v29 }
  0x9c   : > { %v2742_v6 = vadd.f32 1e-05, %v643_v0  ;;  %v671_v27 = vsub.f32 1.5, %v670_v21  ;;  %v2775_v0 = vld [vmem:[%s2761_s26] sm:$0xff]  ;;  %v690_v21 = vmul.f32 0.5, %v689_v30 }
  0x9d   : > { %v2747_v13 = vpop.eup %2296  ;;  %3863 = vst [vmem:[#allocation3_spill] sm:$0xff] %v2775_v0  ;;  %1221 = vrot.lane.b32.xlu1 %v2775_v0, %s2336_s29 }
  0x9e   : > { %2302 = vrsqrt.f32 %v2742_v6  ;;  %v678_v7 = vmul.f32 %v2747_v13, %v2714_v51  ;;  %v2753_v23 = vpop.eup %2298  ;;  %v672_v29 = vmul.f32 %v2716_v52, %v671_v27  ;;  %vm684_vm3 = vweird.f32 %v2747_v13 }
  0x9f   : > { %v2765_v43 = vpop.eup %2300  ;;  %v698_v47 = vmul.f32 %v2753_v23, %v2718_v56  ;;  %v691_v27 = vsub.f32 1.5, %v690_v21  ;;  %vm2819_vm8 = vmor %vm683_vm4, %vm684_vm3  ;;  %v2830_v21 = vld [vmem:[%s2761_s26 + $0x10] sm:$0xff]  ;;  %vm704_vm10 = vweird.f32 %v2753_v23  ;;  %vm753_vm11 = vweird.f32 %v2742_v6 }
  0xa0   : > { %v679_v31 = vmul.f32 %v2747_v13, %v678_v7  ;;  %v718_v22 = vmul.f32 %v2765_v43, %v2723_v60  ;;  %3869 = vst [vmem:[#allocation5_spill] sm:$0xff] %v2830_v21  ;;  %1225 = vrot.lane.b32.xlu0 %v2830_v21, %s2336_s29  ;;  %vm2910_vm14 = vmor %vm703_vm9, %vm704_vm10  ;;  %vm713_vm4 = vweird.f32 %v2669_v16  ;;  %vm723_vm9 = vweird.f32 %v2723_v60 }
  0xa1   : > { %v619_v35 = vpop.xlane.xlu2 %618  ;;  %v617_v40 = vpop.xlane.xlu1 %616  ;;  %vm724_vm10 = vweird.f32 %v2765_v43 }
  0xa2   : > { %v646_v44 = vmul.f32 %v2634_v53, %v619_v35  ;;  %v615_v45 = vpop.xlane.xlu0 %614  ;;  %v680_v57 = vmul.f32 0.5, %v679_v31  ;;  %v645_v61 = vmul.f32 %v2634_v53, %v617_v40  ;;  %v642_v31 = vmul.f32 %v2634_v53, %v611_v50 }
  0xa3   : > { %v644_v63 = vmul.f32 %v2634_v53, %v615_v45  ;;  %v699_v40 = vmul.f32 %v2753_v23, %v698_v47  ;;  %v711_v45 = vsub.f32 1.5, %v710_v2  ;;  %v641_v50 = vmul.f32 %v2634_v53, %v609_v58  ;;  %v2827_v2 = vld [vmem:[%s2761_s26 + $0x20] sm:$0xff] }
  0xa4   : > { %v2778_v1 = vpop.eup %2302  ;;  %v2782_v12 = vadd.f32 1e-05, %v646_v44  ;;  %v681_v7 = vsub.f32 1.5, %v680_v57  ;;  %v2793_v35 = vadd.f32 1e-05, %v645_v61  ;;  %v719_v54 = vmul.f32 %v2765_v43, %v718_v22  ;;  %3868 = vst [vmem:[#allocation4_spill] sm:$0xff] %v2827_v2 }
  0xa5   : > { %v748_v41 = vmul.f32 %v2778_v1, %v2742_v6  ;;  %v2798_v30 = vadd.f32 1e-05, %v644_v63  ;;  %v2823_v20 = vadd.f32 1e-05, %v642_v31  ;;  %v676_v22 = vsel %vm2808_vm5, %v2716_v52, %v672_v29  ;;  %1229 = vrot.lane.b32.xlu1 %v2827_v2, %s2336_s29 }
  0xa6   : > { %2304 = vrsqrt.f32 %v2782_v12  ;;  %v682_v44 = vmul.f32 %v2747_v13, %v681_v7  ;;  %v700_v7 = vmul.f32 0.5, %v699_v40  ;;  %v2848_v52 = vadd.f32 1e-05, %v641_v50 }
  0xa7   : > { %2306 = vrsqrt.f32 %v2793_v35  ;;  %v749_v57 = vmul.f32 %v2778_v1, %v748_v41  ;;  %v720_v40 = vmul.f32 0.5, %v719_v54  ;;  %v827_v50 = vmul.f32 %v2410_v5, %v676_v22 }
  0xa8   : > { %2308 = vrsqrt.f32 %v2798_v30  ;;  %v686_v41 = vsel %vm2819_vm8, %v2747_v13, %v682_v44  ;;  %v2855_v13 = vmul.f32 %v2730_v62, %v691_v27  ;;  %vm754_vm13 = vweird.f32 %v2778_v1 }
  0xa9   : > { %v623_v51 = vpop.xlane.xlu1 %622  ;;  %v750_v44 = vmul.f32 0.5, %v749_v57  ;;  %v828_v58 = vmul.f32 %v2422_v11, %v686_v41  ;;  %v625_v11 = vpop.xlane.xlu2 %624  ;;  %v846_v37 = vmul.f32 %v2768_v46, %v827_v50  ;;  %vm783_vm15 = vweird.f32 %v2782_v12  ;;  %vm2924_vm0 = vmor %vm753_vm11, %vm754_vm13 }
  0xaa   : > { %v648_v61 = vmul.f32 %v2634_v53, %v623_v51  ;;  %v621_v63 = vpop.xlane.xlu0 %620  ;;  %v2845_v51 = vmul.f32 %v2726_v48, %v711_v45  ;;  %v696_v50 = vsel %vm2887_vm12, %v2730_v62, %v2855_v13  ;;  %vm763_vm3 = vweird.f32 %v2798_v30 }
  0xab   : > { %v647_v0 = vmul.f32 %v2634_v53, %v621_v63  ;;  %v701_v63 = vsub.f32 1.5, %v700_v7  ;;  %v751_v57 = vsub.f32 1.5, %v750_v44  ;;  %vm714_vm5 = vweird.f32 %v2726_v48 }
  0xac   : > { %v2842_v31 = vpop.eup %2304  ;;  %v2850_v29 = vadd.f32 1e-05, %v648_v61  ;;  %vm773_vm12 = vweird.f32 %v2793_v35 }
  0xad   : > { %v778_v14 = vmul.f32 %v2842_v31, %v2782_v12  ;;  %v2859_v47 = vpop.eup %2306  ;;  %v2862_v45 = vadd.f32 1e-05, %v647_v0  ;;  %v721_v0 = vsub.f32 1.5, %v720_v40  ;;  %v702_v40 = vmul.f32 %v2753_v23, %v701_v63 }
  0xae   : > { %2310 = vrsqrt.f32 %v2850_v29  ;;  %v2866_v61 = vpop.eup %2308  ;;  %v768_v54 = vmul.f32 %v2859_v47, %v2793_v35  ;;  %v752_v21 = vmul.f32 %v2778_v1, %v751_v57  ;;  %vm784_vm2 = vweird.f32 %v2842_v31 }
  0xaf   : > { %2312 = vrsqrt.f32 %v2823_v20  ;;  %v779_v27 = vmul.f32 %v2842_v31, %v778_v14  ;;  %v758_v5 = vmul.f32 %v2866_v61, %v2798_v30  ;;  %v847_v14 = vmul.f32 %v2768_v46, %v828_v58  ;;  %vm2979_vm11 = vmor %vm783_vm15, %vm784_vm2 }
  0xb0   : > { %2314 = vrsqrt.f32 %v2848_v52  ;;  %v769_v22 = vmul.f32 %v2859_v47, %v768_v54  ;;  %v2904_v63 = vmul.f32 %v2765_v43, %v721_v0  ;;  %vm764_vm1 = vweird.f32 %v2866_v61 }
  0xb1   : > { %2316 = vrsqrt.f32 %v2862_v45  ;;  %v780_v7 = vmul.f32 0.5, %v779_v27  ;;  %v759_v41 = vmul.f32 %v2866_v61, %v758_v5  ;;  %v649_v27 = vmul.f32 %v2634_v53, %v625_v11  ;;  %vm2967_vm7 = vmor %vm763_vm3, %vm764_vm1 }
  0xb2   : > { %v627_v2 = vpop.xlane.xlu0 %626  ;;  %v770_v44 = vmul.f32 0.5, %v769_v22  ;;  %v862_v36 = vpack.c.bf16 %v847_v14, %v846_v37  ;;  %v1196_v14 = vld [vmem:[%s2761_s26 + $0x38] sm:$0xff]  ;;  %vm774_vm6 = vweird.f32 %v2859_v47  ;;  %vm793_vm1 = vweird.f32 %v2862_v45 }
  0xb3   : > { %v760_v58 = vmul.f32 0.5, %v759_v41  ;;  %v650_v5 = vmul.f32 %v2634_v53, %v627_v2  ;;  %v781_v2 = vsub.f32 1.5, %v780_v7  ;;  %v2928_v0 = vadd.f32 1e-05, %v649_v27  ;;  %v2940_v7 = vld [vmem:[%s2761_s26 + $0x8] sm:$0xff]  ;;  %1235 = vrot.lane.b32.xlu1 %v1196_v14, %s2336_s29  ;;  %vm2999_vm13 = vmor %vm773_vm12, %vm774_vm6 }
  0xb4   : > { %v2894_v54 = vpop.eup %2310  ;;  %1050 = vmatmul.bf16.vlgmr.msra.gmra.mxu0 %v862_v36  ;;  %1099 = vmatmul.bf16.vlgmr.msra.gmra.mxu1 %v862_v36  ;;  %v706_v41 = vsel %vm2910_vm14, %v2753_v23, %v702_v40  ;;  %v771_v6 = vsub.f32 1.5, %v770_v44  ;;  %v2952_v23 = vld [vmem:[%s2761_s26 + $0x28] sm:$0xff]  ;;  %v756_v40 = vsel %vm2924_vm0, %v2778_v1, %v752_v21  ;;  %vm803_vm14 = vweird.f32 %v2850_v29  ;;  %vm3057_vm6 = vmor %vm713_vm4, %vm714_vm5 }
  0xb5   : > { %v2901_v39 = vpop.eup %2312  ;;  %v798_v53 = vmul.f32 %v2894_v54, %v2850_v29  ;;  %v761_v13 = vsub.f32 1.5, %v760_v58  ;;  %v2930_v57 = vadd.f32 1e-05, %v650_v5  ;;  %1148 = vmatmul.bf16.vlgmr.msra.gmra.mxu2 %v862_v36  ;;  %2318 = vrsqrt.f32 %v2928_v0  ;;  %1223 = vrot.lane.b32.xlu2 %v2940_v7, %s2336_s29  ;;  %v1197_v29 = vld [vmem:[%s2761_s26 + $0x40] sm:$0xff] }
  0xb6   : > { %v2918_v62 = vpop.eup %2314  ;;  %1231 = vrot.lane.b32.xlu0 %v2952_v23, %s2336_s29  ;;  %v782_v36 = vmul.f32 %v2842_v31, %v781_v2  ;;  %vm804_vm8 = vweird.f32 %v2894_v54  ;;  %v772_v11 = vmul.f32 %v2859_v47, %v771_v6  ;;  %v830_v56 = vmul.f32 %v2420_v10, %v706_v41  ;;  %v3007_v41 = vld [vmem:[%s2761_s26 + $0x18] sm:$0xff] }
  0xb7   : > { %v2932_v22 = vpop.eup %2316  ;;  %v799_v37 = vmul.f32 %v2894_v54, %v798_v53  ;;  %v762_v27 = vmul.f32 %v2866_v61, %v761_v13  ;;  %2320 = vrsqrt.f32 %v2930_v57  ;;  %v2990_v2 = vmul.f32 %v2901_v39, %v2823_v20  ;;  %vm805_vm15 = vmor %vm803_vm14, %vm804_vm8 }
  0xb8   : > { %v788_v58 = vmul.f32 %v2932_v22, %v2862_v45  ;;  %v2994_v12 = vmul.f32 %v2918_v62, %v2848_v52  ;;  %v835_v14 = vmul.f32 %v2432_v17, %v756_v40  ;;  %v786_v35 = vsel %vm2979_vm11, %v2842_v31, %v782_v36  ;;  %vm3068_vm8 = vmor %vm723_vm9, %vm724_vm10 }
  0xb9   : > { %v800_v44 = vmul.f32 0.5, %v799_v37  ;;  %v766_v21 = vsel %vm2967_vm7, %v2866_v61, %v762_v27  ;;  %v829_v61 = vmul.f32 %v2408_v4, %v696_v50  ;;  %v1199_v37 = vld [vmem:[%s2761_s26 + $0x50] sm:$0xff]  ;;  %vm794_vm0 = vweird.f32 %v2932_v22 }
  0xba   : > { %v789_v30 = vmul.f32 %v2932_v22, %v788_v58  ;;  %v836_v4 = vmul.f32 %v2449_v26, %v766_v21  ;;  %v776_v17 = vsel %vm2999_vm13, %v2859_v47, %v772_v11  ;;  %vm795_vm2 = vmor %vm793_vm1, %vm794_vm0  ;;  %v838_v6 = vmul.f32 %v2445_v24, %v786_v35 }
  0xbb   : > { %v801_v53 = vsub.f32 1.5, %v800_v44  ;;  %v3011_v27 = vpop.eup %2318  ;;  %v849_v44 = vmul.f32 %v2768_v46, %v830_v56  ;;  %1241 = vrot.lane.b32.xlu1 %v1199_v37, %s2336_s29  ;;  %v837_v21 = vmul.f32 %v2447_v25, %v776_v17  ;;  %vm813_vm3 = vweird.f32 %v2928_v0  ;;  %v3234_v25 = vld [vmem:[%s3149_s12 + $0x50] sm:$0xff] }
  0xbc   : > { %v790_v13 = vmul.f32 0.5, %v789_v30  ;;  %v808_v31 = vmul.f32 %v3011_v27, %v2928_v0  ;;  %v854_v30 = vmul.f32 %v2768_v46, %v835_v14  ;;  %v855_v45 = vmul.f32 %v2768_v46, %v836_v4  ;;  %v1200_v4 = vld [vmem:[%s2761_s26 + $0x58] sm:$0xff]  ;;  %3893 = vst [vmem:[#allocation9_spill] sm:$0xff] %v3234_v25  ;;  %v902_v14 = vld [vmem:[%s3840_s3] sm:$0x7] }
  0xbd   : > { %v802_v10 = vmul.f32 %v2894_v54, %v801_v53  ;;  %v3021_v50 = vpop.eup %2320  ;;  %1227 = vrot.lane.b32.xlu2 %v3007_v41, %s2336_s29  ;;  %vm814_vm7 = vweird.f32 %v3011_v27  ;;  %v857_v37 = vmul.f32 %v2768_v46, %v838_v6  ;;  %vm823_vm4 = vweird.f32 %v2930_v57  ;;  %v3213_v6 = vld [vmem:[%s3149_s12 + $0x48] sm:$0xff] }
  0xbe   : > { %v791_v58 = vsub.f32 1.5, %v790_v13  ;;  %v818_v26 = vmul.f32 %v3021_v50, %v2930_v57  ;;  %v809_v47 = vmul.f32 %v3011_v27, %v808_v31  ;;  %1237 = vrot.lane.b32.xlu0 %v1197_v29, %s2336_s29  ;;  %v3048_v13 = vpack.c.bf16 %v855_v45, %v854_v30  ;;  %v3080_v29 = vld [vmem:[%s2761_s26 + $0x68] sm:$0xff]  ;;  %vm3094_vm9 = vmor %vm813_vm3, %vm814_vm7  ;;  %v3153_v45 = vld [vmem:[%s2761_s26 + $0x60] sm:$0xff]  ;;  %3891 = vst [vmem:[#allocation7_spill] sm:$0xff] %v3213_v6 }
  0xbf   : > { %v806_v40 = vsel %vm805_vm15, %v2894_v54, %v802_v10  ;;  %v848_v54 = vmul.f32 %v2768_v46, %v829_v61  ;;  %vm824_vm5 = vweird.f32 %v3021_v50  ;;  %v716_v17 = vsel %vm3057_vm6, %v2726_v48, %v2845_v51  ;;  %v1198_v57 = vld [vmem:[%s2761_s26 + $0x48] sm:$0xff] }
  0xc0   : > { %v792_v36 = vmul.f32 %v2932_v22, %v791_v58  ;;  %v840_v1 = vmul.f32 %v2459_v32, %v806_v40  ;;  %v819_v32 = vmul.f32 %v3021_v50, %v818_v26  ;;  %v810_v53 = vmul.f32 0.5, %v809_v47  ;;  %v3077_v58 = vld [vmem:[%s2761_s26 + $0x30] sm:$0xff]  ;;  %vm825_vm10 = vmor %vm823_vm4, %vm824_vm5 }
  0xc1   : > { %v863_v61 = vpack.c.bf16 %v849_v44, %v848_v54  ;;  %v726_v48 = vsel %vm3068_vm8, %v2765_v43, %v2904_v63  ;;  %v739_v51 = vmul.f32 %v2901_v39, %v2990_v2  ;;  %v729_v0 = vmul.f32 %v2918_v62, %v2994_v12 }
  0xc2   : > { %v796_v5 = vsel %vm795_vm2, %v2932_v22, %v792_v36  ;;  %v859_v11 = vmul.f32 %v2768_v46, %v840_v1  ;;  %v820_v10 = vmul.f32 0.5, %v819_v32  ;;  %v856_v22 = vmul.f32 %v2768_v46, %v837_v21  ;;  %v3126_v1 = vld [vmem:[%s2761_s26 + $0x70] sm:$0xff]  ;;  %v3161_v32 = vld [vmem:[%s3149_s12] sm:$0xff] }
  0xc3   : > { %v839_v56 = vmul.f32 %v2463_v34, %v796_v5  ;;  %v811_v34 = vsub.f32 1.5, %v810_v53  ;;  %1247 = vrot.lane.b32.xlu1 %v3080_v29, %s2336_s29  ;;  %v831_v2 = vmul.f32 %v2406_v3, %v716_v17  ;;  %v832_v12 = vmul.f32 %v2418_v9, %v726_v48  ;;  %v3198_v21 = vld [vmem:[%s3149_s12 + $0x30] sm:$0xff]  ;;  %v3201_v53 = vld [vmem:[%s3149_s12 + $0x20] sm:$0xff] }
  0xc4   : > { %v821_v16 = vsub.f32 1.5, %v820_v10  ;;  %1055 = vmatmul.bf16.gmra.mxu0 %v863_v61  ;;  %1104 = vmatmul.bf16.gmra.mxu1 %v863_v61  ;;  %v3083_v60 = vpack.c.bf16 %v857_v37, %v856_v22  ;;  %v740_v36 = vmul.f32 0.5, %v739_v51  ;;  %v730_v26 = vmul.f32 0.5, %v729_v0  ;;  %v3218_v10 = vld [vmem:[%s3149_s12 + $0x38] sm:$0xff]  ;;  %v3231_v22 = vld [vmem:[%s3149_s12 + $0x60] sm:$0xff] }
  0xc5   : > { %v858_v24 = vmul.f32 %v2768_v46, %v839_v56  ;;  %1153 = vmatmul.bf16.gmra.mxu2 %v863_v61  ;;  %v812_v40 = vmul.f32 %v3011_v27, %v811_v34  ;;  %1233 = vrot.lane.b32.xlu2 %v3077_v58, %s2336_s29  ;;  %v850_v54 = vmul.f32 %v2768_v46, %v831_v2  ;;  %vm744_vm11 = vweird.f32 %v2901_v39  ;;  %v3210_v56 = vld [vmem:[%s3149_s12 + $0x40] sm:$0xff]  ;;  %v3228_v61 = vld [vmem:[%s3149_s12 + $0x58] sm:$0xff] }
  0xc6   : > { %v822_v44 = vmul.f32 %v3021_v50, %v821_v16  ;;  %1243 = vrot.lane.b32.xlu0 %v1200_v4, %s2336_s29  ;;  %v741_v3 = vsub.f32 1.5, %v740_v36  ;;  %v731_v9 = vsub.f32 1.5, %v730_v26  ;;  %vm734_vm12 = vweird.f32 %v2918_v62  ;;  %3890 = vst [vmem:[#allocation6_spill] sm:$0xff] %v3210_v56  ;;  %v3246_v34 = vld [vmem:[%s3149_s12 + $0x78] sm:$0xff] }
  0xc7   : > { %v3074_v35 = vpack.c.bf16 %v859_v11, %v858_v24  ;;  %v816_v43 = vsel %vm3094_vm9, %v3011_v27, %v812_v40  ;;  %v851_v27 = vmul.f32 %v2768_v46, %v832_v12  ;;  %vm743_vm13 = vweird.f32 %v2823_v20  ;;  %v3169_v11 = vld [vmem:[%s2761_s26 + $0x78] sm:$0xff]  ;;  %3892 = vst [vmem:[#allocation8_spill] sm:$0xff] %v3228_v61  ;;  %v3251_v24 = vld [vmem:[%s3149_s12 + $0x68] sm:$0xff] }
  0xc8   : > { %v826_v63 = vsel %vm825_vm10, %v3021_v50, %v822_v44  ;;  %v841_v47 = vmul.f32 %v2461_v33, %v816_v43  ;;  %v742_v50 = vmul.f32 %v2901_v39, %v741_v3  ;;  %v732_v30 = vmul.f32 %v2918_v62, %v731_v9  ;;  %vm745_vm14 = vmor %vm743_vm13, %vm744_vm11  ;;  %v3894_v43 = vld [vmem:[#allocation3_spill] sm:$0xff] }
  0xc9   : > { %1080 = vmatmul.bf16.vlgmr.msra.gmra.mxu3 %v3074_v35  ;;  %vm733_vm15 = vweird.f32 %v2848_v52  ;;  %v903_v16 = vunpack.c.l.bf16 %v902_v14  ;;  %vm1269_vm1 = vcmask 523264  }
  0xca   : > { %2268 = vmatpush.bf16.msra.mxu3 %v2495_v49  ;;  %v842_v49 = vmul.f32 %v2471_v38, %v826_v63  ;;  %v864_v38 = vpack.c.bf16 %v851_v27, %v850_v54  ;;  %vm735_vm0 = vmor %vm733_vm15, %vm734_vm12  ;;  %v746_v20 = vsel %vm745_vm14, %v2901_v39, %v742_v50 }
  0xcb   : > { %v736_v5 = vsel %vm735_vm0, %v2918_v62, %v732_v30  ;;  %1318 = vrot.lane.b32.xlu1 %v3161_v32, %s2336_s29  ;;  %v834_v52 = vmul.f32 %v2434_v18, %v746_v20  ;;  %v3888_v18 = vld [vmem:[#allocation2_spill] sm:$0xff]  ;;  %v905_v17 = vperm.slane %v903_v16, 0  ;;  %v906_v40 = vperm.slane %v903_v16, 2 }
  0xcc   : > { %v861_v33 = vmul.f32 %v2768_v46, %v842_v49  ;;  %3889 = vst [vmem:[#allocation2_spill] sm:$0xff] %v3198_v21  ;;  %v907_v27 = vperm.slane %v903_v16, 4 }
  0xcd   : > { %1239 = vrot.lane.b32.xlu2 %v1198_v57, %s2336_s29  ;;  %v853_v62 = vmul.f32 %v2768_v46, %v834_v52  ;;  %v3264_v31 = vperm.slane %v905_v17, 0  ;;  %v3266_v44 = vperm.slane %v906_v40, 0  ;;  %v3896_v52 = vld [vmem:[#allocation5_spill] sm:$0xff] }
  0xce   : > { %2269 = vmatpush.bf16.msra.mxu3 %v2521_v59  ;;  %1249 = vrot.lane.b32.xlu0 %v3126_v1, %s2336_s29  ;;  %v860_v59 = vmul.f32 %v2768_v46, %v841_v47 }
  0xd2   : > { %2270 = vmatpush.bf16.msra.mxu3 %v2547_v8  ;;  %v869_v8 = vpack.c.bf16 %v861_v33, %v860_v59 }
  0xd4   : > { %1060 = vmatmul.bf16.gmra.mxu0 %v864_v38  ;;  %1109 = vmatmul.bf16.gmra.mxu1 %v864_v38 }
  0xd5   : > { %1158 = vmatmul.bf16.gmra.mxu2 %v864_v38  ;;  %1245 = vrot.lane.b32.xlu2 %v3153_v45, %s2336_s29 }
  0xd6   : > { %2271 = vmatpush.bf16.msra.mxu3 %v2576_v28  ;;  %v833_v28 = vmul.f32 %v2436_v19, %v736_v5  ;;  %v3179_v19 = vld [vmem:[%s3149_s12 + $0x10] sm:$0xff] }
  0xd8   : > { %v852_v39 = vmul.f32 %v2768_v46, %v833_v28  ;;  %v3185_v46 = vld [vmem:[%s3149_s12 + $0x8] sm:$0xff] }
  0xd9   : > { %1085 = vmatmul.bf16.gmra.mxu3 %v869_v8  ;;  %1320 = vrot.lane.b32.xlu0 %v3185_v46, %s2336_s29 }
  0xda   : > { %2272 = vmatpush.bf16.msra.mxu3 %v2604_v42  ;;  %v865_v42 = vpack.c.bf16 %v853_v62, %v852_v39 }
  0xdd   : > { %1251 = vrot.lane.b32.xlu2 %v3169_v11, %s2336_s29 }
  0xde   : > { %2273 = vmatpush.bf16.msra.mxu3 %v2638_v55  ;;  %v3182_v55 = vld [vmem:[%s3149_s12 + $0x18] sm:$0xff] }
  0xdf   : > { %1324 = vrot.lane.b32.xlu1 %v3182_v55, %s2336_s29 }
  0xe1   : > { %1326 = vrot.lane.b32.xlu0 %v3201_v53, %s2336_s29 }
  0xe2   : > { %2274 = vmatpush.bf16.msra.mxu3 %v2667_v15  ;;  %v3195_v15 = vld [vmem:[%s3149_s12 + $0x28] sm:$0xff] }
  0xe4   : > { %1065 = vmatmul.bf16.gmra.mxu0 %v865_v42  ;;  %1114 = vmatmul.bf16.gmra.mxu1 %v865_v42 }
  0xe5   : > { %1163 = vmatmul.bf16.gmra.mxu2 %v865_v42  ;;  %1322 = vrot.lane.b32.xlu2 %v3179_v19, %s2336_s29 }
  0xe6   : > { %2275 = vmatpush.bf16.msra.mxu3 %v3888_v18 }
  0xe7   : > { %1330 = vrot.lane.b32.xlu1 %v3198_v21, %s2336_s29 }
  0xe9   : > { %1129 = vmatmul.bf16.vlgmr.msrb.gmra.mxu3 %v3074_v35  ;;  %1332 = vrot.lane.b32.xlu0 %v3218_v10, %s2336_s29 }
  0xed   : > { %1328 = vrot.lane.b32.xlu2 %v3195_v15, %s2336_s29 }
  0xef   : > { %1336 = vrot.lane.b32.xlu1 %v3213_v6, %s2336_s29 }
  0xf1   : > { %1338 = vrot.lane.b32.xlu0 %v3234_v25, %s2336_s29 }
  0xf4   : > { %1070 = vmatmul.bf16.gmra.mxu0 %v3048_v13  ;;  %1119 = vmatmul.bf16.gmra.mxu1 %v3048_v13 }
  0xf5   : > { %1168 = vmatmul.bf16.gmra.mxu2 %v3048_v13  ;;  %1334 = vrot.lane.b32.xlu2 %v3210_v56, %s2336_s29  ;;  %v3243_v13 = vld [vmem:[%s3149_s12 + $0x70] sm:$0xff] }
  0xf7   : > { %1342 = vrot.lane.b32.xlu1 %v3231_v22, %s2336_s29 }
  0xf9   : > { %1134 = vmatmul.bf16.gmra.mxu3 %v869_v8  ;;  %1344 = vrot.lane.b32.xlu0 %v3251_v24, %s2336_s29 }
  0xfd   : > { %1340 = vrot.lane.b32.xlu2 %v3228_v61, %s2336_s29 }
  0xff   : > { %1348 = vrot.lane.b32.xlu1 %v3246_v34, %s2336_s29 }
 0x104   : > { %1075 = vmatmul.bf16.gmra.mxu0 %v3083_v60  ;;  %1124 = vmatmul.bf16.gmra.mxu1 %v3083_v60 }
 0x105   : > { %1173 = vmatmul.bf16.gmra.mxu2 %v3083_v60  ;;  %1346 = vrot.lane.b32.xlu2 %v3243_v13, %s2336_s29 }
 0x109   : > { %1178 = vmatmul.bf16.vlgmr.msra.gmra.mxu3 %v3074_v35 }
 0x10f   : > { %v1224_v37 = vpop.permute.xlu2 %1223  ;;  %v1222_v4 = vpop.permute.xlu1 %1221 }
 0x110   : > { %v1270_v63 = vsel %vm1269_vm1, %v3894_v43, %v1222_v4  ;;  %v1271_v54 = vsel %vm1269_vm1, %v2940_v7, %v1224_v37 }
 0x112   : > { %v1226_v35 = vpop.permute.xlu0 %1225 }
 0x113   : > { %v1272_v39 = vsel %vm1269_vm1, %v3896_v52, %v1226_v35 }
 0x117   : > { %v1228_v60 = vpop.permute.xlu2 %1227  ;;  %v3268_v48 = vpop.permute.xlu1 %1229 }
 0x119   : > { %1183 = vmatmul.bf16.gmra.mxu3 %v869_v8  ;;  %v3299_v8 = vperm.slane %v907_v27, 0 }
 0x11f   : > { %v3274_v36 = vpop.permute.xlu2 %1233 }
 0x125   : > { %v3291_v38 = vpop.permute.xlu1 %1235 }
 0x127   : > { %v3302_v7 = vpop.permute.xlu2 %1239 }
 0x128   : > { %v3283_v49 = vpop.permute.xlu0 %1231  ;;  %3895 = vst [vmem:[#allocation3_spill] sm:$0xff] %v3302_v7 }
 0x12d   : > { %v3326_v40 = vpop.permute.xlu1 %1241 }
 0x12e   : > { %3898 = vst [vmem:[#allocation10_spill] sm:$0xff] %v3326_v40 }
 0x12f   : > { %v1246_v35 = vpop.permute.xlu2 %1245 }
 0x130   : > { %v3318_v16 = vpop.permute.xlu0 %1237 }
 0x131   : > { %v1051_v51 = vpop.f32.mrf.mxu0  ;;  %v1100_v0 = vpop.f32.mrf.mxu1  ;;  %3897 = vst [vmem:[#allocation5_spill] sm:$0xff] %v3318_v16 }
 0x132   : > { %v1052_v2 = vadd.f32 %v1051_v51, %v3264_v31  ;;  %v1101_v12 = vadd.f32 %v1100_v0, %v3266_v44  ;;  %v1273_v0 = vsel %vm1269_vm1, %v3007_v41, %v1228_v60 }
 0x134   : > { %v3276_v26 = vmul.f32 %v1270_v63, %v1052_v2  ;;  %v3278_v57 = vmul.f32 %v1270_v63, %v1101_v12  ;;  %1575 = vrot.lane.b32.xlu1 %v1101_v12, %s2337_s13  ;;  %1429 = vrot.lane.b32.xlu2 %v1052_v2, %s2338_s15 }
 0x135   : > { %1397 = vrot.lane.b32.xlu0 %v1052_v2, %s2337_s13 }
 0x138   : > { %v1149_v47 = vpop.f32.mrf.mxu2  ;;  %v3349_v60 = vpop.permute.xlu0 %1243 }
 0x139   : > { %v1053_v3 = vpop.f32.mrf.mxu0  ;;  %v1102_v9 = vpop.f32.mrf.mxu1  ;;  %v1150_v5 = vadd.f32 %v1149_v47, %v3299_v8  ;;  %3899 = vst [vmem:[#allocation11_spill] sm:$0xff] %v3349_v60 }
 0x13a   : > { %v1054_v59 = vadd.f32 %v1053_v3, %v3264_v31  ;;  %v3289_v33 = vadd.f32 %v1102_v9, %v3266_v44 }
 0x13c   : > { %v3293_v50 = vmul.f32 %v1271_v54, %v1054_v59  ;;  %v3296_v30 = vmul.f32 %v1271_v54, %v3289_v33  ;;  %1431 = vrot.lane.b32.xlu1 %v1054_v59, %s2338_s15  ;;  %v1282_v54 = vsel %vm1269_vm1, %v3153_v45, %v1246_v35  ;;  %v3900_v45 = vld [vmem:[#allocation4_spill] sm:$0xff] }
 0x13d   : > { %1607 = vrot.lane.b32.xlu0 %v1101_v12, %s2338_s15 }
 0x140   : > { %v1151_v20 = vpop.f32.mrf.mxu2 }
 0x141   : > { %v1152_v28 = vadd.f32 %v1151_v20, %v3299_v8  ;;  %v1056_v62 = vpop.f32.mrf.mxu0  ;;  %v1105_v42 = vpop.f32.mrf.mxu1 }
 0x142   : > { %v1057_v18 = vadd.f32 %v1056_v62, %v3264_v31  ;;  %v3316_v37 = vadd.f32 %v1105_v42, %v3266_v44  ;;  %v1248_v20 = vpop.permute.xlu1 %1247 }
 0x143   : > { %v2187_v14 = vpack.c.bf16 %v1152_v28, %v1150_v5  ;;  %v1274_v28 = vsel %vm1269_vm1, %v3900_v45, %v3268_v48 }
 0x144   : > { %v3320_v4 = vmul.f32 %v1272_v39, %v1057_v18  ;;  %v3323_v17 = vmul.f32 %v1272_v39, %v3316_v37 }
 0x145   : > { %2188 = vst [vmem:[%s3312_s17] sm:$0xff] %v2187_v14  }
 0x148   : > { %v1154_v51 = vpop.f32.mrf.mxu2 }
 0x149   : > { %v1058_v43 = vpop.f32.mrf.mxu0  ;;  %v1107_v63 = vpop.f32.mrf.mxu1  ;;  %v1155_v52 = vadd.f32 %v1154_v51, %v3299_v8 }
 0x14a   : > { %v3331_v2 = vadd.f32 %v1058_v43, %v3264_v31  ;;  %v3334_v12 = vadd.f32 %v1107_v63, %v3266_v44  ;;  %v3364_v43 = vsel %vm1269_vm1, %v3080_v29, %v1248_v20  ;;  %v1250_v29 = vpop.permute.xlu0 %1249 }
 0x14b   : > { %3901 = vst [vmem:[#allocation4_spill] sm:$0xff] %v3364_v43 }
 0x14c   : > { %v1081_v47 = vpop.f32.mrf.mxu3  ;;  %v3340_v3 = vmul.f32 %v1273_v0, %v3331_v2  ;;  %v3343_v9 = vmul.f32 %v1273_v0, %v3334_v12 }
 0x14d   : > { %v1082_v27 = vadd.f32 %v1081_v47, %v3264_v31 }
 0x14f   : > { %v3345_v41 = vmul.f32 %v1282_v54, %v1082_v27  ;;  %1453 = vrot.lane.b32.xlu2 %v1082_v27, %s2338_s15  ;;  %1421 = vrot.lane.b32.xlu0 %v1082_v27, %s2337_s13 }
 0x150   : > { %v1156_v5 = vpop.f32.mrf.mxu2 }
 0x151   : > { %v1157_v39 = vadd.f32 %v1156_v5, %v3299_v8  ;;  %v1061_v62 = vpop.f32.mrf.mxu0  ;;  %v1110_v42 = vpop.f32.mrf.mxu1  ;;  %v1275_v5 = vsel %vm1269_vm1, %v2952_v23, %v3283_v49 }
 0x152   : > { %v3357_v14 = vadd.f32 %v1061_v62, %v3264_v31  ;;  %v3360_v35 = vadd.f32 %v1110_v42, %v3266_v44 }
 0x153   : > { %v2192_v63 = vpack.c.bf16 %v1157_v39, %v1155_v52 }
 0x154   : > { %v1083_v0 = vpop.f32.mrf.mxu3  ;;  %v3368_v51 = vmul.f32 %v1274_v28, %v3357_v14  ;;  %v3371_v47 = vmul.f32 %v1274_v28, %v3360_v35 }
 0x155   : > { %v1084_v48 = vadd.f32 %v1083_v0, %v3264_v31  ;;  %2245 = vst [vmem:[%s3312_s17 + $0x8] sm:$0xff] %v2192_v63  }
 0x157   : > { %v3375_v27 = vmul.f32 %v3364_v43, %v1084_v48  ;;  %1455 = vrot.lane.b32.xlu1 %v1084_v48, %s2338_s15  ;;  %1399 = vrot.lane.b32.xlu2 %v1054_v59, %s2337_s13  ;;  %v3392_v59 = vsel %vm1269_vm1, %v3126_v1, %v1250_v29  ;;  %v1252_v29 = vpop.permute.xlu2 %1251 }
 0x158   : > { %1577 = vrot.lane.b32.xlu0 %v3289_v33, %s2337_s13  ;;  %v1159_v20 = vpop.f32.mrf.mxu2  ;;  %3902 = vst [vmem:[#allocation12_spill] sm:$0xff] %v3392_v59 }
 0x159   : > { %v1063_v45 = vpop.f32.mrf.mxu0  ;;  %v1112_v28 = vpop.f32.mrf.mxu1  ;;  %v1160_v63 = vadd.f32 %v1159_v20, %v3299_v8 }
 0x15a   : > { %v3385_v52 = vadd.f32 %v1063_v45, %v3264_v31  ;;  %v3388_v39 = vadd.f32 %v1112_v28, %v3266_v44 }
 0x15c   : > { %v1086_v62 = vpop.f32.mrf.mxu3  ;;  %v3396_v0 = vmul.f32 %v1275_v5, %v3385_v52  ;;  %v3399_v23 = vmul.f32 %v1275_v5, %v3388_v39  ;;  %v3412_v5 = vsel %vm1269_vm1, %v3169_v11, %v1252_v29  ;;  %v3423_v11 = vpop.permute.xlu1 %1318 }
 0x15d   : > { %v1087_v42 = vadd.f32 %v1086_v62, %v3264_v31  ;;  %3903 = vst [vmem:[#allocation13_spill] sm:$0xff] %v3412_v5 }
 0x15f   : > { %v3402_v49 = vmul.f32 %v3392_v59, %v1087_v42  ;;  %1401 = vrot.lane.b32.xlu1 %v1057_v18, %s2337_s13  ;;  %1609 = vrot.lane.b32.xlu2 %v3289_v33, %s2338_s15 }
 0x160   : > { %1433 = vrot.lane.b32.xlu0 %v1057_v18, %s2338_s15  ;;  %v1161_v1 = vpop.f32.mrf.mxu2 }
 0x161   : > { %v1162_v45 = vadd.f32 %v1161_v1, %v3299_v8  ;;  %v3426_v1 = vpop.permute.xlu2 %1322  ;;  %v1066_v7 = vpop.f32.mrf.mxu0 }
 0x163   : > { %v2197_v62 = vpack.c.bf16 %v1162_v45, %v1160_v63 }
 0x164   : > { %v1088_v28 = vpop.f32.mrf.mxu3 }
 0x165   : > { %v1089_v59 = vadd.f32 %v1088_v28, %v3264_v31  ;;  %2246 = vst [vmem:[%s3312_s17 + $0x10] sm:$0xff] %v2197_v62  }
 0x167   : > { %v3417_v61 = vmul.f32 %v3412_v5, %v1089_v59  ;;  %1611 = vrot.lane.b32.xlu1 %v3316_v37, %s2338_s15  ;;  %1423 = vrot.lane.b32.xlu2 %v1084_v48, %s2337_s13 }
 0x168   : > { %1457 = vrot.lane.b32.xlu0 %v1087_v42, %s2338_s15  ;;  %v1164_v33 = vpop.f32.mrf.mxu2 }
 0x169   : > { %v1165_v29 = vadd.f32 %v1164_v33, %v3299_v8 }
 0x16c   : > { %v1130_v18 = vpop.f32.mrf.mxu3 }
 0x16d   : > { %v1131_v20 = vadd.f32 %v1130_v18, %v3266_v44  ;;  %v3437_v18 = vpop.permute.xlu1 %1324 }
 0x16f   : > { %v3428_v63 = vmul.f32 %v1282_v54, %v1131_v20  ;;  %1579 = vrot.lane.b32.xlu2 %v3316_v37, %s2337_s13  ;;  %1425 = vrot.lane.b32.xlu1 %v1087_v42, %s2337_s13  ;;  %v3444_v37 = vpop.permute.xlu0 %1320  ;;  %v3448_v54 = vpop.permute.xlu2 %1328 }
 0x170   : > { %1403 = vrot.lane.b32.xlu0 %v3331_v2, %s2337_s13  ;;  %v1166_v48 = vpop.f32.mrf.mxu2 }
 0x171   : > { %v1167_v45 = vadd.f32 %v1166_v48, %v3299_v8 }
 0x173   : > { %v2202_v62 = vpack.c.bf16 %v1167_v45, %v1165_v29 }
 0x174   : > { %v1132_v28 = vpop.f32.mrf.mxu3 }
 0x175   : > { %2247 = vst [vmem:[%s3312_s17 + $0x18] sm:$0xff] %v2202_v62  }
 0x177   : > { %1435 = vrot.lane.b32.xlu2 %v3331_v2, %s2338_s15  ;;  %1581 = vrot.lane.b32.xlu1 %v3334_v12, %s2337_s13  ;;  %v3454_v2 = vpop.permute.xlu1 %1330  ;;  %v3456_v48 = vpop.permute.xlu0 %1326 }
 0x178   : > { %1613 = vrot.lane.b32.xlu0 %v3334_v12, %s2338_s15  ;;  %v1169_v42 = vpop.f32.mrf.mxu2  ;;  %3904 = vst [vmem:[#allocation14_spill] sm:$0xff] %v3454_v2  ;;  %v3458_v45 = vpop.permute.xlu2 %1334 }
 0x179   : > { %3905 = vst [vmem:[#allocation15_spill] sm:$0xff] %v3458_v45  ;;  %v1170_v12 = vadd.f32 %v1169_v42, %v3299_v8 }
 0x17c   : > { %v1135_v33 = vpop.f32.mrf.mxu3 }
 0x17f   : > { %1459 = vrot.lane.b32.xlu2 %v1089_v59, %s2338_s15  ;;  %1437 = vrot.lane.b32.xlu1 %v3357_v14, %s2338_s15  ;;  %v3468_v25 = vpop.permute.xlu1 %1336  ;;  %v3470_v43 = vpop.permute.xlu0 %1332 }
 0x180   : > { %1427 = vrot.lane.b32.xlu0 %v1089_v59, %s2337_s13  ;;  %v1171_v29 = vpop.f32.mrf.mxu2  ;;  %3906 = vst [vmem:[#allocation16_spill] sm:$0xff] %v3468_v25  ;;  %v3472_v42 = vpop.permute.xlu2 %1340 }
 0x181   : > { %v1172_v62 = vadd.f32 %v1171_v29, %v3299_v8  ;;  %3907 = vst [vmem:[#allocation17_spill] sm:$0xff] %v3472_v42 }
 0x183   : > { %v2207_v60 = vpack.c.bf16 %v1172_v62, %v1170_v12 }
 0x184   : > { %v1137_v5 = vpop.f32.mrf.mxu3 }
 0x185   : > { %2248 = vst [vmem:[%s3312_s17 + $0x20] sm:$0xff] %v2207_v60  }
 0x187   : > { %1405 = vrot.lane.b32.xlu2 %v3357_v14, %s2337_s13  ;;  %1599 = vrot.lane.b32.xlu1 %v1131_v20, %s2337_s13  ;;  %v3481_v12 = vpop.permute.xlu1 %1342  ;;  %v3484_v25 = vpop.permute.xlu0 %1338 }
 0x188   : > { %1583 = vrot.lane.b32.xlu0 %v3360_v35, %s2337_s13  ;;  %v1174_v59 = vpop.f32.mrf.mxu2  ;;  %3908 = vst [vmem:[#allocation18_spill] sm:$0xff] %v3484_v25  ;;  %v3487_v56 = vpop.permute.xlu2 %1346 }
 0x189   : > { %v1175_v14 = vadd.f32 %v1174_v59, %v3299_v8 }
 0x18c   : > { %v1179_v40 = vpop.f32.mrf.mxu3 }
 0x18d   : > { %v1180_v42 = vadd.f32 %v1179_v40, %v3299_v8  ;;  %v1115_v40 = vpop.f32.mrf.mxu1 }
 0x18f   : > { %1615 = vrot.lane.b32.xlu2 %v3360_v35, %s2338_s15  ;;  %1407 = vrot.lane.b32.xlu1 %v3385_v52, %s2337_s13 }
 0x190   : > { %1631 = vrot.lane.b32.xlu0 %v1131_v20, %s2338_s15  ;;  %v1176_v60 = vpop.f32.mrf.mxu2 }
 0x191   : > { %v1177_v29 = vadd.f32 %v1176_v60, %v3299_v8  ;;  %v3498_v60 = vadd.f32 %v1066_v7, %v3264_v31  ;;  %v1068_v7 = vpop.f32.mrf.mxu0 }
 0x193   : > { %v2212_v6 = vpack.c.bf16 %v1177_v29, %v1175_v14  ;;  %3909 = vst [vmem:[#allocation19_spill] sm:$0xff] %v3498_v60  ;;  %v3501_v14 = vadd.f32 %v1115_v40, %v3266_v44  ;;  %v3506_v29 = vpop.permute.xlu1 %1348 }
 0x194   : > { %v1181_v62 = vpop.f32.mrf.mxu3 }
 0x195   : > { %v1182_v35 = vadd.f32 %v1181_v62, %v3299_v8  ;;  %2249 = vst [vmem:[%s3312_s17 + $0x28] sm:$0xff] %v2212_v6   ;;  %v1382_v6 = vlaneseq  ;;  %v3508_v62 = vpop.permute.xlu0 %1344 }
 0x196   : > { %3910 = vst [vmem:[#allocation20_spill] sm:$0xff] %v3501_v14 }
 0x197   : > { %v2217_v20 = vpack.c.bf16 %v1182_v35, %v1180_v42  ;;  %1585 = vrot.lane.b32.xlu2 %v3388_v39, %s2337_s13  ;;  %1617 = vrot.lane.b32.xlu1 %v3388_v39, %s2338_s15  ;;  %v3504_v42 = vadd.f32 %v1132_v28, %v3266_v44  ;;  %v1383_v39 = vand.u32 127, %v1382_v6  ;;  %v3517_v28 = vadd.f32 %v1068_v7, %v3264_v31 }
 0x198   : > { %1439 = vrot.lane.b32.xlu0 %v3385_v52, %s2338_s15  ;;  %v1430_v52 = vpop.permute.xlu2 %1429 }
 0x199   : > { %2250 = vst [vmem:[%s3312_s17 + $0x30] sm:$0xff] %v2217_v20   ;;  %v3520_v20 = vadd.f32 %v1135_v33, %v3266_v44  ;;  %v1388_v25 = vand.u32 63, %v1383_v39  ;;  %v1117_v39 = vpop.f32.mrf.mxu1 }
 0x19b   : > { %vm3530_vm2 = vcmp.lt.s32.totalorder %v1388_v25, 32 }
 0x19c   : > { %v1184_v59 = vpop.f32.mrf.mxu3 }
 0x19d   : > { %v1185_v40 = vadd.f32 %v1184_v59, %v3299_v8 }
 0x19f   : > { %1441 = vrot.lane.b32.xlu2 %v3498_v60, %s2338_s15  ;;  %1587 = vrot.lane.b32.xlu1 %v3501_v14, %s2337_s13 }
 0x1a0   : > { %1601 = vrot.lane.b32.xlu0 %v3504_v42, %s2337_s13 }
 0x1a4   : > { %v1186_v35 = vpop.f32.mrf.mxu3 }
 0x1a5   : > { %v1187_v45 = vadd.f32 %v1186_v35, %v3299_v8  ;;  %v1366_v35 = vsel %vm1269_vm1, %v3161_v32, %v3423_v11 }
 0x1a6   : > { %v1576_v6 = vpop.permute.xlu1 %1575 }
 0x1a7   : > { %v2222_v16 = vpack.c.bf16 %v1187_v45, %v1185_v40  ;;  %1603 = vrot.lane.b32.xlu2 %v3520_v20, %s2337_s13  ;;  %1443 = vrot.lane.b32.xlu1 %v3517_v28, %s2338_s15  ;;  %v1398_v33 = vpop.permute.xlu0 %1397  ;;  %v3538_v45 = vadd.f32 %v1137_v5, %v3266_v44  ;;  %v1071_v5 = vpop.f32.mrf.mxu0 }
 0x1a8   : > { %1409 = vrot.lane.b32.xlu0 %v3498_v60, %s2337_s13  ;;  %v1463_v8 = vsel %vm3530_vm2, %v1398_v33, %v1430_v52  ;;  %v1367_v52 = vsel %vm1269_vm1, %v3185_v46, %v3444_v37  ;;  %v3559_v60 = vadd.f32 %v1071_v5, %v3264_v31  ;;  %v1120_v46 = vpop.f32.mrf.mxu1 }
 0x1a9   : > { %2251 = vst [vmem:[%s3312_s17 + $0x38] sm:$0xff] %v2222_v16   ;;  %v1454_v59 = vpop.permute.xlu2 %1453  ;;  %v1495_v40 = vmul.f32 %v1463_v8, %v1366_v35  ;;  %v3556_v8 = vadd.f32 %v1117_v39, %v3266_v44 }
 0x1aa   : > { %3913 = vst [vmem:[#allocation21_spill] sm:$0xff] %v3559_v60 }
 0x1ab   : > { %v1511_v11 = vadd.f32 %v1495_v40, %v3276_v26 }
 0x1ad   : > { %v1527_v21 = vmul.f32 0.125, %v1511_v11 }
 0x1ae   : > { %v1432_v25 = vpop.permute.xlu1 %1431 }
 0x1af   : > { %1411 = vrot.lane.b32.xlu2 %v3517_v28, %s2337_s13  ;;  %1605 = vrot.lane.b32.xlu1 %v3538_v45, %s2337_s13  ;;  %v1608_v26 = vpop.permute.xlu0 %1607  ;;  %v1073_v39 = vpop.f32.mrf.mxu0 }
 0x1b0   : > { %1619 = vrot.lane.b32.xlu0 %v3501_v14, %s2338_s15  ;;  %v1639_v11 = vsel %vm3530_vm2, %v1576_v6, %v1608_v26 }
 0x1b1   : > { %v1400_v16 = vpop.permute.xlu2 %1399 }
 0x1b2   : > { %v1464_v32 = vsel %vm3530_vm2, %v1400_v16, %v1432_v25  ;;  %v1122_v16 = vpop.f32.mrf.mxu1 }
 0x1b3   : > { %v1496_v33 = vmul.f32 %v1464_v32, %v1367_v52  ;;  %v3590_v5 = vadd.f32 %v1122_v16, %v3266_v44  ;;  %v3595_v32 = vsel %vm1269_vm1, %v3231_v22, %v3481_v12  ;;  %v3609_v22 = vsel %vm1269_vm1, %v3251_v24, %v3508_v62 }
 0x1b4   : > { %v1671_v12 = vmul.f32 %v1639_v11, %v1366_v35  ;;  %v1368_v11 = vsel %vm1269_vm1, %v3179_v19, %v3426_v1 }
 0x1b5   : > { %v1512_v14 = vadd.f32 %v1496_v33, %v3293_v50 }
 0x1b6   : > { %v1687_v24 = vadd.f32 %v1671_v12, %v3278_v57 }
 0x1b7   : > { %v1528_v2 = vmul.f32 0.125, %v1512_v14  ;;  %1621 = vrot.lane.b32.xlu2 %v3556_v8, %s2338_s15  ;;  %1413 = vrot.lane.b32.xlu1 %v3559_v60, %s2337_s13  ;;  %v3576_v14 = vadd.f32 %v1120_v46, %v3266_v44 }
 0x1b8   : > { %1589 = vrot.lane.b32.xlu0 %v3556_v8, %s2337_s13 }
 0x1b9   : > { %v2107_v50 = vpack.c.bf16 %v1528_v2, %v1527_v21  ;;  %v1610_v37 = vpop.permute.xlu2 %1609  ;;  %v3587_v2 = vadd.f32 %v1073_v39, %v3264_v31 }
 0x1bb   : > { %2108 = vst [vmem:[%s3570_s25] sm:$0xff] %v2107_v50  }
 0x1bc   : > { %3914 = vst [vmem:[#allocation22_spill] sm:$0xff] %v3587_v2 }
 0x1bf   : > { %1591 = vrot.lane.b32.xlu2 %v3576_v14, %s2337_s13  ;;  %1623 = vrot.lane.b32.xlu1 %v3576_v14, %s2338_s15 }
 0x1c0   : > { %1445 = vrot.lane.b32.xlu0 %v3559_v60, %s2338_s15 }
 0x1c1   : > { %v1424_v40 = vpop.permute.xlu2 %1423  ;;  %v1422_v25 = vpop.permute.xlu0 %1421 }
 0x1c2   : > { %v1475_v21 = vsel %vm3530_vm2, %v1422_v25, %v1454_v59  ;;  %v1076_v59 = vpop.f32.mrf.mxu0 }
 0x1c3   : > { %v1507_v33 = vmul.f32 %v1475_v21, %v3595_v32 }
 0x1c5   : > { %v1523_v39 = vadd.f32 %v1507_v33, %v3345_v41  ;;  %v1125_v41 = vpop.f32.mrf.mxu1 }
 0x1c7   : > { %1447 = vrot.lane.b32.xlu2 %v3587_v2, %s2338_s15  ;;  %1593 = vrot.lane.b32.xlu1 %v3590_v5, %s2337_s13  ;;  %v1539_v35 = vmul.f32 0.125, %v1523_v39 }
 0x1c8   : > { %1415 = vrot.lane.b32.xlu0 %v3587_v2, %s2337_s13  ;;  %v3618_v2 = vadd.f32 %v1076_v59, %v3264_v31 }
 0x1c9   : > { %v1456_v46 = vpop.permute.xlu1 %1455  ;;  %v1580_v50 = vpop.permute.xlu2 %1579 }
 0x1ca   : > { %v1476_v6 = vsel %vm3530_vm2, %v1424_v40, %v1456_v46  ;;  %v1578_v26 = vpop.permute.xlu0 %1577  ;;  %v3643_v46 = vadd.f32 %v1125_v41, %v3266_v44 }
 0x1cb   : > { %v1508_v25 = vmul.f32 %v1476_v6, %v3609_v22  ;;  %v1640_v16 = vsel %vm3530_vm2, %v1578_v26, %v1610_v37 }
 0x1cc   : > { %v1672_v21 = vmul.f32 %v1640_v16, %v1367_v52  ;;  %v1078_v52 = vpop.f32.mrf.mxu0 }
 0x1cd   : > { %v1524_v60 = vadd.f32 %v1508_v25, %v3375_v27  ;;  %v3646_v12 = vadd.f32 %v1078_v52, %v3264_v31  ;;  %v1127_v26 = vpop.f32.mrf.mxu1 }
 0x1ce   : > { %v1688_v62 = vadd.f32 %v1672_v21, %v3296_v30  ;;  %v3658_v16 = vadd.f32 %v1127_v26, %v3266_v44  ;;  %v1369_v44 = vsel %vm1269_vm1, %v3182_v55, %v3437_v18 }
 0x1cf   : > { %v1540_v40 = vmul.f32 0.125, %v1524_v60  ;;  %1417 = vrot.lane.b32.xlu2 %v3618_v2, %s2337_s13  ;;  %1449 = vrot.lane.b32.xlu1 %v3618_v2, %s2338_s15 }
 0x1d0   : > { %v2147_v27 = vpack.c.bf16 %v1688_v62, %v1687_v24  ;;  %1625 = vrot.lane.b32.xlu0 %v3590_v5, %s2338_s15 }
 0x1d1   : > { %v2137_v57 = vpack.c.bf16 %v1540_v40, %v1539_v35  ;;  %v1402_v30 = vpop.permute.xlu1 %1401  ;;  %v1436_v60 = vpop.permute.xlu2 %1435 }
 0x1d2   : > { %2148 = vst [vmem:[%s3627_s22] sm:$0xff] %v2147_v27   ;;  %v1434_v37 = vpop.permute.xlu0 %1433 }
 0x1d3   : > { %2236 = vst [vmem:[%s3570_s25 + $0x30] sm:$0xff] %v2137_v57   ;;  %v1465_v33 = vsel %vm3530_vm2, %v1402_v30, %v1434_v37  ;;  %v3688_v37 = vsel %vm1269_vm1, %v3243_v13, %v3487_v56  ;;  %v3700_v56 = vsel %vm1269_vm1, %v3246_v34, %v3506_v29 }
 0x1d4   : > { %v1497_v59 = vmul.f32 %v1465_v33, %v1368_v11 }
 0x1d6   : > { %v1513_v6 = vadd.f32 %v1497_v59, %v3320_v4 }
 0x1d7   : > { %1627 = vrot.lane.b32.xlu2 %v3643_v46, %s2338_s15  ;;  %1419 = vrot.lane.b32.xlu1 %v3646_v12, %s2337_s13 }
 0x1d8   : > { %1595 = vrot.lane.b32.xlu0 %v3643_v46, %s2337_s13  ;;  %v1529_v40 = vmul.f32 0.125, %v1513_v6 }
 0x1d9   : > { %v1612_v19 = vpop.permute.xlu1 %1611  ;;  %v1460_v1 = vpop.permute.xlu2 %1459 }
 0x1da   : > { %v1641_v39 = vsel %vm3530_vm2, %v1580_v50, %v1612_v19  ;;  %v1458_v25 = vpop.permute.xlu0 %1457  ;;  %v1370_v19 = vsel %vm1269_vm1, %v3201_v53, %v3456_v48 }
 0x1db   : > { %v1673_v31 = vmul.f32 %v1641_v39, %v1368_v11 }
 0x1dd   : > { %v1689_v4 = vadd.f32 %v1673_v31, %v3323_v17 }
 0x1df   : > { %1597 = vrot.lane.b32.xlu2 %v3658_v16, %s2337_s13  ;;  %1629 = vrot.lane.b32.xlu1 %v3658_v16, %s2338_s15 }
 0x1e0   : > { %1451 = vrot.lane.b32.xlu0 %v3646_v12, %s2338_s15 }
 0x1e1   : > { %v1406_v21 = vpop.permute.xlu2 %1405  ;;  %v1426_v24 = vpop.permute.xlu1 %1425 }
 0x1e2   : > { %v1404_v50 = vpop.permute.xlu0 %1403 }
 0x1e3   : > { %v1466_v17 = vsel %vm3530_vm2, %v1404_v50, %v1436_v60  ;;  %v1477_v60 = vsel %vm3530_vm2, %v1426_v24, %v1458_v25 }
 0x1e4   : > { %v1498_v62 = vmul.f32 %v1466_v17, %v1369_v44  ;;  %v1509_v11 = vmul.f32 %v1477_v60, %v3688_v37 }
 0x1e6   : > { %v1514_v35 = vadd.f32 %v1498_v62, %v3340_v3  ;;  %v1525_v25 = vadd.f32 %v1509_v11, %v3402_v49 }
 0x1e7   : > { %1633 = vrot.lane.b32.xlu2 %v3504_v42, %s2338_s15  ;;  %1635 = vrot.lane.b32.xlu1 %v3520_v20, %s2338_s15 }
 0x1e8   : > { %v1530_v41 = vmul.f32 0.125, %v1514_v35  ;;  %1637 = vrot.lane.b32.xlu0 %v3538_v45, %s2338_s15 }
 0x1e9   : > { %v1616_v27 = vpop.permute.xlu2 %1615  ;;  %v1582_v55 = vpop.permute.xlu1 %1581 }
 0x1ea   : > { %v2112_v18 = vpack.c.bf16 %v1530_v41, %v1529_v40  ;;  %v1614_v57 = vpop.permute.xlu0 %1613 }
 0x1eb   : > { %v1642_v30 = vsel %vm3530_vm2, %v1582_v55, %v1614_v57 }
 0x1ec   : > { %2231 = vst [vmem:[%s3570_s25 + $0x8] sm:$0xff] %v2112_v18   ;;  %v1674_v3 = vmul.f32 %v1642_v30, %v1369_v44 }
 0x1ee   : > { %v1690_v52 = vadd.f32 %v1674_v3, %v3343_v9 }
 0x1f0   : > { %v2152_v33 = vpack.c.bf16 %v1690_v52, %v1689_v4  ;;  %v1541_v4 = vmul.f32 0.125, %v1525_v25 }
 0x1f1   : > { %v1586_v59 = vpop.permute.xlu2 %1585  ;;  %v1438_v6 = vpop.permute.xlu1 %1437 }
 0x1f2   : > { %2238 = vst [vmem:[%s3627_s22 + $0x8] sm:$0xff] %v2152_v33   ;;  %v1467_v26 = vsel %vm3530_vm2, %v1406_v21, %v1438_v6  ;;  %v1428_v9 = vpop.permute.xlu0 %1427 }
 0x1f3   : > { %v1499_v13 = vmul.f32 %v1467_v26, %v1370_v19  ;;  %v1478_v39 = vsel %vm3530_vm2, %v1428_v9, %v1460_v1  ;;  %v1373_v9 = vsel %vm1269_vm1, %v3218_v10, %v3470_v43 }
 0x1f4   : > { %v1510_v31 = vmul.f32 %v1478_v39, %v3700_v56 }
 0x1f5   : > { %v1515_v53 = vadd.f32 %v1499_v13, %v3368_v51 }
 0x1f6   : > { %v1526_v48 = vadd.f32 %v1510_v31, %v3417_v61  ;;  %v3915_v31 = vld [vmem:[#allocation14_spill] sm:$0xff] }
 0x1f7   : > { %v1531_v52 = vmul.f32 0.125, %v1515_v53  ;;  %v3916_v53 = vld [vmem:[#allocation2_spill] sm:$0xff] }
 0x1f8   : > { %v1542_v21 = vmul.f32 0.125, %v1526_v48 }
 0x1f9   : > { %v1442_v24 = vpop.permute.xlu2 %1441  ;;  %v1600_v50 = vpop.permute.xlu1 %1599 }
 0x1fa   : > { %v2142_v44 = vpack.c.bf16 %v1542_v21, %v1541_v4  ;;  %v1584_v17 = vpop.permute.xlu0 %1583 }
 0x1fb   : > { %v1643_v34 = vsel %vm3530_vm2, %v1584_v17, %v1616_v27  ;;  %v1371_v27 = vsel %vm1269_vm1, %v3195_v15, %v3448_v54 }
 0x1fc   : > { %2237 = vst [vmem:[%s3570_s25 + $0x38] sm:$0xff] %v2142_v44   ;;  %v1675_v29 = vmul.f32 %v1643_v34, %v1370_v19 }
 0x1fe   : > { %v1691_v1 = vadd.f32 %v1675_v29, %v3371_v47 }
 0x201   : > { %v3712_v49 = vpop.permute.xlu2 %1603  ;;  %v1408_v62 = vpop.permute.xlu1 %1407 }
 0x202   : > { %v1632_v35 = vpop.permute.xlu0 %1631 }
 0x203   : > { %v1651_v61 = vsel %vm3530_vm2, %v1600_v50, %v1632_v35 }
 0x204   : > { %v1683_v51 = vmul.f32 %v1651_v61, %v3595_v32 }
 0x206   : > { %v3718_v40 = vadd.f32 %v1683_v51, %v3428_v63 }
 0x209   : > { %v1412_v41 = vpop.permute.xlu2 %1411  ;;  %v1618_v55 = vpop.permute.xlu1 %1617 }
 0x20a   : > { %v1644_v47 = vsel %vm3530_vm2, %v1586_v59, %v1618_v55  ;;  %v1440_v18 = vpop.permute.xlu0 %1439  ;;  %v2322_v59 = vld [vmem:[%s2761_s26 + $0x38] sm:$0xff] }
 0x20b   : > { %v1676_v57 = vmul.f32 %v1644_v47, %v1371_v27  ;;  %v1468_v30 = vsel %vm3530_vm2, %v1408_v62, %v1440_v18  ;;  %v1277_v19 = vsel %vm1269_vm1, %v2322_v59, %v3291_v38  ;;  %v1372_v38 = vsel %vm1269_vm1, %v3916_v53, %v3915_v31  ;;  %v3918_v62 = vld [vmem:[#allocation20_spill] sm:$0xff]  ;;  %v2324_v31 = vld [vmem:[%s2761_s26 + $0x48] sm:$0xff] }
 0x20c   : > { %v1500_v32 = vmul.f32 %v1468_v30, %v1371_v27  ;;  %v1486_v25 = vmul.f32 %v1277_v19, %v3517_v28  ;;  %v1662_v47 = vmul.f32 %v1277_v19, %v3556_v8  ;;  %v2323_v30 = vld [vmem:[%s2761_s26 + $0x40] sm:$0xff]  ;;  %v3923_v53 = vld [vmem:[#allocation3_spill] sm:$0xff] }
 0x20d   : > { %v1692_v63 = vadd.f32 %v1676_v57, %v3399_v23  ;;  %v1276_v23 = vsel %vm1269_vm1, %v3077_v58, %v3274_v36  ;;  %v3917_v36 = vld [vmem:[#allocation19_spill] sm:$0xff] }
 0x20e   : > { %v1516_v3 = vadd.f32 %v1500_v32, %v3396_v0  ;;  %v1485_v4 = vmul.f32 %v1276_v23, %v3917_v36  ;;  %v1661_v35 = vmul.f32 %v1276_v23, %v3918_v62  ;;  %v3919_v32 = vld [vmem:[#allocation5_spill] sm:$0xff]  ;;  %v3924_v36 = vld [vmem:[#allocation16_spill] sm:$0xff]  ;;  %v3927_v62 = vld [vmem:[#allocation10_spill] sm:$0xff] }
 0x20f   : > { %v2157_v60 = vpack.c.bf16 %v1692_v63, %v1691_v1  ;;  %v1278_v63 = vsel %vm1269_vm1, %v2323_v30, %v3919_v32 }
 0x210   : > { %v1532_v11 = vmul.f32 0.125, %v1516_v3  ;;  %v1663_v8 = vmul.f32 %v1278_v63, %v3576_v14 }
 0x211   : > { %2239 = vst [vmem:[%s3627_s22 + $0x10] sm:$0xff] %v2157_v60   ;;  %v1622_v15 = vpop.permute.xlu2 %1621  ;;  %v1588_v54 = vpop.permute.xlu1 %1587 }
 0x212   : > { %v2117_v33 = vpack.c.bf16 %v1532_v11, %v1531_v52  ;;  %v3730_v6 = vpop.permute.xlu0 %1601  ;;  %v3920_v11 = vld [vmem:[#allocation15_spill] sm:$0xff] }
 0x214   : > { %2232 = vst [vmem:[%s3570_s25 + $0x10] sm:$0xff] %v2117_v33  }
 0x219   : > { %v1592_v26 = vpop.permute.xlu2 %1591  ;;  %v1444_v0 = vpop.permute.xlu1 %1443 }
 0x21a   : > { %v1470_v13 = vsel %vm3530_vm2, %v1412_v41, %v1444_v0  ;;  %v1410_v39 = vpop.permute.xlu0 %1409  ;;  %v3922_v0 = vld [vmem:[#allocation21_spill] sm:$0xff] }
 0x21b   : > { %v1502_v48 = vmul.f32 %v1470_v13, %v1373_v9  ;;  %v1469_v58 = vsel %vm3530_vm2, %v1410_v39, %v1442_v24 }
 0x21c   : > { %v1501_v21 = vmul.f32 %v1469_v58, %v1372_v38 }
 0x21d   : > { %v1518_v50 = vadd.f32 %v1502_v48, %v1486_v25 }
 0x21e   : > { %v1517_v10 = vadd.f32 %v1501_v21, %v1485_v4  ;;  %v3925_v4 = vld [vmem:[#allocation7_spill] sm:$0xff] }
 0x21f   : > { %v1534_v43 = vmul.f32 0.125, %v1518_v50  ;;  %v1375_v14 = vsel %vm1269_vm1, %v3925_v4, %v3924_v36  ;;  %v3926_v50 = vld [vmem:[#allocation22_spill] sm:$0xff] }
 0x220   : > { %v1533_v44 = vmul.f32 0.125, %v1517_v10 }
 0x221   : > { %v1448_v17 = vpop.permute.xlu2 %1447  ;;  %v3751_v34 = vpop.permute.xlu1 %1605 }
 0x222   : > { %v2122_v28 = vpack.c.bf16 %v1534_v43, %v1533_v44  ;;  %v1620_v29 = vpop.permute.xlu0 %1619 }
 0x223   : > { %v1645_v1 = vsel %vm3530_vm2, %v1588_v54, %v1620_v29  ;;  %v3921_v54 = vld [vmem:[#allocation6_spill] sm:$0xff] }
 0x224   : > { %2233 = vst [vmem:[%s3570_s25 + $0x18] sm:$0xff] %v2122_v28   ;;  %v1677_v24 = vmul.f32 %v1645_v1, %v1372_v38  ;;  %v1374_v33 = vsel %vm1269_vm1, %v3921_v54, %v3920_v11  ;;  %v1279_v38 = vsel %vm1269_vm1, %v2324_v31, %v3923_v53  ;;  %v2325_v1 = vld [vmem:[%s2761_s26 + $0x50] sm:$0xff]  ;;  %v3932_v31 = vld [vmem:[#allocation17_spill] sm:$0xff] }
 0x225   : > { %v1488_v10 = vmul.f32 %v1279_v38, %v3926_v50  ;;  %v1664_v11 = vmul.f32 %v1279_v38, %v3590_v5 }
 0x226   : > { %v1693_v61 = vadd.f32 %v1677_v24, %v1661_v35  ;;  %v1280_v35 = vsel %vm1269_vm1, %v2325_v1, %v3927_v62  ;;  %v3928_v24 = vld [vmem:[#allocation4_spill] sm:$0xff]  ;;  %v3935_v62 = vld [vmem:[#allocation13_spill] sm:$0xff] }
 0x229   : > { %v1418_v51 = vpop.permute.xlu2 %1417  ;;  %v1414_v41 = vpop.permute.xlu1 %1413 }
 0x22a   : > { %v1590_v55 = vpop.permute.xlu0 %1589 }
 0x22b   : > { %v1646_v27 = vsel %vm3530_vm2, %v1590_v55, %v1622_v15 }
 0x22c   : > { %v1678_v18 = vmul.f32 %v1646_v27, %v1373_v9  ;;  %v1487_v9 = vmul.f32 %v1278_v63, %v3922_v0  ;;  %v3929_v27 = vld [vmem:[#allocation18_spill] sm:$0xff]  ;;  %v1489_v63 = vmul.f32 %v1280_v35, %v3618_v2 }
 0x22e   : > { %v1694_v57 = vadd.f32 %v1678_v18, %v1662_v47  ;;  %v3930_v47 = vld [vmem:[#allocation9_spill] sm:$0xff] }
 0x230   : > { %v2162_v3 = vpack.c.bf16 %v1694_v57, %v1693_v61  ;;  %v1668_v61 = vmul.f32 %v3928_v24, %v3504_v42 }
 0x231   : > { %v1628_v60 = vpop.permute.xlu2 %1627  ;;  %v1624_v52 = vpop.permute.xlu1 %1623 }
 0x232   : > { %2240 = vst [vmem:[%s3627_s22 + $0x18] sm:$0xff] %v2162_v3   ;;  %v1647_v15 = vsel %vm3530_vm2, %v1592_v26, %v1624_v52  ;;  %v1446_v59 = vpop.permute.xlu0 %1445 }
 0x233   : > { %v1679_v19 = vmul.f32 %v1647_v15, %v1374_v33  ;;  %v1471_v23 = vsel %vm3530_vm2, %v1414_v41, %v1446_v59 }
 0x234   : > { %v1503_v13 = vmul.f32 %v1471_v23, %v1374_v33 }
 0x235   : > { %v1695_v39 = vadd.f32 %v1679_v19, %v1663_v8  ;;  %v1665_v19 = vmul.f32 %v1280_v35, %v3643_v46  ;;  %v1670_v35 = vmul.f32 %v3935_v62, %v3538_v45 }
 0x236   : > { %v1519_v25 = vadd.f32 %v1503_v13, %v1487_v9  ;;  %v2326_v9 = vld [vmem:[%s2761_s26 + $0x58] sm:$0xff]  ;;  %v3931_v13 = vld [vmem:[#allocation11_spill] sm:$0xff] }
 0x238   : > { %v1535_v28 = vmul.f32 0.125, %v1519_v25  ;;  %v1281_v25 = vsel %vm1269_vm1, %v2326_v9, %v3931_v13 }
 0x239   : > { %v1598_v48 = vpop.permute.xlu2 %1597  ;;  %v1594_v58 = vpop.permute.xlu1 %1593 }
 0x23a   : > { %v1416_v26 = vpop.permute.xlu0 %1415 }
 0x23b   : > { %v1472_v21 = vsel %vm3530_vm2, %v1416_v26, %v1448_v17  ;;  %v1376_v17 = vsel %vm1269_vm1, %v3930_v47, %v3929_v27  ;;  %v1490_v26 = vmul.f32 %v1281_v25, %v3646_v12 }
 0x23c   : > { %v1504_v43 = vmul.f32 %v1472_v21, %v1375_v14 }
 0x23e   : > { %v1520_v44 = vadd.f32 %v1504_v43, %v1488_v10 }
 0x240   : > { %v1536_v29 = vmul.f32 0.125, %v1520_v44 }
 0x241   : > { %v1634_v41 = vpop.permute.xlu2 %1633  ;;  %v1450_v55 = vpop.permute.xlu1 %1449 }
 0x242   : > { %v2127_v18 = vpack.c.bf16 %v1536_v29, %v1535_v28  ;;  %v1652_v57 = vsel %vm3530_vm2, %v3730_v6, %v1634_v41  ;;  %v1473_v30 = vsel %vm3530_vm2, %v1418_v51, %v1450_v55  ;;  %v1626_v32 = vpop.permute.xlu0 %1625  ;;  %v3934_v28 = vld [vmem:[#allocation12_spill] sm:$0xff] }
 0x243   : > { %v1684_v42 = vmul.f32 %v1652_v57, %v3609_v22  ;;  %v1505_v3 = vmul.f32 %v1473_v30, %v1376_v17  ;;  %v1648_v52 = vsel %vm3530_vm2, %v1594_v58, %v1626_v32  ;;  %v1669_v29 = vmul.f32 %v3934_v28, %v3520_v20 }
 0x244   : > { %2234 = vst [vmem:[%s3570_s25 + $0x20] sm:$0xff] %v2127_v18   ;;  %v1680_v54 = vmul.f32 %v1648_v52, %v1375_v14 }
 0x245   : > { %v1700_v33 = vadd.f32 %v1684_v42, %v1668_v61  ;;  %v1521_v6 = vadd.f32 %v1505_v3, %v1489_v63 }
 0x246   : > { %v1696_v15 = vadd.f32 %v1680_v54, %v1664_v11 }
 0x247   : > { %v2177_v51 = vpack.c.bf16 %v1700_v33, %v3718_v40  ;;  %v3933_v40 = vld [vmem:[#allocation8_spill] sm:$0xff]  ;;  %v1537_v50 = vmul.f32 0.125, %v1521_v6 }
 0x248   : > { %v2167_v59 = vpack.c.bf16 %v1696_v15, %v1695_v39  ;;  %v1377_v39 = vsel %vm1269_vm1, %v3933_v40, %v3932_v31 }
 0x249   : > { %2243 = vst [vmem:[%s3627_s22 + $0x30] sm:$0xff] %v2177_v51   ;;  %v1420_v8 = vpop.permute.xlu1 %1419 }
 0x24a   : > { %2241 = vst [vmem:[%s3627_s22 + $0x20] sm:$0xff] %v2167_v59   ;;  %v1596_v2 = vpop.permute.xlu0 %1595 }
 0x24b   : > { %v1649_v22 = vsel %vm3530_vm2, %v1596_v2, %v1628_v60  ;;  %v1666_v60 = vmul.f32 %v1281_v25, %v3658_v16 }
 0x24c   : > { %v1681_v23 = vmul.f32 %v1649_v22, %v1376_v17 }
 0x24e   : > { %v1697_v5 = vadd.f32 %v1681_v23, %v1665_v19 }
 0x251   : > { %v1630_v0 = vpop.permute.xlu1 %1629 }
 0x252   : > { %v1650_v53 = vsel %vm3530_vm2, %v1598_v48, %v1630_v0  ;;  %v1452_v38 = vpop.permute.xlu0 %1451 }
 0x253   : > { %v1682_v58 = vmul.f32 %v1650_v53, %v1377_v39  ;;  %v1474_v46 = vsel %vm3530_vm2, %v1420_v8, %v1452_v38 }
 0x254   : > { %v1506_v36 = vmul.f32 %v1474_v46, %v1377_v39 }
 0x255   : > { %v1698_v4 = vadd.f32 %v1682_v58, %v1666_v60 }
 0x256   : > { %v1522_v14 = vadd.f32 %v1506_v36, %v1490_v26 }
 0x257   : > { %v2172_v21 = vpack.c.bf16 %v1698_v4, %v1697_v5 }
 0x258   : > { %v1538_v10 = vmul.f32 0.125, %v1522_v14 }
 0x259   : > { %2242 = vst [vmem:[%s3627_s22 + $0x28] sm:$0xff] %v2172_v21   ;;  %v1636_v43 = vpop.permute.xlu1 %1635 }
 0x25a   : > { %v2132_v48 = vpack.c.bf16 %v1538_v10, %v1537_v50  ;;  %v1653_v16 = vsel %vm3530_vm2, %v3712_v49, %v1636_v43  ;;  %v1638_v44 = vpop.permute.xlu0 %1637 }
 0x25b   : > { %v1685_v12 = vmul.f32 %v1653_v16, %v3688_v37  ;;  %v1654_v1 = vsel %vm3530_vm2, %v3751_v34, %v1638_v44 }
 0x25c   : > { %2235 = vst [vmem:[%s3570_s25 + $0x28] sm:$0xff] %v2132_v48   ;;  %v1686_v24 = vmul.f32 %v1654_v1, %v3700_v56 }
 0x25d   : > { %v1701_v61 = vadd.f32 %v1685_v12, %v1669_v29 }
 0x25e   : > { %v1702_v41 = vadd.f32 %v1686_v24, %v1670_v35 }
 0x260   : > { %v2182_v55 = vpack.c.bf16 %v1702_v41, %v1701_v61 }
 0x262   : > { %2244 = vst [vmem:[%s3627_s22 + $0x38] sm:$0xff] %v2182_v55  }
 0x263 PF: > { %s19_s27 = sadd.s32 1, %s2333_s27  }
 0x264   : > { %p16_p7 = scmp.ge.s32.totalorder %s19_s27, 6  }
 0x266   :  { %18 = sbr.rel (!%p16_p7) target bundleno = 1 (0x1), region = 104 }

// kernel: pixtral_transformer_forward.7
= control target key start
LH: loop header
LB: loop body
LE: loop exit
PB: predicated region body
PF: predicated region fallthrough
CT: control target
= control target key end

     0   :  { %s2898_s12 = smov 0   ;;  %s2900_s13 = smov 0   ;;  %s4049_s0 = inlined_call_operand.vmem [shape: bf16[2,256,128], index: 0, kind: input, shape index: {}]   ;;  %s4050_s1 = inlined_call_operand.vmem [shape: bf16[2,256,128], index: 1, kind: input, shape index: {}]   ;;  %s4051_s2 = inlined_call_operand.vmem [shape: bf16[2,256,128], index: 2, kind: input, shape index: {}]   ;;  %s4052_s3 = inlined_call_operand.vmem [shape: bf16[2,256,128], index: 3, kind: output, shape index: {}]  }
   0x1   :  { %s2902_s14 = smov 0   ;;  %s2904_s15 = smov 0  }
   0x2   :  { %s2906_s16 = smov 0   ;;  %s2908_s17 = smov 0  }
   0x3   :  { %s2910_s18 = smov 0  }
   0x4 LB: > { %s25_s19 = sadd.s32 1, %s2857_s15  ;;  %s28_s20 = sadd.s32 1, %s2861_s16  ;;  %s2869_s18 = sphi %s2910_s18, %s13_s18   ;;  %s2865_s17 = sphi %s2908_s17, %s4185_s17   ;;  %s2861_s16 = sphi %s2906_s16, %s4184_s16   ;;  %s2857_s15 = sphi %s2904_s15, %s4183_s15   ;;  %s2853_s14 = sphi %s2902_s14, %s4182_s14   ;;  %s2849_s13 = sphi %s2900_s13, %s4181_s13   ;;  %s2845_s12 = sphi %s2898_s12, %s4180_s12  }
   0x5   : > { %p26_p0 = scmp.ge.s32.totalorder %s25_s19, 2  ;;  %p2370_p1 = scmp.ge.s32.totalorder %s2869_s18, 1 }
   0x6   : > { %p199_p2 = scmp.lt.s32.totalorder %s2869_s18, 9  ;;  %s32_s21 = sadd.s32 1, %s2865_s17 }
   0x7   : > { %s4187_s19 = smov (%p26_p0, %s25_s19), 0  ;;  %s4189_s20 = smov (!%p26_p0, %s28_s20), %s2861_s16 }
   0x8   : > { %p200_p3 = pnand %p2370_p1, %p199_p2  ;;  %p30_p4 = scmp.ge.s32.totalorder %s4189_s20, 2 }
   0xa   : > { %s4191_s20 = smov (%p30_p4, %s4189_s20), 0  ;;  %s4193_s21 = smov (!%p30_p4, %s32_s21), %s2865_s17 }
   0xb   : > { %p34_p5 = scmp.ge.s32.totalorder %s4193_s21, 2  ;;  %203 = sbr.rel (%p200_p3) target bundleno = 1556 (0x614), region = 32 }
   0xd   : > { %s4195_s21 = smov (%p34_p5, %s4193_s21), 0 }
  0x10   : > { %s2371_s22 = sshll.u32 %s2849_s13, 4  ;;  %p250_p6 = scmp.lt.s32.totalorder %s2853_s14, 1 }
  0x11   : > { %p252_p7 = scmp.lt.s32.totalorder %s2371_s22, 31  ;;  %s2374_s23 = sshll.u32 %s2845_s12, 4 }
  0x12   : > { %s4197_s14 = smov (!%p250_p6, %s2853_s14), 1  ;;  %p262_p8 = scmp.lt.s32.totalorder %s2374_s23, 31 }
  0x13   : > { %s4199_s22 = smov (!%p252_p7, %s2371_s22), 31  ;;  %s2372_s24 = sshll.u32 %s4197_s14, 5 }
  0x14   : > { %s255_s25 = sadd.s32 %s2372_s24, %s4199_s22  ;;  %s4201_s23 = smov (!%p262_p8, %s2374_s23), 31 }
  0x15   : > { %s2373_s26 = sshll.u32 %s255_s25, 2  ;;  %s265_s6 = sadd.s32 %s2372_s24, %s4201_s23 }
  0x16   : > { %s2946_s29 = scalar_lea.vmem %s4049_s0, %s2373_s26  ;;  %s2951_s5 = scalar_lea.vmem %s4052_s3, %s2373_s26 }
  0x17   : > { %s2376_s7 = sshll.u32 %s265_s6, 2  ;;  %p2383_p9 = scmp.ne.s32.totalorder %s2845_s12, 0 }
  0x18   : > { %s2956_s10 = scalar_lea.vmem %s4050_s1, %s2376_s7  ;;  %s2961_s14 = scalar_lea.vmem %s4051_s2, %s2376_s7 }
  0x19   : > { %292 = sbr.rel (%p2383_p9) target bundleno = 79 (0x4f), region = 36 }
  0x1e   : > { %vm293_vm0 = vcmask 15360   ;;  %v2871_v0 = vmov -1e+30   ;;  %v2872_v1 = vmov 0.0  }
  0x1f   : > { %294 = vst.msk [vmem:[#allocation2] sm:$0xff] %vm293_vm0, %v2871_v0 }
  0x20   : > { %295 = vst.msk [vmem:[#allocation2 + $0x8] sm:$0xff] %vm293_vm0, %v2871_v0 }
  0x21   : > { %296 = vst.msk [vmem:[#allocation2 + $0x10] sm:$0xff] %vm293_vm0, %v2871_v0 }
  0x22   : > { %297 = vst.msk [vmem:[#allocation2 + $0x18] sm:$0xff] %vm293_vm0, %v2871_v0 }
  0x23   : > { %298 = vst.msk [vmem:[#allocation2 + $0x20] sm:$0xff] %vm293_vm0, %v2871_v0 }
  0x24   : > { %299 = vst.msk [vmem:[#allocation2 + $0x28] sm:$0xff] %vm293_vm0, %v2871_v0 }
  0x25   : > { %300 = vst.msk [vmem:[#allocation2 + $0x30] sm:$0xff] %vm293_vm0, %v2871_v0 }
  0x26   : > { %301 = vst.msk [vmem:[#allocation2 + $0x38] sm:$0xff] %vm293_vm0, %v2871_v0 }
  0x27   : > { %302 = vst.msk [vmem:[#allocation2 + $0x40] sm:$0xff] %vm293_vm0, %v2871_v0 }
  0x28   : > { %303 = vst.msk [vmem:[#allocation2 + $0x48] sm:$0xff] %vm293_vm0, %v2871_v0 }
  0x29   : > { %304 = vst.msk [vmem:[#allocation2 + $0x50] sm:$0xff] %vm293_vm0, %v2871_v0 }
  0x2a   : > { %305 = vst.msk [vmem:[#allocation2 + $0x58] sm:$0xff] %vm293_vm0, %v2871_v0 }
  0x2b   : > { %306 = vst.msk [vmem:[#allocation2 + $0x60] sm:$0xff] %vm293_vm0, %v2871_v0 }
  0x2c   : > { %307 = vst.msk [vmem:[#allocation2 + $0x68] sm:$0xff] %vm293_vm0, %v2871_v0 }
  0x2d   : > { %308 = vst.msk [vmem:[#allocation2 + $0x70] sm:$0xff] %vm293_vm0, %v2871_v0 }
  0x2e   : > { %309 = vst.msk [vmem:[#allocation2 + $0x78] sm:$0xff] %vm293_vm0, %v2871_v0 }
  0x2f   : > { %310 = vst.msk [vmem:[#allocation3] sm:$0xff] %vm293_vm0, %v2872_v1 }
  0x30   : > { %311 = vst.msk [vmem:[#allocation3 + $0x8] sm:$0xff] %vm293_vm0, %v2872_v1 }
  0x31   : > { %312 = vst.msk [vmem:[#allocation3 + $0x10] sm:$0xff] %vm293_vm0, %v2872_v1 }
  0x32   : > { %313 = vst.msk [vmem:[#allocation3 + $0x18] sm:$0xff] %vm293_vm0, %v2872_v1 }
  0x33   : > { %314 = vst.msk [vmem:[#allocation3 + $0x20] sm:$0xff] %vm293_vm0, %v2872_v1 }
  0x34   : > { %315 = vst.msk [vmem:[#allocation3 + $0x28] sm:$0xff] %vm293_vm0, %v2872_v1 }
  0x35   : > { %316 = vst.msk [vmem:[#allocation3 + $0x30] sm:$0xff] %vm293_vm0, %v2872_v1 }
  0x36   : > { %317 = vst.msk [vmem:[#allocation3 + $0x38] sm:$0xff] %vm293_vm0, %v2872_v1 }
  0x37   : > { %318 = vst.msk [vmem:[#allocation3 + $0x40] sm:$0xff] %vm293_vm0, %v2872_v1 }
  0x38   : > { %319 = vst.msk [vmem:[#allocation3 + $0x48] sm:$0xff] %vm293_vm0, %v2872_v1 }
  0x39   : > { %320 = vst.msk [vmem:[#allocation3 + $0x50] sm:$0xff] %vm293_vm0, %v2872_v1 }
  0x3a   : > { %321 = vst.msk [vmem:[#allocation3 + $0x58] sm:$0xff] %vm293_vm0, %v2872_v1 }
  0x3b   : > { %322 = vst.msk [vmem:[#allocation3 + $0x60] sm:$0xff] %vm293_vm0, %v2872_v1 }
  0x3c   : > { %323 = vst.msk [vmem:[#allocation3 + $0x68] sm:$0xff] %vm293_vm0, %v2872_v1 }
  0x3d   : > { %324 = vst.msk [vmem:[#allocation3 + $0x70] sm:$0xff] %vm293_vm0, %v2872_v1 }
  0x3e   : > { %325 = vst.msk [vmem:[#allocation3 + $0x78] sm:$0xff] %vm293_vm0, %v2872_v1 }
  0x3f   : > { %326 = vst [vmem:[#allocation4] sm:$0xff] %v2872_v1 }
  0x40   : > { %327 = vst [vmem:[#allocation4 + $0x8] sm:$0xff] %v2872_v1 }
  0x41   : > { %328 = vst [vmem:[#allocation4 + $0x10] sm:$0xff] %v2872_v1 }
  0x42   : > { %329 = vst [vmem:[#allocation4 + $0x18] sm:$0xff] %v2872_v1 }
  0x43   : > { %330 = vst [vmem:[#allocation4 + $0x20] sm:$0xff] %v2872_v1 }
  0x44   : > { %331 = vst [vmem:[#allocation4 + $0x28] sm:$0xff] %v2872_v1 }
  0x45   : > { %332 = vst [vmem:[#allocation4 + $0x30] sm:$0xff] %v2872_v1 }
  0x46   : > { %333 = vst [vmem:[#allocation4 + $0x38] sm:$0xff] %v2872_v1 }
  0x47   : > { %334 = vst [vmem:[#allocation4 + $0x40] sm:$0xff] %v2872_v1 }
  0x48   : > { %335 = vst [vmem:[#allocation4 + $0x48] sm:$0xff] %v2872_v1 }
  0x49   : > { %336 = vst [vmem:[#allocation4 + $0x50] sm:$0xff] %v2872_v1 }
  0x4a   : > { %337 = vst [vmem:[#allocation4 + $0x58] sm:$0xff] %v2872_v1 }
  0x4b   : > { %338 = vst [vmem:[#allocation4 + $0x60] sm:$0xff] %v2872_v1 }
  0x4c   : > { %339 = vst [vmem:[#allocation4 + $0x68] sm:$0xff] %v2872_v1 }
  0x4d   : > { %340 = vst [vmem:[#allocation4 + $0x70] sm:$0xff] %v2872_v1 }
  0x4e   : > { %341 = vst [vmem:[#allocation4 + $0x78] sm:$0xff] %v2872_v1 }
  0x4f PF: > { %v2513_v2 = vld [vmem:[%s2956_s10 + $0x30] sm:$0xff]  ;;  %v2514_v3 = vld [vmem:[%s2956_s10 + $0x38] sm:$0xff]  ;;  %vm470_vm1 = vcmask 523264   ;;  %v2512_v4 = vld [vmem:[%s2956_s10 + $0x28] sm:$0xff]  ;;  %s2873_s22 = smov 64   ;;  %vm888_vm2 = vcmask 7168  }
  0x50   : > { %1198 = vrot.lane.b32.xlu0 %v2513_v2, %s2873_s22  ;;  %v517_v5 = vsel %vm470_vm1, %v2514_v3, 0  ;;  %1196 = vrot.lane.b32.xlu1 %v2512_v4, %s2873_s22  ;;  %v2511_v6 = vld [vmem:[%s2956_s10 + $0x20] sm:$0xff]  ;;  %v2510_v7 = vld [vmem:[%s2956_s10 + $0x18] sm:$0xff]  ;;  %v514_v8 = vsel %vm470_vm1, %v2513_v2, 0  ;;  %v511_v11 = vsel %vm470_vm1, %v2512_v4, 0  ;;  %vm1619_vm3 = vcmask 15368  }
  0x51   : > { %519 = vmatpush.bf16.xpose.msra.mxu0 %v517_v5  ;;  %1200 = vrot.lane.b32.xlu2 %v2514_v3, %s2873_s22  ;;  %v2509_v9 = vld [vmem:[%s2956_s10 + $0x10] sm:$0xff]  ;;  %v2508_v10 = vld [vmem:[%s2956_s10 + $0x8] sm:$0xff]  ;;  %v2507_v12 = vld [vmem:[%s2956_s10] sm:$0xff]  ;;  %v508_v13 = vsel %vm470_vm1, %v2511_v6, 0  ;;  %v505_v15 = vsel %vm470_vm1, %v2510_v7, 0  ;;  %vm1909_vm4 = vcmask 1048064  }
  0x52   : > { %v2499_v14 = vld [vmem:[%s2946_s29] sm:$0xff]  ;;  %v2500_v16 = vld [vmem:[%s2946_s29 + $0x8] sm:$0xff]  ;;  %v502_v17 = vsel %vm470_vm1, %v2509_v9, 0  ;;  %v499_v18 = vsel %vm470_vm1, %v2508_v10, 0  ;;  %v2501_v19 = vld [vmem:[%s2946_s29 + $0x10] sm:$0xff]  ;;  %v496_v20 = vsel %vm470_vm1, %v2507_v12, 0 }
  0x53   : > { %v2502_v21 = vld [vmem:[%s2946_s29 + $0x18] sm:$0xff]  ;;  %v2503_v22 = vld [vmem:[%s2946_s29 + $0x20] sm:$0xff]  ;;  %v2521_v26 = vld [vmem:[%s2961_s14 + $0x30] sm:$0xff]  ;;  %p2496_p10 = scmp.ne.s32.totalorder %s2845_s12, 1 }
  0x54   : > { %v2506_v23 = vld [vmem:[%s2946_s29 + $0x38] sm:$0xff]  ;;  %v2504_v27 = vld [vmem:[%s2946_s29 + $0x28] sm:$0xff]  ;;  %v2505_v28 = vld [vmem:[%s2946_s29 + $0x30] sm:$0xff] }
  0x55   : > { %v2522_v29 = vld [vmem:[%s2961_s14 + $0x38] sm:$0xff]  ;;  %v2515_v31 = vld [vmem:[%s2961_s14] sm:$0xff]  ;;  %v2520_v33 = vld [vmem:[%s2961_s14 + $0x28] sm:$0xff] }
  0x56   : > { %1073 = vmatpush.bf16.msra.mxu1 %v2522_v29  ;;  %v2516_v36 = vld [vmem:[%s2961_s14 + $0x8] sm:$0xff]  ;;  %v2519_v38 = vld [vmem:[%s2961_s14 + $0x20] sm:$0xff]  ;;  %v2518_v40 = vld [vmem:[%s2961_s14 + $0x18] sm:$0xff] }
  0x57   : > { %v2517_v44 = vld [vmem:[%s2961_s14 + $0x10] sm:$0xff] }
  0x58   : > { %1194 = vrot.lane.b32.xlu0 %v2511_v6, %s2873_s22  ;;  %1192 = vrot.lane.b32.xlu1 %v2510_v7, %s2873_s22 }
  0x59   : > { %520 = vmatpush.bf16.xpose.msra.mxu0 %v514_v8  ;;  %1190 = vrot.lane.b32.xlu2 %v2509_v9, %s2873_s22 }
  0x5a   : > { %1074 = vmatpush.bf16.msra.mxu1 %v2521_v26 }
  0x5e   : > { %1075 = vmatpush.bf16.msra.mxu1 %v2520_v33 }
  0x60   : > { %1188 = vrot.lane.b32.xlu1 %v2508_v10, %s2873_s22  ;;  %1174 = vrot.lane.b32.xlu0 %v2501_v19, %s2873_s22 }
  0x61   : > { %521 = vmatpush.bf16.xpose.msra.mxu0 %v511_v11  ;;  %1186 = vrot.lane.b32.xlu2 %v2507_v12, %s2873_s22 }
  0x62   : > { %1076 = vmatpush.bf16.msra.mxu1 %v2519_v38 }
  0x66   : > { %1077 = vmatpush.bf16.msra.mxu1 %v2518_v40 }
  0x68   : > { %1176 = vrot.lane.b32.xlu1 %v2502_v21, %s2873_s22  ;;  %1178 = vrot.lane.b32.xlu0 %v2503_v22, %s2873_s22 }
  0x69   : > { %522 = vmatpush.bf16.xpose.msra.mxu0 %v508_v13  ;;  %1170 = vrot.lane.b32.xlu2 %v2499_v14, %s2873_s22 }
  0x6a   : > { %1078 = vmatpush.bf16.msra.mxu1 %v2517_v44 }
  0x6e   : > { %1079 = vmatpush.bf16.msra.mxu1 %v2516_v36 }
  0x70   : > { %1184 = vrot.lane.b32.xlu0 %v2506_v23, %s2873_s22  ;;  %1758 = vrot.lane.b32.xlu1 %v2516_v36, %s2873_s22 }
  0x71   : > { %523 = vmatpush.bf16.xpose.msra.mxu0 %v505_v15  ;;  %1172 = vrot.lane.b32.xlu2 %v2500_v16, %s2873_s22  ;;  %v4053_v15 = vmov 0  }
  0x72   : > { %1080 = vmatpush.bf16.msra.mxu1 %v2515_v31  ;;  %2633 = vset.pattern.permute.xlu1 %v4053_v15 }
  0x73   : > { %2634 = vset.pattern.permute.xlu2 %v4053_v15  ;;  %2635 = vset.pattern.permute.xlu0 %v4053_v15 }
  0x78   : > { %1768 = vrot.lane.b32.xlu0 %v2521_v26, %s2873_s22 }
  0x79   : > { %524 = vmatpush.bf16.xpose.msra.mxu0 %v502_v17  ;;  %1180 = vrot.lane.b32.xlu2 %v2504_v27, %s2873_s22 }
  0x80   : > { %1756 = vrot.lane.b32.xlu0 %v2515_v31, %s2873_s22 }
  0x81   : > { %525 = vmatpush.bf16.xpose.msra.mxu0 %v499_v18  ;;  %1182 = vrot.lane.b32.xlu2 %v2505_v28, %s2873_s22  ;;  %v568_v18 = vld [vmem:[#allocation2] sm:$0xff] }
  0x89   : > { %526 = vmatpush.bf16.xpose.msra.mxu0 %v496_v20  ;;  %1770 = vrot.lane.b32.xlu2 %v2522_v29, %s2873_s22 }
  0x90   : > { %2448 = vmatmul.msk.bf16.vlgmr.msra.gmra.mxu0 %vm470_vm1, %v2499_v14 }
  0x91   : > { %1766 = vrot.lane.b32.xlu2 %v2520_v33, %s2873_s22 }
  0x99   : > { %1764 = vrot.lane.b32.xlu2 %v2519_v38, %s2873_s22 }
  0xa0   : > { %2449 = vmatmul.msk.bf16.gmra.mxu0 %vm470_vm1, %v2500_v16 }
  0xa1   : > { %1762 = vrot.lane.b32.xlu2 %v2518_v40, %s2873_s22 }
  0xa9   : > { %1760 = vrot.lane.b32.xlu2 %v2517_v44, %s2873_s22  ;;  %v3178_v44 = vld [vmem:[#allocation2 + $0x28] sm:$0xff] }
  0xab   : > { %v1201_v24 = vpop.permute.xlu2 %1200 }
  0xac   : > { %v1248_v25 = vsel %vm470_vm1, %v1201_v24, 0 }
  0xad   : > { %1250 = vmatpush.bf16.xpose.msra.mxu2 %v1248_v25 }
  0xb0   : > { %2450 = vmatmul.msk.bf16.gmra.mxu0 %vm470_vm1, %v2501_v19 }
  0xb3   : > { %v1191_v43 = vpop.permute.xlu2 %1190 }
  0xb4   : > { %v1233_v45 = vsel %vm470_vm1, %v1191_v43, 0 }
  0xbb   : > { %v1187_v48 = vpop.permute.xlu2 %1186 }
  0xbc   : > { %v1227_v49 = vsel %vm470_vm1, %v1187_v48, 0 }
  0xc0   : > { %2451 = vmatmul.msk.bf16.gmra.mxu0 %vm470_vm1, %v2502_v21 }
  0xc2   : > { %v1199_v30 = vpop.permute.xlu0 %1198  ;;  %v1197_v34 = vpop.permute.xlu1 %1196 }
  0xc3   : > { %v1245_v32 = vsel %vm470_vm1, %v1199_v30, 0  ;;  %v1242_v35 = vsel %vm470_vm1, %v1197_v34, 0  ;;  %v1171_v50 = vpop.permute.xlu2 %1170  ;;  %v3143_v30 = vld [vmem:[#allocation2 + $0x10] sm:$0xff] }
  0xc4   : > { %1251 = vmatpush.bf16.xpose.msra.mxu2 %v1245_v32 }
  0xca   : > { %v1195_v37 = vpop.permute.xlu0 %1194  ;;  %v1193_v41 = vpop.permute.xlu1 %1192 }
  0xcb   : > { %v1239_v39 = vsel %vm470_vm1, %v1195_v37, 0  ;;  %v1236_v42 = vsel %vm470_vm1, %v1193_v41, 0  ;;  %v1173_v51 = vpop.permute.xlu2 %1172 }
  0xcc   : > { %1252 = vmatpush.bf16.xpose.msra.mxu2 %v1242_v35  ;;  %v3155_v35 = vld [vmem:[#allocation2 + $0x18] sm:$0xff] }
  0xd0   : > { %2452 = vmatmul.msk.bf16.gmra.mxu0 %vm470_vm1, %v2503_v22 }
  0xd2   : > { %v1189_v46 = vpop.permute.xlu1 %1188  ;;  %v1175_v52 = vpop.permute.xlu0 %1174 }
  0xd3   : > { %v1230_v47 = vsel %vm470_vm1, %v1189_v46, 0  ;;  %v1181_v53 = vpop.permute.xlu2 %1180 }
  0xd4   : > { %1253 = vmatpush.bf16.xpose.msra.mxu2 %v1239_v39  ;;  %v3165_v39 = vld [vmem:[#allocation2 + $0x20] sm:$0xff] }
  0xda   : > { %v1179_v55 = vpop.permute.xlu0 %1178  ;;  %v1177_v0 = vpop.permute.xlu1 %1176 }
  0xdb   : > { %v1183_v56 = vpop.permute.xlu2 %1182 }
  0xdc   : > { %1254 = vmatpush.bf16.xpose.msra.mxu2 %v1236_v42 }
  0xe0   : > { %2453 = vmatmul.msk.bf16.gmra.mxu0 %vm470_vm1, %v2504_v27 }
  0xe2   : > { %v1185_v58 = vpop.permute.xlu0 %1184  ;;  %v1759_v7 = vpop.permute.xlu1 %1758 }
  0xe3   : > { %v1771_v59 = vpop.permute.xlu2 %1770 }
  0xe4   : > { %1255 = vmatpush.bf16.xpose.msra.mxu2 %v1233_v45  ;;  %1780 = vmatpush.bf16.msra.mxu3 %v1771_v59  ;;  %v3207_v59 = vld [vmem:[#allocation2 + $0x40] sm:$0xff] }
  0xea   : > { %v1769_v61 = vpop.permute.xlu0 %1768 }
  0xeb   : > { %v1767_v62 = vpop.permute.xlu2 %1766  ;;  %1781 = vmatpush.bf16.msra.mxu3 %v1769_v61 }
  0xec   : > { %1256 = vmatpush.bf16.xpose.msra.mxu2 %v1230_v47 }
  0xef   : > { %1782 = vmatpush.bf16.msra.mxu3 %v1767_v62 }
  0xf0   : > { %2454 = vmatmul.msk.bf16.gmra.mxu0 %vm470_vm1, %v2505_v28 }
  0xf2   : > { %v1757_v8 = vpop.permute.xlu0 %1756 }
  0xf3   : > { %v1765_v1 = vpop.permute.xlu2 %1764 }
  0xf4   : > { %1257 = vmatpush.bf16.xpose.msra.mxu2 %v1227_v49  ;;  %1783 = vmatpush.bf16.msra.mxu3 %v1765_v1  ;;  %v3189_v49 = vld [vmem:[#allocation2 + $0x30] sm:$0xff] }
  0xf5   : > { %4091 = vst [vmem:[#allocation5_spill] sm:$0xff] %v3189_v49 }
  0xfb   : > { %2488 = vmatmul.msk.bf16.vlgmr.msra.gmra.mxu2 %vm470_vm1, %v1171_v50  ;;  %v1763_v3 = vpop.permute.xlu2 %1762 }
  0xfc   : > { %1784 = vmatpush.bf16.msra.mxu3 %v1763_v3  ;;  %v3219_v3 = vld [vmem:[#allocation2 + $0x48] sm:$0xff] }
  0xfd   : > { %4096 = vst [vmem:[#allocation10_spill] sm:$0xff] %v3219_v3 }
 0x100   : > { %2455 = vmatmul.msk.bf16.gmra.mxu0 %vm470_vm1, %v2506_v23  ;;  %v3131_v23 = vld [vmem:[#allocation2 + $0x8] sm:$0xff] }
 0x103   : > { %v1761_v5 = vpop.permute.xlu2 %1760 }
 0x104   : > { %1785 = vmatpush.bf16.msra.mxu3 %v1761_v5 }
 0x108   : > { %1786 = vmatpush.bf16.msra.mxu3 %v1759_v7 }
 0x10b   : > { %2489 = vmatmul.msk.bf16.gmra.mxu2 %vm470_vm1, %v1173_v51 }
 0x10c   : > { %1787 = vmatpush.bf16.msra.mxu3 %v1757_v8 }
 0x10d   : > { %v3070_v54 = vpop.f32.mrf.mxu0 }
 0x10e   : > { %584 = vmax.xlane.f32.xlu0 %v3070_v54 }
 0x115   : > { %v3073_v57 = vpop.f32.mrf.mxu0 }
 0x116   : > { %586 = vmax.xlane.f32.xlu0 %v3073_v57 }
 0x11b   : > { %2490 = vmatmul.msk.bf16.gmra.mxu2 %vm470_vm1, %v1175_v52 }
 0x11d   : > { %v3077_v60 = vpop.f32.mrf.mxu0 }
 0x11e   : > { %588 = vmax.xlane.f32.xlu1 %v3077_v60 }
 0x125   : > { %v3080_v63 = vpop.f32.mrf.mxu0 }
 0x126   : > { %590 = vmax.xlane.f32.xlu1 %v3080_v63 }
 0x12b   : > { %2491 = vmatmul.msk.bf16.gmra.mxu2 %vm470_vm1, %v1177_v0 }
 0x12d   : > { %v3084_v2 = vpop.f32.mrf.mxu0 }
 0x12e   : > { %592 = vmax.xlane.f32.xlu2 %v3084_v2 }
 0x135   : > { %v3087_v4 = vpop.f32.mrf.mxu0 }
 0x136   : > { %594 = vmax.xlane.f32.xlu2 %v3087_v4 }
 0x13b   : > { %2492 = vmatmul.msk.bf16.gmra.mxu2 %vm470_vm1, %v1179_v55 }
 0x13d   : > { %v3091_v6 = vpop.f32.mrf.mxu0 }
 0x13e   : > { %596 = vmax.xlane.f32.xlu0 %v3091_v6 }
 0x145   : > { %v3094_v9 = vpop.f32.mrf.mxu0 }
 0x146   : > { %598 = vmax.xlane.f32.xlu1 %v3094_v9 }
 0x14b   : > { %2493 = vmatmul.msk.bf16.gmra.mxu2 %vm470_vm1, %v1181_v53  ;;  %v3198_v53 = vld [vmem:[#allocation2 + $0x38] sm:$0xff] }
 0x14c   : > { %4093 = vst [vmem:[#allocation7_spill] sm:$0xff] %v3198_v53 }
 0x14d   : > { %v3098_v10 = vpop.f32.mrf.mxu0 }
 0x14e   : > { %600 = vmax.xlane.f32.xlu2 %v3098_v10 }
 0x155   : > { %v3101_v11 = vpop.f32.mrf.mxu0 }
 0x156   : > { %602 = vmax.xlane.f32.xlu0 %v3101_v11 }
 0x15b   : > { %2494 = vmatmul.msk.bf16.gmra.mxu2 %vm470_vm1, %v1183_v56 }
 0x15d   : > { %v3105_v12 = vpop.f32.mrf.mxu0 }
 0x15e   : > { %604 = vmax.xlane.f32.xlu1 %v3105_v12 }
 0x165   : > { %v3108_v13 = vpop.f32.mrf.mxu0 }
 0x166   : > { %606 = vmax.xlane.f32.xlu2 %v3108_v13 }
 0x16b   : > { %2495 = vmatmul.msk.bf16.gmra.mxu2 %vm470_vm1, %v1185_v58 }
 0x16d   : > { %v3112_v14 = vpop.f32.mrf.mxu0 }
 0x16e   : > { %608 = vmax.xlane.f32.xlu0 %v3112_v14 }
 0x175   : > { %v3118_v16 = vpop.f32.mrf.mxu0 }
 0x176   : > { %610 = vmax.xlane.f32.xlu1 %v3118_v16 }
 0x17d   : > { %v3121_v17 = vpop.f32.mrf.mxu0 }
 0x17e   : > { %612 = vmax.xlane.f32.xlu2 %v3121_v17  ;;  %v3124_v21 = vpop.f32.mrf.mxu2 }
 0x181   : > { %v585_v19 = vpop.xlane.xlu0 %584 }
 0x182   : > { %v616_v20 = vmax.f32 %v568_v18, %v585_v19 }
 0x184   : > { %1154 = vst.msk [vmem:[#allocation2] sm:$0xff] %vm888_vm2, %v616_v20  ;;  %v632_v24 = vsub.f32 %v568_v18, %v616_v20  ;;  %v3230_v18 = vld [vmem:[#allocation2 + $0x50] sm:$0xff] }
 0x185   : > { %v3127_v22 = vpop.f32.mrf.mxu0 }
 0x186   : > { %1315 = vmax.xlane.f32.xlu2 %v3124_v21  ;;  %614 = vmax.xlane.f32.xlu0 %v3127_v22  ;;  %v648_v27 = vmul.f32 1.442695, %v632_v24  ;;  %v3140_v29 = vpop.f32.mrf.mxu2 }
 0x188   : > { %2649 = vpow2.f32 %v648_v27 }
 0x189   : > { %v587_v25 = vpop.xlane.xlu0 %586 }
 0x18a   : > { %v3134_v26 = vmax.f32 %v3131_v23, %v587_v25  ;;  %v3240_v25 = vld [vmem:[#allocation2 + $0x58] sm:$0xff] }
 0x18b   : > { %4098 = vst [vmem:[#allocation12_spill] sm:$0xff] %v3240_v25  ;;  %v3281_v33 = vld [vmem:[#allocation2] sm:$0xff] }
 0x18c   : > { %1155 = vst.msk [vmem:[#allocation2 + $0x8] sm:$0xff] %vm888_vm2, %v3134_v26 }
 0x18e   : > { %1317 = vmax.xlane.f32.xlu0 %v3140_v29  ;;  %v3152_v34 = vpop.eup %2649  ;;  %v3160_v38 = vpop.f32.mrf.mxu2 }
 0x18f   : > { %682 = vperm.xlu1 %2633, %v616_v20  }
 0x191   : > { %v589_v31 = vpop.xlane.xlu1 %588 }
 0x192   : > { %v3146_v32 = vmax.f32 %v3143_v30, %v589_v31 }
 0x194   : > { %1156 = vst.msk [vmem:[#allocation2 + $0x10] sm:$0xff] %vm888_vm2, %v3146_v32 }
 0x196   : > { %v3176_v43 = vpop.f32.mrf.mxu2 }
 0x197   : > { %923 = vperm.xlu1 %2633, %v3152_v34  }
 0x199   : > { %v591_v36 = vpop.xlane.xlu1 %590 }
 0x19a   : > { %v3158_v37 = vmax.f32 %v3155_v35, %v591_v36  ;;  %v3249_v36 = vld [vmem:[#allocation2 + $0x60] sm:$0xff] }
 0x19b   : > { %4100 = vst [vmem:[#allocation14_spill] sm:$0xff] %v3249_v36 }
 0x19c   : > { %1157 = vst.msk [vmem:[#allocation2 + $0x18] sm:$0xff] %vm888_vm2, %v3158_v37 }
 0x19e   : > { %687 = vperm.xlu2 %2634, %v3134_v26   ;;  %v3187_v48 = vpop.f32.mrf.mxu2 }
 0x1a1   : > { %v593_v40 = vpop.xlane.xlu2 %592 }
 0x1a2   : > { %v3168_v41 = vmax.f32 %v3165_v39, %v593_v40  ;;  %692 = vperm.xlu0 %2635, %v3146_v32  }
 0x1a4   : > { %1158 = vst.msk [vmem:[#allocation2 + $0x20] sm:$0xff] %vm888_vm2, %v3168_v41  ;;  %702 = vperm.xlu1 %2633, %v3168_v41  }
 0x1a6   : > { %v3200_v55 = vpop.f32.mrf.mxu2 }
 0x1a9   : > { %v595_v45 = vpop.xlane.xlu2 %594 }
 0x1aa   : > { %v3181_v46 = vmax.f32 %v3178_v44, %v595_v45 }
 0x1ac   : > { %1159 = vst.msk [vmem:[#allocation2 + $0x28] sm:$0xff] %vm888_vm2, %v3181_v46 }
 0x1ae   : > { %v3212_v0 = vpop.f32.mrf.mxu2 }
 0x1af   : > { %4095 = vst [vmem:[#allocation9_spill] sm:$0xff] %v3212_v0 }
 0x1b1   : > { %v597_v50 = vpop.xlane.xlu0 %596 }
 0x1b2   : > { %v3192_v51 = vmax.f32 %v3189_v49, %v597_v50  ;;  %v808_v49 = vld [vmem:[#allocation3] sm:$0xff] }
 0x1b4   : > { %4092 = vst [vmem:[#allocation6_spill] sm:$0xff] %v3192_v51 }
 0x1b5   : > { %1160 = vst.msk [vmem:[#allocation2 + $0x30] sm:$0xff] %vm888_vm2, %v3192_v51 }
 0x1b6   : > { %v3227_v8 = vpop.f32.mrf.mxu2 }
 0x1b9   : > { %v599_v56 = vpop.xlane.xlu1 %598 }
 0x1ba   : > { %v3203_v58 = vmax.f32 %v3198_v53, %v599_v56  ;;  %v3261_v56 = vld [vmem:[#allocation2 + $0x68] sm:$0xff] }
 0x1bc   : > { %4094 = vst [vmem:[#allocation8_spill] sm:$0xff] %v3203_v58 }
 0x1bd   : > { %1161 = vst.msk [vmem:[#allocation2 + $0x38] sm:$0xff] %vm888_vm2, %v3203_v58 }
 0x1be   : > { %v3238_v24 = vpop.f32.mrf.mxu2 }
 0x1bf   : > { %4097 = vst [vmem:[#allocation11_spill] sm:$0xff] %v3238_v24 }
 0x1c1   : > { %v601_v61 = vpop.xlane.xlu2 %600 }
 0x1c2   : > { %v3210_v62 = vmax.f32 %v3207_v59, %v601_v61 }
 0x1c4   : > { %1162 = vst.msk [vmem:[#allocation2 + $0x40] sm:$0xff] %vm888_vm2, %v3210_v62 }
 0x1c6   : > { %v3251_v40 = vpop.f32.mrf.mxu2 }
 0x1c7   : > { %1319 = vmax.xlane.f32.xlu2 %v3160_v38  ;;  %4101 = vst [vmem:[#allocation15_spill] sm:$0xff] %v3251_v40 }
 0x1c9   : > { %v603_v5 = vpop.xlane.xlu0 %602 }
 0x1ca   : > { %v3222_v7 = vmax.f32 %v3219_v3, %v603_v5  ;;  %v3295_v3 = vld [vmem:[#allocation2 + $0x8] sm:$0xff] }
 0x1cb   : > { %4107 = vst [vmem:[#allocation21_spill] sm:$0xff] %v3295_v3 }
 0x1cc   : > { %1163 = vst.msk [vmem:[#allocation2 + $0x48] sm:$0xff] %vm888_vm2, %v3222_v7  ;;  %1321 = vmax.xlane.f32.xlu0 %v3176_v43 }
 0x1ce   : > { %1323 = vmax.xlane.f32.xlu1 %v3187_v48 }
 0x1d1   : > { %v605_v19 = vpop.xlane.xlu1 %604 }
 0x1d2   : > { %v3233_v20 = vmax.f32 %v3230_v18, %v605_v19  ;;  %v3266_v19 = vpop.f32.mrf.mxu2 }
 0x1d3   : > { %4102 = vst [vmem:[#allocation16_spill] sm:$0xff] %v3266_v19 }
 0x1d4   : > { %1325 = vmax.xlane.f32.xlu0 %v3200_v55  ;;  %1164 = vst.msk [vmem:[#allocation2 + $0x50] sm:$0xff] %vm888_vm2, %v3233_v20 }
 0x1d9   : > { %v607_v27 = vpop.xlane.xlu2 %606 }
 0x1da   : > { %v3243_v31 = vmax.f32 %v3240_v25, %v607_v27  ;;  %v3272_v27 = vld [vmem:[#allocation2 + $0x70] sm:$0xff] }
 0x1db   : > { %4103 = vst [vmem:[#allocation17_spill] sm:$0xff] %v3272_v27 }
 0x1dc   : > { %4099 = vst [vmem:[#allocation13_spill] sm:$0xff] %v3243_v31  ;;  %1329 = vmax.xlane.f32.xlu0 %v3227_v8 }
 0x1dd   : > { %1165 = vst.msk [vmem:[#allocation2 + $0x58] sm:$0xff] %vm888_vm2, %v3243_v31 }
 0x1df   : > { %697 = vperm.xlu2 %2634, %v3158_v37  }
 0x1e1   : > { %v609_v45 = vpop.xlane.xlu0 %608 }
 0x1e2   : > { %v3254_v50 = vmax.f32 %v3249_v36, %v609_v45 }
 0x1e4   : > { %1331 = vmax.xlane.f32.xlu0 %v3238_v24  ;;  %1166 = vst.msk [vmem:[#allocation2 + $0x60] sm:$0xff] %vm888_vm2, %v3254_v50 }
 0x1e7   : > { %712 = vperm.xlu1 %2633, %v3192_v51   ;;  %707 = vperm.xlu2 %2634, %v3181_v46  }
 0x1e9   : > { %v611_v61 = vpop.xlane.xlu1 %610 }
 0x1ea   : > { %v3264_v5 = vmax.f32 %v3261_v56, %v611_v61  ;;  %v3279_v61 = vld [vmem:[#allocation2 + $0x78] sm:$0xff] }
 0x1eb   : > { %4105 = vst [vmem:[#allocation19_spill] sm:$0xff] %v3279_v61 }
 0x1ec   : > { %1167 = vst.msk [vmem:[#allocation2 + $0x68] sm:$0xff] %vm888_vm2, %v3264_v5  ;;  %1335 = vmax.xlane.f32.xlu0 %v3266_v19 }
 0x1ef   : > { %722 = vperm.xlu1 %2633, %v3210_v62  }
 0x1f1   : > { %v613_v45 = vpop.xlane.xlu2 %612 }
 0x1f2   : > { %v3275_v52 = vmax.f32 %v3272_v27, %v613_v45 }
 0x1f4   : > { %4104 = vst [vmem:[#allocation18_spill] sm:$0xff] %v3275_v52 }
 0x1f5   : > { %1168 = vst.msk [vmem:[#allocation2 + $0x70] sm:$0xff] %vm888_vm2, %v3275_v52 }
 0x1f9   : > { %v1316_v28 = vpop.xlane.xlu2 %1315  ;;  %v615_v1 = vpop.xlane.xlu0 %614 }
 0x1fa   : > { %v3284_v47 = vmax.f32 %v3281_v33, %v1316_v28  ;;  %v3287_v42 = vmax.f32 %v3279_v61, %v615_v1 }
 0x1fc   : > { %4106 = vst [vmem:[#allocation20_spill] sm:$0xff] %v3287_v42 }
 0x1fd   : > { %1926 = vst.msk [vmem:[#allocation2] sm:$0xff] %vm1619_vm3, %v3284_v47 }
 0x1fe   : > { %1169 = vst.msk [vmem:[#allocation2 + $0x78] sm:$0xff] %vm888_vm2, %v3287_v42 }
 0x201   : > { %v683_v45 = vpop.permute.xlu1 %682  ;;  %v688_v15 = vpop.permute.xlu2 %687 }
 0x202   : > { %v760_v27 = vsub.f32 %v3070_v54, %v683_v45  ;;  %v761_v36 = vsub.f32 %v3073_v57, %v688_v15  ;;  %v1318_v25 = vpop.xlane.xlu0 %1317  ;;  %v3314_v45 = vld [vmem:[#allocation2 + $0x10] sm:$0xff] }
 0x203   : > { %v3298_v28 = vmax.f32 %v3295_v3, %v1318_v25  ;;  %4108 = vst [vmem:[#allocation22_spill] sm:$0xff] %v3314_v45  ;;  %v3327_v3 = vld [vmem:[#allocation2 + $0x20] sm:$0xff] }
 0x204   : > { %v776_v1 = vmul.f32 1.442695, %v760_v27  ;;  %v778_v61 = vmul.f32 1.442695, %v761_v36  ;;  %4112 = vst [vmem:[#allocation26_spill] sm:$0xff] %v3327_v3 }
 0x205   : > { %1927 = vst.msk [vmem:[#allocation2 + $0x8] sm:$0xff] %vm1619_vm3, %v3298_v28 }
 0x206   : > { %2651 = vpow2.f32 %v776_v1 }
 0x207   : > { %2653 = vpow2.f32 %v778_v61  ;;  %v4063_v61 = vmov 1  }
 0x208   : > { %2638 = vset.pattern.permute.xlu0 %v4063_v61 }
 0x209   : > { %v3304_v54 = vpop.permute.xlu1 %923 }
 0x20c   : > { %v2652_v53 = vpop.eup %2651 }
 0x20d   : > { %v3302_v24 = vpop.eup %2653  ;;  %840 = vadd.xlane.f32.xlu0 %v2652_v53 }
 0x20e   : > { %v1017_v57 = vpack.c.bf16 %v3302_v24, %v2652_v53 }
 0x210   : > { %1081 = vmatmul.bf16.vlgmr.msra.gmra.mxu1 %v1017_v57  ;;  %1327 = vmax.xlane.f32.xlu2 %v3212_v0 }
 0x214   : > { %v693_v53 = vpop.permute.xlu0 %692 }
 0x215   : > { %v762_v57 = vsub.f32 %v3077_v60, %v693_v53  ;;  %v3337_v53 = vld [vmem:[#allocation2 + $0x28] sm:$0xff] }
 0x216   : > { %v703_v15 = vpop.permute.xlu1 %702 }
 0x217   : > { %v764_v25 = vsub.f32 %v3084_v2, %v703_v15  ;;  %v3322_v15 = vld [vmem:[#allocation2 + $0x18] sm:$0xff] }
 0x218   : > { %4110 = vst [vmem:[#allocation24_spill] sm:$0xff] %v3322_v15 }
 0x219   : > { %v784_v36 = vmul.f32 1.442695, %v764_v25  ;;  %1333 = vmax.xlane.f32.xlu1 %v3251_v40 }
 0x21b   : > { %2655 = vpow2.f32 %v784_v36 }
 0x221   : > { %v2656_v27 = vpop.eup %2655 }
 0x222   : > { %848 = vadd.xlane.f32.xlu0 %v2656_v27 }
 0x228   : > { %717 = vperm.xlu2 %2634, %v3203_v58  }
 0x230   : > { %732 = vperm.xlu2 %2634, %v3233_v20  }
 0x232   : > { %737 = vperm.xlu1 %2633, %v3243_v31   ;;  %v780_v31 = vmul.f32 1.442695, %v762_v57 }
 0x234   : > { %2657 = vpow2.f32 %v780_v31 }
 0x23a   : > { %v1320_v1 = vpop.xlane.xlu2 %1319 }
 0x23b   : > { %v3317_v2 = vmax.f32 %v3314_v45, %v1320_v1 }
 0x23d   : > { %4109 = vst [vmem:[#allocation23_spill] sm:$0xff] %v3317_v2 }
 0x23e   : > { %1928 = vst.msk [vmem:[#allocation2 + $0x10] sm:$0xff] %vm1619_vm3, %v3317_v2 }
 0x23f   : > { %v1322_v25 = vpop.xlane.xlu0 %1321 }
 0x240   : > { %v3325_v36 = vmax.f32 %v3322_v15, %v1322_v25  ;;  %v3344_v15 = vpop.eup %2657 }
 0x241   : > { %v1324_v61 = vpop.xlane.xlu1 %1323 }
 0x242   : > { %4111 = vst [vmem:[#allocation25_spill] sm:$0xff] %v3325_v36  ;;  %v3332_v1 = vmax.f32 %v3327_v3, %v1324_v61  ;;  %v698_v45 = vpop.permute.xlu2 %697  ;;  %v3346_v3 = vpop.f32.mrf.mxu2 }
 0x243   : > { %1929 = vst.msk [vmem:[#allocation2 + $0x18] sm:$0xff] %vm1619_vm3, %v3325_v36  ;;  %v763_v58 = vsub.f32 %v3080_v63, %v698_v45  ;;  %v3353_v45 = vld [vmem:[#allocation2 + $0x38] sm:$0xff] }
 0x244   : > { %1930 = vst.msk [vmem:[#allocation2 + $0x20] sm:$0xff] %vm1619_vm3, %v3332_v1 }
 0x245   : > { %v782_v60 = vmul.f32 1.442695, %v763_v58  ;;  %4113 = vst [vmem:[#allocation27_spill] sm:$0xff] %v3346_v3 }
 0x246   : > { %4114 = vst [vmem:[#allocation28_spill] sm:$0xff] %v3353_v45 }
 0x247   : > { %2659 = vpow2.f32 %v782_v60  ;;  %v1326_v25 = vpop.xlane.xlu0 %1325 }
 0x248   : > { %v3340_v57 = vmax.f32 %v3337_v53, %v1326_v25 }
 0x24a   : > { %1931 = vst.msk [vmem:[#allocation2 + $0x28] sm:$0xff] %vm1619_vm3, %v3340_v57  ;;  %v708_v61 = vpop.permute.xlu2 %707 }
 0x24b   : > { %v765_v58 = vsub.f32 %v3087_v4, %v708_v61  ;;  %v3363_v4 = vpop.f32.mrf.mxu2  ;;  %v3365_v61 = vld [vmem:[#allocation2 + $0x40] sm:$0xff] }
 0x24c   : > { %4116 = vst [vmem:[#allocation30_spill] sm:$0xff] %v3363_v4 }
 0x24d   : > { %v3348_v63 = vpop.eup %2659  ;;  %v786_v40 = vmul.f32 1.442695, %v765_v58  ;;  %v4119_v58 = vmov 0  }
 0x24e   : > { %v1018_v31 = vpack.c.bf16 %v3348_v63, %v3344_v15 }
 0x24f   : > { %v1330_v60 = vpop.xlane.xlu0 %1329  ;;  %2661 = vpow2.f32 %v786_v40 }
 0x250   : > { %v3356_v25 = vmax.f32 %v3353_v45, %v1330_v60  ;;  %1086 = vmatmul.bf16.gmra.mxu1 %v1018_v31  ;;  %v3380_v60 = vld [vmem:[#allocation2 + $0x50] sm:$0xff] }
 0x251   : > { %4117 = vst [vmem:[#allocation31_spill] sm:$0xff] %v3380_v60 }
 0x252   : > { %4115 = vst [vmem:[#allocation29_spill] sm:$0xff] %v3356_v25  ;;  %1448 = vperm.xlu0 %2638, %v3356_v25  }
 0x253   : > { %1933 = vst.msk [vmem:[#allocation2 + $0x38] sm:$0xff] %vm1619_vm3, %v3356_v25  ;;  %v3382_v0 = vpop.f32.mrf.mxu2 }
 0x254   : > { %4118 = vst [vmem:[#allocation32_spill] sm:$0xff] %v3382_v0 }
 0x255   : > { %v3376_v31 = vpop.eup %2661 }
 0x256   : > { %v1019_v40 = vpack.c.bf16 %v3376_v31, %v2656_v27 }
 0x257   : > { %v1332_v19 = vpop.xlane.xlu0 %1331 }
 0x258   : > { %v3368_v51 = vmax.f32 %v3365_v61, %v1332_v19 }
 0x259   : > { %1337 = vmax.xlane.f32.xlu2 %v3346_v3  ;;  %v713_v25 = vpop.permute.xlu1 %712 }
 0x25a   : > { %1934 = vst.msk [vmem:[#allocation2 + $0x40] sm:$0xff] %vm1619_vm3, %v3368_v51  ;;  %1453 = vperm.xlu0 %2638, %v3368_v51  }
 0x25c   : > { %1339 = vmax.xlane.f32.xlu1 %v3363_v4 }
 0x25f   : > { %v1336_v19 = vpop.xlane.xlu0 %1335 }
 0x260   : > { %v3385_v3 = vmax.f32 %v3380_v60, %v1336_v19  ;;  %1091 = vmatmul.bf16.gmra.mxu1 %v1019_v40  ;;  %v4120_v19 = vmov 1   ;;  %v824_v40 = vmul.f32 %v3152_v34, %v808_v49  ;;  %v4122_v34 = vsub.f32 %v3165_v39, %v3168_v41 }
 0x261   : > { %1341 = vmax.xlane.f32.xlu2 %v3382_v0  ;;  %v723_v4 = vpop.permute.xlu1 %722 }
 0x262   : > { %1936 = vst.msk [vmem:[#allocation2 + $0x50] sm:$0xff] %vm1619_vm3, %v3385_v3  ;;  %2639 = vset.pattern.permute.xlu0 %v4119_v58  ;;  %v768_v27 = vsub.f32 %v3098_v10, %v723_v4  ;;  %v3401_v10 = vld [vmem:[#allocation2 + $0x30] sm:$0xff]  ;;  %v656_v49 = vmul.f32 1.442695, %v4122_v34 }
 0x263   : > { %4121 = vst [vmem:[#allocation33_spill] sm:$0xff] %v3401_v10 }
 0x264   : > { %v792_v45 = vmul.f32 1.442695, %v768_v27 }
 0x266   : > { %2663 = vpow2.f32 %v792_v45  ;;  %v766_v45 = vsub.f32 %v3091_v6, %v713_v25 }
 0x267   : > { %2665 = vpow2.f32 %v656_v49 }
 0x26c   : > { %v3398_v58 = vpop.eup %2663 }
 0x275   : > { %747 = vperm.xlu1 %2633, %v3264_v5  }
 0x279   : > { %752 = vperm.xlu2 %2634, %v3275_v52   ;;  %v3419_v52 = vld [vmem:[#allocation2 + $0x48] sm:$0xff] }
 0x27a   : > { %4124 = vst [vmem:[#allocation35_spill] sm:$0xff] %v3419_v52 }
 0x27d   : > { %2636 = vset.pattern.permute.xlu1 %v4120_v19 }
 0x27e   : > { %1413 = vperm.xlu1 %2636, %v3284_v47  }
 0x280   : > { %v841_v60 = vpop.xlane.xlu0 %840 }
 0x281   : > { %v872_v0 = vadd.f32 %v841_v60, %v824_v40  ;;  %757 = vperm.xlu2 %2634, %v3287_v42   ;;  %v905_v60 = vld [vmem:[#allocation4] sm:$0xff]  ;;  %v788_v40 = vmul.f32 1.442695, %v766_v45 }
 0x283   : > { %889 = vst.msk [vmem:[#allocation3] sm:$0xff] %vm888_vm2, %v872_v0  ;;  %v1328_v4 = vpop.xlane.xlu2 %1327  ;;  %v3415_v0 = vpop.f32.mrf.mxu2  ;;  %2667 = vpow2.f32 %v788_v40 }
 0x284   : > { %v3404_v27 = vmax.f32 %v3401_v10, %v1328_v4  ;;  %856 = vadd.xlane.f32.xlu0 %v3398_v58  ;;  %4123 = vst [vmem:[#allocation34_spill] sm:$0xff] %v3415_v0  ;;  %v1001_v10 = vmul.f32 %v3304_v54, %v905_v60  ;;  %v3428_v54 = vpop.eup %2665 }
 0x286   : > { %1932 = vst.msk [vmem:[#allocation2 + $0x30] sm:$0xff] %vm1619_vm3, %v3404_v27 }
 0x289   : > { %2637 = vset.pattern.permute.xlu2 %v4120_v19  ;;  %v3431_v45 = vpop.eup %2667 }
 0x28a   : > { %1418 = vperm.xlu2 %2637, %v3298_v28  }
 0x28b   : > { %v718_v4 = vpop.permute.xlu2 %717 }
 0x28c   : > { %v767_v42 = vsub.f32 %v3094_v9, %v718_v4  ;;  %v1334_v39 = vpop.xlane.xlu1 %1333  ;;  %1343 = vmax.xlane.f32.xlu0 %v3415_v0  ;;  %v812_v9 = vld [vmem:[#allocation3 + $0x20] sm:$0xff] }
 0x28d   : > { %v3423_v6 = vmax.f32 %v3419_v52, %v1334_v39  ;;  %v1082_v41 = vpop.f32.mrf.mxu1  ;;  %v828_v49 = vmul.f32 %v3428_v54, %v812_v9 }
 0x28e   : > { %v790_v25 = vmul.f32 1.442695, %v767_v42  ;;  %v1122_v34 = vadd.f32 %v1082_v41, %v1001_v10  ;;  %v4125_v41 = vsub.f32 %v3178_v44, %v3181_v46 }
 0x28f   : > { %1935 = vst.msk [vmem:[#allocation2 + $0x48] sm:$0xff] %vm1619_vm3, %v3423_v6 }
 0x290   : > { %2669 = vpow2.f32 %v790_v25  ;;  %1138 = vst.msk [vmem:[#allocation4] sm:$0xff] %vm470_vm1, %v1122_v34  ;;  %v658_v25 = vmul.f32 1.442695, %v4125_v41  ;;  %v3485_v41 = vld [vmem:[#allocation2 + $0x68] sm:$0xff] }
 0x291   : > { %4127 = vst [vmem:[#allocation37_spill] sm:$0xff] %v3485_v41 }
 0x292   : > { %2671 = vpow2.f32 %v658_v25 }
 0x293   : > { %v733_v10 = vpop.permute.xlu2 %732 }
 0x294   : > { %v770_v40 = vsub.f32 %v3105_v12, %v733_v10  ;;  %v642_v12 = vsub.f32 %v3230_v18, %v3233_v20 }
 0x295   : > { %v849_v60 = vpop.xlane.xlu0 %848 }
 0x296   : > { %v3433_v4 = vpop.eup %2669  ;;  %v876_v39 = vadd.f32 %v849_v60, %v828_v49  ;;  %v796_v34 = vmul.f32 1.442695, %v770_v40 }
 0x297   : > { %v1020_v42 = vpack.c.bf16 %v3433_v4, %v3431_v45 }
 0x298   : > { %893 = vst.msk [vmem:[#allocation3 + $0x20] sm:$0xff] %vm888_vm2, %v876_v39  ;;  %2673 = vpow2.f32 %v796_v34  ;;  %v3448_v60 = vpop.eup %2671  ;;  %v668_v39 = vmul.f32 1.442695, %v642_v12 }
 0x299   : > { %1096 = vmatmul.bf16.gmra.mxu1 %v1020_v42  ;;  %v3477_v42 = vld [vmem:[#allocation2 + $0x60] sm:$0xff] }
 0x29a   : > { %4126 = vst [vmem:[#allocation36_spill] sm:$0xff] %v3477_v42 }
 0x29e   : > { %v3450_v44 = vpop.eup %2673 }
 0x2a0   : > { %727 = vperm.xlu0 %2639, %v3222_v7  }
 0x2a4   : > { %v738_v9 = vpop.permute.xlu1 %737 }
 0x2a5   : > { %v771_v52 = vsub.f32 %v3108_v13, %v738_v9 }
 0x2a7   : > { %v798_v49 = vmul.f32 1.442695, %v771_v52  ;;  %v645_v52 = vsub.f32 %v3261_v56, %v3264_v5  ;;  %v3470_v56 = vld [vmem:[#allocation2 + $0x58] sm:$0xff] }
 0x2a8   : > { %842 = vadd.xlane.f32.xlu1 %v3302_v24  ;;  %742 = vperm.xlu0 %2639, %v3254_v50  }
 0x2a9   : > { %2675 = vpow2.f32 %v798_v49  ;;  %v674_v18 = vmul.f32 1.442695, %v645_v52  ;;  %v4128_v52 = vsub.f32 %v3207_v59, %v3210_v62 }
 0x2aa   : > { %2677 = vpow2.f32 %v668_v39 }
 0x2ab   : > { %2679 = vpow2.f32 %v674_v18  ;;  %v664_v18 = vmul.f32 1.442695, %v4128_v52 }
 0x2ad   : > { %2681 = vpow2.f32 %v664_v18 }
 0x2af   : > { %v3452_v46 = vpop.eup %2675 }
 0x2b0   : > { %948 = vperm.xlu0 %2639, %v3448_v60   ;;  %v3460_v20 = vpop.eup %2677 }
 0x2b1   : > { %v3463_v24 = vpop.eup %2679 }
 0x2b3   : > { %844 = vadd.xlane.f32.xlu2 %v3344_v15  ;;  %v3507_v0 = vpop.eup %2681 }
 0x2b8   : > { %973 = vperm.xlu0 %2639, %v3460_v20  }
 0x2c0   : > { %988 = vperm.xlu0 %2639, %v3463_v24  }
 0x2c1   : > { %1423 = vperm.xlu1 %2636, %v3317_v2   ;;  %v816_v2 = vld [vmem:[#allocation3 + $0x40] sm:$0xff] }
 0x2c2   : > { %v832_v59 = vmul.f32 %v3507_v0, %v816_v2 }
 0x2c4   : > { %v3496_v12 = vpop.permute.xlu0 %1448 }
 0x2c8   : > { %2646 = vset.pattern.permute.xlu0 %v4120_v19 }
 0x2c9   : > { %1428 = vperm.xlu1 %2636, %v3325_v36  }
 0x2cb   : > { %1433 = vperm.xlu2 %2637, %v3332_v1  }
 0x2cc   : > { %v1338_v5 = vpop.xlane.xlu2 %1337 }
 0x2cd   : > { %v3473_v15 = vmax.f32 %v3470_v56, %v1338_v5 }
 0x2cf   : > { %1937 = vst.msk [vmem:[#allocation2 + $0x58] sm:$0xff] %vm1619_vm3, %v3473_v15  ;;  %v1340_v10 = vpop.xlane.xlu1 %1339 }
 0x2d0   : > { %v3480_v40 = vmax.f32 %v3477_v42, %v1340_v10 }
 0x2d2   : > { %1938 = vst.msk [vmem:[#allocation2 + $0x60] sm:$0xff] %vm1619_vm3, %v3480_v40 }
 0x2d3   : > { %1438 = vperm.xlu2 %2637, %v3340_v57  }
 0x2d4   : > { %v1342_v25 = vpop.xlane.xlu2 %1341 }
 0x2d5   : > { %v3488_v34 = vmax.f32 %v3485_v41, %v1342_v25  ;;  %v3504_v25 = vpop.permute.xlu0 %1453 }
 0x2d7   : > { %1939 = vst.msk [vmem:[#allocation2 + $0x68] sm:$0xff] %vm1619_vm3, %v3488_v34 }
 0x2dc   : > { %v3492_v9 = vpop.permute.xlu2 %752 }
 0x2e4   : > { %v3494_v49 = vpop.permute.xlu2 %757 }
 0x2e7   : > { %v3498_v39 = vpop.permute.xlu1 %747 }
 0x2ec   : > { %v1419_v5 = vpop.permute.xlu2 %1418 }
 0x2ed   : > { %v1492_v10 = vsub.f32 %v3140_v29, %v1419_v5  ;;  %v4129_v5 = vsub.f32 %v3131_v23, %v3134_v26 }
 0x2ef   : > { %v1509_v13 = vmul.f32 1.442695, %v1492_v10  ;;  %v650_v10 = vmul.f32 1.442695, %v4129_v5 }
 0x2f0   : > { %v1414_v41 = vpop.permute.xlu1 %1413 }
 0x2f1   : > { %v1491_v42 = vsub.f32 %v3124_v21, %v1414_v41  ;;  %2683 = vpow2.f32 %v1509_v13  ;;  %v1363_v21 = vsub.f32 %v3281_v33, %v3284_v47  ;;  %v1313_v13 = vld [vmem:[#allocation2 + $0x70] sm:$0xff]  ;;  %v1368_v33 = vsub.f32 %v3337_v53, %v3340_v57 }
 0x2f2   : > { %v1374_v57 = vsub.f32 %v3470_v56, %v3473_v15 }
 0x2f3   : > { %v1507_v36 = vmul.f32 1.442695, %v1491_v42  ;;  %846 = vadd.xlane.f32.xlu1 %v3348_v63  ;;  %v3522_v63 = vpop.f32.mrf.mxu1  ;;  %v1379_v2 = vmul.f32 1.442695, %v1363_v21 }
 0x2f5   : > { %2685 = vpow2.f32 %v1507_v36 }
 0x2f6   : > { %2687 = vpow2.f32 %v1379_v2  ;;  %v4131_v2 = vsub.f32 %v3143_v30, %v3146_v32 }
 0x2f7   : > { %v857_v62 = vpop.xlane.xlu0 %856  ;;  %v3511_v18 = vpop.eup %2683 }
 0x2f8   : > { %v880_v52 = vadd.f32 %v857_v62, %v832_v59  ;;  %v4130_v59 = vsub.f32 %v3365_v61, %v3368_v51  ;;  %v1401_v51 = vmul.f32 1.442695, %v1374_v57  ;;  %v809_v61 = vld [vmem:[#allocation3 + $0x8] sm:$0xff] }
 0x2fa   : > { %897 = vst.msk [vmem:[#allocation3 + $0x40] sm:$0xff] %vm888_vm2, %v880_v52  ;;  %v1395_v62 = vmul.f32 1.442695, %v4130_v59 }
 0x2fb   : > { %v3514_v29 = vpop.eup %2685  ;;  %850 = vadd.xlane.f32.xlu1 %v3376_v31  ;;  %v3527_v47 = vpop.f32.mrf.mxu1  ;;  %v1389_v31 = vmul.f32 1.442695, %v1368_v33 }
 0x2fc   : > { %852 = vadd.xlane.f32.xlu2 %v3431_v45  ;;  %v1748_v36 = vpack.c.bf16 %v3511_v18, %v3514_v29  ;;  %v3529_v45 = vpop.eup %2687 }
 0x2fd   : > { %2689 = vpow2.f32 %v1389_v31 }
 0x2fe   : > { %1788 = vmatmul.bf16.vlgmr.msra.gmra.mxu3 %v1748_v36  ;;  %2691 = vpow2.f32 %v650_v10 }
 0x2ff   : > { %v1344_v42 = vpop.xlane.xlu0 %1343  ;;  %2693 = vpow2.f32 %v1395_v62 }
 0x300   : > { %v1361_v41 = vmax.f32 %v1313_v13, %v1344_v42  ;;  %v652_v42 = vmul.f32 1.442695, %v4131_v2 }
 0x302   : > { %1940 = vst.msk [vmem:[#allocation2 + $0x70] sm:$0xff] %vm1619_vm3, %v1361_v41  ;;  %1483 = vperm.xlu0 %2646, %v1361_v41   ;;  %v1377_v5 = vsub.f32 %v1313_v13, %v1361_v41  ;;  %v810_v41 = vld [vmem:[#allocation3 + $0x10] sm:$0xff] }
 0x303   : > { %v3538_v52 = vpop.f32.mrf.mxu1  ;;  %v3540_v21 = vpop.eup %2689 }
 0x304   : > { %v3548_v26 = vpop.eup %2691  ;;  %v1407_v32 = vmul.f32 1.442695, %v1377_v5 }
 0x305   : > { %v3553_v33 = vpop.eup %2693  ;;  %v825_v56 = vmul.f32 %v3548_v26, %v809_v61 }
 0x30a   : > { %1654 = vperm.xlu0 %2646, %v3529_v45  }
 0x30b   : > { %v3555_v31 = vpop.f32.mrf.mxu1 }
 0x312   : > { %1679 = vperm.xlu0 %2646, %v3540_v21   ;;  %v728_v53 = vpop.permute.xlu0 %727 }
 0x313   : > { %v769_v36 = vsub.f32 %v3101_v11, %v728_v53  ;;  %v910_v53 = vld [vmem:[#allocation4 + $0x28] sm:$0xff] }
 0x314   : > { %1443 = vperm.xlu1 %2636, %v3404_v27   ;;  %1458 = vperm.xlu2 %2637, %v3423_v6  }
 0x315   : > { %v794_v23 = vmul.f32 1.442695, %v769_v36 }
 0x317   : > { %2695 = vpow2.f32 %v794_v23 }
 0x318   : > { %2697 = vpow2.f32 %v1401_v51  ;;  %v1094_v51 = vpop.f32.mrf.mxu1 }
 0x319   : > { %2699 = vpow2.f32 %v652_v42 }
 0x31a   : > { %1694 = vperm.xlu0 %2646, %v3553_v33   ;;  %v743_v11 = vpop.permute.xlu0 %742  ;;  %2701 = vpow2.f32 %v1407_v32 }
 0x31b   : > { %v843_v10 = vpop.xlane.xlu1 %842  ;;  %v772_v5 = vsub.f32 %v3112_v14, %v743_v11 }
 0x31c   : > { %v873_v59 = vadd.f32 %v843_v10, %v825_v56  ;;  %1463 = vperm.xlu2 %2637, %v3385_v3   ;;  %v773_v10 = vsub.f32 %v3118_v16, %v3498_v39  ;;  %v775_v16 = vsub.f32 %v3127_v22, %v3494_v49 }
 0x31d   : > { %v3560_v62 = vpop.eup %2695 }
 0x31e   : > { %890 = vst.msk [vmem:[#allocation3 + $0x8] sm:$0xff] %vm888_vm2, %v873_v59  ;;  %v1021_v30 = vpack.c.bf16 %v3560_v62, %v3398_v58  ;;  %v3565_v57 = vpop.eup %2697  ;;  %v4133_v59 = vpack.c.bf16 %v3452_v46, %v3450_v44  ;;  %v802_v32 = vmul.f32 1.442695, %v773_v10  ;;  %v3597_v10 = vpop.f32.mrf.mxu2 }
 0x31f   : > { %v3567_v36 = vpop.eup %2699 }
 0x320   : > { %1101 = vmatmul.bf16.gmra.mxu1 %v1021_v30  ;;  %v826_v2 = vmul.f32 %v3567_v36, %v810_v41  ;;  %v3572_v56 = vpop.eup %2701  ;;  %v800_v30 = vmul.f32 1.442695, %v772_v5 }
 0x321   : > { %4132 = vst [vmem:[#allocation38_spill] sm:$0xff] %v3572_v56 }
 0x322   : > { %1709 = vperm.xlu0 %2646, %v3565_v57   ;;  %v949_v13 = vpop.permute.xlu0 %948  ;;  %2703 = vpow2.f32 %v800_v30 }
 0x323   : > { %v1006_v23 = vmul.f32 %v949_v13, %v910_v53  ;;  %2705 = vpow2.f32 %v802_v32 }
 0x325   : > { %v1127_v61 = vadd.f32 %v1094_v51, %v1006_v23 }
 0x326   : > { %v845_v42 = vpop.xlane.xlu2 %844 }
 0x327   : > { %1143 = vst.msk [vmem:[#allocation4 + $0x28] sm:$0xff] %vm470_vm1, %v1127_v61  ;;  %v874_v58 = vadd.f32 %v845_v42, %v826_v2  ;;  %v806_v42 = vmul.f32 1.442695, %v775_v16 }
 0x328   : > { %v3583_v23 = vpop.eup %2703 }
 0x329   : > { %891 = vst.msk [vmem:[#allocation3 + $0x10] sm:$0xff] %vm888_vm2, %v874_v58  ;;  %v3586_v11 = vpop.eup %2705 }
 0x32a   : > { %1724 = vperm.xlu0 %2646, %v3572_v56   ;;  %v1023_v2 = vpack.c.bf16 %v3586_v11, %v3583_v23 }
 0x32e   : > { %v1434_v41 = vpop.permute.xlu2 %1433 }
 0x330   : > { %1106 = vmatmul.bf16.gmra.mxu1 %v4133_v59 }
 0x333   : > { %v1424_v53 = vpop.permute.xlu1 %1423 }
 0x334   : > { %v1493_v13 = vsub.f32 %v3160_v38, %v1424_v53  ;;  %v774_v38 = vsub.f32 %v3121_v17, %v3492_v9  ;;  %v1495_v9 = vsub.f32 %v3187_v48, %v1434_v41  ;;  %v635_v48 = vsub.f32 %v3155_v35, %v3158_v37  ;;  %v4135_v35 = vld [vmem:[#allocation6_spill] sm:$0xff] }
 0x335   : > { %v1498_v53 = vsub.f32 %v3227_v8, %v3496_v12  ;;  %v811_v8 = vld [vmem:[#allocation3 + $0x18] sm:$0xff] }
 0x336   : > { %v1511_v51 = vmul.f32 1.442695, %v1493_v13  ;;  %v804_v58 = vmul.f32 1.442695, %v774_v38  ;;  %v1515_v30 = vmul.f32 1.442695, %v1495_v9 }
 0x337   : > { %v654_v41 = vmul.f32 1.442695, %v635_v48  ;;  %v813_v38 = vld [vmem:[#allocation3 + $0x28] sm:$0xff]  ;;  %v4138_v48 = vld [vmem:[#allocation16_spill] sm:$0xff] }
 0x338   : > { %2707 = vpow2.f32 %v1511_v51  ;;  %v1521_v51 = vmul.f32 1.442695, %v1498_v53 }
 0x33b   : > { %v1429_v61 = vpop.permute.xlu1 %1428 }
 0x33c   : > { %v1494_v14 = vsub.f32 %v3176_v43, %v1429_v61  ;;  %v1439_v43 = vpop.permute.xlu2 %1438  ;;  %v4134_v61 = vld [vmem:[#allocation5_spill] sm:$0xff] }
 0x33d   : > { %v4136_v37 = vsub.f32 %v4134_v61, %v4135_v35 }
 0x33e   : > { %v1513_v39 = vmul.f32 1.442695, %v1494_v14  ;;  %854 = vadd.xlane.f32.xlu1 %v3433_v4  ;;  %v3595_v5 = vpop.eup %2707  ;;  %v1496_v4 = vsub.f32 %v3200_v55, %v1439_v43  ;;  %v829_v43 = vmul.f32 %v3448_v60, %v813_v38  ;;  %v974_v60 = vpop.permute.xlu0 %973  ;;  %v4141_v38 = vld [vmem:[#allocation11_spill] sm:$0xff] }
 0x340   : > { %2709 = vpow2.f32 %v1513_v39  ;;  %1111 = vmatmul.bf16.gmra.mxu1 %v1023_v2  ;;  %v1517_v49 = vmul.f32 1.442695, %v1496_v4 }
 0x341   : > { %2711 = vpow2.f32 %v806_v42 }
 0x342   : > { %2713 = vpow2.f32 %v804_v58  ;;  %v814_v58 = vld [vmem:[#allocation3 + $0x30] sm:$0xff] }
 0x343   : > { %2715 = vpow2.f32 %v1517_v49 }
 0x344   : > { %2717 = vpow2.f32 %v1515_v30 }
 0x345   : > { %862 = vadd.xlane.f32.xlu2 %v3452_v46  ;;  %2719 = vpow2.f32 %v654_v41 }
 0x346   : > { %v3600_v22 = vpop.eup %2709  ;;  %1345 = vmax.xlane.f32.xlu1 %v3597_v10  ;;  %2721 = vpow2.f32 %v1521_v51 }
 0x347   : > { %v1749_v17 = vpack.c.bf16 %v3600_v22, %v3595_v5  ;;  %v3607_v59 = vpop.eup %2711 }
 0x348   : > { %v3609_v32 = vpop.eup %2713 }
 0x349   : > { %1793 = vmatmul.bf16.gmra.mxu3 %v1749_v17  ;;  %v1024_v55 = vpack.c.bf16 %v3607_v59, %v3609_v32  ;;  %v3614_v46 = vpop.eup %2715 }
 0x34a   : > { %v2718_v13 = vpop.eup %2717 }
 0x34b   : > { %v3627_v14 = vpop.eup %2719 }
 0x34c   : > { %v2722_v12 = vpop.eup %2721  ;;  %v827_v16 = vmul.f32 %v3627_v14, %v811_v8 }
 0x34e   : > { %858 = vadd.xlane.f32.xlu1 %v3560_v62  ;;  %v1750_v62 = vpack.c.bf16 %v3614_v46, %v2718_v13 }
 0x350   : > { %1116 = vmatmul.bf16.gmra.mxu1 %v1024_v55 }
 0x354   : > { %1573 = vadd.xlane.f32.xlu0 %v3511_v18  ;;  %v660_v18 = vmul.f32 1.442695, %v4136_v37  ;;  %v3650_v37 = vpop.f32.mrf.mxu1 }
 0x356   : > { %860 = vadd.xlane.f32.xlu1 %v3450_v44  ;;  %2723 = vpow2.f32 %v660_v18  ;;  %v4137_v44 = vmov 0  }
 0x359   : > { %1798 = vmatmul.bf16.gmra.mxu3 %v1750_v62  ;;  %v3645_v62 = vpop.permute.xlu0 %988 }
 0x35c   : > { %1579 = vadd.xlane.f32.xlu0 %v2718_v13  ;;  %v3633_v42 = vpop.eup %2723 }
 0x35d   : > { %1473 = vperm.xlu2 %2637, %v3480_v40   ;;  %v830_v17 = vmul.f32 %v3633_v42, %v814_v58  ;;  %v1499_v58 = vsub.f32 %v4141_v38, %v3504_v25 }
 0x364   : > { %1585 = vadd.xlane.f32.xlu0 %v2722_v12 }
 0x365   : > { %2641 = vset.pattern.permute.xlu2 %v4137_v44 }
 0x366   : > { %v847_v39 = vpop.xlane.xlu1 %846  ;;  %933 = vperm.xlu2 %2641, %v3567_v36  }
 0x367   : > { %v875_v2 = vadd.f32 %v847_v39, %v827_v16  ;;  %v4140_v16 = vld [vmem:[#allocation15_spill] sm:$0xff] }
 0x369   : > { %892 = vst.msk [vmem:[#allocation3 + $0x18] sm:$0xff] %vm888_vm2, %v875_v2 }
 0x36e   : > { %v851_v4 = vpop.xlane.xlu1 %850  ;;  %2642 = vset.pattern.permute.xlu2 %v4120_v19 }
 0x36f   : > { %v877_v9 = vadd.f32 %v851_v4, %v829_v43  ;;  %v853_v49 = vpop.xlane.xlu2 %852  ;;  %1478 = vperm.xlu2 %2642, %v3488_v34   ;;  %1468 = vperm.xlu1 %2636, %v3473_v15   ;;  %v4139_v15 = vld [vmem:[#allocation9_spill] sm:$0xff]  ;;  %v3661_v43 = vpop.f32.mrf.mxu1 }
 0x370   : > { %v878_v36 = vadd.f32 %v853_v49, %v830_v17  ;;  %v1523_v17 = vmul.f32 1.442695, %v1499_v58  ;;  %v815_v58 = vld [vmem:[#allocation3 + $0x38] sm:$0xff] }
 0x371   : > { %894 = vst.msk [vmem:[#allocation3 + $0x28] sm:$0xff] %vm888_vm2, %v877_v9 }
 0x372   : > { %895 = vst.msk [vmem:[#allocation3 + $0x30] sm:$0xff] %vm888_vm2, %v878_v36 }
 0x374   : > { %v3653_v18 = vpop.permute.xlu0 %1483 }
 0x377   : > { %v1459_v30 = vpop.permute.xlu2 %1458  ;;  %2643 = vset.pattern.permute.xlu2 %v4137_v44  ;;  %2640 = vset.pattern.permute.xlu1 %v4137_v44 }
 0x378   : > { %v1500_v39 = vsub.f32 %v4140_v16, %v1459_v30  ;;  %v4143_v30 = vld [vmem:[#allocation7_spill] sm:$0xff] }
 0x37a   : > { %v1525_v4 = vmul.f32 1.442695, %v1500_v39 }
 0x37c   : > { %v3663_v9 = vpop.permute.xlu0 %1654 }
 0x37f   : > { %v1464_v55 = vpop.permute.xlu2 %1463 }
 0x380   : > { %v1501_v53 = vsub.f32 %v4138_v48, %v1464_v55 }
 0x382   : > { %v1527_v13 = vmul.f32 1.442695, %v1501_v53 }
 0x384   : > { %2725 = vpow2.f32 %v1527_v13  ;;  %v3675_v48 = vpop.permute.xlu0 %1679 }
 0x385   : > { %4144 = vst [vmem:[#allocation5_spill] sm:$0xff] %v3675_v48  ;;  %v4154_v48 = vld [vmem:[#allocation29_spill] sm:$0xff] }
 0x386   : > { %v1444_v41 = vpop.permute.xlu1 %1443 }
 0x387   : > { %v1497_v51 = vsub.f32 %v4139_v15, %v1444_v41  ;;  %v4146_v41 = vld [vmem:[#allocation12_spill] sm:$0xff] }
 0x389   : > { %v1519_v61 = vmul.f32 1.442695, %v1497_v51  ;;  %v915_v51 = vld [vmem:[#allocation4 + $0x50] sm:$0xff] }
 0x38a   : > { %v3648_v35 = vpop.eup %2725  ;;  %v1011_v39 = vmul.f32 %v974_v60, %v915_v51 }
 0x38b   : > { %2727 = vpow2.f32 %v1519_v61  ;;  %1591 = vadd.xlane.f32.xlu0 %v3648_v35 }
 0x38c   : > { %2729 = vpow2.f32 %v1525_v4  ;;  %v3683_v16 = vpop.permute.xlu0 %1694 }
 0x38d   : > { %2731 = vpow2.f32 %v1523_v17  ;;  %4147 = vst [vmem:[#allocation6_spill] sm:$0xff] %v3683_v16  ;;  %v4148_v17 = vld [vmem:[#allocation10_spill] sm:$0xff]  ;;  %v907_v16 = vld [vmem:[#allocation4 + $0x10] sm:$0xff] }
 0x391   : > { %v3655_v8 = vpop.eup %2727 }
 0x392   : > { %v1751_v2 = vpack.c.bf16 %v2722_v12, %v3655_v8  ;;  %v3669_v36 = vpop.eup %2729  ;;  %v4142_v12 = vld [vmem:[#allocation8_spill] sm:$0xff] }
 0x393   : > { %v639_v25 = vsub.f32 %v4143_v30, %v4142_v12  ;;  %v3673_v55 = vpop.eup %2731  ;;  %v641_v12 = vsub.f32 %v4148_v17, %v3222_v7  ;;  %v4150_v7 = vld [vmem:[#allocation21_spill] sm:$0xff] }
 0x394   : > { %1803 = vmatmul.bf16.gmra.mxu3 %v1751_v2  ;;  %v1752_v53 = vpack.c.bf16 %v3669_v36, %v3673_v55 }
 0x395   : > { %v662_v13 = vmul.f32 1.442695, %v639_v25  ;;  %v666_v60 = vmul.f32 1.442695, %v641_v12 }
 0x397   : > { %2733 = vpow2.f32 %v662_v13 }
 0x398   : > { %866 = vadd.xlane.f32.xlu2 %v3586_v11 }
 0x399   : > { %864 = vadd.xlane.f32.xlu1 %v3583_v23  ;;  %v4145_v23 = vld [vmem:[#allocation13_spill] sm:$0xff] }
 0x39a   : > { %v643_v15 = vsub.f32 %v4146_v41, %v4145_v23  ;;  %v819_v23 = vld [vmem:[#allocation3 + $0x58] sm:$0xff]  ;;  %v3696_v41 = vpop.permute.xlu0 %1709 }
 0x39b   : > { %4149 = vst [vmem:[#allocation16_spill] sm:$0xff] %v3696_v41 }
 0x39c   : > { %v670_v61 = vmul.f32 1.442695, %v643_v15 }
 0x39d   : > { %v3667_v49 = vpop.f32.mrf.mxu1  ;;  %v3685_v2 = vpop.eup %2733 }
 0x39e   : > { %2735 = vpow2.f32 %v670_v61  ;;  %v831_v30 = vmul.f32 %v3685_v2, %v815_v58 }
 0x39f   : > { %2737 = vpow2.f32 %v666_v60 }
 0x3a2   : > { %v3721_v60 = vpop.permute.xlu0 %1724 }
 0x3a3   : > { %4152 = vst [vmem:[#allocation9_spill] sm:$0xff] %v3721_v60 }
 0x3a4   : > { %1808 = vmatmul.bf16.gmra.mxu3 %v1752_v53  ;;  %v3693_v13 = vpop.eup %2735 }
 0x3a5   : > { %v3679_v11 = vpop.f32.mrf.mxu1  ;;  %v835_v51 = vmul.f32 %v3693_v13, %v819_v23 }
 0x3ad   : > { %v1107_v38 = vpop.f32.mrf.mxu1 }
 0x3ae   : > { %v1132_v4 = vadd.f32 %v1107_v38, %v1011_v39  ;;  %v3704_v39 = vld [vmem:[#allocation2 + $0x78] sm:$0xff] }
 0x3b0   : > { %1148 = vst.msk [vmem:[#allocation4 + $0x50] sm:$0xff] %vm470_vm1, %v1132_v4  ;;  %943 = vperm.xlu2 %2643, %v3428_v54   ;;  %v1364_v54 = vsub.f32 %v4150_v7, %v3298_v28  ;;  %v3715_v28 = vpop.eup %2737 }
 0x3b1   : > { %v855_v25 = vpop.xlane.xlu1 %854 }
 0x3b2   : > { %v879_v53 = vadd.f32 %v855_v25, %v831_v30  ;;  %928 = vperm.xlu1 %2640, %v3548_v26   ;;  %v1381_v4 = vmul.f32 1.442695, %v1364_v54  ;;  %v817_v30 = vld [vmem:[#allocation3 + $0x48] sm:$0xff] }
 0x3b3   : > { %v4151_v25 = vld [vmem:[#allocation26_spill] sm:$0xff]  ;;  %v833_v7 = vmul.f32 %v3715_v28, %v817_v30 }
 0x3b4   : > { %896 = vst.msk [vmem:[#allocation3 + $0x38] sm:$0xff] %vm888_vm2, %v879_v53  ;;  %2739 = vpow2.f32 %v1381_v4  ;;  %v1367_v53 = vsub.f32 %v4151_v25, %v3332_v1  ;;  %v918_v54 = vld [vmem:[#allocation4 + $0x68] sm:$0xff]  ;;  %v818_v25 = vld [vmem:[#allocation3 + $0x50] sm:$0xff] }
 0x3b5   : > { %v3698_v15 = vpop.f32.mrf.mxu1  ;;  %v1014_v17 = vmul.f32 %v3645_v62, %v918_v54  ;;  %v834_v62 = vmul.f32 %v3460_v20, %v818_v25  ;;  %v4156_v25 = vld [vmem:[#allocation32_spill] sm:$0xff] }
 0x3b8   : > { %v863_v61 = vpop.xlane.xlu2 %862  ;;  %2644 = vset.pattern.permute.xlu2 %v4120_v19 }
 0x3b9   : > { %v883_v26 = vadd.f32 %v863_v61, %v835_v51  ;;  %v1346_v38 = vpop.xlane.xlu1 %1345 }
 0x3ba   : > { %v3707_v58 = vmax.f32 %v3704_v39, %v1346_v38  ;;  %v1540_v38 = vld [vmem:[#allocation3 + $0x8] sm:$0xff]  ;;  %v3729_v4 = vpop.eup %2739 }
 0x3bb   : > { %900 = vst.msk [vmem:[#allocation3 + $0x58] sm:$0xff] %vm888_vm2, %v883_v26  ;;  %v1387_v26 = vmul.f32 1.442695, %v1367_v53  ;;  %v1556_v41 = vmul.f32 %v3729_v4, %v1540_v38 }
 0x3bc   : > { %1941 = vst.msk [vmem:[#allocation2 + $0x78] sm:$0xff] %vm1619_vm3, %v3707_v58  ;;  %1488 = vperm.xlu2 %2644, %v3707_v58  }
 0x3bd   : > { %v3717_v12 = vpop.f32.mrf.mxu1  ;;  %2741 = vpow2.f32 %v1387_v26 }
 0x3c0   : > { %v3723_v23 = vpop.permute.xlu2 %1473 }
 0x3c1   : > { %v859_v51 = vpop.xlane.xlu1 %858 }
 0x3c2   : > { %v881_v61 = vadd.f32 %v859_v51, %v833_v7 }
 0x3c3   : > { %v3740_v26 = vpop.eup %2741 }
 0x3c4   : > { %898 = vst.msk [vmem:[#allocation3 + $0x48] sm:$0xff] %vm888_vm2, %v881_v61  ;;  %2645 = vset.pattern.permute.xlu2 %v4137_v44  ;;  %v4153_v61 = vld [vmem:[#allocation28_spill] sm:$0xff] }
 0x3c5   : > { %v1114_v1 = vpop.f32.mrf.mxu1  ;;  %v4155_v56 = vsub.f32 %v4153_v61, %v4154_v48  ;;  %v1546_v48 = vld [vmem:[#allocation3 + $0x38] sm:$0xff]  ;;  %v4157_v61 = vld [vmem:[#allocation27_spill] sm:$0xff] }
 0x3c6   : > { %v1135_v60 = vadd.f32 %v1114_v1, %v1014_v17  ;;  %v1543_v1 = vld [vmem:[#allocation3 + $0x20] sm:$0xff] }
 0x3c7   : > { %v1574_v30 = vpop.xlane.xlu0 %1573  ;;  %v1393_v17 = vmul.f32 1.442695, %v4155_v56  ;;  %v1559_v20 = vmul.f32 %v3740_v26, %v1543_v1 }
 0x3c8   : > { %1151 = vst.msk [vmem:[#allocation4 + $0x68] sm:$0xff] %vm470_vm1, %v1135_v60  ;;  %v1604_v53 = vadd.f32 %v1574_v30, %v1556_v41  ;;  %v934_v7 = vpop.permute.xlu2 %933 }
 0x3c9   : > { %v1003_v54 = vmul.f32 %v934_v7, %v907_v16  ;;  %v861_v51 = vpop.xlane.xlu1 %860  ;;  %2743 = vpow2.f32 %v1393_v17 }
 0x3ca   : > { %1621 = vst.msk [vmem:[#allocation3 + $0x8] sm:$0xff] %vm1619_vm3, %v1604_v53  ;;  %v882_v44 = vadd.f32 %v861_v51, %v834_v62  ;;  %v1789_v51 = vpop.f32.mrf.mxu3 }
 0x3cb   : > { %v1124_v38 = vadd.f32 %v3527_v47, %v1003_v54 }
 0x3cc   : > { %899 = vst.msk [vmem:[#allocation3 + $0x50] sm:$0xff] %vm888_vm2, %v882_v44 }
 0x3cd   : > { %1140 = vst.msk [vmem:[#allocation4 + $0x10] sm:$0xff] %vm470_vm1, %v1124_v38 }
 0x3cf   : > { %v1580_v16 = vpop.xlane.xlu0 %1579  ;;  %v3746_v47 = vpop.eup %2743 }
 0x3d0   : > { %v1607_v41 = vadd.f32 %v1580_v16, %v1559_v20  ;;  %v1479_v60 = vpop.permute.xlu2 %1478  ;;  %v1562_v53 = vmul.f32 %v3746_v47, %v1546_v48  ;;  %v4158_v16 = vld [vmem:[#allocation31_spill] sm:$0xff] }
 0x3d1   : > { %v1504_v30 = vsub.f32 %v4156_v25, %v1479_v60 }
 0x3d2   : > { %1624 = vst.msk [vmem:[#allocation3 + $0x20] sm:$0xff] %vm1619_vm3, %v1607_v41  ;;  %v3752_v1 = vpop.f32.mrf.mxu3  ;;  %v1373_v41 = vsub.f32 %v4158_v16, %v3385_v3  ;;  %v4160_v3 = vld [vmem:[#allocation14_spill] sm:$0xff] }
 0x3d3   : > { %v1533_v56 = vmul.f32 1.442695, %v1504_v30 }
 0x3d5   : > { %2745 = vpow2.f32 %v1533_v56  ;;  %v1399_v56 = vmul.f32 1.442695, %v1373_v41 }
 0x3d7   : > { %v1586_v7 = vpop.xlane.xlu0 %1585 }
 0x3d8   : > { %v1610_v62 = vadd.f32 %v1586_v7, %v1562_v53  ;;  %v644_v53 = vsub.f32 %v4160_v3, %v3254_v50  ;;  %v1549_v7 = vld [vmem:[#allocation3 + $0x50] sm:$0xff]  ;;  %v4161_v50 = vld [vmem:[#allocation18_spill] sm:$0xff] }
 0x3da   : > { %1627 = vst.msk [vmem:[#allocation3 + $0x38] sm:$0xff] %vm1619_vm3, %v1610_v62  ;;  %v3759_v60 = vpop.f32.mrf.mxu3 }
 0x3db   : > { %v2746_v54 = vpop.eup %2745 }
 0x3dc   : > { %1597 = vadd.xlane.f32.xlu0 %v2746_v54  ;;  %868 = vadd.xlane.f32.xlu1 %v3609_v32  ;;  %v4159_v32 = vld [vmem:[#allocation30_spill] sm:$0xff] }
 0x3dd   : > { %v1503_v30 = vsub.f32 %v4159_v32, %v3723_v23  ;;  %v820_v32 = vld [vmem:[#allocation3 + $0x60] sm:$0xff] }
 0x3df   : > { %v1531_v48 = vmul.f32 1.442695, %v1503_v30 }
 0x3e1   : > { %v1469_v44 = vpop.permute.xlu1 %1468 }
 0x3e2   : > { %v1502_v17 = vsub.f32 %v4157_v61, %v1469_v44 }
 0x3e4   : > { %v1529_v38 = vmul.f32 1.442695, %v1502_v17  ;;  %v4162_v17 = vld [vmem:[#allocation17_spill] sm:$0xff] }
 0x3e5   : > { %870 = vadd.xlane.f32.xlu2 %v3607_v59  ;;  %v1796_v59 = vpop.f32.mrf.mxu3 }
 0x3e6   : > { %2747 = vpow2.f32 %v1529_v38  ;;  %v646_v38 = vsub.f32 %v4162_v17, %v4161_v50 }
 0x3e7   : > { %2749 = vpow2.f32 %v1399_v56 }
 0x3e8   : > { %2751 = vpow2.f32 %v1531_v48  ;;  %v676_v30 = vmul.f32 1.442695, %v646_v38 }
 0x3ec   : > { %v3755_v20 = vpop.eup %2747 }
 0x3ed   : > { %v1753_v25 = vpack.c.bf16 %v3755_v20, %v3648_v35  ;;  %v3770_v35 = vpop.eup %2749  ;;  %v3781_v16 = vpop.f32.mrf.mxu3 }
 0x3ee   : > { %v3772_v62 = vpop.eup %2751  ;;  %v1565_v23 = vmul.f32 %v3770_v35, %v1549_v7 }
 0x3ef   : > { %1813 = vmatmul.bf16.gmra.mxu3 %v1753_v25 }
 0x3f0   : > { %1845 = vrot.lane.b32.xlu0 %v1789_v51, %s2873_s22  ;;  %v672_v51 = vmul.f32 1.442695, %v644_v53 }
 0x3f2   : > { %2753 = vpow2.f32 %v672_v51 }
 0x3f3   : > { %2755 = vpow2.f32 %v676_v30 }
 0x3f5   : > { %938 = vperm.xlu1 %2640, %v3627_v14   ;;  %v1754_v14 = vpack.c.bf16 %v2746_v54, %v3772_v62  ;;  %v821_v54 = vld [vmem:[#allocation3 + $0x68] sm:$0xff]  ;;  %v3792_v51 = vpop.f32.mrf.mxu3 }
 0x3f6   : > { %v837_v48 = vmul.f32 %v3463_v24, %v821_v54  ;;  %v909_v24 = vld [vmem:[#allocation4 + $0x20] sm:$0xff]  ;;  %v4169_v54 = vld [vmem:[#allocation34_spill] sm:$0xff] }
 0x3f8   : > { %1851 = vrot.lane.b32.xlu0 %v1796_v59, %s2873_s22  ;;  %v2754_v25 = vpop.eup %2753 }
 0x3f9   : > { %v836_v3 = vmul.f32 %v2754_v25, %v820_v32 }
 0x3fd   : > { %958 = vperm.xlu2 %2645, %v3685_v2   ;;  %953 = vperm.xlu1 %2640, %v3633_v42   ;;  %v4163_v42 = vld [vmem:[#allocation20_spill] sm:$0xff]  ;;  %v4164_v2 = vld [vmem:[#allocation19_spill] sm:$0xff] }
 0x3fe   : > { %v1592_v44 = vpop.xlane.xlu0 %1591  ;;  %v647_v41 = vsub.f32 %v4164_v2, %v4163_v42  ;;  %v4168_v42 = vld [vmem:[#allocation24_spill] sm:$0xff] }
 0x3ff   : > { %v1613_v61 = vadd.f32 %v1592_v44, %v1565_v23  ;;  %1818 = vmatmul.bf16.gmra.mxu3 %v1754_v14  ;;  %v3795_v44 = vpop.eup %2755 }
 0x400   : > { %v678_v56 = vmul.f32 1.442695, %v647_v41 }
 0x401   : > { %1630 = vst.msk [vmem:[#allocation3 + $0x50] sm:$0xff] %vm1619_vm3, %v1613_v61 }
 0x402   : > { %2757 = vpow2.f32 %v678_v56 }
 0x405   : > { %968 = vperm.xlu2 %2645, %v3715_v28   ;;  %963 = vperm.xlu1 %2640, %v3507_v0   ;;  %v4165_v0 = vld [vmem:[#allocation23_spill] sm:$0xff]  ;;  %v4166_v28 = vld [vmem:[#allocation22_spill] sm:$0xff] }
 0x406   : > { %v1365_v14 = vsub.f32 %v4166_v28, %v4165_v0 }
 0x408   : > { %v1383_v61 = vmul.f32 1.442695, %v1365_v14  ;;  %v3797_v17 = vpop.eup %2757 }
 0x40a   : > { %2759 = vpow2.f32 %v1383_v61 }
 0x40b   : > { %v867_v59 = vpop.xlane.xlu2 %866 }
 0x40c   : > { %v885_v53 = vadd.f32 %v867_v59, %v837_v48  ;;  %v865_v7 = vpop.xlane.xlu1 %864 }
 0x40d   : > { %v884_v23 = vadd.f32 %v865_v7, %v836_v3  ;;  %983 = vperm.xlu2 %2645, %v2754_v25   ;;  %978 = vperm.xlu1 %2640, %v3693_v13   ;;  %v4167_v13 = vld [vmem:[#allocation25_spill] sm:$0xff]  ;;  %v1505_v25 = vsub.f32 %v4169_v54, %v3653_v18 }
 0x40e   : > { %902 = vst.msk [vmem:[#allocation3 + $0x68] sm:$0xff] %vm888_vm2, %v885_v53  ;;  %v1366_v2 = vsub.f32 %v4168_v42, %v4167_v13  ;;  %v4170_v18 = vld [vmem:[#allocation33_spill] sm:$0xff] }
 0x40f   : > { %901 = vst.msk [vmem:[#allocation3 + $0x60] sm:$0xff] %vm888_vm2, %v884_v23  ;;  %v1535_v56 = vmul.f32 1.442695, %v1505_v25  ;;  %v1369_v53 = vsub.f32 %v4170_v18, %v3404_v27  ;;  %v4171_v27 = vld [vmem:[#allocation35_spill] sm:$0xff] }
 0x410   : > { %v1385_v30 = vmul.f32 1.442695, %v1366_v2  ;;  %v3809_v3 = vpop.eup %2759 }
 0x411   : > { %v1391_v23 = vmul.f32 1.442695, %v1369_v53 }
 0x412   : > { %2761 = vpow2.f32 %v1385_v30 }
 0x413   : > { %v944_v50 = vpop.permute.xlu2 %943  ;;  %2763 = vpow2.f32 %v1535_v56 }
 0x414   : > { %v1005_v38 = vmul.f32 %v944_v50, %v909_v24 }
 0x415   : > { %998 = vperm.xlu2 %2645, %v3797_v17   ;;  %993 = vperm.xlu1 %2640, %v3795_v44  }
 0x416   : > { %v1126_v41 = vadd.f32 %v3555_v31, %v1005_v38 }
 0x417   : > { %v1804_v32 = vpop.f32.mrf.mxu3 }
 0x418   : > { %1142 = vst.msk [vmem:[#allocation4 + $0x20] sm:$0xff] %vm470_vm1, %v1126_v41  ;;  %1857 = vrot.lane.b32.xlu0 %v1804_v32, %s2873_s22  ;;  %v3819_v0 = vpop.eup %2761 }
 0x419   : > { %v3821_v14 = vpop.eup %2763 }
 0x41b   : > { %v1489_v48 = vpop.permute.xlu2 %1488 }
 0x41c   : > { %v1506_v59 = vsub.f32 %v3597_v10, %v1489_v48  ;;  %v906_v10 = vld [vmem:[#allocation4 + $0x8] sm:$0xff]  ;;  %v822_v48 = vld [vmem:[#allocation3 + $0x70] sm:$0xff] }
 0x41d   : > { %2648 = vset.pattern.permute.xlu2 %v4120_v19  ;;  %2647 = vset.pattern.permute.xlu1 %v4120_v19 }
 0x41e   : > { %v1537_v31 = vmul.f32 1.442695, %v1506_v59  ;;  %1664 = vperm.xlu2 %2648, %v3809_v3   ;;  %1659 = vperm.xlu1 %2647, %v3729_v4   ;;  %v1372_v4 = vsub.f32 %v4171_v27, %v3423_v6  ;;  %v4173_v6 = vld [vmem:[#allocation37_spill] sm:$0xff]  ;;  %v838_v59 = vmul.f32 %v3795_v44, %v822_v48  ;;  %v912_v27 = vld [vmem:[#allocation4 + $0x38] sm:$0xff]  ;;  %v1117_v48 = vpop.f32.mrf.mxu1 }
 0x41f   : > { %v3817_v7 = vpop.f32.mrf.mxu3 }
 0x420   : > { %2765 = vpow2.f32 %v1537_v31  ;;  %v1397_v13 = vmul.f32 1.442695, %v1372_v4  ;;  %v1636_v4 = vld [vmem:[#allocation4] sm:$0xff] }
 0x421   : > { %2767 = vpow2.f32 %v1391_v23  ;;  %v1732_v44 = vmul.f32 %v3663_v9, %v1636_v4 }
 0x422   : > { %2769 = vpow2.f32 %v1397_v13 }
 0x424   : > { %v929_v28 = vpop.permute.xlu1 %928 }
 0x425   : > { %v1002_v19 = vmul.f32 %v929_v28, %v906_v10  ;;  %v823_v10 = vld [vmem:[#allocation3 + $0x78] sm:$0xff] }
 0x426   : > { %v3823_v24 = vpop.eup %2765  ;;  %1674 = vperm.xlu2 %2648, %v3740_v26   ;;  %1669 = vperm.xlu1 %2647, %v3819_v0   ;;  %v4172_v26 = vld [vmem:[#allocation36_spill] sm:$0xff]  ;;  %v839_v23 = vmul.f32 %v3797_v17, %v823_v10  ;;  %v914_v17 = vld [vmem:[#allocation4 + $0x48] sm:$0xff]  ;;  %v1119_v10 = vpop.f32.mrf.mxu1 }
 0x427   : > { %v1123_v61 = vadd.f32 %v3522_v63, %v1002_v19  ;;  %v3830_v50 = vpop.f32.mrf.mxu3  ;;  %v1755_v38 = vpack.c.bf16 %v3823_v24, %v3821_v14  ;;  %v3835_v42 = vpop.eup %2767  ;;  %v1375_v2 = vsub.f32 %v4172_v26, %v3480_v40  ;;  %v1376_v63 = vsub.f32 %v4173_v6, %v3488_v34  ;;  %v908_v6 = vld [vmem:[#allocation4 + $0x18] sm:$0xff] }
 0x428   : > { %v3844_v32 = vpop.eup %2769  ;;  %v4174_v40 = vsub.f32 %v3704_v39, %v3707_v58 }
 0x429   : > { %1139 = vst.msk [vmem:[#allocation4 + $0x8] sm:$0xff] %vm470_vm1, %v1123_v61  ;;  %1823 = vmatmul.bf16.gmra.mxu3 %v1755_v38  ;;  %v1403_v54 = vmul.f32 1.442695, %v1375_v2  ;;  %v1405_v25 = vmul.f32 1.442695, %v1376_v63 }
 0x42b   : > { %2771 = vpow2.f32 %v1403_v54 }
 0x42c   : > { %2773 = vpow2.f32 %v1405_v25 }
 0x42e   : > { %1689 = vperm.xlu2 %2648, %v3746_v47   ;;  %1684 = vperm.xlu1 %2647, %v3835_v42   ;;  %v1409_v47 = vmul.f32 1.442695, %v4174_v40 }
 0x42f   : > { %v1811_v41 = vpop.f32.mrf.mxu3 }
 0x430   : > { %1863 = vrot.lane.b32.xlu0 %v1811_v41, %s2873_s22  ;;  %2775 = vpow2.f32 %v1409_v47  ;;  %v917_v47 = vld [vmem:[#allocation4 + $0x60] sm:$0xff] }
 0x431   : > { %v3851_v30 = vpop.eup %2771 }
 0x432   : > { %v2774_v34 = vpop.eup %2773 }
 0x436   : > { %1704 = vperm.xlu2 %2648, %v3770_v35   ;;  %1699 = vperm.xlu1 %2647, %v3844_v32   ;;  %v3854_v56 = vpop.eup %2775  ;;  %v1552_v35 = vld [vmem:[#allocation3 + $0x68] sm:$0xff] }
 0x437   : > { %v1568_v31 = vmul.f32 %v2774_v34, %v1552_v35 }
 0x43e   : > { %1719 = vperm.xlu2 %2648, %v2774_v34   ;;  %1714 = vperm.xlu1 %2647, %v3851_v30  }
 0x446   : > { %1729 = vperm.xlu1 %2647, %v3854_v56  }
 0x44f   : > { %v869_v18 = vpop.xlane.xlu1 %868  ;;  %v1598_v53 = vpop.xlane.xlu0 %1597 }
 0x450   : > { %v886_v39 = vadd.f32 %v869_v18, %v838_v59  ;;  %v1616_v58 = vadd.f32 %v1598_v53, %v1568_v31  ;;  %v913_v18 = vld [vmem:[#allocation4 + $0x40] sm:$0xff]  ;;  %v920_v53 = vld [vmem:[#allocation4 + $0x78] sm:$0xff] }
 0x452   : > { %903 = vst.msk [vmem:[#allocation3 + $0x70] sm:$0xff] %vm888_vm2, %v886_v39 }
 0x453   : > { %1633 = vst.msk [vmem:[#allocation3 + $0x68] sm:$0xff] %vm1619_vm3, %v1616_v58 }
 0x458   : > { %v871_v28 = vpop.xlane.xlu2 %870 }
 0x459   : > { %v887_v19 = vadd.f32 %v871_v28, %v839_v23 }
 0x45b   : > { %904 = vst.msk [vmem:[#allocation3 + $0x78] sm:$0xff] %vm888_vm2, %v887_v19 }
 0x460   : > { %v959_v61 = vpop.permute.xlu2 %958 }
 0x461   : > { %v1008_v38 = vmul.f32 %v959_v61, %v912_v27 }
 0x462   : > { %v1846_v13 = vpop.permute.xlu0 %1845 }
 0x463   : > { %v1129_v26 = vadd.f32 %v3661_v43, %v1008_v38  ;;  %v1893_v2 = vadd.f32 %v1846_v13, %v1732_v44  ;;  %v911_v43 = vld [vmem:[#allocation4 + $0x30] sm:$0xff] }
 0x465   : > { %1145 = vst.msk [vmem:[#allocation4 + $0x38] sm:$0xff] %vm470_vm1, %v1129_v26 }
 0x466   : > { %1910 = vst.msk [vmem:[#allocation4] sm:$0xff] %vm1909_vm4, %v1893_v2 }
 0x467   : > { %1571 = vadd.xlane.f32.xlu2 %v3514_v29  ;;  %v939_v63 = vpop.permute.xlu1 %938 }
 0x468   : > { %v1004_v41 = vmul.f32 %v939_v63, %v908_v6  ;;  %v969_v54 = vpop.permute.xlu2 %968 }
 0x469   : > { %v1010_v25 = vmul.f32 %v969_v54, %v914_v17 }
 0x46a   : > { %v1125_v9 = vadd.f32 %v3538_v52, %v1004_v41  ;;  %v1852_v13 = vpop.permute.xlu0 %1851 }
 0x46b   : > { %v1131_v40 = vadd.f32 %v3679_v11, %v1010_v25 }
 0x46c   : > { %1141 = vst.msk [vmem:[#allocation4 + $0x18] sm:$0xff] %vm470_vm1, %v1125_v9 }
 0x46d   : > { %1147 = vst.msk [vmem:[#allocation4 + $0x48] sm:$0xff] %vm470_vm1, %v1131_v40 }
 0x46f   : > { %1577 = vadd.xlane.f32.xlu2 %v3600_v22  ;;  %v954_v34 = vpop.permute.xlu1 %953 }
 0x470   : > { %v1007_v35 = vmul.f32 %v954_v34, %v911_v43  ;;  %v984_v29 = vpop.permute.xlu2 %983  ;;  %1575 = vadd.xlane.f32.xlu1 %v3595_v5 }
 0x471   : > { %v1013_v59 = vmul.f32 %v984_v29, %v917_v47  ;;  %v1542_v29 = vld [vmem:[#allocation3 + $0x18] sm:$0xff] }
 0x472   : > { %v1128_v31 = vadd.f32 %v3650_v37, %v1007_v35  ;;  %v3874_v52 = vpop.f32.mrf.mxu3 }
 0x473   : > { %v1134_v11 = vadd.f32 %v3717_v12, %v1013_v59  ;;  %v916_v12 = vld [vmem:[#allocation4 + $0x58] sm:$0xff]  ;;  %v1541_v59 = vld [vmem:[#allocation3 + $0x10] sm:$0xff] }
 0x474   : > { %1144 = vst.msk [vmem:[#allocation4 + $0x30] sm:$0xff] %vm470_vm1, %v1128_v31  ;;  %v1558_v31 = vmul.f32 %v3819_v0, %v1542_v29 }
 0x475   : > { %1150 = vst.msk [vmem:[#allocation4 + $0x60] sm:$0xff] %vm470_vm1, %v1134_v11  ;;  %v1557_v11 = vmul.f32 %v3809_v3, %v1541_v59  ;;  %v1548_v3 = vld [vmem:[#allocation3 + $0x48] sm:$0xff] }
 0x477   : > { %1583 = vadd.xlane.f32.xlu2 %v3655_v8  ;;  %v964_v22 = vpop.permute.xlu1 %963 }
 0x478   : > { %v1009_v39 = vmul.f32 %v964_v22, %v913_v18  ;;  %v999_v58 = vpop.permute.xlu2 %998  ;;  %1581 = vadd.xlane.f32.xlu1 %v3614_v46 }
 0x479   : > { %v1016_v5 = vmul.f32 %v999_v58, %v920_v53 }
 0x47a   : > { %v1130_v37 = vadd.f32 %v3667_v49, %v1009_v39  ;;  %v1816_v23 = vpop.f32.mrf.mxu3  ;;  %v919_v49 = vld [vmem:[#allocation4 + $0x70] sm:$0xff]  ;;  %v1544_v39 = vld [vmem:[#allocation3 + $0x28] sm:$0xff] }
 0x47b   : > { %v1137_v28 = vadd.f32 %v1119_v10, %v1016_v5  ;;  %v1560_v10 = vmul.f32 %v3540_v21, %v1544_v39 }
 0x47c   : > { %1146 = vst.msk [vmem:[#allocation4 + $0x40] sm:$0xff] %vm470_vm1, %v1130_v37 }
 0x47d   : > { %1153 = vst.msk [vmem:[#allocation4 + $0x78] sm:$0xff] %vm470_vm1, %v1137_v28  ;;  %v1547_v28 = vld [vmem:[#allocation3 + $0x40] sm:$0xff] }
 0x47f   : > { %1589 = vadd.xlane.f32.xlu2 %v3669_v36  ;;  %v979_v19 = vpop.permute.xlu1 %978 }
 0x480   : > { %v1012_v8 = vmul.f32 %v979_v19, %v916_v12  ;;  %1587 = vadd.xlane.f32.xlu1 %v3673_v55  ;;  %v1639_v55 = vld [vmem:[#allocation4 + $0x18] sm:$0xff]  ;;  %v3902_v54 = vpop.permute.xlu2 %1664  ;;  %v1564_v12 = vmul.f32 %v3844_v32, %v1548_v3 }
 0x482   : > { %v1133_v27 = vadd.f32 %v3698_v15, %v1012_v8  ;;  %v1819_v46 = vpop.f32.mrf.mxu3  ;;  %v1563_v8 = vmul.f32 %v3553_v33, %v1547_v28 }
 0x483   : > { %1869 = vrot.lane.b32.xlu0 %v1819_v46, %s2873_s22 }
 0x484   : > { %1149 = vst.msk [vmem:[#allocation4 + $0x58] sm:$0xff] %vm470_vm1, %v1133_v27  ;;  %v1648_v27 = vld [vmem:[#allocation4 + $0x60] sm:$0xff] }
 0x487   : > { %1595 = vadd.xlane.f32.xlu2 %v3772_v62  ;;  %v994_v4 = vpop.permute.xlu1 %993  ;;  %v1642_v62 = vld [vmem:[#allocation4 + $0x30] sm:$0xff] }
 0x488   : > { %v1015_v61 = vmul.f32 %v994_v4, %v919_v49  ;;  %1593 = vadd.xlane.f32.xlu1 %v3755_v20 }
 0x48a   : > { %v1136_v44 = vadd.f32 %v1117_v48, %v1015_v61  ;;  %v1858_v20 = vpop.permute.xlu0 %1857  ;;  %v1821_v63 = vpop.f32.mrf.mxu3 }
 0x48c   : > { %1152 = vst.msk [vmem:[#allocation4 + $0x70] sm:$0xff] %vm470_vm1, %v1136_v44  ;;  %v1551_v44 = vld [vmem:[#allocation3 + $0x60] sm:$0xff] }
 0x48d   : > { %v1567_v32 = vmul.f32 %v3851_v30, %v1551_v44  ;;  %v1649_v44 = vld [vmem:[#allocation4 + $0x68] sm:$0xff] }
 0x48f   : > { %1601 = vadd.xlane.f32.xlu2 %v3823_v24  ;;  %v1645_v24 = vld [vmem:[#allocation4 + $0x48] sm:$0xff] }
 0x490   : > { %v3893_v36 = vpop.permute.xlu1 %1659  ;;  %1599 = vadd.xlane.f32.xlu1 %v3821_v14 }
 0x498   : > { %v1670_v15 = vpop.permute.xlu1 %1669 }
 0x499   : > { %v1735_v38 = vmul.f32 %v1670_v15, %v1639_v55  ;;  %v1550_v55 = vld [vmem:[#allocation3 + $0x58] sm:$0xff] }
 0x49a   : > { %v1566_v33 = vmul.f32 %v3565_v57, %v1550_v55  ;;  %v1638_v57 = vld [vmem:[#allocation4 + $0x10] sm:$0xff] }
 0x49b   : > { %v1896_v26 = vadd.f32 %v1852_v13, %v1735_v38 }
 0x49d   : > { %1913 = vst.msk [vmem:[#allocation4 + $0x18] sm:$0xff] %vm1909_vm4, %v1896_v26 }
 0x4a0   : > { %v1685_v2 = vpop.permute.xlu1 %1684 }
 0x4a1   : > { %v1738_v6 = vmul.f32 %v1685_v2, %v1642_v62  ;;  %v1554_v62 = vld [vmem:[#allocation3 + $0x78] sm:$0xff]  ;;  %v1553_v2 = vld [vmem:[#allocation3 + $0x70] sm:$0xff] }
 0x4a2   : > { %v1864_v25 = vpop.permute.xlu0 %1863 }
 0x4a3   : > { %v1899_v17 = vadd.f32 %v1858_v20, %v1738_v6  ;;  %v1570_v6 = vmul.f32 %v3854_v56, %v1554_v62 }
 0x4a5   : > { %1916 = vst.msk [vmem:[#allocation4 + $0x30] sm:$0xff] %vm1909_vm4, %v1899_v17  ;;  %v4175_v17 = vld [vmem:[#allocation38_spill] sm:$0xff] }
 0x4a7   : > { %1849 = vrot.lane.b32.xlu2 %v3759_v60, %s2873_s22  ;;  %v3909_v60 = vpop.permute.xlu2 %1674 }
 0x4a8   : > { %v1700_v14 = vpop.permute.xlu1 %1699 }
 0x4a9   : > { %v1741_v41 = vmul.f32 %v1700_v14, %v1645_v24  ;;  %1847 = vrot.lane.b32.xlu1 %v3752_v1, %s2873_s22 }
 0x4ab   : > { %v1902_v9 = vadd.f32 %v1864_v25, %v1741_v41  ;;  %v1734_v41 = vmul.f32 %v3902_v54, %v1638_v57 }
 0x4ac   : > { %v1824_v40 = vpop.f32.mrf.mxu3 }
 0x4ad   : > { %1919 = vst.msk [vmem:[#allocation4 + $0x48] sm:$0xff] %vm1909_vm4, %v1902_v9 }
 0x4af   : > { %1855 = vrot.lane.b32.xlu2 %v3792_v51, %s2873_s22  ;;  %v3916_v1 = vpop.permute.xlu2 %1689 }
 0x4b0   : > { %v1715_v51 = vpop.permute.xlu1 %1714 }
 0x4b1   : > { %1853 = vrot.lane.b32.xlu1 %v3781_v16, %s2873_s22  ;;  %v1744_v49 = vmul.f32 %v1715_v51, %v1648_v27 }
 0x4b4   : > { %v1826_v43 = vpop.f32.mrf.mxu3 }
 0x4b5   : > { %1875 = vrot.lane.b32.xlu0 %v1826_v43, %s2873_s22  ;;  %v4176_v43 = vld [vmem:[#allocation5_spill] sm:$0xff] }
 0x4b7   : > { %1861 = vrot.lane.b32.xlu2 %v3830_v50, %s2873_s22  ;;  %v3922_v16 = vpop.permute.xlu2 %1704  ;;  %v1539_v50 = vld [vmem:[#allocation3] sm:$0xff] }
 0x4b8   : > { %v1555_v34 = vmul.f32 %v3529_v45, %v1539_v50  ;;  %v3928_v48 = vpop.permute.xlu1 %1729  ;;  %v1545_v45 = vld [vmem:[#allocation3 + $0x30] sm:$0xff] }
 0x4b9   : > { %1859 = vrot.lane.b32.xlu1 %v3817_v7, %s2873_s22  ;;  %v1561_v58 = vmul.f32 %v3835_v42, %v1545_v45 }
 0x4bf   : > { %1867 = vrot.lane.b32.xlu2 %v1816_v23, %s2873_s22  ;;  %v3925_v47 = vpop.permute.xlu2 %1719 }
 0x4c1   : > { %1865 = vrot.lane.b32.xlu1 %v3874_v52, %s2873_s22 }
 0x4c7   : > { %1873 = vrot.lane.b32.xlu2 %v1824_v40, %s2873_s22  ;;  %v1641_v40 = vld [vmem:[#allocation4 + $0x28] sm:$0xff] }
 0x4c8   : > { %v1737_v56 = vmul.f32 %v4176_v43, %v1641_v40 }
 0x4c9   : > { %1871 = vrot.lane.b32.xlu1 %v1821_v63, %s2873_s22  ;;  %v1569_v63 = vmul.f32 %v4175_v17, %v1553_v2 }
 0x4da   : > { %v1572_v7 = vpop.xlane.xlu2 %1571 }
 0x4db   : > { %v1603_v35 = vadd.f32 %v1572_v7, %v1555_v34  ;;  %v1644_v34 = vld [vmem:[#allocation4 + $0x40] sm:$0xff]  ;;  %v1637_v7 = vld [vmem:[#allocation4 + $0x8] sm:$0xff] }
 0x4dc   : > { %v1733_v59 = vmul.f32 %v3893_v36, %v1637_v7 }
 0x4dd   : > { %1620 = vst.msk [vmem:[#allocation3] sm:$0xff] %vm1619_vm3, %v1603_v35  ;;  %v4177_v35 = vld [vmem:[#allocation6_spill] sm:$0xff] }
 0x4de   : > { %v1740_v29 = vmul.f32 %v4177_v35, %v1644_v34 }
 0x4e2   : > { %v1578_v52 = vpop.xlane.xlu2 %1577 }
 0x4e3   : > { %v1606_v18 = vadd.f32 %v1578_v52, %v1558_v31  ;;  %v1576_v53 = vpop.xlane.xlu1 %1575 }
 0x4e4   : > { %v1605_v22 = vadd.f32 %v1576_v53, %v1557_v11  ;;  %v1640_v53 = vld [vmem:[#allocation4 + $0x20] sm:$0xff] }
 0x4e5   : > { %1623 = vst.msk [vmem:[#allocation3 + $0x18] sm:$0xff] %vm1619_vm3, %v1606_v18  ;;  %v1647_v18 = vld [vmem:[#allocation4 + $0x58] sm:$0xff]  ;;  %v1736_v39 = vmul.f32 %v3909_v60, %v1640_v53 }
 0x4e6   : > { %1622 = vst.msk [vmem:[#allocation3 + $0x10] sm:$0xff] %vm1619_vm3, %v1605_v22  ;;  %v4178_v22 = vld [vmem:[#allocation16_spill] sm:$0xff] }
 0x4e7   : > { %v1743_v45 = vmul.f32 %v4178_v22, %v1647_v18 }
 0x4ea   : > { %v1584_v5 = vpop.xlane.xlu2 %1583 }
 0x4eb   : > { %v1609_v37 = vadd.f32 %v1584_v5, %v1561_v58  ;;  %v1582_v23 = vpop.xlane.xlu1 %1581 }
 0x4ec   : > { %v1608_v0 = vadd.f32 %v1582_v23, %v1560_v10  ;;  %v1651_v23 = vld [vmem:[#allocation4 + $0x78] sm:$0xff] }
 0x4ed   : > { %1626 = vst.msk [vmem:[#allocation3 + $0x30] sm:$0xff] %vm1619_vm3, %v1609_v37  ;;  %v1747_v36 = vmul.f32 %v3928_v48, %v1651_v23  ;;  %v1646_v48 = vld [vmem:[#allocation4 + $0x50] sm:$0xff] }
 0x4ee   : > { %1625 = vst.msk [vmem:[#allocation3 + $0x28] sm:$0xff] %vm1619_vm3, %v1608_v0  ;;  %v1650_v0 = vld [vmem:[#allocation4 + $0x70] sm:$0xff] }
 0x4f2   : > { %v1590_v19 = vpop.xlane.xlu2 %1589 }
 0x4f3   : > { %v1612_v46 = vadd.f32 %v1590_v19, %v1564_v12  ;;  %v1588_v42 = vpop.xlane.xlu1 %1587  ;;  %v1643_v12 = vld [vmem:[#allocation4 + $0x38] sm:$0xff]  ;;  %v4179_v19 = vld [vmem:[#allocation9_spill] sm:$0xff] }
 0x4f4   : > { %v1611_v4 = vadd.f32 %v1588_v42, %v1563_v8  ;;  %v1746_v8 = vmul.f32 %v4179_v19, %v1650_v0  ;;  %v1739_v27 = vmul.f32 %v3916_v1, %v1643_v12  ;;  %v1745_v1 = vmul.f32 %v3925_v47, %v1649_v44 }
 0x4f5   : > { %1629 = vst.msk [vmem:[#allocation3 + $0x48] sm:$0xff] %vm1619_vm3, %v1612_v46  ;;  %v1870_v21 = vpop.permute.xlu0 %1869 }
 0x4f6   : > { %1628 = vst.msk [vmem:[#allocation3 + $0x40] sm:$0xff] %vm1619_vm3, %v1611_v4  ;;  %v1905_v61 = vadd.f32 %v1870_v21, %v1744_v49  ;;  %v1742_v4 = vmul.f32 %v3922_v16, %v1646_v48 }
 0x4f8   : > { %1922 = vst.msk [vmem:[#allocation4 + $0x60] sm:$0xff] %vm1909_vm4, %v1905_v61 }
 0x4fa   : > { %v1596_v15 = vpop.xlane.xlu2 %1595 }
 0x4fb   : > { %v1615_v38 = vadd.f32 %v1596_v15, %v1567_v32  ;;  %v1594_v13 = vpop.xlane.xlu1 %1593 }
 0x4fc   : > { %v1614_v26 = vadd.f32 %v1594_v13, %v1566_v33 }
 0x4fd   : > { %1632 = vst.msk [vmem:[#allocation3 + $0x60] sm:$0xff] %vm1619_vm3, %v1615_v38 }
 0x4fe   : > { %1631 = vst.msk [vmem:[#allocation3 + $0x58] sm:$0xff] %vm1619_vm3, %v1614_v26 }
 0x502   : > { %v1602_v20 = vpop.xlane.xlu2 %1601 }
 0x503   : > { %v1618_v24 = vadd.f32 %v1602_v20, %v1570_v6  ;;  %v1600_v14 = vpop.xlane.xlu1 %1599 }
 0x504   : > { %v1617_v30 = vadd.f32 %v1600_v14, %v1569_v63 }
 0x505   : > { %1635 = vst.msk [vmem:[#allocation3 + $0x78] sm:$0xff] %vm1619_vm3, %v1618_v24 }
 0x506   : > { %1634 = vst.msk [vmem:[#allocation3 + $0x70] sm:$0xff] %vm1619_vm3, %v1617_v30 }
 0x50a   : > { %v1850_v25 = vpop.permute.xlu2 %1849 }
 0x50b   : > { %v1895_v9 = vadd.f32 %v1850_v25, %v1734_v41 }
 0x50d   : > { %1912 = vst.msk [vmem:[#allocation4 + $0x10] sm:$0xff] %vm1909_vm4, %v1895_v9 }
 0x512   : > { %v1856_v51 = vpop.permute.xlu2 %1855 }
 0x513   : > { %v1898_v50 = vadd.f32 %v1856_v51, %v1737_v56 }
 0x515   : > { %1915 = vst.msk [vmem:[#allocation4 + $0x28] sm:$0xff] %vm1909_vm4, %v1898_v50 }
 0x51a   : > { %v1862_v31 = vpop.permute.xlu2 %1861 }
 0x51b   : > { %v1901_v52 = vadd.f32 %v1862_v31, %v1740_v29  ;;  %v1848_v54 = vpop.permute.xlu1 %1847 }
 0x51c   : > { %v1894_v11 = vadd.f32 %v1848_v54, %v1733_v59 }
 0x51d   : > { %1918 = vst.msk [vmem:[#allocation4 + $0x40] sm:$0xff] %vm1909_vm4, %v1901_v52 }
 0x51e   : > { %1911 = vst.msk [vmem:[#allocation4 + $0x8] sm:$0xff] %vm1909_vm4, %v1894_v11 }
 0x522   : > { %v1868_v58 = vpop.permute.xlu2 %1867 }
 0x523   : > { %v1904_v5 = vadd.f32 %v1868_v58, %v1743_v45  ;;  %v1854_v10 = vpop.permute.xlu1 %1853 }
 0x524   : > { %v1897_v37 = vadd.f32 %v1854_v10, %v1736_v39 }
 0x525   : > { %1921 = vst.msk [vmem:[#allocation4 + $0x58] sm:$0xff] %vm1909_vm4, %v1904_v5 }
 0x526   : > { %1914 = vst.msk [vmem:[#allocation4 + $0x20] sm:$0xff] %vm1909_vm4, %v1897_v37 }
 0x527   : > { %v1876_v3 = vpop.permute.xlu0 %1875 }
 0x528   : > { %v1908_v28 = vadd.f32 %v1876_v3, %v1747_v36 }
 0x52a   : > { %1925 = vst.msk [vmem:[#allocation4 + $0x78] sm:$0xff] %vm1909_vm4, %v1908_v28  ;;  %v1874_v60 = vpop.permute.xlu2 %1873 }
 0x52b   : > { %v1907_v46 = vadd.f32 %v1874_v60, %v1746_v8  ;;  %v1860_v42 = vpop.permute.xlu1 %1859 }
 0x52c   : > { %v1900_v49 = vadd.f32 %v1860_v42, %v1739_v27 }
 0x52d   : > { %1924 = vst.msk [vmem:[#allocation4 + $0x70] sm:$0xff] %vm1909_vm4, %v1907_v46 }
 0x52e   : > { %1917 = vst.msk [vmem:[#allocation4 + $0x38] sm:$0xff] %vm1909_vm4, %v1900_v49 }
 0x533   : > { %v1866_v21 = vpop.permute.xlu1 %1865 }
 0x534   : > { %v1903_v61 = vadd.f32 %v1866_v21, %v1742_v4 }
 0x536   : > { %1920 = vst.msk [vmem:[#allocation4 + $0x50] sm:$0xff] %vm1909_vm4, %v1903_v61 }
 0x53a   : > { %1945 = sbr.rel (%p2496_p10) target bundleno = 1556 (0x614), region = 40 }
 0x53b   : > { %v1872_v55 = vpop.permute.xlu1 %1871 }
 0x53c   : > { %v1906_v32 = vadd.f32 %v1872_v55, %v1745_v1 }
 0x53e   : > { %1923 = vst.msk [vmem:[#allocation4 + $0x68] sm:$0xff] %vm1909_vm4, %v1906_v32 }
 0x53f   : > { %v1950_v15 = vld [vmem:[#allocation3 + $0x20] sm:$0xff]  ;;  %v1948_v33 = vld [vmem:[#allocation3 + $0x10] sm:$0xff]  ;;  %v2876_v13 = vmov 0   ;;  %v1951_v2 = vld [vmem:[#allocation3 + $0x28] sm:$0xff]  ;;  %v2877_v19 = vmov 1  }
 0x540   : > { %v1946_v38 = vld [vmem:[#allocation3] sm:$0xff]  ;;  %2779 = vset.pattern.permute.xlu2 %v2876_v13  ;;  %2778 = vset.pattern.permute.xlu1 %v2876_v13  ;;  %v1966_v16 = vmax.f32 %v1950_v15, 1e-30  ;;  %v1964_v26 = vmax.f32 %v1948_v33, 1e-30  ;;  %v1949_v47 = vld [vmem:[#allocation3 + $0x18] sm:$0xff] }
 0x541   : > { %v1962_v62 = vmax.f32 %v1946_v38, 1e-30  ;;  %2777 = vset.pattern.permute.xlu0 %v2876_v13  ;;  %v1947_v6 = vld [vmem:[#allocation3 + $0x8] sm:$0xff]  ;;  %v1967_v20 = vmax.f32 %v1951_v2, 1e-30  ;;  %v1954_v30 = vld [vmem:[#allocation3 + $0x40] sm:$0xff] }
 0x542   : > { %2783 = vrcp.f32 %v1966_v16  ;;  %v1965_v17 = vmax.f32 %v1949_v47, 1e-30  ;;  %v1963_v63 = vmax.f32 %v1947_v6, 1e-30  ;;  %v1953_v41 = vld [vmem:[#allocation3 + $0x38] sm:$0xff]  ;;  %v1952_v25 = vld [vmem:[#allocation3 + $0x30] sm:$0xff] }
 0x543   : > { %2785 = vrcp.f32 %v1964_v26  ;;  %v1970_v9 = vmax.f32 %v1954_v30, 1e-30  ;;  %v1969_v40 = vmax.f32 %v1953_v41, 1e-30  ;;  %v1968_v56 = vmax.f32 %v1952_v25, 1e-30 }
 0x544   : > { %2787 = vrcp.f32 %v1962_v62  ;;  %v1957_v34 = vld [vmem:[#allocation3 + $0x58] sm:$0xff]  ;;  %v1956_v7 = vld [vmem:[#allocation3 + $0x50] sm:$0xff]  ;;  %v1955_v35 = vld [vmem:[#allocation3 + $0x48] sm:$0xff] }
 0x545   : > { %2789 = vrcp.f32 %v1967_v20  ;;  %v1973_v29 = vmax.f32 %v1957_v34, 1e-30  ;;  %v1972_v59 = vmax.f32 %v1956_v7, 1e-30  ;;  %v1971_v52 = vmax.f32 %v1955_v35, 1e-30 }
 0x546   : > { %2791 = vrcp.f32 %v1965_v17  ;;  %v1960_v18 = vld [vmem:[#allocation3 + $0x70] sm:$0xff]  ;;  %v1959_v53 = vld [vmem:[#allocation3 + $0x68] sm:$0xff]  ;;  %v1958_v22 = vld [vmem:[#allocation3 + $0x60] sm:$0xff] }
 0x547   : > { %2793 = vrcp.f32 %v1963_v63  ;;  %v1976_v45 = vmax.f32 %v1960_v18, 1e-30  ;;  %v1975_v39 = vmax.f32 %v1959_v53, 1e-30  ;;  %v1974_v5 = vmax.f32 %v1958_v22, 1e-30 }
 0x548   : > { %v3975_v24 = vpop.eup %2783  ;;  %2795 = vrcp.f32 %v1970_v9  ;;  %v1961_v23 = vld [vmem:[#allocation3 + $0x78] sm:$0xff]  ;;  %v1994_v13 = vld [vmem:[#allocation4] sm:$0xff]  ;;  %v1995_v16 = vld [vmem:[#allocation4 + $0x8] sm:$0xff] }
 0x549   : > { %v3977_v14 = vpop.eup %2785  ;;  %2032 = vperm.xlu2 %2779, %v3975_v24   ;;  %2797 = vrcp.f32 %v1969_v40  ;;  %v1977_v0 = vmax.f32 %v1961_v23, 1e-30  ;;  %v1998_v7 = vld [vmem:[#allocation4 + $0x20] sm:$0xff]  ;;  %v1999_v35 = vld [vmem:[#allocation4 + $0x28] sm:$0xff] }
 0x54a   : > { %v2788_v57 = vpop.eup %2787  ;;  %2022 = vperm.xlu1 %2778, %v3977_v14   ;;  %2799 = vrcp.f32 %v1968_v56 }
 0x54b   : > { %2012 = vperm.xlu0 %2777, %v2788_v57   ;;  %v2790_v43 = vpop.eup %2789  ;;  %2801 = vrcp.f32 %v1973_v29  ;;  %v2001_v29 = vld [vmem:[#allocation4 + $0x38] sm:$0xff] }
 0x54c   : > { %v2792_v51 = vpop.eup %2791  ;;  %2803 = vrcp.f32 %v1972_v59  ;;  %v2000_v59 = vld [vmem:[#allocation4 + $0x30] sm:$0xff] }
 0x54d   : > { %v2794_v50 = vpop.eup %2793  ;;  %2805 = vrcp.f32 %v1971_v52 }
 0x54e   : > { %v2796_v31 = vpop.eup %2795  ;;  %2807 = vrcp.f32 %v1976_v45 }
 0x54f   : > { %v2798_v54 = vpop.eup %2797  ;;  %2809 = vrcp.f32 %v1975_v39 }
 0x550   : > { %v2800_v11 = vpop.eup %2799  ;;  %2811 = vrcp.f32 %v1974_v5 }
 0x551   : > { %2037 = vperm.xlu2 %2779, %v2790_v43   ;;  %v2802_v58 = vpop.eup %2801  ;;  %2813 = vrcp.f32 %v1977_v0 }
 0x552   : > { %2027 = vperm.xlu1 %2778, %v2792_v51   ;;  %v2804_v10 = vpop.eup %2803 }
 0x553   : > { %2017 = vperm.xlu0 %2777, %v2794_v50   ;;  %v2806_v37 = vpop.eup %2805 }
 0x554   : > { %v2808_v36 = vpop.eup %2807 }
 0x555   : > { %v2810_v3 = vpop.eup %2809 }
 0x556   : > { %v2812_v28 = vpop.eup %2811 }
 0x557   : > { %v2814_v12 = vpop.eup %2813 }
 0x559   : > { %2052 = vperm.xlu2 %2779, %v2796_v31  }
 0x55a   : > { %2047 = vperm.xlu1 %2778, %v2798_v54  }
 0x55b   : > { %2042 = vperm.xlu0 %2777, %v2800_v11  }
 0x561   : > { %2067 = vperm.xlu2 %2779, %v2802_v58  }
 0x562   : > { %2062 = vperm.xlu1 %2778, %v2804_v10  }
 0x563   : > { %2057 = vperm.xlu0 %2777, %v2806_v37  }
 0x569   : > { %2082 = vperm.xlu2 %2779, %v2808_v36  }
 0x56a   : > { %2077 = vperm.xlu1 %2778, %v2810_v3  }
 0x56b   : > { %2072 = vperm.xlu0 %2777, %v2812_v28  }
 0x571   : > { %2781 = vset.pattern.permute.xlu2 %v2877_v19 }
 0x572   : > { %2780 = vset.pattern.permute.xlu1 %v2877_v19  ;;  %2111 = vperm.xlu2 %2781, %v2794_v50  }
 0x573   : > { %2087 = vperm.xlu0 %2777, %v2814_v12   ;;  %2107 = vperm.xlu1 %2780, %v2788_v57   ;;  %v1996_v57 = vld [vmem:[#allocation4 + $0x10] sm:$0xff] }
 0x57a   : > { %2123 = vperm.xlu2 %2781, %v3975_v24  }
 0x57b   : > { %2782 = vset.pattern.permute.xlu0 %v2877_v19  ;;  %2119 = vperm.xlu1 %2780, %v2792_v51  }
 0x57c   : > { %2115 = vperm.xlu0 %2782, %v3977_v14   ;;  %v1997_v14 = vld [vmem:[#allocation4 + $0x18] sm:$0xff] }
 0x582   : > { %2131 = vperm.xlu2 %2781, %v2800_v11  }
 0x583   : > { %2127 = vperm.xlu1 %2780, %v2790_v43  }
 0x584   : > { %2135 = vperm.xlu0 %2782, %v2798_v54  }
 0x58a   : > { %2143 = vperm.xlu2 %2781, %v2806_v37  }
 0x58b   : > { %2139 = vperm.xlu1 %2780, %v2796_v31  }
 0x58c   : > { %2147 = vperm.xlu0 %2782, %v2804_v10  }
 0x592   : > { %2155 = vperm.xlu2 %2781, %v2812_v28   ;;  %v2002_v28 = vld [vmem:[#allocation4 + $0x40] sm:$0xff] }
 0x593   : > { %2151 = vperm.xlu1 %2780, %v2802_v58  }
 0x594   : > { %2159 = vperm.xlu0 %2782, %v2810_v3  }
 0x59a   : > { %2167 = vperm.xlu2 %2781, %v2814_v12   ;;  %v2003_v12 = vld [vmem:[#allocation4 + $0x48] sm:$0xff] }
 0x59b   : > { %2163 = vperm.xlu1 %2780, %v2808_v36  }
 0x5a3   : > { %v2033_v8 = vpop.permute.xlu2 %2032 }
 0x5a4   : > { %v2094_v18 = vmul.f32 %v2033_v8, %v1998_v7 }
 0x5ab   : > { %v2038_v27 = vpop.permute.xlu2 %2037 }
 0x5ac   : > { %v2095_v53 = vmul.f32 %v2038_v27, %v1999_v35 }
 0x5b3   : > { %v3983_v60 = vpop.permute.xlu2 %2052 }
 0x5b4   : > { %v2098_v27 = vmul.f32 %v3983_v60, %v2002_v28 }
 0x5bb   : > { %v3985_v49 = vpop.permute.xlu2 %2067 }
 0x5bc   : > { %v2023_v46 = vpop.permute.xlu1 %2022 }
 0x5bd   : > { %v2013_v42 = vpop.permute.xlu0 %2012  ;;  %v2092_v43 = vmul.f32 %v2023_v46, %v1996_v57 }
 0x5be   : > { %v2090_v47 = vmul.f32 %v2013_v42, %v1994_v13 }
 0x5c3   : > { %v3987_v61 = vpop.permute.xlu2 %2082 }
 0x5c4   : > { %v2028_v48 = vpop.permute.xlu1 %2027 }
 0x5c5   : > { %v2018_v4 = vpop.permute.xlu0 %2017  ;;  %v2093_v25 = vmul.f32 %v2028_v48, %v1997_v14 }
 0x5c6   : > { %v2091_v6 = vmul.f32 %v2018_v4, %v1995_v16 }
 0x5cc   : > { %v2048_v21 = vpop.permute.xlu1 %2047  ;;  %v2112_v32 = vpop.permute.xlu2 %2111 }
 0x5cd   : > { %v2043_v44 = vpop.permute.xlu0 %2042  ;;  %v2171_v26 = vmul.f32 %v2112_v32, %v1995_v16  ;;  %v2097_v39 = vmul.f32 %v2048_v21, %v2001_v29  ;;  %v2007_v16 = vld [vmem:[#allocation4 + $0x68] sm:$0xff] }
 0x5ce   : > { %v2096_v58 = vmul.f32 %v2043_v44, %v2000_v59 }
 0x5cf   : > { %v2187_v17 = vsel %vm470_vm1, %v2091_v6, %v2171_v26  ;;  %v2006_v26 = vld [vmem:[#allocation4 + $0x60] sm:$0xff] }
 0x5d4   : > { %v3989_v1 = vpop.permute.xlu1 %2062  ;;  %v2124_v38 = vpop.permute.xlu2 %2123 }
 0x5d5   : > { %v2058_v55 = vpop.permute.xlu0 %2057  ;;  %v2174_v31 = vmul.f32 %v2124_v38, %v1998_v7  ;;  %v2005_v38 = vld [vmem:[#allocation4 + $0x58] sm:$0xff] }
 0x5d6   : > { %v2099_v46 = vmul.f32 %v2058_v55, %v2003_v12 }
 0x5d7   : > { %v2190_v10 = vsel %vm470_vm1, %v2094_v18, %v2174_v31 }
 0x5dc   : > { %v3991_v15 = vpop.permute.xlu1 %2077  ;;  %v2132_v30 = vpop.permute.xlu2 %2131 }
 0x5dd   : > { %v3993_v33 = vpop.permute.xlu0 %2072  ;;  %v2176_v52 = vmul.f32 %v2132_v30, %v2000_v59 }
 0x5df   : > { %v2192_v23 = vsel %vm470_vm1, %v2096_v58, %v2176_v52 }
 0x5e4   : > { %v2144_v54 = vpop.permute.xlu2 %2143 }
 0x5e5   : > { %v3995_v62 = vpop.permute.xlu0 %2087  ;;  %v2108_v2 = vpop.permute.xlu1 %2107  ;;  %v2179_v19 = vmul.f32 %v2144_v54, %v2003_v12 }
 0x5e6   : > { %v2170_v20 = vmul.f32 %v2108_v2, %v1994_v13  ;;  %v2004_v13 = vld [vmem:[#allocation4 + $0x50] sm:$0xff] }
 0x5e7   : > { %v2195_v21 = vsel %vm470_vm1, %v2099_v46, %v2179_v19  ;;  %v2100_v60 = vmul.f32 %v3989_v1, %v2004_v13 }
 0x5e8   : > { %v2186_v63 = vsel %vm470_vm1, %v2090_v47, %v2170_v20  ;;  %v2101_v20 = vmul.f32 %v3985_v49, %v2005_v38 }
 0x5e9   : > { %v2526_v24 = vpack.c.bf16 %v2187_v17, %v2186_v63  ;;  %v2103_v63 = vmul.f32 %v3991_v15, %v2007_v16 }
 0x5eb   : > { %2527 = vst [vmem:[%s2951_s5] sm:$0xff] %v2526_v24   ;;  %v2102_v24 = vmul.f32 %v3993_v33, %v2006_v26 }
 0x5ec   : > { %v2156_v4 = vpop.permute.xlu2 %2155 }
 0x5ed   : > { %v2120_v41 = vpop.permute.xlu1 %2119  ;;  %v2182_v47 = vmul.f32 %v2156_v4, %v2006_v26 }
 0x5ee   : > { %v2173_v9 = vmul.f32 %v2120_v41, %v1997_v14  ;;  %v2116_v40 = vpop.permute.xlu0 %2115 }
 0x5ef   : > { %v2172_v56 = vmul.f32 %v2116_v40, %v1996_v57  ;;  %v2198_v41 = vsel %vm470_vm1, %v2102_v24, %v2182_v47  ;;  %v2008_v40 = vld [vmem:[#allocation4 + $0x70] sm:$0xff] }
 0x5f0   : > { %v2189_v51 = vsel %vm470_vm1, %v2093_v25, %v2173_v9  ;;  %v2104_v33 = vmul.f32 %v3987_v61, %v2008_v40 }
 0x5f1   : > { %v2188_v50 = vsel %vm470_vm1, %v2092_v43, %v2172_v56  ;;  %v2009_v43 = vld [vmem:[#allocation4 + $0x78] sm:$0xff] }
 0x5f2   : > { %v2531_v34 = vpack.c.bf16 %v2189_v51, %v2188_v50  ;;  %v2105_v51 = vmul.f32 %v3995_v62, %v2009_v43 }
 0x5f4   : > { %2563 = vst [vmem:[%s2951_s5 + $0x8] sm:$0xff] %v2531_v34   ;;  %v2168_v25 = vpop.permute.xlu2 %2167 }
 0x5f5   : > { %v2128_v11 = vpop.permute.xlu1 %2127  ;;  %v2185_v56 = vmul.f32 %v2168_v25, %v2009_v43 }
 0x5f6   : > { %v2175_v22 = vmul.f32 %v2128_v11, %v1999_v35  ;;  %v2136_v45 = vpop.permute.xlu0 %2135 }
 0x5f7   : > { %v2177_v5 = vmul.f32 %v2136_v45, %v2001_v29  ;;  %v2201_v34 = vsel %vm470_vm1, %v2105_v51, %v2185_v56 }
 0x5f8   : > { %v2191_v37 = vsel %vm470_vm1, %v2095_v53, %v2175_v22 }
 0x5f9   : > { %v2536_v36 = vpack.c.bf16 %v2191_v37, %v2190_v10  ;;  %v2193_v0 = vsel %vm470_vm1, %v2097_v39, %v2177_v5 }
 0x5fa   : > { %v2541_v3 = vpack.c.bf16 %v2193_v0, %v2192_v23 }
 0x5fb   : > { %2564 = vst [vmem:[%s2951_s5 + $0x10] sm:$0xff] %v2536_v36  }
 0x5fc   : > { %2565 = vst [vmem:[%s2951_s5 + $0x18] sm:$0xff] %v2541_v3  }
 0x5fd   : > { %v2140_v8 = vpop.permute.xlu1 %2139 }
 0x5fe   : > { %v2178_v42 = vmul.f32 %v2140_v8, %v2002_v28  ;;  %v2148_v48 = vpop.permute.xlu0 %2147 }
 0x5ff   : > { %v2180_v2 = vmul.f32 %v2148_v48, %v2004_v13 }
 0x600   : > { %v2194_v44 = vsel %vm470_vm1, %v2098_v27, %v2178_v42 }
 0x601   : > { %v2546_v32 = vpack.c.bf16 %v2195_v21, %v2194_v44  ;;  %v2196_v30 = vsel %vm470_vm1, %v2100_v60, %v2180_v2 }
 0x603   : > { %2566 = vst [vmem:[%s2951_s5 + $0x20] sm:$0xff] %v2546_v32  }
 0x605   : > { %v2152_v6 = vpop.permute.xlu1 %2151 }
 0x606   : > { %v2181_v55 = vmul.f32 %v2152_v6, %v2005_v38  ;;  %v2160_v17 = vpop.permute.xlu0 %2159 }
 0x607   : > { %v2183_v14 = vmul.f32 %v2160_v17, %v2007_v16 }
 0x608   : > { %v2197_v57 = vsel %vm470_vm1, %v2101_v20, %v2181_v55 }
 0x609   : > { %v2551_v49 = vpack.c.bf16 %v2197_v57, %v2196_v30  ;;  %v2199_v9 = vsel %vm470_vm1, %v2103_v63, %v2183_v14 }
 0x60a   : > { %v2556_v1 = vpack.c.bf16 %v2199_v9, %v2198_v41 }
 0x60b   : > { %2567 = vst [vmem:[%s2951_s5 + $0x28] sm:$0xff] %v2551_v49  }
 0x60c   : > { %2568 = vst [vmem:[%s2951_s5 + $0x30] sm:$0xff] %v2556_v1  }
 0x60d   : > { %v2164_v15 = vpop.permute.xlu1 %2163 }
 0x60e   : > { %v2184_v50 = vmul.f32 %v2164_v15, %v2008_v40 }
 0x610   : > { %v2200_v7 = vsel %vm470_vm1, %v2104_v33, %v2184_v50 }
 0x611   : > { %v2561_v35 = vpack.c.bf16 %v2201_v34, %v2200_v7 }
 0x613   : > { %2569 = vst [vmem:[%s2951_s5 + $0x38] sm:$0xff] %v2561_v35  }
 0x614 PF: > { %s13_s18 = sadd.s32 1, %s2869_s18   ;;  %s4180_s12 = smov %s2857_s15 }
 0x615   : > { %p10_p11 = scmp.ge.s32.totalorder %s13_s18, 10   ;;  %s4181_s13 = smov %s2861_s16 }
 0x616   : > { %s4182_s14 = smov %s2865_s17  ;;  %s4183_s15 = smov %s4187_s19 }
 0x617   : > { %s4184_s16 = smov %s4191_s20  ;;  %s4185_s17 = smov %s4195_s21 }
 0x618   :  { %12 = sbr.rel (!%p10_p11) target bundleno = 4 (0x4), region = 76 }

</bundles_post_ra>
